<compile_context>
chip_gen: v7x
topology: tpu7x:2x2x1
jax: 0.10.0
libtpu: 0.0.40
codegen_flags: <defaults>
</compile_context>

<pallas_src>
import functools

import jax
import jax.numpy as jnp
from jax import lax
from jax.experimental import pallas as pl
from jax.experimental.pallas import tpu as pltpu


# ---------------------------------------------------------------------------
# Fused Pallas kernel: 4 x LSTM layer (wavefront) + fc head
# ---------------------------------------------------------------------------
def _fused_lstm_kernel(*refs, num_layers, seq_len, batch, hidden):
    """refs layout (positional):
        x_ref                           (T, B, D_in)     time-major input, f32
        wih0_ref, whh0_ref, b0_ref      (D,4H) bf16, (H,4H) bf16, (1,4H) f32
        [wcat_l, b_l]  for l=1..L-1     (2H,4H) bf16, (1,4H) f32
        fcw_ref, fcb_ref                (H,128) bf16, (1,128) f32
        o_ref                           (B,128) f32  output (lane-padded)
        gx0_scr                         (T, B, 4H) f32  hoisted layer-0 gates
    """
    T, B, H, L = seq_len, batch, hidden, num_layers
    f32, bf16 = jnp.float32, jnp.bfloat16

    x_ref = refs[0]
    wih0_ref, whh0_ref, b0_ref = refs[1], refs[2], refs[3]
    cat_refs = [(refs[4 + 2 * (l - 1)], refs[5 + 2 * (l - 1)])
                for l in range(1, L)]
    fcw_ref = refs[4 + 2 * (L - 1)]
    fcb_ref = refs[5 + 2 * (L - 1)]
    o_ref = refs[6 + 2 * (L - 1)]
    gx0_scr = refs[7 + 2 * (L - 1)]

    # ---- Layer 0: hoisted input projection, one MXU matmul over the whole
    # sequence (bias b_ih+b_hh folded in once).
    d_in = x_ref.shape[-1]
    x2d = x_ref[...].reshape(T * B, d_in).astype(bf16)
    gx0 = jnp.dot(x2d, wih0_ref[...], preferred_element_type=f32) + b0_ref[...]
    gx0_scr[...] = gx0.reshape(T, B, 4 * H)

    def lstm_cell(gates, c_prev):
        # gate columns pre-permuted at init to [i, f, o, g]:
        # one sigmoid over 3H lanes, one tanh over the last H lanes.
        sig = jax.nn.sigmoid(gates[:, : 3 * H])
        i_g = sig[:, 0 * H:1 * H]
        f_g = sig[:, 1 * H:2 * H]
        o_g = sig[:, 2 * H:3 * H]
        g_g = jnp.tanh(gates[:, 3 * H:4 * H])
        c_new = f_g * c_prev + i_g * g_g
        h_new = o_g * jnp.tanh(c_new)
        return h_new, c_new

    h = [jnp.zeros((B, H), f32) for _ in range(L)]
    c = [jnp.zeros((B, H), f32) for _ in range(L)]

    # ---- Cross-layer wavefront (fully unrolled, T and L are static):
    # at step s, layer l processes t = s - l.  Iterating l in descending
    # order lets layer l read h[l-1] before layer l-1 is updated this step,
    # i.e. exactly y_{l-1}[t] from wavefront step s-1.
    for s in range(T + L - 1):
        for l in range(L - 1, -1, -1):
            t = s - l
            if not (0 <= t < T):
                continue
            if l == 0:
                # recurrent matmul only; input projection already in gx0_scr.
                gates = gx0_scr[t] + jnp.dot(
                    h[0].astype(bf16), whh0_ref[...],
                    preferred_element_type=f32)
            else:
                wcat_ref, b_ref = cat_refs[l - 1]
                # fold W_ih into the per-step matmul: one K=2H MXU push.
                inp = jnp.concatenate([h[l - 1], h[l]], axis=1).astype(bf16)
                gates = jnp.dot(inp, wcat_ref[...],
                                preferred_element_type=f32) + b_ref[...]
            h[l], c[l] = lstm_cell(gates, c[l])

    # ---- fc head on top layer's h at t = T-1; lane-dense (B, 128) store.
    o_ref[...] = (jnp.dot(h[L - 1].astype(bf16), fcw_ref[...],
                          preferred_element_type=f32) + fcb_ref[...])


# ---------------------------------------------------------------------------
# Wrapper around pallas_call
# ---------------------------------------------------------------------------
def _full_spec(shape):
    nd = len(shape)
    return pl.BlockSpec(shape, lambda *_: (0,) * nd)


@functools.partial(jax.jit, static_argnames=("out_dim",))
def lstm_forward(x_btd, kparams, *, out_dim):
    """Equivalent of LSTM.forward: L-layer LSTM (zero init state) + fc on last step."""
    B, T, D = x_btd.shape
    H = kparams["whh0"].shape[0]
    L = 1 + len(kparams["wcat"])
    o_pad = kparams["fc_w"].shape[1]

    # Tiny transpose to time-major so per-t reads of gx0 are contiguous
    # sublane slices.  (See TODO at top of file.)
    x_tbd = jnp.transpose(x_btd, (1, 0, 2))

    args = [x_tbd, kparams["wih0"], kparams["whh0"], kparams["b0"]]
    for wcat, b in zip(kparams["wcat"], kparams["b"]):
        args += [wcat, b]
    args += [kparams["fc_w"], kparams["fc_b"]]
    in_specs = [_full_spec(a.shape) for a in args]

    kernel = functools.partial(_fused_lstm_kernel, num_layers=L,
                               seq_len=T, batch=B, hidden=H)
    out_pad = pl.pallas_call(
        kernel,
        out_shape=jax.ShapeDtypeStruct((B, o_pad), jnp.float32),
        in_specs=in_specs,
        out_specs=_full_spec((B, o_pad)),
        scratch_shapes=[
            pltpu.VMEM((T, B, 4 * H), jnp.float32),  # hoisted layer-0 gates
        ],
    )(*args)
    return out_pad[:, :out_dim]


# ---------------------------------------------------------------------------
# Parameter init (PyTorch-style uniform(-1/sqrt(H), 1/sqrt(H))),
# gate columns pre-permuted from PyTorch's [i, f, g, o] to [i, f, o, g].
# ---------------------------------------------------------------------------
def init_params(key, input_size, hidden_size, num_layers, output_size):
    H = hidden_size
    k = 1.0 / jnp.sqrt(jnp.float32(H))
    perm = jnp.concatenate([jnp.arange(0, H), jnp.arange(H, 2 * H),
                            jnp.arange(3 * H, 4 * H), jnp.arange(2 * H, 3 * H)])
    layers = []
    for layer in range(num_layers):
        d_in = input_size if layer == 0 else H
        key, k1, k2, k3, k4 = jax.random.split(key, 5)
        w_ih = jax.random.uniform(k1, (4 * H, d_in), jnp.float32, -k, k)[perm]
        w_hh = jax.random.uniform(k2, (4 * H, H), jnp.float32, -k, k)[perm]
        b_ih = jax.random.uniform(k3, (4 * H,), jnp.float32, -k, k)[perm]
        b_hh = jax.random.uniform(k4, (4 * H,), jnp.float32, -k, k)[perm]
        layers.append((w_ih.T, w_hh.T, (b_ih + b_hh)[None, :]))  # (Din,4H),(H,4H),(1,4H)
    key, k5, k6 = jax.random.split(key, 3)
    fc_w = jax.random.uniform(k5, (output_size, H), jnp.float32, -k, k)
    fc_b = jax.random.uniform(k6, (output_size,), jnp.float32, -k, k)
    return {"layers": layers, "fc_w": fc_w.T, "fc_b": fc_b[None, :]}


def prepare_kernel_params(params, *, lane_pad=128):
    """Pack master f32 params into kernel form: bf16 weights, concatenated
    [W_ih; W_hh] for layers >= 1, lane-padded fc head."""
    layers = params["layers"]
    wih0_t, whh0_t, b0 = layers[0]
    wcat, biases = [], []
    for (wih_t, whh_t, b) in layers[1:]:
        wcat.append(jnp.concatenate([wih_t, whh_t], axis=0).astype(jnp.bfloat16))
        biases.append(b)
    H, O = params["fc_w"].shape
    o_pad = max(lane_pad, O)
    fc_w = jnp.zeros((H, o_pad), jnp.float32).at[:, :O].set(params["fc_w"])
    fc_b = jnp.zeros((1, o_pad), jnp.float32).at[:, :O].set(params["fc_b"])
    return {
        "wih0": wih0_t.astype(jnp.bfloat16),
        "whh0": whh0_t.astype(jnp.bfloat16),
        "b0": b0,
        "wcat": wcat,
        "b": biases,
        "fc_w": fc_w.astype(jnp.bfloat16),
        "fc_b": fc_b,
    }


# ---------------------------------------------------------------------------
# Pure-JAX f32 reference (layer-serial scan) for correctness check
# ---------------------------------------------------------------------------
def lstm_forward_ref(x_btd, params):
    B = x_btd.shape[0]
    x = jnp.transpose(x_btd, (1, 0, 2))
    for (w_ih_t, w_hh_t, bias) in params["layers"]:
        H = w_hh_t.shape[0]

        def step(carry, x_t, w_ih_t=w_ih_t, w_hh_t=w_hh_t, bias=bias, H=H):
            h, c = carry
            gates = x_t @ w_ih_t + h @ w_hh_t + bias
            # permuted gate order [i, f, o, g]
            i_g = jax.nn.sigmoid(gates[:, 0 * H:1 * H])
            f_g = jax.nn.sigmoid(gates[:, 1 * H:2 * H])
            o_g = jax.nn.sigmoid(gates[:, 2 * H:3 * H])
            g_g = jnp.tanh(gates[:, 3 * H:4 * H])
            c_new = f_g * c + i_g * g_g
            h_new = o_g * jnp.tanh(c_new)
            return (h_new, c_new), h_new

        init = (jnp.zeros((B, H), jnp.float32), jnp.zeros((B, H), jnp.float32))
        _, x = lax.scan(step, init, x)
    return x[-1] @ params["fc_w"] + params["fc_b"]


# ---------------------------------------------------------------------------
if __name__ == "__main__":
    # Small shapes consistent with the module's forward:
    # x: (batch, seq, input_size); 4 layers, output=1.
    # hidden=128 keeps each gate slice exactly one 128-lane vreg.
    batch, seq, input_size = 8, 8, 16
    hidden_size, num_layers, output_size = 128, 4, 1

    key = jax.random.PRNGKey(0)
    key, pkey, xkey = jax.random.split(key, 3)
    params = init_params(pkey, input_size, hidden_size, num_layers, output_size)
    kparams = prepare_kernel_params(params)
    x = jax.random.normal(xkey, (batch, seq, input_size), jnp.float32)

    out = lstm_forward(x, kparams, out_dim=output_size)
    out = jax.block_until_ready(out)

    ref = lstm_forward_ref(x, params)
    assert out.shape == (batch, output_size), out.shape
    # bf16 matmul operands vs f32 reference -> relaxed tolerance.
    assert jnp.allclose(out, ref, atol=2e-2, rtol=2e-2), (out, ref)

    print("KERNEL_OK")
</pallas_src>

<mosaic_0001>
module attributes {stable_mosaic.version = 11 : i64} {
  func.func @_fused_lstm_kernel(%arg0: memref<8x8x16xf32, #tpu.memory_space<vmem>>, %arg1: memref<16x512xbf16, #tpu.memory_space<vmem>>, %arg2: memref<128x512xbf16, #tpu.memory_space<vmem>>, %arg3: memref<1x512xf32, #tpu.memory_space<vmem>>, %arg4: memref<256x512xbf16, #tpu.memory_space<vmem>>, %arg5: memref<1x512xf32, #tpu.memory_space<vmem>>, %arg6: memref<256x512xbf16, #tpu.memory_space<vmem>>, %arg7: memref<1x512xf32, #tpu.memory_space<vmem>>, %arg8: memref<256x512xbf16, #tpu.memory_space<vmem>>, %arg9: memref<1x512xf32, #tpu.memory_space<vmem>>, %arg10: memref<128x128xbf16, #tpu.memory_space<vmem>>, %arg11: memref<1x128xf32, #tpu.memory_space<vmem>>, %arg12: memref<8x128xf32, #tpu.memory_space<vmem>>, %arg13: memref<8x8x512xf32, #tpu.memory_space<vmem>>) attributes {dimension_semantics = [], scalar_prefetch = 0 : i64, scratch_operands = 1 : i64, tpu.core_type = #tpu.core_type<tc>} {
    %c0 = arith.constant 0 : index
    %c0_0 = arith.constant 0 : index
    %c0_1 = arith.constant 0 : index
    %0 = vector.load %arg0[%c0, %c0_0, %c0_1] : memref<8x8x16xf32, #tpu.memory_space<vmem>>, vector<8x8x16xf32>
    %1 = vector.shape_cast %0 : vector<8x8x16xf32> to vector<64x16xf32>
    %2 = arith.truncf %1 : vector<64x16xf32> to vector<64x16xbf16>
    %c0_2 = arith.constant 0 : index
    %c0_3 = arith.constant 0 : index
    %3 = vector.load %arg1[%c0_2, %c0_3] : memref<16x512xbf16, #tpu.memory_space<vmem>>, vector<16x512xbf16>
    %cst = arith.constant dense<0.000000e+00> : vector<64x512xf32>
    %4 = tpu.matmul %2, %3, %cst {dimension_numbers = #tpu.dot_dimension_numbers<[1], [0], [0], [1], [0, 0, 1, 1], [], []>} : vector<64x16xbf16>, vector<16x512xbf16>, vector<64x512xf32> -> vector<64x512xf32>
    %c0_4 = arith.constant 0 : index
    %c0_5 = arith.constant 0 : index
    %5 = vector.load %arg3[%c0_4, %c0_5] : memref<1x512xf32, #tpu.memory_space<vmem>>, vector<1x512xf32>
    %6 = vector.broadcast %5 : vector<1x512xf32> to vector<64x512xf32>
    %7 = arith.addf %4, %6 : vector<64x512xf32>
    %8 = vector.shape_cast %7 : vector<64x512xf32> to vector<8x8x512xf32>
    %c0_6 = arith.constant 0 : index
    %c0_7 = arith.constant 0 : index
    %c0_8 = arith.constant 0 : index
    %9 = vector.load %arg13[%c0_6, %c0_7, %c0_8] : memref<8x8x512xf32, #tpu.memory_space<vmem>>, vector<8x8x512xf32>
    tpu.vector_store %arg13[%c0_6, %c0_7, %c0_8], %8 {strides = array<i32>} : memref<8x8x512xf32, #tpu.memory_space<vmem>>, vector<8x8x512xf32>,
    %cst_9 = arith.constant 0.000000e+00 : f32
    %10 = vector.broadcast %cst_9 : f32 to vector<8x128xf32>
    %cst_10 = arith.constant 0.000000e+00 : f32
    %11 = vector.broadcast %cst_10 : f32 to vector<8x128xf32>
    %cst_11 = arith.constant 0.000000e+00 : f32
    %12 = vector.broadcast %cst_11 : f32 to vector<8x128xf32>
    %cst_12 = arith.constant 0.000000e+00 : f32
    %13 = vector.broadcast %cst_12 : f32 to vector<8x128xf32>
    %cst_13 = arith.constant 0.000000e+00 : f32
    %14 = vector.broadcast %cst_13 : f32 to vector<8x128xf32>
    %cst_14 = arith.constant 0.000000e+00 : f32
    %15 = vector.broadcast %cst_14 : f32 to vector<8x128xf32>
    %cst_15 = arith.constant 0.000000e+00 : f32
    %16 = vector.broadcast %cst_15 : f32 to vector<8x128xf32>
    %cst_16 = arith.constant 0.000000e+00 : f32
    %17 = vector.broadcast %cst_16 : f32 to vector<8x128xf32>
    %c0_17 = arith.constant 0 : index
    %c0_18 = arith.constant 0 : index
    %c0_19 = arith.constant 0 : index
    %18 = vector.load %arg13[%c0_17, %c0_18, %c0_19] : memref<8x8x512xf32, #tpu.memory_space<vmem>>, vector<1x8x512xf32>
    %19 = vector.shape_cast %18 : vector<1x8x512xf32> to vector<8x512xf32>
    %20 = arith.truncf %10 : vector<8x128xf32> to vector<8x128xbf16>
    %c0_20 = arith.constant 0 : index
    %c0_21 = arith.constant 0 : index
    %21 = vector.load %arg2[%c0_20, %c0_21] : memref<128x512xbf16, #tpu.memory_space<vmem>>, vector<128x512xbf16>
    %cst_22 = arith.constant dense<0.000000e+00> : vector<8x512xf32>
    %22 = tpu.matmul %20, %21, %cst_22 {dimension_numbers = #tpu.dot_dimension_numbers<[1], [0], [0], [1], [0, 0, 1, 1], [], []>} : vector<8x128xbf16>, vector<128x512xbf16>, vector<8x512xf32> -> vector<8x512xf32>
    %23 = arith.addf %19, %22 : vector<8x512xf32>
    %24 = vector.extract_strided_slice %23 {offsets = [0, 0], sizes = [8, 384], strides = [1, 1]} : vector<8x512xf32> to vector<8x384xf32>
    %25 = arith.negf %24 : vector<8x384xf32>
    %26 = math.exp %25 : vector<8x384xf32>
    %cst_23 = arith.constant 1.000000e+00 : f32
    %27 = vector.broadcast %cst_23 : f32 to vector<8x384xf32>
    %28 = arith.addf %27, %26 : vector<8x384xf32>
    %29 = arith.divf %27, %28 : vector<8x384xf32>
    %30 = vector.extract_strided_slice %29 {offsets = [0, 0], sizes = [8, 128], strides = [1, 1]} : vector<8x384xf32> to vector<8x128xf32>
    %31 = vector.extract_strided_slice %29 {offsets = [0, 128], sizes = [8, 128], strides = [1, 1]} : vector<8x384xf32> to vector<8x128xf32>
    %32 = vector.extract_strided_slice %29 {offsets = [0, 256], sizes = [8, 128], strides = [1, 1]} : vector<8x384xf32> to vector<8x128xf32>
    %33 = vector.extract_strided_slice %23 {offsets = [0, 384], sizes = [8, 128], strides = [1, 1]} : vector<8x512xf32> to vector<8x128xf32>
    %34 = math.tanh %33 : vector<8x128xf32>
    %35 = arith.mulf %31, %14 : vector<8x128xf32>
    %36 = arith.mulf %30, %34 : vector<8x128xf32>
    %37 = arith.addf %35, %36 : vector<8x128xf32>
    %38 = math.tanh %37 : vector<8x128xf32>
    %39 = arith.mulf %32, %38 : vector<8x128xf32>
    %40 = tpu.concatenate %39, %11 in 1 : vector<8x128xf32>, vector<8x128xf32> -> vector<8x256xf32>
    %41 = arith.truncf %40 : vector<8x256xf32> to vector<8x256xbf16>
    %c0_24 = arith.constant 0 : index
    %c0_25 = arith.constant 0 : index
    %42 = vector.load %arg4[%c0_24, %c0_25] : memref<256x512xbf16, #tpu.memory_space<vmem>>, vector<256x512xbf16>
    %cst_26 = arith.constant dense<0.000000e+00> : vector<8x512xf32>
    %43 = tpu.matmul %41, %42, %cst_26 {dimension_numbers = #tpu.dot_dimension_numbers<[1], [0], [0], [1], [0, 0, 1, 1], [], []>} : vector<8x256xbf16>, vector<256x512xbf16>, vector<8x512xf32> -> vector<8x512xf32>
    %c0_27 = arith.constant 0 : index
    %c0_28 = arith.constant 0 : index
    %44 = vector.load %arg5[%c0_27, %c0_28] : memref<1x512xf32, #tpu.memory_space<vmem>>, vector<1x512xf32>
    %45 = vector.broadcast %44 : vector<1x512xf32> to vector<8x512xf32>
    %46 = arith.addf %43, %45 : vector<8x512xf32>
    %47 = vector.extract_strided_slice %46 {offsets = [0, 0], sizes = [8, 384], strides = [1, 1]} : vector<8x512xf32> to vector<8x384xf32>
    %48 = arith.negf %47 : vector<8x384xf32>
    %49 = math.exp %48 : vector<8x384xf32>
    %cst_29 = arith.constant 1.000000e+00 : f32
    %50 = vector.broadcast %cst_29 : f32 to vector<8x384xf32>
    %51 = arith.addf %50, %49 : vector<8x384xf32>
    %52 = arith.divf %50, %51 : vector<8x384xf32>
    %53 = vector.extract_strided_slice %52 {offsets = [0, 0], sizes = [8, 128], strides = [1, 1]} : vector<8x384xf32> to vector<8x128xf32>
    %54 = vector.extract_strided_slice %52 {offsets = [0, 128], sizes = [8, 128], strides = [1, 1]} : vector<8x384xf32> to vector<8x128xf32>
    %55 = vector.extract_strided_slice %52 {offsets = [0, 256], sizes = [8, 128], strides = [1, 1]} : vector<8x384xf32> to vector<8x128xf32>
    %56 = vector.extract_strided_slice %46 {offsets = [0, 384], sizes = [8, 128], strides = [1, 1]} : vector<8x512xf32> to vector<8x128xf32>
    %57 = math.tanh %56 : vector<8x128xf32>
    %58 = arith.mulf %54, %15 : vector<8x128xf32>
    %59 = arith.mulf %53, %57 : vector<8x128xf32>
    %60 = arith.addf %58, %59 : vector<8x128xf32>
    %61 = math.tanh %60 : vector<8x128xf32>
    %62 = arith.mulf %55, %61 : vector<8x128xf32>
    %c1 = arith.constant 1 : index
    %c0_30 = arith.constant 0 : index
    %c0_31 = arith.constant 0 : index
    %63 = vector.load %arg13[%c1, %c0_30, %c0_31] : memref<8x8x512xf32, #tpu.memory_space<vmem>>, vector<1x8x512xf32>
    %64 = vector.shape_cast %63 : vector<1x8x512xf32> to vector<8x512xf32>
    %65 = arith.truncf %39 : vector<8x128xf32> to vector<8x128xbf16>
    %c0_32 = arith.constant 0 : index
    %c0_33 = arith.constant 0 : index
    %66 = vector.load %arg2[%c0_32, %c0_33] : memref<128x512xbf16, #tpu.memory_space<vmem>>, vector<128x512xbf16>
    %cst_34 = arith.constant dense<0.000000e+00> : vector<8x512xf32>
    %67 = tpu.matmul %65, %66, %cst_34 {dimension_numbers = #tpu.dot_dimension_numbers<[1], [0], [0], [1], [0, 0, 1, 1], [], []>} : vector<8x128xbf16>, vector<128x512xbf16>, vector<8x512xf32> -> vector<8x512xf32>
    %68 = arith.addf %64, %67 : vector<8x512xf32>
    %69 = vector.extract_strided_slice %68 {offsets = [0, 0], sizes = [8, 384], strides = [1, 1]} : vector<8x512xf32> to vector<8x384xf32>
    %70 = arith.negf %69 : vector<8x384xf32>
    %71 = math.exp %70 : vector<8x384xf32>
    %cst_35 = arith.constant 1.000000e+00 : f32
    %72 = vector.broadcast %cst_35 : f32 to vector<8x384xf32>
    %73 = arith.addf %72, %71 : vector<8x384xf32>
    %74 = arith.divf %72, %73 : vector<8x384xf32>
    %75 = vector.extract_strided_slice %74 {offsets = [0, 0], sizes = [8, 128], strides = [1, 1]} : vector<8x384xf32> to vector<8x128xf32>
    %76 = vector.extract_strided_slice %74 {offsets = [0, 128], sizes = [8, 128], strides = [1, 1]} : vector<8x384xf32> to vector<8x128xf32>
    %77 = vector.extract_strided_slice %74 {offsets = [0, 256], sizes = [8, 128], strides = [1, 1]} : vector<8x384xf32> to vector<8x128xf32>
    %78 = vector.extract_strided_slice %68 {offsets = [0, 384], sizes = [8, 128], strides = [1, 1]} : vector<8x512xf32> to vector<8x128xf32>
    %79 = math.tanh %78 : vector<8x128xf32>
    %80 = arith.mulf %76, %37 : vector<8x128xf32>
    %81 = arith.mulf %75, %79 : vector<8x128xf32>
    %82 = arith.addf %80, %81 : vector<8x128xf32>
    %83 = math.tanh %82 : vector<8x128xf32>
    %84 = arith.mulf %77, %83 : vector<8x128xf32>
    %85 = tpu.concatenate %62, %12 in 1 : vector<8x128xf32>, vector<8x128xf32> -> vector<8x256xf32>
    %86 = arith.truncf %85 : vector<8x256xf32> to vector<8x256xbf16>
    %c0_36 = arith.constant 0 : index
    %c0_37 = arith.constant 0 : index
    %87 = vector.load %arg6[%c0_36, %c0_37] : memref<256x512xbf16, #tpu.memory_space<vmem>>, vector<256x512xbf16>
    %cst_38 = arith.constant dense<0.000000e+00> : vector<8x512xf32>
    %88 = tpu.matmul %86, %87, %cst_38 {dimension_numbers = #tpu.dot_dimension_numbers<[1], [0], [0], [1], [0, 0, 1, 1], [], []>} : vector<8x256xbf16>, vector<256x512xbf16>, vector<8x512xf32> -> vector<8x512xf32>
    %c0_39 = arith.constant 0 : index
    %c0_40 = arith.constant 0 : index
    %89 = vector.load %arg7[%c0_39, %c0_40] : memref<1x512xf32, #tpu.memory_space<vmem>>, vector<1x512xf32>
    %90 = vector.broadcast %89 : vector<1x512xf32> to vector<8x512xf32>
    %91 = arith.addf %88, %90 : vector<8x512xf32>
    %92 = vector.extract_strided_slice %91 {offsets = [0, 0], sizes = [8, 384], strides = [1, 1]} : vector<8x512xf32> to vector<8x384xf32>
    %93 = arith.negf %92 : vector<8x384xf32>
    %94 = math.exp %93 : vector<8x384xf32>
    %cst_41 = arith.constant 1.000000e+00 : f32
    %95 = vector.broadcast %cst_41 : f32 to vector<8x384xf32>
    %96 = arith.addf %95, %94 : vector<8x384xf32>
    %97 = arith.divf %95, %96 : vector<8x384xf32>
    %98 = vector.extract_strided_slice %97 {offsets = [0, 0], sizes = [8, 128], strides = [1, 1]} : vector<8x384xf32> to vector<8x128xf32>
    %99 = vector.extract_strided_slice %97 {offsets = [0, 128], sizes = [8, 128], strides = [1, 1]} : vector<8x384xf32> to vector<8x128xf32>
    %100 = vector.extract_strided_slice %97 {offsets = [0, 256], sizes = [8, 128], strides = [1, 1]} : vector<8x384xf32> to vector<8x128xf32>
    %101 = vector.extract_strided_slice %91 {offsets = [0, 384], sizes = [8, 128], strides = [1, 1]} : vector<8x512xf32> to vector<8x128xf32>
    %102 = math.tanh %101 : vector<8x128xf32>
    %103 = arith.mulf %99, %16 : vector<8x128xf32>
    %104 = arith.mulf %98, %102 : vector<8x128xf32>
    %105 = arith.addf %103, %104 : vector<8x128xf32>
    %106 = math.tanh %105 : vector<8x128xf32>
    %107 = arith.mulf %100, %106 : vector<8x128xf32>
    %108 = tpu.concatenate %84, %62 in 1 : vector<8x128xf32>, vector<8x128xf32> -> vector<8x256xf32>
    %109 = arith.truncf %108 : vector<8x256xf32> to vector<8x256xbf16>
    %c0_42 = arith.constant 0 : index
    %c0_43 = arith.constant 0 : index
    %110 = vector.load %arg4[%c0_42, %c0_43] : memref<256x512xbf16, #tpu.memory_space<vmem>>, vector<256x512xbf16>
    %cst_44 = arith.constant dense<0.000000e+00> : vector<8x512xf32>
    %111 = tpu.matmul %109, %110, %cst_44 {dimension_numbers = #tpu.dot_dimension_numbers<[1], [0], [0], [1], [0, 0, 1, 1], [], []>} : vector<8x256xbf16>, vector<256x512xbf16>, vector<8x512xf32> -> vector<8x512xf32>
    %c0_45 = arith.constant 0 : index
    %c0_46 = arith.constant 0 : index
    %112 = vector.load %arg5[%c0_45, %c0_46] : memref<1x512xf32, #tpu.memory_space<vmem>>, vector<1x512xf32>
    %113 = vector.broadcast %112 : vector<1x512xf32> to vector<8x512xf32>
    %114 = arith.addf %111, %113 : vector<8x512xf32>
    %115 = vector.extract_strided_slice %114 {offsets = [0, 0], sizes = [8, 384], strides = [1, 1]} : vector<8x512xf32> to vector<8x384xf32>
    %116 = arith.negf %115 : vector<8x384xf32>
    %117 = math.exp %116 : vector<8x384xf32>
    %cst_47 = arith.constant 1.000000e+00 : f32
    %118 = vector.broadcast %cst_47 : f32 to vector<8x384xf32>
    %119 = arith.addf %118, %117 : vector<8x384xf32>
    %120 = arith.divf %118, %119 : vector<8x384xf32>
    %121 = vector.extract_strided_slice %120 {offsets = [0, 0], sizes = [8, 128], strides = [1, 1]} : vector<8x384xf32> to vector<8x128xf32>
    %122 = vector.extract_strided_slice %120 {offsets = [0, 128], sizes = [8, 128], strides = [1, 1]} : vector<8x384xf32> to vector<8x128xf32>
    %123 = vector.extract_strided_slice %120 {offsets = [0, 256], sizes = [8, 128], strides = [1, 1]} : vector<8x384xf32> to vector<8x128xf32>
    %124 = vector.extract_strided_slice %114 {offsets = [0, 384], sizes = [8, 128], strides = [1, 1]} : vector<8x512xf32> to vector<8x128xf32>
    %125 = math.tanh %124 : vector<8x128xf32>
    %126 = arith.mulf %122, %60 : vector<8x128xf32>
    %127 = arith.mulf %121, %125 : vector<8x128xf32>
    %128 = arith.addf %126, %127 : vector<8x128xf32>
    %129 = math.tanh %128 : vector<8x128xf32>
    %130 = arith.mulf %123, %129 : vector<8x128xf32>
    %c2 = arith.constant 2 : index
    %c0_48 = arith.constant 0 : index
    %c0_49 = arith.constant 0 : index
    %131 = vector.load %arg13[%c2, %c0_48, %c0_49] : memref<8x8x512xf32, #tpu.memory_space<vmem>>, vector<1x8x512xf32>
    %132 = vector.shape_cast %131 : vector<1x8x512xf32> to vector<8x512xf32>
    %133 = arith.truncf %84 : vector<8x128xf32> to vector<8x128xbf16>
    %c0_50 = arith.constant 0 : index
    %c0_51 = arith.constant 0 : index
    %134 = vector.load %arg2[%c0_50, %c0_51] : memref<128x512xbf16, #tpu.memory_space<vmem>>, vector<128x512xbf16>
    %cst_52 = arith.constant dense<0.000000e+00> : vector<8x512xf32>
    %135 = tpu.matmul %133, %134, %cst_52 {dimension_numbers = #tpu.dot_dimension_numbers<[1], [0], [0], [1], [0, 0, 1, 1], [], []>} : vector<8x128xbf16>, vector<128x512xbf16>, vector<8x512xf32> -> vector<8x512xf32>
    %136 = arith.addf %132, %135 : vector<8x512xf32>
    %137 = vector.extract_strided_slice %136 {offsets = [0, 0], sizes = [8, 384], strides = [1, 1]} : vector<8x512xf32> to vector<8x384xf32>
    %138 = arith.negf %137 : vector<8x384xf32>
    %139 = math.exp %138 : vector<8x384xf32>
    %cst_53 = arith.constant 1.000000e+00 : f32
    %140 = vector.broadcast %cst_53 : f32 to vector<8x384xf32>
    %141 = arith.addf %140, %139 : vector<8x384xf32>
    %142 = arith.divf %140, %141 : vector<8x384xf32>
    %143 = vector.extract_strided_slice %142 {offsets = [0, 0], sizes = [8, 128], strides = [1, 1]} : vector<8x384xf32> to vector<8x128xf32>
    %144 = vector.extract_strided_slice %142 {offsets = [0, 128], sizes = [8, 128], strides = [1, 1]} : vector<8x384xf32> to vector<8x128xf32>
    %145 = vector.extract_strided_slice %142 {offsets = [0, 256], sizes = [8, 128], strides = [1, 1]} : vector<8x384xf32> to vector<8x128xf32>
    %146 = vector.extract_strided_slice %136 {offsets = [0, 384], sizes = [8, 128], strides = [1, 1]} : vector<8x512xf32> to vector<8x128xf32>
    %147 = math.tanh %146 : vector<8x128xf32>
    %148 = arith.mulf %144, %82 : vector<8x128xf32>
    %149 = arith.mulf %143, %147 : vector<8x128xf32>
    %150 = arith.addf %148, %149 : vector<8x128xf32>
    %151 = math.tanh %150 : vector<8x128xf32>
    %152 = arith.mulf %145, %151 : vector<8x128xf32>
    %153 = tpu.concatenate %107, %13 in 1 : vector<8x128xf32>, vector<8x128xf32> -> vector<8x256xf32>
    %154 = arith.truncf %153 : vector<8x256xf32> to vector<8x256xbf16>
    %c0_54 = arith.constant 0 : index
    %c0_55 = arith.constant 0 : index
    %155 = vector.load %arg8[%c0_54, %c0_55] : memref<256x512xbf16, #tpu.memory_space<vmem>>, vector<256x512xbf16>
    %cst_56 = arith.constant dense<0.000000e+00> : vector<8x512xf32>
    %156 = tpu.matmul %154, %155, %cst_56 {dimension_numbers = #tpu.dot_dimension_numbers<[1], [0], [0], [1], [0, 0, 1, 1], [], []>} : vector<8x256xbf16>, vector<256x512xbf16>, vector<8x512xf32> -> vector<8x512xf32>
    %c0_57 = arith.constant 0 : index
    %c0_58 = arith.constant 0 : index
    %157 = vector.load %arg9[%c0_57, %c0_58] : memref<1x512xf32, #tpu.memory_space<vmem>>, vector<1x512xf32>
    %158 = vector.broadcast %157 : vector<1x512xf32> to vector<8x512xf32>
    %159 = arith.addf %156, %158 : vector<8x512xf32>
    %160 = vector.extract_strided_slice %159 {offsets = [0, 0], sizes = [8, 384], strides = [1, 1]} : vector<8x512xf32> to vector<8x384xf32>
    %161 = arith.negf %160 : vector<8x384xf32>
    %162 = math.exp %161 : vector<8x384xf32>
    %cst_59 = arith.constant 1.000000e+00 : f32
    %163 = vector.broadcast %cst_59 : f32 to vector<8x384xf32>
    %164 = arith.addf %163, %162 : vector<8x384xf32>
    %165 = arith.divf %163, %164 : vector<8x384xf32>
    %166 = vector.extract_strided_slice %165 {offsets = [0, 0], sizes = [8, 128], strides = [1, 1]} : vector<8x384xf32> to vector<8x128xf32>
    %167 = vector.extract_strided_slice %165 {offsets = [0, 128], sizes = [8, 128], strides = [1, 1]} : vector<8x384xf32> to vector<8x128xf32>
    %168 = vector.extract_strided_slice %165 {offsets = [0, 256], sizes = [8, 128], strides = [1, 1]} : vector<8x384xf32> to vector<8x128xf32>
    %169 = vector.extract_strided_slice %159 {offsets = [0, 384], sizes = [8, 128], strides = [1, 1]} : vector<8x512xf32> to vector<8x128xf32>
    %170 = math.tanh %169 : vector<8x128xf32>
    %171 = arith.mulf %167, %17 : vector<8x128xf32>
    %172 = arith.mulf %166, %170 : vector<8x128xf32>
    %173 = arith.addf %171, %172 : vector<8x128xf32>
    %174 = math.tanh %173 : vector<8x128xf32>
    %175 = arith.mulf %168, %174 : vector<8x128xf32>
    %176 = tpu.concatenate %130, %107 in 1 : vector<8x128xf32>, vector<8x128xf32> -> vector<8x256xf32>
    %177 = arith.truncf %176 : vector<8x256xf32> to vector<8x256xbf16>
    %c0_60 = arith.constant 0 : index
    %c0_61 = arith.constant 0 : index
    %178 = vector.load %arg6[%c0_60, %c0_61] : memref<256x512xbf16, #tpu.memory_space<vmem>>, vector<256x512xbf16>
    %cst_62 = arith.constant dense<0.000000e+00> : vector<8x512xf32>
    %179 = tpu.matmul %177, %178, %cst_62 {dimension_numbers = #tpu.dot_dimension_numbers<[1], [0], [0], [1], [0, 0, 1, 1], [], []>} : vector<8x256xbf16>, vector<256x512xbf16>, vector<8x512xf32> -> vector<8x512xf32>
    %c0_63 = arith.constant 0 : index
    %c0_64 = arith.constant 0 : index
    %180 = vector.load %arg7[%c0_63, %c0_64] : memref<1x512xf32, #tpu.memory_space<vmem>>, vector<1x512xf32>
    %181 = vector.broadcast %180 : vector<1x512xf32> to vector<8x512xf32>
    %182 = arith.addf %179, %181 : vector<8x512xf32>
    %183 = vector.extract_strided_slice %182 {offsets = [0, 0], sizes = [8, 384], strides = [1, 1]} : vector<8x512xf32> to vector<8x384xf32>
    %184 = arith.negf %183 : vector<8x384xf32>
    %185 = math.exp %184 : vector<8x384xf32>
    %cst_65 = arith.constant 1.000000e+00 : f32
    %186 = vector.broadcast %cst_65 : f32 to vector<8x384xf32>
    %187 = arith.addf %186, %185 : vector<8x384xf32>
    %188 = arith.divf %186, %187 : vector<8x384xf32>
    %189 = vector.extract_strided_slice %188 {offsets = [0, 0], sizes = [8, 128], strides = [1, 1]} : vector<8x384xf32> to vector<8x128xf32>
    %190 = vector.extract_strided_slice %188 {offsets = [0, 128], sizes = [8, 128], strides = [1, 1]} : vector<8x384xf32> to vector<8x128xf32>
    %191 = vector.extract_strided_slice %188 {offsets = [0, 256], sizes = [8, 128], strides = [1, 1]} : vector<8x384xf32> to vector<8x128xf32>
    %192 = vector.extract_strided_slice %182 {offsets = [0, 384], sizes = [8, 128], strides = [1, 1]} : vector<8x512xf32> to vector<8x128xf32>
    %193 = math.tanh %192 : vector<8x128xf32>
    %194 = arith.mulf %190, %105 : vector<8x128xf32>
    %195 = arith.mulf %189, %193 : vector<8x128xf32>
    %196 = arith.addf %194, %195 : vector<8x128xf32>
    %197 = math.tanh %196 : vector<8x128xf32>
    %198 = arith.mulf %191, %197 : vector<8x128xf32>
    %199 = tpu.concatenate %152, %130 in 1 : vector<8x128xf32>, vector<8x128xf32> -> vector<8x256xf32>
    %200 = arith.truncf %199 : vector<8x256xf32> to vector<8x256xbf16>
    %c0_66 = arith.constant 0 : index
    %c0_67 = arith.constant 0 : index
    %201 = vector.load %arg4[%c0_66, %c0_67] : memref<256x512xbf16, #tpu.memory_space<vmem>>, vector<256x512xbf16>
    %cst_68 = arith.constant dense<0.000000e+00> : vector<8x512xf32>
    %202 = tpu.matmul %200, %201, %cst_68 {dimension_numbers = #tpu.dot_dimension_numbers<[1], [0], [0], [1], [0, 0, 1, 1], [], []>} : vector<8x256xbf16>, vector<256x512xbf16>, vector<8x512xf32> -> vector<8x512xf32>
    %c0_69 = arith.constant 0 : index
    %c0_70 = arith.constant 0 : index
    %203 = vector.load %arg5[%c0_69, %c0_70] : memref<1x512xf32, #tpu.memory_space<vmem>>, vector<1x512xf32>
    %204 = vector.broadcast %203 : vector<1x512xf32> to vector<8x512xf32>
    %205 = arith.addf %202, %204 : vector<8x512xf32>
    %206 = vector.extract_strided_slice %205 {offsets = [0, 0], sizes = [8, 384], strides = [1, 1]} : vector<8x512xf32> to vector<8x384xf32>
    %207 = arith.negf %206 : vector<8x384xf32>
    %208 = math.exp %207 : vector<8x384xf32>
    %cst_71 = arith.constant 1.000000e+00 : f32
    %209 = vector.broadcast %cst_71 : f32 to vector<8x384xf32>
    %210 = arith.addf %209, %208 : vector<8x384xf32>
    %211 = arith.divf %209, %210 : vector<8x384xf32>
    %212 = vector.extract_strided_slice %211 {offsets = [0, 0], sizes = [8, 128], strides = [1, 1]} : vector<8x384xf32> to vector<8x128xf32>
    %213 = vector.extract_strided_slice %211 {offsets = [0, 128], sizes = [8, 128], strides = [1, 1]} : vector<8x384xf32> to vector<8x128xf32>
    %214 = vector.extract_strided_slice %211 {offsets = [0, 256], sizes = [8, 128], strides = [1, 1]} : vector<8x384xf32> to vector<8x128xf32>
    %215 = vector.extract_strided_slice %205 {offsets = [0, 384], sizes = [8, 128], strides = [1, 1]} : vector<8x512xf32> to vector<8x128xf32>
    %216 = math.tanh %215 : vector<8x128xf32>
    %217 = arith.mulf %213, %128 : vector<8x128xf32>
    %218 = arith.mulf %212, %216 : vector<8x128xf32>
    %219 = arith.addf %217, %218 : vector<8x128xf32>
    %220 = math.tanh %219 : vector<8x128xf32>
    %221 = arith.mulf %214, %220 : vector<8x128xf32>
    %c3 = arith.constant 3 : index
    %c0_72 = arith.constant 0 : index
    %c0_73 = arith.constant 0 : index
    %222 = vector.load %arg13[%c3, %c0_72, %c0_73] : memref<8x8x512xf32, #tpu.memory_space<vmem>>, vector<1x8x512xf32>
    %223 = vector.shape_cast %222 : vector<1x8x512xf32> to vector<8x512xf32>
    %224 = arith.truncf %152 : vector<8x128xf32> to vector<8x128xbf16>
    %c0_74 = arith.constant 0 : index
    %c0_75 = arith.constant 0 : index
    %225 = vector.load %arg2[%c0_74, %c0_75] : memref<128x512xbf16, #tpu.memory_space<vmem>>, vector<128x512xbf16>
    %cst_76 = arith.constant dense<0.000000e+00> : vector<8x512xf32>
    %226 = tpu.matmul %224, %225, %cst_76 {dimension_numbers = #tpu.dot_dimension_numbers<[1], [0], [0], [1], [0, 0, 1, 1], [], []>} : vector<8x128xbf16>, vector<128x512xbf16>, vector<8x512xf32> -> vector<8x512xf32>
    %227 = arith.addf %223, %226 : vector<8x512xf32>
    %228 = vector.extract_strided_slice %227 {offsets = [0, 0], sizes = [8, 384], strides = [1, 1]} : vector<8x512xf32> to vector<8x384xf32>
    %229 = arith.negf %228 : vector<8x384xf32>
    %230 = math.exp %229 : vector<8x384xf32>
    %cst_77 = arith.constant 1.000000e+00 : f32
    %231 = vector.broadcast %cst_77 : f32 to vector<8x384xf32>
    %232 = arith.addf %231, %230 : vector<8x384xf32>
    %233 = arith.divf %231, %232 : vector<8x384xf32>
    %234 = vector.extract_strided_slice %233 {offsets = [0, 0], sizes = [8, 128], strides = [1, 1]} : vector<8x384xf32> to vector<8x128xf32>
    %235 = vector.extract_strided_slice %233 {offsets = [0, 128], sizes = [8, 128], strides = [1, 1]} : vector<8x384xf32> to vector<8x128xf32>
    %236 = vector.extract_strided_slice %233 {offsets = [0, 256], sizes = [8, 128], strides = [1, 1]} : vector<8x384xf32> to vector<8x128xf32>
    %237 = vector.extract_strided_slice %227 {offsets = [0, 384], sizes = [8, 128], strides = [1, 1]} : vector<8x512xf32> to vector<8x128xf32>
    %238 = math.tanh %237 : vector<8x128xf32>
    %239 = arith.mulf %235, %150 : vector<8x128xf32>
    %240 = arith.mulf %234, %238 : vector<8x128xf32>
    %241 = arith.addf %239, %240 : vector<8x128xf32>
    %242 = math.tanh %241 : vector<8x128xf32>
    %243 = arith.mulf %236, %242 : vector<8x128xf32>
    %244 = tpu.concatenate %198, %175 in 1 : vector<8x128xf32>, vector<8x128xf32> -> vector<8x256xf32>
    %245 = arith.truncf %244 : vector<8x256xf32> to vector<8x256xbf16>
    %c0_78 = arith.constant 0 : index
    %c0_79 = arith.constant 0 : index
    %246 = vector.load %arg8[%c0_78, %c0_79] : memref<256x512xbf16, #tpu.memory_space<vmem>>, vector<256x512xbf16>
    %cst_80 = arith.constant dense<0.000000e+00> : vector<8x512xf32>
    %247 = tpu.matmul %245, %246, %cst_80 {dimension_numbers = #tpu.dot_dimension_numbers<[1], [0], [0], [1], [0, 0, 1, 1], [], []>} : vector<8x256xbf16>, vector<256x512xbf16>, vector<8x512xf32> -> vector<8x512xf32>
    %c0_81 = arith.constant 0 : index
    %c0_82 = arith.constant 0 : index
    %248 = vector.load %arg9[%c0_81, %c0_82] : memref<1x512xf32, #tpu.memory_space<vmem>>, vector<1x512xf32>
    %249 = vector.broadcast %248 : vector<1x512xf32> to vector<8x512xf32>
    %250 = arith.addf %247, %249 : vector<8x512xf32>
    %251 = vector.extract_strided_slice %250 {offsets = [0, 0], sizes = [8, 384], strides = [1, 1]} : vector<8x512xf32> to vector<8x384xf32>
    %252 = arith.negf %251 : vector<8x384xf32>
    %253 = math.exp %252 : vector<8x384xf32>
    %cst_83 = arith.constant 1.000000e+00 : f32
    %254 = vector.broadcast %cst_83 : f32 to vector<8x384xf32>
    %255 = arith.addf %254, %253 : vector<8x384xf32>
    %256 = arith.divf %254, %255 : vector<8x384xf32>
    %257 = vector.extract_strided_slice %256 {offsets = [0, 0], sizes = [8, 128], strides = [1, 1]} : vector<8x384xf32> to vector<8x128xf32>
    %258 = vector.extract_strided_slice %256 {offsets = [0, 128], sizes = [8, 128], strides = [1, 1]} : vector<8x384xf32> to vector<8x128xf32>
    %259 = vector.extract_strided_slice %256 {offsets = [0, 256], sizes = [8, 128], strides = [1, 1]} : vector<8x384xf32> to vector<8x128xf32>
    %260 = vector.extract_strided_slice %250 {offsets = [0, 384], sizes = [8, 128], strides = [1, 1]} : vector<8x512xf32> to vector<8x128xf32>
    %261 = math.tanh %260 : vector<8x128xf32>
    %262 = arith.mulf %258, %173 : vector<8x128xf32>
    %263 = arith.mulf %257, %261 : vector<8x128xf32>
    %264 = arith.addf %262, %263 : vector<8x128xf32>
    %265 = math.tanh %264 : vector<8x128xf32>
    %266 = arith.mulf %259, %265 : vector<8x128xf32>
    %267 = tpu.concatenate %221, %198 in 1 : vector<8x128xf32>, vector<8x128xf32> -> vector<8x256xf32>
    %268 = arith.truncf %267 : vector<8x256xf32> to vector<8x256xbf16>
    %c0_84 = arith.constant 0 : index
    %c0_85 = arith.constant 0 : index
    %269 = vector.load %arg6[%c0_84, %c0_85] : memref<256x512xbf16, #tpu.memory_space<vmem>>, vector<256x512xbf16>
    %cst_86 = arith.constant dense<0.000000e+00> : vector<8x512xf32>
    %270 = tpu.matmul %268, %269, %cst_86 {dimension_numbers = #tpu.dot_dimension_numbers<[1], [0], [0], [1], [0, 0, 1, 1], [], []>} : vector<8x256xbf16>, vector<256x512xbf16>, vector<8x512xf32> -> vector<8x512xf32>
    %c0_87 = arith.constant 0 : index
    %c0_88 = arith.constant 0 : index
    %271 = vector.load %arg7[%c0_87, %c0_88] : memref<1x512xf32, #tpu.memory_space<vmem>>, vector<1x512xf32>
    %272 = vector.broadcast %271 : vector<1x512xf32> to vector<8x512xf32>
    %273 = arith.addf %270, %272 : vector<8x512xf32>
    %274 = vector.extract_strided_slice %273 {offsets = [0, 0], sizes = [8, 384], strides = [1, 1]} : vector<8x512xf32> to vector<8x384xf32>
    %275 = arith.negf %274 : vector<8x384xf32>
    %276 = math.exp %275 : vector<8x384xf32>
    %cst_89 = arith.constant 1.000000e+00 : f32
    %277 = vector.broadcast %cst_89 : f32 to vector<8x384xf32>
    %278 = arith.addf %277, %276 : vector<8x384xf32>
    %279 = arith.divf %277, %278 : vector<8x384xf32>
    %280 = vector.extract_strided_slice %279 {offsets = [0, 0], sizes = [8, 128], strides = [1, 1]} : vector<8x384xf32> to vector<8x128xf32>
    %281 = vector.extract_strided_slice %279 {offsets = [0, 128], sizes = [8, 128], strides = [1, 1]} : vector<8x384xf32> to vector<8x128xf32>
    %282 = vector.extract_strided_slice %279 {offsets = [0, 256], sizes = [8, 128], strides = [1, 1]} : vector<8x384xf32> to vector<8x128xf32>
    %283 = vector.extract_strided_slice %273 {offsets = [0, 384], sizes = [8, 128], strides = [1, 1]} : vector<8x512xf32> to vector<8x128xf32>
    %284 = math.tanh %283 : vector<8x128xf32>
    %285 = arith.mulf %281, %196 : vector<8x128xf32>
    %286 = arith.mulf %280, %284 : vector<8x128xf32>
    %287 = arith.addf %285, %286 : vector<8x128xf32>
    %288 = math.tanh %287 : vector<8x128xf32>
    %289 = arith.mulf %282, %288 : vector<8x128xf32>
    %290 = tpu.concatenate %243, %221 in 1 : vector<8x128xf32>, vector<8x128xf32> -> vector<8x256xf32>
    %291 = arith.truncf %290 : vector<8x256xf32> to vector<8x256xbf16>
    %c0_90 = arith.constant 0 : index
    %c0_91 = arith.constant 0 : index
    %292 = vector.load %arg4[%c0_90, %c0_91] : memref<256x512xbf16, #tpu.memory_space<vmem>>, vector<256x512xbf16>
    %cst_92 = arith.constant dense<0.000000e+00> : vector<8x512xf32>
    %293 = tpu.matmul %291, %292, %cst_92 {dimension_numbers = #tpu.dot_dimension_numbers<[1], [0], [0], [1], [0, 0, 1, 1], [], []>} : vector<8x256xbf16>, vector<256x512xbf16>, vector<8x512xf32> -> vector<8x512xf32>
    %c0_93 = arith.constant 0 : index
    %c0_94 = arith.constant 0 : index
    %294 = vector.load %arg5[%c0_93, %c0_94] : memref<1x512xf32, #tpu.memory_space<vmem>>, vector<1x512xf32>
    %295 = vector.broadcast %294 : vector<1x512xf32> to vector<8x512xf32>
    %296 = arith.addf %293, %295 : vector<8x512xf32>
    %297 = vector.extract_strided_slice %296 {offsets = [0, 0], sizes = [8, 384], strides = [1, 1]} : vector<8x512xf32> to vector<8x384xf32>
    %298 = arith.negf %297 : vector<8x384xf32>
    %299 = math.exp %298 : vector<8x384xf32>
    %cst_95 = arith.constant 1.000000e+00 : f32
    %300 = vector.broadcast %cst_95 : f32 to vector<8x384xf32>
    %301 = arith.addf %300, %299 : vector<8x384xf32>
    %302 = arith.divf %300, %301 : vector<8x384xf32>
    %303 = vector.extract_strided_slice %302 {offsets = [0, 0], sizes = [8, 128], strides = [1, 1]} : vector<8x384xf32> to vector<8x128xf32>
    %304 = vector.extract_strided_slice %302 {offsets = [0, 128], sizes = [8, 128], strides = [1, 1]} : vector<8x384xf32> to vector<8x128xf32>
    %305 = vector.extract_strided_slice %302 {offsets = [0, 256], sizes = [8, 128], strides = [1, 1]} : vector<8x384xf32> to vector<8x128xf32>
    %306 = vector.extract_strided_slice %296 {offsets = [0, 384], sizes = [8, 128], strides = [1, 1]} : vector<8x512xf32> to vector<8x128xf32>
    %307 = math.tanh %306 : vector<8x128xf32>
    %308 = arith.mulf %304, %219 : vector<8x128xf32>
    %309 = arith.mulf %303, %307 : vector<8x128xf32>
    %310 = arith.addf %308, %309 : vector<8x128xf32>
    %311 = math.tanh %310 : vector<8x128xf32>
    %312 = arith.mulf %305, %311 : vector<8x128xf32>
    %c4 = arith.constant 4 : index
    %c0_96 = arith.constant 0 : index
    %c0_97 = arith.constant 0 : index
    %313 = vector.load %arg13[%c4, %c0_96, %c0_97] : memref<8x8x512xf32, #tpu.memory_space<vmem>>, vector<1x8x512xf32>
    %314 = vector.shape_cast %313 : vector<1x8x512xf32> to vector<8x512xf32>
    %315 = arith.truncf %243 : vector<8x128xf32> to vector<8x128xbf16>
    %c0_98 = arith.constant 0 : index
    %c0_99 = arith.constant 0 : index
    %316 = vector.load %arg2[%c0_98, %c0_99] : memref<128x512xbf16, #tpu.memory_space<vmem>>, vector<128x512xbf16>
    %cst_100 = arith.constant dense<0.000000e+00> : vector<8x512xf32>
    %317 = tpu.matmul %315, %316, %cst_100 {dimension_numbers = #tpu.dot_dimension_numbers<[1], [0], [0], [1], [0, 0, 1, 1], [], []>} : vector<8x128xbf16>, vector<128x512xbf16>, vector<8x512xf32> -> vector<8x512xf32>
    %318 = arith.addf %314, %317 : vector<8x512xf32>
    %319 = vector.extract_strided_slice %318 {offsets = [0, 0], sizes = [8, 384], strides = [1, 1]} : vector<8x512xf32> to vector<8x384xf32>
    %320 = arith.negf %319 : vector<8x384xf32>
    %321 = math.exp %320 : vector<8x384xf32>
    %cst_101 = arith.constant 1.000000e+00 : f32
    %322 = vector.broadcast %cst_101 : f32 to vector<8x384xf32>
    %323 = arith.addf %322, %321 : vector<8x384xf32>
    %324 = arith.divf %322, %323 : vector<8x384xf32>
    %325 = vector.extract_strided_slice %324 {offsets = [0, 0], sizes = [8, 128], strides = [1, 1]} : vector<8x384xf32> to vector<8x128xf32>
    %326 = vector.extract_strided_slice %324 {offsets = [0, 128], sizes = [8, 128], strides = [1, 1]} : vector<8x384xf32> to vector<8x128xf32>
    %327 = vector.extract_strided_slice %324 {offsets = [0, 256], sizes = [8, 128], strides = [1, 1]} : vector<8x384xf32> to vector<8x128xf32>
    %328 = vector.extract_strided_slice %318 {offsets = [0, 384], sizes = [8, 128], strides = [1, 1]} : vector<8x512xf32> to vector<8x128xf32>
    %329 = math.tanh %328 : vector<8x128xf32>
    %330 = arith.mulf %326, %241 : vector<8x128xf32>
    %331 = arith.mulf %325, %329 : vector<8x128xf32>
    %332 = arith.addf %330, %331 : vector<8x128xf32>
    %333 = math.tanh %332 : vector<8x128xf32>
    %334 = arith.mulf %327, %333 : vector<8x128xf32>
    %335 = tpu.concatenate %289, %266 in 1 : vector<8x128xf32>, vector<8x128xf32> -> vector<8x256xf32>
    %336 = arith.truncf %335 : vector<8x256xf32> to vector<8x256xbf16>
    %c0_102 = arith.constant 0 : index
    %c0_103 = arith.constant 0 : index
    %337 = vector.load %arg8[%c0_102, %c0_103] : memref<256x512xbf16, #tpu.memory_space<vmem>>, vector<256x512xbf16>
    %cst_104 = arith.constant dense<0.000000e+00> : vector<8x512xf32>
    %338 = tpu.matmul %336, %337, %cst_104 {dimension_numbers = #tpu.dot_dimension_numbers<[1], [0], [0], [1], [0, 0, 1, 1], [], []>} : vector<8x256xbf16>, vector<256x512xbf16>, vector<8x512xf32> -> vector<8x512xf32>
    %c0_105 = arith.constant 0 : index
    %c0_106 = arith.constant 0 : index
    %339 = vector.load %arg9[%c0_105, %c0_106] : memref<1x512xf32, #tpu.memory_space<vmem>>, vector<1x512xf32>
    %340 = vector.broadcast %339 : vector<1x512xf32> to vector<8x512xf32>
    %341 = arith.addf %338, %340 : vector<8x512xf32>
    %342 = vector.extract_strided_slice %341 {offsets = [0, 0], sizes = [8, 384], strides = [1, 1]} : vector<8x512xf32> to vector<8x384xf32>
    %343 = arith.negf %342 : vector<8x384xf32>
    %344 = math.exp %343 : vector<8x384xf32>
    %cst_107 = arith.constant 1.000000e+00 : f32
    %345 = vector.broadcast %cst_107 : f32 to vector<8x384xf32>
    %346 = arith.addf %345, %344 : vector<8x384xf32>
    %347 = arith.divf %345, %346 : vector<8x384xf32>
    %348 = vector.extract_strided_slice %347 {offsets = [0, 0], sizes = [8, 128], strides = [1, 1]} : vector<8x384xf32> to vector<8x128xf32>
    %349 = vector.extract_strided_slice %347 {offsets = [0, 128], sizes = [8, 128], strides = [1, 1]} : vector<8x384xf32> to vector<8x128xf32>
    %350 = vector.extract_strided_slice %347 {offsets = [0, 256], sizes = [8, 128], strides = [1, 1]} : vector<8x384xf32> to vector<8x128xf32>
    %351 = vector.extract_strided_slice %341 {offsets = [0, 384], sizes = [8, 128], strides = [1, 1]} : vector<8x512xf32> to vector<8x128xf32>
    %352 = math.tanh %351 : vector<8x128xf32>
    %353 = arith.mulf %349, %264 : vector<8x128xf32>
    %354 = arith.mulf %348, %352 : vector<8x128xf32>
    %355 = arith.addf %353, %354 : vector<8x128xf32>
    %356 = math.tanh %355 : vector<8x128xf32>
    %357 = arith.mulf %350, %356 : vector<8x128xf32>
    %358 = tpu.concatenate %312, %289 in 1 : vector<8x128xf32>, vector<8x128xf32> -> vector<8x256xf32>
    %359 = arith.truncf %358 : vector<8x256xf32> to vector<8x256xbf16>
    %c0_108 = arith.constant 0 : index
    %c0_109 = arith.constant 0 : index
    %360 = vector.load %arg6[%c0_108, %c0_109] : memref<256x512xbf16, #tpu.memory_space<vmem>>, vector<256x512xbf16>
    %cst_110 = arith.constant dense<0.000000e+00> : vector<8x512xf32>
    %361 = tpu.matmul %359, %360, %cst_110 {dimension_numbers = #tpu.dot_dimension_numbers<[1], [0], [0], [1], [0, 0, 1, 1], [], []>} : vector<8x256xbf16>, vector<256x512xbf16>, vector<8x512xf32> -> vector<8x512xf32>
    %c0_111 = arith.constant 0 : index
    %c0_112 = arith.constant 0 : index
    %362 = vector.load %arg7[%c0_111, %c0_112] : memref<1x512xf32, #tpu.memory_space<vmem>>, vector<1x512xf32>
    %363 = vector.broadcast %362 : vector<1x512xf32> to vector<8x512xf32>
    %364 = arith.addf %361, %363 : vector<8x512xf32>
    %365 = vector.extract_strided_slice %364 {offsets = [0, 0], sizes = [8, 384], strides = [1, 1]} : vector<8x512xf32> to vector<8x384xf32>
    %366 = arith.negf %365 : vector<8x384xf32>
    %367 = math.exp %366 : vector<8x384xf32>
    %cst_113 = arith.constant 1.000000e+00 : f32
    %368 = vector.broadcast %cst_113 : f32 to vector<8x384xf32>
    %369 = arith.addf %368, %367 : vector<8x384xf32>
    %370 = arith.divf %368, %369 : vector<8x384xf32>
    %371 = vector.extract_strided_slice %370 {offsets = [0, 0], sizes = [8, 128], strides = [1, 1]} : vector<8x384xf32> to vector<8x128xf32>
    %372 = vector.extract_strided_slice %370 {offsets = [0, 128], sizes = [8, 128], strides = [1, 1]} : vector<8x384xf32> to vector<8x128xf32>
    %373 = vector.extract_strided_slice %370 {offsets = [0, 256], sizes = [8, 128], strides = [1, 1]} : vector<8x384xf32> to vector<8x128xf32>
    %374 = vector.extract_strided_slice %364 {offsets = [0, 384], sizes = [8, 128], strides = [1, 1]} : vector<8x512xf32> to vector<8x128xf32>
    %375 = math.tanh %374 : vector<8x128xf32>
    %376 = arith.mulf %372, %287 : vector<8x128xf32>
    %377 = arith.mulf %371, %375 : vector<8x128xf32>
    %378 = arith.addf %376, %377 : vector<8x128xf32>
    %379 = math.tanh %378 : vector<8x128xf32>
    %380 = arith.mulf %373, %379 : vector<8x128xf32>
    %381 = tpu.concatenate %334, %312 in 1 : vector<8x128xf32>, vector<8x128xf32> -> vector<8x256xf32>
    %382 = arith.truncf %381 : vector<8x256xf32> to vector<8x256xbf16>
    %c0_114 = arith.constant 0 : index
    %c0_115 = arith.constant 0 : index
    %383 = vector.load %arg4[%c0_114, %c0_115] : memref<256x512xbf16, #tpu.memory_space<vmem>>, vector<256x512xbf16>
    %cst_116 = arith.constant dense<0.000000e+00> : vector<8x512xf32>
    %384 = tpu.matmul %382, %383, %cst_116 {dimension_numbers = #tpu.dot_dimension_numbers<[1], [0], [0], [1], [0, 0, 1, 1], [], []>} : vector<8x256xbf16>, vector<256x512xbf16>, vector<8x512xf32> -> vector<8x512xf32>
    %c0_117 = arith.constant 0 : index
    %c0_118 = arith.constant 0 : index
    %385 = vector.load %arg5[%c0_117, %c0_118] : memref<1x512xf32, #tpu.memory_space<vmem>>, vector<1x512xf32>
    %386 = vector.broadcast %385 : vector<1x512xf32> to vector<8x512xf32>
    %387 = arith.addf %384, %386 : vector<8x512xf32>
    %388 = vector.extract_strided_slice %387 {offsets = [0, 0], sizes = [8, 384], strides = [1, 1]} : vector<8x512xf32> to vector<8x384xf32>
    %389 = arith.negf %388 : vector<8x384xf32>
    %390 = math.exp %389 : vector<8x384xf32>
    %cst_119 = arith.constant 1.000000e+00 : f32
    %391 = vector.broadcast %cst_119 : f32 to vector<8x384xf32>
    %392 = arith.addf %391, %390 : vector<8x384xf32>
    %393 = arith.divf %391, %392 : vector<8x384xf32>
    %394 = vector.extract_strided_slice %393 {offsets = [0, 0], sizes = [8, 128], strides = [1, 1]} : vector<8x384xf32> to vector<8x128xf32>
    %395 = vector.extract_strided_slice %393 {offsets = [0, 128], sizes = [8, 128], strides = [1, 1]} : vector<8x384xf32> to vector<8x128xf32>
    %396 = vector.extract_strided_slice %393 {offsets = [0, 256], sizes = [8, 128], strides = [1, 1]} : vector<8x384xf32> to vector<8x128xf32>
    %397 = vector.extract_strided_slice %387 {offsets = [0, 384], sizes = [8, 128], strides = [1, 1]} : vector<8x512xf32> to vector<8x128xf32>
    %398 = math.tanh %397 : vector<8x128xf32>
    %399 = arith.mulf %395, %310 : vector<8x128xf32>
    %400 = arith.mulf %394, %398 : vector<8x128xf32>
    %401 = arith.addf %399, %400 : vector<8x128xf32>
    %402 = math.tanh %401 : vector<8x128xf32>
    %403 = arith.mulf %396, %402 : vector<8x128xf32>
    %c5 = arith.constant 5 : index
    %c0_120 = arith.constant 0 : index
    %c0_121 = arith.constant 0 : index
    %404 = vector.load %arg13[%c5, %c0_120, %c0_121] : memref<8x8x512xf32, #tpu.memory_space<vmem>>, vector<1x8x512xf32>
    %405 = vector.shape_cast %404 : vector<1x8x512xf32> to vector<8x512xf32>
    %406 = arith.truncf %334 : vector<8x128xf32> to vector<8x128xbf16>
    %c0_122 = arith.constant 0 : index
    %c0_123 = arith.constant 0 : index
    %407 = vector.load %arg2[%c0_122, %c0_123] : memref<128x512xbf16, #tpu.memory_space<vmem>>, vector<128x512xbf16>
    %cst_124 = arith.constant dense<0.000000e+00> : vector<8x512xf32>
    %408 = tpu.matmul %406, %407, %cst_124 {dimension_numbers = #tpu.dot_dimension_numbers<[1], [0], [0], [1], [0, 0, 1, 1], [], []>} : vector<8x128xbf16>, vector<128x512xbf16>, vector<8x512xf32> -> vector<8x512xf32>
    %409 = arith.addf %405, %408 : vector<8x512xf32>
    %410 = vector.extract_strided_slice %409 {offsets = [0, 0], sizes = [8, 384], strides = [1, 1]} : vector<8x512xf32> to vector<8x384xf32>
    %411 = arith.negf %410 : vector<8x384xf32>
    %412 = math.exp %411 : vector<8x384xf32>
    %cst_125 = arith.constant 1.000000e+00 : f32
    %413 = vector.broadcast %cst_125 : f32 to vector<8x384xf32>
    %414 = arith.addf %413, %412 : vector<8x384xf32>
    %415 = arith.divf %413, %414 : vector<8x384xf32>
    %416 = vector.extract_strided_slice %415 {offsets = [0, 0], sizes = [8, 128], strides = [1, 1]} : vector<8x384xf32> to vector<8x128xf32>
    %417 = vector.extract_strided_slice %415 {offsets = [0, 128], sizes = [8, 128], strides = [1, 1]} : vector<8x384xf32> to vector<8x128xf32>
    %418 = vector.extract_strided_slice %415 {offsets = [0, 256], sizes = [8, 128], strides = [1, 1]} : vector<8x384xf32> to vector<8x128xf32>
    %419 = vector.extract_strided_slice %409 {offsets = [0, 384], sizes = [8, 128], strides = [1, 1]} : vector<8x512xf32> to vector<8x128xf32>
    %420 = math.tanh %419 : vector<8x128xf32>
    %421 = arith.mulf %417, %332 : vector<8x128xf32>
    %422 = arith.mulf %416, %420 : vector<8x128xf32>
    %423 = arith.addf %421, %422 : vector<8x128xf32>
    %424 = math.tanh %423 : vector<8x128xf32>
    %425 = arith.mulf %418, %424 : vector<8x128xf32>
    %426 = tpu.concatenate %380, %357 in 1 : vector<8x128xf32>, vector<8x128xf32> -> vector<8x256xf32>
    %427 = arith.truncf %426 : vector<8x256xf32> to vector<8x256xbf16>
    %c0_126 = arith.constant 0 : index
    %c0_127 = arith.constant 0 : index
    %428 = vector.load %arg8[%c0_126, %c0_127] : memref<256x512xbf16, #tpu.memory_space<vmem>>, vector<256x512xbf16>
    %cst_128 = arith.constant dense<0.000000e+00> : vector<8x512xf32>
    %429 = tpu.matmul %427, %428, %cst_128 {dimension_numbers = #tpu.dot_dimension_numbers<[1], [0], [0], [1], [0, 0, 1, 1], [], []>} : vector<8x256xbf16>, vector<256x512xbf16>, vector<8x512xf32> -> vector<8x512xf32>
    %c0_129 = arith.constant 0 : index
    %c0_130 = arith.constant 0 : index
    %430 = vector.load %arg9[%c0_129, %c0_130] : memref<1x512xf32, #tpu.memory_space<vmem>>, vector<1x512xf32>
    %431 = vector.broadcast %430 : vector<1x512xf32> to vector<8x512xf32>
    %432 = arith.addf %429, %431 : vector<8x512xf32>
    %433 = vector.extract_strided_slice %432 {offsets = [0, 0], sizes = [8, 384], strides = [1, 1]} : vector<8x512xf32> to vector<8x384xf32>
    %434 = arith.negf %433 : vector<8x384xf32>
    %435 = math.exp %434 : vector<8x384xf32>
    %cst_131 = arith.constant 1.000000e+00 : f32
    %436 = vector.broadcast %cst_131 : f32 to vector<8x384xf32>
    %437 = arith.addf %436, %435 : vector<8x384xf32>
    %438 = arith.divf %436, %437 : vector<8x384xf32>
    %439 = vector.extract_strided_slice %438 {offsets = [0, 0], sizes = [8, 128], strides = [1, 1]} : vector<8x384xf32> to vector<8x128xf32>
    %440 = vector.extract_strided_slice %438 {offsets = [0, 128], sizes = [8, 128], strides = [1, 1]} : vector<8x384xf32> to vector<8x128xf32>
    %441 = vector.extract_strided_slice %438 {offsets = [0, 256], sizes = [8, 128], strides = [1, 1]} : vector<8x384xf32> to vector<8x128xf32>
    %442 = vector.extract_strided_slice %432 {offsets = [0, 384], sizes = [8, 128], strides = [1, 1]} : vector<8x512xf32> to vector<8x128xf32>
    %443 = math.tanh %442 : vector<8x128xf32>
    %444 = arith.mulf %440, %355 : vector<8x128xf32>
    %445 = arith.mulf %439, %443 : vector<8x128xf32>
    %446 = arith.addf %444, %445 : vector<8x128xf32>
    %447 = math.tanh %446 : vector<8x128xf32>
    %448 = arith.mulf %441, %447 : vector<8x128xf32>
    %449 = tpu.concatenate %403, %380 in 1 : vector<8x128xf32>, vector<8x128xf32> -> vector<8x256xf32>
    %450 = arith.truncf %449 : vector<8x256xf32> to vector<8x256xbf16>
    %c0_132 = arith.constant 0 : index
    %c0_133 = arith.constant 0 : index
    %451 = vector.load %arg6[%c0_132, %c0_133] : memref<256x512xbf16, #tpu.memory_space<vmem>>, vector<256x512xbf16>
    %cst_134 = arith.constant dense<0.000000e+00> : vector<8x512xf32>
    %452 = tpu.matmul %450, %451, %cst_134 {dimension_numbers = #tpu.dot_dimension_numbers<[1], [0], [0], [1], [0, 0, 1, 1], [], []>} : vector<8x256xbf16>, vector<256x512xbf16>, vector<8x512xf32> -> vector<8x512xf32>
    %c0_135 = arith.constant 0 : index
    %c0_136 = arith.constant 0 : index
    %453 = vector.load %arg7[%c0_135, %c0_136] : memref<1x512xf32, #tpu.memory_space<vmem>>, vector<1x512xf32>
    %454 = vector.broadcast %453 : vector<1x512xf32> to vector<8x512xf32>
    %455 = arith.addf %452, %454 : vector<8x512xf32>
    %456 = vector.extract_strided_slice %455 {offsets = [0, 0], sizes = [8, 384], strides = [1, 1]} : vector<8x512xf32> to vector<8x384xf32>
    %457 = arith.negf %456 : vector<8x384xf32>
    %458 = math.exp %457 : vector<8x384xf32>
    %cst_137 = arith.constant 1.000000e+00 : f32
    %459 = vector.broadcast %cst_137 : f32 to vector<8x384xf32>
    %460 = arith.addf %459, %458 : vector<8x384xf32>
    %461 = arith.divf %459, %460 : vector<8x384xf32>
    %462 = vector.extract_strided_slice %461 {offsets = [0, 0], sizes = [8, 128], strides = [1, 1]} : vector<8x384xf32> to vector<8x128xf32>
    %463 = vector.extract_strided_slice %461 {offsets = [0, 128], sizes = [8, 128], strides = [1, 1]} : vector<8x384xf32> to vector<8x128xf32>
    %464 = vector.extract_strided_slice %461 {offsets = [0, 256], sizes = [8, 128], strides = [1, 1]} : vector<8x384xf32> to vector<8x128xf32>
    %465 = vector.extract_strided_slice %455 {offsets = [0, 384], sizes = [8, 128], strides = [1, 1]} : vector<8x512xf32> to vector<8x128xf32>
    %466 = math.tanh %465 : vector<8x128xf32>
    %467 = arith.mulf %463, %378 : vector<8x128xf32>
    %468 = arith.mulf %462, %466 : vector<8x128xf32>
    %469 = arith.addf %467, %468 : vector<8x128xf32>
    %470 = math.tanh %469 : vector<8x128xf32>
    %471 = arith.mulf %464, %470 : vector<8x128xf32>
    %472 = tpu.concatenate %425, %403 in 1 : vector<8x128xf32>, vector<8x128xf32> -> vector<8x256xf32>
    %473 = arith.truncf %472 : vector<8x256xf32> to vector<8x256xbf16>
    %c0_138 = arith.constant 0 : index
    %c0_139 = arith.constant 0 : index
    %474 = vector.load %arg4[%c0_138, %c0_139] : memref<256x512xbf16, #tpu.memory_space<vmem>>, vector<256x512xbf16>
    %cst_140 = arith.constant dense<0.000000e+00> : vector<8x512xf32>
    %475 = tpu.matmul %473, %474, %cst_140 {dimension_numbers = #tpu.dot_dimension_numbers<[1], [0], [0], [1], [0, 0, 1, 1], [], []>} : vector<8x256xbf16>, vector<256x512xbf16>, vector<8x512xf32> -> vector<8x512xf32>
    %c0_141 = arith.constant 0 : index
    %c0_142 = arith.constant 0 : index
    %476 = vector.load %arg5[%c0_141, %c0_142] : memref<1x512xf32, #tpu.memory_space<vmem>>, vector<1x512xf32>
    %477 = vector.broadcast %476 : vector<1x512xf32> to vector<8x512xf32>
    %478 = arith.addf %475, %477 : vector<8x512xf32>
    %479 = vector.extract_strided_slice %478 {offsets = [0, 0], sizes = [8, 384], strides = [1, 1]} : vector<8x512xf32> to vector<8x384xf32>
    %480 = arith.negf %479 : vector<8x384xf32>
    %481 = math.exp %480 : vector<8x384xf32>
    %cst_143 = arith.constant 1.000000e+00 : f32
    %482 = vector.broadcast %cst_143 : f32 to vector<8x384xf32>
    %483 = arith.addf %482, %481 : vector<8x384xf32>
    %484 = arith.divf %482, %483 : vector<8x384xf32>
    %485 = vector.extract_strided_slice %484 {offsets = [0, 0], sizes = [8, 128], strides = [1, 1]} : vector<8x384xf32> to vector<8x128xf32>
    %486 = vector.extract_strided_slice %484 {offsets = [0, 128], sizes = [8, 128], strides = [1, 1]} : vector<8x384xf32> to vector<8x128xf32>
    %487 = vector.extract_strided_slice %484 {offsets = [0, 256], sizes = [8, 128], strides = [1, 1]} : vector<8x384xf32> to vector<8x128xf32>
    %488 = vector.extract_strided_slice %478 {offsets = [0, 384], sizes = [8, 128], strides = [1, 1]} : vector<8x512xf32> to vector<8x128xf32>
    %489 = math.tanh %488 : vector<8x128xf32>
    %490 = arith.mulf %486, %401 : vector<8x128xf32>
    %491 = arith.mulf %485, %489 : vector<8x128xf32>
    %492 = arith.addf %490, %491 : vector<8x128xf32>
    %493 = math.tanh %492 : vector<8x128xf32>
    %494 = arith.mulf %487, %493 : vector<8x128xf32>
    %c6 = arith.constant 6 : index
    %c0_144 = arith.constant 0 : index
    %c0_145 = arith.constant 0 : index
    %495 = vector.load %arg13[%c6, %c0_144, %c0_145] : memref<8x8x512xf32, #tpu.memory_space<vmem>>, vector<1x8x512xf32>
    %496 = vector.shape_cast %495 : vector<1x8x512xf32> to vector<8x512xf32>
    %497 = arith.truncf %425 : vector<8x128xf32> to vector<8x128xbf16>
    %c0_146 = arith.constant 0 : index
    %c0_147 = arith.constant 0 : index
    %498 = vector.load %arg2[%c0_146, %c0_147] : memref<128x512xbf16, #tpu.memory_space<vmem>>, vector<128x512xbf16>
    %cst_148 = arith.constant dense<0.000000e+00> : vector<8x512xf32>
    %499 = tpu.matmul %497, %498, %cst_148 {dimension_numbers = #tpu.dot_dimension_numbers<[1], [0], [0], [1], [0, 0, 1, 1], [], []>} : vector<8x128xbf16>, vector<128x512xbf16>, vector<8x512xf32> -> vector<8x512xf32>
    %500 = arith.addf %496, %499 : vector<8x512xf32>
    %501 = vector.extract_strided_slice %500 {offsets = [0, 0], sizes = [8, 384], strides = [1, 1]} : vector<8x512xf32> to vector<8x384xf32>
    %502 = arith.negf %501 : vector<8x384xf32>
    %503 = math.exp %502 : vector<8x384xf32>
    %cst_149 = arith.constant 1.000000e+00 : f32
    %504 = vector.broadcast %cst_149 : f32 to vector<8x384xf32>
    %505 = arith.addf %504, %503 : vector<8x384xf32>
    %506 = arith.divf %504, %505 : vector<8x384xf32>
    %507 = vector.extract_strided_slice %506 {offsets = [0, 0], sizes = [8, 128], strides = [1, 1]} : vector<8x384xf32> to vector<8x128xf32>
    %508 = vector.extract_strided_slice %506 {offsets = [0, 128], sizes = [8, 128], strides = [1, 1]} : vector<8x384xf32> to vector<8x128xf32>
    %509 = vector.extract_strided_slice %506 {offsets = [0, 256], sizes = [8, 128], strides = [1, 1]} : vector<8x384xf32> to vector<8x128xf32>
    %510 = vector.extract_strided_slice %500 {offsets = [0, 384], sizes = [8, 128], strides = [1, 1]} : vector<8x512xf32> to vector<8x128xf32>
    %511 = math.tanh %510 : vector<8x128xf32>
    %512 = arith.mulf %508, %423 : vector<8x128xf32>
    %513 = arith.mulf %507, %511 : vector<8x128xf32>
    %514 = arith.addf %512, %513 : vector<8x128xf32>
    %515 = math.tanh %514 : vector<8x128xf32>
    %516 = arith.mulf %509, %515 : vector<8x128xf32>
    %517 = tpu.concatenate %471, %448 in 1 : vector<8x128xf32>, vector<8x128xf32> -> vector<8x256xf32>
    %518 = arith.truncf %517 : vector<8x256xf32> to vector<8x256xbf16>
    %c0_150 = arith.constant 0 : index
    %c0_151 = arith.constant 0 : index
    %519 = vector.load %arg8[%c0_150, %c0_151] : memref<256x512xbf16, #tpu.memory_space<vmem>>, vector<256x512xbf16>
    %cst_152 = arith.constant dense<0.000000e+00> : vector<8x512xf32>
    %520 = tpu.matmul %518, %519, %cst_152 {dimension_numbers = #tpu.dot_dimension_numbers<[1], [0], [0], [1], [0, 0, 1, 1], [], []>} : vector<8x256xbf16>, vector<256x512xbf16>, vector<8x512xf32> -> vector<8x512xf32>
    %c0_153 = arith.constant 0 : index
    %c0_154 = arith.constant 0 : index
    %521 = vector.load %arg9[%c0_153, %c0_154] : memref<1x512xf32, #tpu.memory_space<vmem>>, vector<1x512xf32>
    %522 = vector.broadcast %521 : vector<1x512xf32> to vector<8x512xf32>
    %523 = arith.addf %520, %522 : vector<8x512xf32>
    %524 = vector.extract_strided_slice %523 {offsets = [0, 0], sizes = [8, 384], strides = [1, 1]} : vector<8x512xf32> to vector<8x384xf32>
    %525 = arith.negf %524 : vector<8x384xf32>
    %526 = math.exp %525 : vector<8x384xf32>
    %cst_155 = arith.constant 1.000000e+00 : f32
    %527 = vector.broadcast %cst_155 : f32 to vector<8x384xf32>
    %528 = arith.addf %527, %526 : vector<8x384xf32>
    %529 = arith.divf %527, %528 : vector<8x384xf32>
    %530 = vector.extract_strided_slice %529 {offsets = [0, 0], sizes = [8, 128], strides = [1, 1]} : vector<8x384xf32> to vector<8x128xf32>
    %531 = vector.extract_strided_slice %529 {offsets = [0, 128], sizes = [8, 128], strides = [1, 1]} : vector<8x384xf32> to vector<8x128xf32>
    %532 = vector.extract_strided_slice %529 {offsets = [0, 256], sizes = [8, 128], strides = [1, 1]} : vector<8x384xf32> to vector<8x128xf32>
    %533 = vector.extract_strided_slice %523 {offsets = [0, 384], sizes = [8, 128], strides = [1, 1]} : vector<8x512xf32> to vector<8x128xf32>
    %534 = math.tanh %533 : vector<8x128xf32>
    %535 = arith.mulf %531, %446 : vector<8x128xf32>
    %536 = arith.mulf %530, %534 : vector<8x128xf32>
    %537 = arith.addf %535, %536 : vector<8x128xf32>
    %538 = math.tanh %537 : vector<8x128xf32>
    %539 = arith.mulf %532, %538 : vector<8x128xf32>
    %540 = tpu.concatenate %494, %471 in 1 : vector<8x128xf32>, vector<8x128xf32> -> vector<8x256xf32>
    %541 = arith.truncf %540 : vector<8x256xf32> to vector<8x256xbf16>
    %c0_156 = arith.constant 0 : index
    %c0_157 = arith.constant 0 : index
    %542 = vector.load %arg6[%c0_156, %c0_157] : memref<256x512xbf16, #tpu.memory_space<vmem>>, vector<256x512xbf16>
    %cst_158 = arith.constant dense<0.000000e+00> : vector<8x512xf32>
    %543 = tpu.matmul %541, %542, %cst_158 {dimension_numbers = #tpu.dot_dimension_numbers<[1], [0], [0], [1], [0, 0, 1, 1], [], []>} : vector<8x256xbf16>, vector<256x512xbf16>, vector<8x512xf32> -> vector<8x512xf32>
    %c0_159 = arith.constant 0 : index
    %c0_160 = arith.constant 0 : index
    %544 = vector.load %arg7[%c0_159, %c0_160] : memref<1x512xf32, #tpu.memory_space<vmem>>, vector<1x512xf32>
    %545 = vector.broadcast %544 : vector<1x512xf32> to vector<8x512xf32>
    %546 = arith.addf %543, %545 : vector<8x512xf32>
    %547 = vector.extract_strided_slice %546 {offsets = [0, 0], sizes = [8, 384], strides = [1, 1]} : vector<8x512xf32> to vector<8x384xf32>
    %548 = arith.negf %547 : vector<8x384xf32>
    %549 = math.exp %548 : vector<8x384xf32>
    %cst_161 = arith.constant 1.000000e+00 : f32
    %550 = vector.broadcast %cst_161 : f32 to vector<8x384xf32>
    %551 = arith.addf %550, %549 : vector<8x384xf32>
    %552 = arith.divf %550, %551 : vector<8x384xf32>
    %553 = vector.extract_strided_slice %552 {offsets = [0, 0], sizes = [8, 128], strides = [1, 1]} : vector<8x384xf32> to vector<8x128xf32>
    %554 = vector.extract_strided_slice %552 {offsets = [0, 128], sizes = [8, 128], strides = [1, 1]} : vector<8x384xf32> to vector<8x128xf32>
    %555 = vector.extract_strided_slice %552 {offsets = [0, 256], sizes = [8, 128], strides = [1, 1]} : vector<8x384xf32> to vector<8x128xf32>
    %556 = vector.extract_strided_slice %546 {offsets = [0, 384], sizes = [8, 128], strides = [1, 1]} : vector<8x512xf32> to vector<8x128xf32>
    %557 = math.tanh %556 : vector<8x128xf32>
    %558 = arith.mulf %554, %469 : vector<8x128xf32>
    %559 = arith.mulf %553, %557 : vector<8x128xf32>
    %560 = arith.addf %558, %559 : vector<8x128xf32>
    %561 = math.tanh %560 : vector<8x128xf32>
    %562 = arith.mulf %555, %561 : vector<8x128xf32>
    %563 = tpu.concatenate %516, %494 in 1 : vector<8x128xf32>, vector<8x128xf32> -> vector<8x256xf32>
    %564 = arith.truncf %563 : vector<8x256xf32> to vector<8x256xbf16>
    %c0_162 = arith.constant 0 : index
    %c0_163 = arith.constant 0 : index
    %565 = vector.load %arg4[%c0_162, %c0_163] : memref<256x512xbf16, #tpu.memory_space<vmem>>, vector<256x512xbf16>
    %cst_164 = arith.constant dense<0.000000e+00> : vector<8x512xf32>
    %566 = tpu.matmul %564, %565, %cst_164 {dimension_numbers = #tpu.dot_dimension_numbers<[1], [0], [0], [1], [0, 0, 1, 1], [], []>} : vector<8x256xbf16>, vector<256x512xbf16>, vector<8x512xf32> -> vector<8x512xf32>
    %c0_165 = arith.constant 0 : index
    %c0_166 = arith.constant 0 : index
    %567 = vector.load %arg5[%c0_165, %c0_166] : memref<1x512xf32, #tpu.memory_space<vmem>>, vector<1x512xf32>
    %568 = vector.broadcast %567 : vector<1x512xf32> to vector<8x512xf32>
    %569 = arith.addf %566, %568 : vector<8x512xf32>
    %570 = vector.extract_strided_slice %569 {offsets = [0, 0], sizes = [8, 384], strides = [1, 1]} : vector<8x512xf32> to vector<8x384xf32>
    %571 = arith.negf %570 : vector<8x384xf32>
    %572 = math.exp %571 : vector<8x384xf32>
    %cst_167 = arith.constant 1.000000e+00 : f32
    %573 = vector.broadcast %cst_167 : f32 to vector<8x384xf32>
    %574 = arith.addf %573, %572 : vector<8x384xf32>
    %575 = arith.divf %573, %574 : vector<8x384xf32>
    %576 = vector.extract_strided_slice %575 {offsets = [0, 0], sizes = [8, 128], strides = [1, 1]} : vector<8x384xf32> to vector<8x128xf32>
    %577 = vector.extract_strided_slice %575 {offsets = [0, 128], sizes = [8, 128], strides = [1, 1]} : vector<8x384xf32> to vector<8x128xf32>
    %578 = vector.extract_strided_slice %575 {offsets = [0, 256], sizes = [8, 128], strides = [1, 1]} : vector<8x384xf32> to vector<8x128xf32>
    %579 = vector.extract_strided_slice %569 {offsets = [0, 384], sizes = [8, 128], strides = [1, 1]} : vector<8x512xf32> to vector<8x128xf32>
    %580 = math.tanh %579 : vector<8x128xf32>
    %581 = arith.mulf %577, %492 : vector<8x128xf32>
    %582 = arith.mulf %576, %580 : vector<8x128xf32>
    %583 = arith.addf %581, %582 : vector<8x128xf32>
    %584 = math.tanh %583 : vector<8x128xf32>
    %585 = arith.mulf %578, %584 : vector<8x128xf32>
    %c7 = arith.constant 7 : index
    %c0_168 = arith.constant 0 : index
    %c0_169 = arith.constant 0 : index
    %586 = vector.load %arg13[%c7, %c0_168, %c0_169] : memref<8x8x512xf32, #tpu.memory_space<vmem>>, vector<1x8x512xf32>
    %587 = vector.shape_cast %586 : vector<1x8x512xf32> to vector<8x512xf32>
    %588 = arith.truncf %516 : vector<8x128xf32> to vector<8x128xbf16>
    %c0_170 = arith.constant 0 : index
    %c0_171 = arith.constant 0 : index
    %589 = vector.load %arg2[%c0_170, %c0_171] : memref<128x512xbf16, #tpu.memory_space<vmem>>, vector<128x512xbf16>
    %cst_172 = arith.constant dense<0.000000e+00> : vector<8x512xf32>
    %590 = tpu.matmul %588, %589, %cst_172 {dimension_numbers = #tpu.dot_dimension_numbers<[1], [0], [0], [1], [0, 0, 1, 1], [], []>} : vector<8x128xbf16>, vector<128x512xbf16>, vector<8x512xf32> -> vector<8x512xf32>
    %591 = arith.addf %587, %590 : vector<8x512xf32>
    %592 = vector.extract_strided_slice %591 {offsets = [0, 0], sizes = [8, 384], strides = [1, 1]} : vector<8x512xf32> to vector<8x384xf32>
    %593 = arith.negf %592 : vector<8x384xf32>
    %594 = math.exp %593 : vector<8x384xf32>
    %cst_173 = arith.constant 1.000000e+00 : f32
    %595 = vector.broadcast %cst_173 : f32 to vector<8x384xf32>
    %596 = arith.addf %595, %594 : vector<8x384xf32>
    %597 = arith.divf %595, %596 : vector<8x384xf32>
    %598 = vector.extract_strided_slice %597 {offsets = [0, 0], sizes = [8, 128], strides = [1, 1]} : vector<8x384xf32> to vector<8x128xf32>
    %599 = vector.extract_strided_slice %597 {offsets = [0, 128], sizes = [8, 128], strides = [1, 1]} : vector<8x384xf32> to vector<8x128xf32>
    %600 = vector.extract_strided_slice %597 {offsets = [0, 256], sizes = [8, 128], strides = [1, 1]} : vector<8x384xf32> to vector<8x128xf32>
    %601 = vector.extract_strided_slice %591 {offsets = [0, 384], sizes = [8, 128], strides = [1, 1]} : vector<8x512xf32> to vector<8x128xf32>
    %602 = math.tanh %601 : vector<8x128xf32>
    %603 = arith.mulf %599, %514 : vector<8x128xf32>
    %604 = arith.mulf %598, %602 : vector<8x128xf32>
    %605 = arith.addf %603, %604 : vector<8x128xf32>
    %606 = math.tanh %605 : vector<8x128xf32>
    %607 = arith.mulf %600, %606 : vector<8x128xf32>
    %608 = tpu.concatenate %562, %539 in 1 : vector<8x128xf32>, vector<8x128xf32> -> vector<8x256xf32>
    %609 = arith.truncf %608 : vector<8x256xf32> to vector<8x256xbf16>
    %c0_174 = arith.constant 0 : index
    %c0_175 = arith.constant 0 : index
    %610 = vector.load %arg8[%c0_174, %c0_175] : memref<256x512xbf16, #tpu.memory_space<vmem>>, vector<256x512xbf16>
    %cst_176 = arith.constant dense<0.000000e+00> : vector<8x512xf32>
    %611 = tpu.matmul %609, %610, %cst_176 {dimension_numbers = #tpu.dot_dimension_numbers<[1], [0], [0], [1], [0, 0, 1, 1], [], []>} : vector<8x256xbf16>, vector<256x512xbf16>, vector<8x512xf32> -> vector<8x512xf32>
    %c0_177 = arith.constant 0 : index
    %c0_178 = arith.constant 0 : index
    %612 = vector.load %arg9[%c0_177, %c0_178] : memref<1x512xf32, #tpu.memory_space<vmem>>, vector<1x512xf32>
    %613 = vector.broadcast %612 : vector<1x512xf32> to vector<8x512xf32>
    %614 = arith.addf %611, %613 : vector<8x512xf32>
    %615 = vector.extract_strided_slice %614 {offsets = [0, 0], sizes = [8, 384], strides = [1, 1]} : vector<8x512xf32> to vector<8x384xf32>
    %616 = arith.negf %615 : vector<8x384xf32>
    %617 = math.exp %616 : vector<8x384xf32>
    %cst_179 = arith.constant 1.000000e+00 : f32
    %618 = vector.broadcast %cst_179 : f32 to vector<8x384xf32>
    %619 = arith.addf %618, %617 : vector<8x384xf32>
    %620 = arith.divf %618, %619 : vector<8x384xf32>
    %621 = vector.extract_strided_slice %620 {offsets = [0, 0], sizes = [8, 128], strides = [1, 1]} : vector<8x384xf32> to vector<8x128xf32>
    %622 = vector.extract_strided_slice %620 {offsets = [0, 128], sizes = [8, 128], strides = [1, 1]} : vector<8x384xf32> to vector<8x128xf32>
    %623 = vector.extract_strided_slice %620 {offsets = [0, 256], sizes = [8, 128], strides = [1, 1]} : vector<8x384xf32> to vector<8x128xf32>
    %624 = vector.extract_strided_slice %614 {offsets = [0, 384], sizes = [8, 128], strides = [1, 1]} : vector<8x512xf32> to vector<8x128xf32>
    %625 = math.tanh %624 : vector<8x128xf32>
    %626 = arith.mulf %622, %537 : vector<8x128xf32>
    %627 = arith.mulf %621, %625 : vector<8x128xf32>
    %628 = arith.addf %626, %627 : vector<8x128xf32>
    %629 = math.tanh %628 : vector<8x128xf32>
    %630 = arith.mulf %623, %629 : vector<8x128xf32>
    %631 = tpu.concatenate %585, %562 in 1 : vector<8x128xf32>, vector<8x128xf32> -> vector<8x256xf32>
    %632 = arith.truncf %631 : vector<8x256xf32> to vector<8x256xbf16>
    %c0_180 = arith.constant 0 : index
    %c0_181 = arith.constant 0 : index
    %633 = vector.load %arg6[%c0_180, %c0_181] : memref<256x512xbf16, #tpu.memory_space<vmem>>, vector<256x512xbf16>
    %cst_182 = arith.constant dense<0.000000e+00> : vector<8x512xf32>
    %634 = tpu.matmul %632, %633, %cst_182 {dimension_numbers = #tpu.dot_dimension_numbers<[1], [0], [0], [1], [0, 0, 1, 1], [], []>} : vector<8x256xbf16>, vector<256x512xbf16>, vector<8x512xf32> -> vector<8x512xf32>
    %c0_183 = arith.constant 0 : index
    %c0_184 = arith.constant 0 : index
    %635 = vector.load %arg7[%c0_183, %c0_184] : memref<1x512xf32, #tpu.memory_space<vmem>>, vector<1x512xf32>
    %636 = vector.broadcast %635 : vector<1x512xf32> to vector<8x512xf32>
    %637 = arith.addf %634, %636 : vector<8x512xf32>
    %638 = vector.extract_strided_slice %637 {offsets = [0, 0], sizes = [8, 384], strides = [1, 1]} : vector<8x512xf32> to vector<8x384xf32>
    %639 = arith.negf %638 : vector<8x384xf32>
    %640 = math.exp %639 : vector<8x384xf32>
    %cst_185 = arith.constant 1.000000e+00 : f32
    %641 = vector.broadcast %cst_185 : f32 to vector<8x384xf32>
    %642 = arith.addf %641, %640 : vector<8x384xf32>
    %643 = arith.divf %641, %642 : vector<8x384xf32>
    %644 = vector.extract_strided_slice %643 {offsets = [0, 0], sizes = [8, 128], strides = [1, 1]} : vector<8x384xf32> to vector<8x128xf32>
    %645 = vector.extract_strided_slice %643 {offsets = [0, 128], sizes = [8, 128], strides = [1, 1]} : vector<8x384xf32> to vector<8x128xf32>
    %646 = vector.extract_strided_slice %643 {offsets = [0, 256], sizes = [8, 128], strides = [1, 1]} : vector<8x384xf32> to vector<8x128xf32>
    %647 = vector.extract_strided_slice %637 {offsets = [0, 384], sizes = [8, 128], strides = [1, 1]} : vector<8x512xf32> to vector<8x128xf32>
    %648 = math.tanh %647 : vector<8x128xf32>
    %649 = arith.mulf %645, %560 : vector<8x128xf32>
    %650 = arith.mulf %644, %648 : vector<8x128xf32>
    %651 = arith.addf %649, %650 : vector<8x128xf32>
    %652 = math.tanh %651 : vector<8x128xf32>
    %653 = arith.mulf %646, %652 : vector<8x128xf32>
    %654 = tpu.concatenate %607, %585 in 1 : vector<8x128xf32>, vector<8x128xf32> -> vector<8x256xf32>
    %655 = arith.truncf %654 : vector<8x256xf32> to vector<8x256xbf16>
    %c0_186 = arith.constant 0 : index
    %c0_187 = arith.constant 0 : index
    %656 = vector.load %arg4[%c0_186, %c0_187] : memref<256x512xbf16, #tpu.memory_space<vmem>>, vector<256x512xbf16>
    %cst_188 = arith.constant dense<0.000000e+00> : vector<8x512xf32>
    %657 = tpu.matmul %655, %656, %cst_188 {dimension_numbers = #tpu.dot_dimension_numbers<[1], [0], [0], [1], [0, 0, 1, 1], [], []>} : vector<8x256xbf16>, vector<256x512xbf16>, vector<8x512xf32> -> vector<8x512xf32>
    %c0_189 = arith.constant 0 : index
    %c0_190 = arith.constant 0 : index
    %658 = vector.load %arg5[%c0_189, %c0_190] : memref<1x512xf32, #tpu.memory_space<vmem>>, vector<1x512xf32>
    %659 = vector.broadcast %658 : vector<1x512xf32> to vector<8x512xf32>
    %660 = arith.addf %657, %659 : vector<8x512xf32>
    %661 = vector.extract_strided_slice %660 {offsets = [0, 0], sizes = [8, 384], strides = [1, 1]} : vector<8x512xf32> to vector<8x384xf32>
    %662 = arith.negf %661 : vector<8x384xf32>
    %663 = math.exp %662 : vector<8x384xf32>
    %cst_191 = arith.constant 1.000000e+00 : f32
    %664 = vector.broadcast %cst_191 : f32 to vector<8x384xf32>
    %665 = arith.addf %664, %663 : vector<8x384xf32>
    %666 = arith.divf %664, %665 : vector<8x384xf32>
    %667 = vector.extract_strided_slice %666 {offsets = [0, 0], sizes = [8, 128], strides = [1, 1]} : vector<8x384xf32> to vector<8x128xf32>
    %668 = vector.extract_strided_slice %666 {offsets = [0, 128], sizes = [8, 128], strides = [1, 1]} : vector<8x384xf32> to vector<8x128xf32>
    %669 = vector.extract_strided_slice %666 {offsets = [0, 256], sizes = [8, 128], strides = [1, 1]} : vector<8x384xf32> to vector<8x128xf32>
    %670 = vector.extract_strided_slice %660 {offsets = [0, 384], sizes = [8, 128], strides = [1, 1]} : vector<8x512xf32> to vector<8x128xf32>
    %671 = math.tanh %670 : vector<8x128xf32>
    %672 = arith.mulf %668, %583 : vector<8x128xf32>
    %673 = arith.mulf %667, %671 : vector<8x128xf32>
    %674 = arith.addf %672, %673 : vector<8x128xf32>
    %675 = math.tanh %674 : vector<8x128xf32>
    %676 = arith.mulf %669, %675 : vector<8x128xf32>
    %677 = tpu.concatenate %653, %630 in 1 : vector<8x128xf32>, vector<8x128xf32> -> vector<8x256xf32>
    %678 = arith.truncf %677 : vector<8x256xf32> to vector<8x256xbf16>
    %c0_192 = arith.constant 0 : index
    %c0_193 = arith.constant 0 : index
    %679 = vector.load %arg8[%c0_192, %c0_193] : memref<256x512xbf16, #tpu.memory_space<vmem>>, vector<256x512xbf16>
    %cst_194 = arith.constant dense<0.000000e+00> : vector<8x512xf32>
    %680 = tpu.matmul %678, %679, %cst_194 {dimension_numbers = #tpu.dot_dimension_numbers<[1], [0], [0], [1], [0, 0, 1, 1], [], []>} : vector<8x256xbf16>, vector<256x512xbf16>, vector<8x512xf32> -> vector<8x512xf32>
    %c0_195 = arith.constant 0 : index
    %c0_196 = arith.constant 0 : index
    %681 = vector.load %arg9[%c0_195, %c0_196] : memref<1x512xf32, #tpu.memory_space<vmem>>, vector<1x512xf32>
    %682 = vector.broadcast %681 : vector<1x512xf32> to vector<8x512xf32>
    %683 = arith.addf %680, %682 : vector<8x512xf32>
    %684 = vector.extract_strided_slice %683 {offsets = [0, 0], sizes = [8, 384], strides = [1, 1]} : vector<8x512xf32> to vector<8x384xf32>
    %685 = arith.negf %684 : vector<8x384xf32>
    %686 = math.exp %685 : vector<8x384xf32>
    %cst_197 = arith.constant 1.000000e+00 : f32
    %687 = vector.broadcast %cst_197 : f32 to vector<8x384xf32>
    %688 = arith.addf %687, %686 : vector<8x384xf32>
    %689 = arith.divf %687, %688 : vector<8x384xf32>
    %690 = vector.extract_strided_slice %689 {offsets = [0, 0], sizes = [8, 128], strides = [1, 1]} : vector<8x384xf32> to vector<8x128xf32>
    %691 = vector.extract_strided_slice %689 {offsets = [0, 128], sizes = [8, 128], strides = [1, 1]} : vector<8x384xf32> to vector<8x128xf32>
    %692 = vector.extract_strided_slice %689 {offsets = [0, 256], sizes = [8, 128], strides = [1, 1]} : vector<8x384xf32> to vector<8x128xf32>
    %693 = vector.extract_strided_slice %683 {offsets = [0, 384], sizes = [8, 128], strides = [1, 1]} : vector<8x512xf32> to vector<8x128xf32>
    %694 = math.tanh %693 : vector<8x128xf32>
    %695 = arith.mulf %691, %628 : vector<8x128xf32>
    %696 = arith.mulf %690, %694 : vector<8x128xf32>
    %697 = arith.addf %695, %696 : vector<8x128xf32>
    %698 = math.tanh %697 : vector<8x128xf32>
    %699 = arith.mulf %692, %698 : vector<8x128xf32>
    %700 = tpu.concatenate %676, %653 in 1 : vector<8x128xf32>, vector<8x128xf32> -> vector<8x256xf32>
    %701 = arith.truncf %700 : vector<8x256xf32> to vector<8x256xbf16>
    %c0_198 = arith.constant 0 : index
    %c0_199 = arith.constant 0 : index
    %702 = vector.load %arg6[%c0_198, %c0_199] : memref<256x512xbf16, #tpu.memory_space<vmem>>, vector<256x512xbf16>
    %cst_200 = arith.constant dense<0.000000e+00> : vector<8x512xf32>
    %703 = tpu.matmul %701, %702, %cst_200 {dimension_numbers = #tpu.dot_dimension_numbers<[1], [0], [0], [1], [0, 0, 1, 1], [], []>} : vector<8x256xbf16>, vector<256x512xbf16>, vector<8x512xf32> -> vector<8x512xf32>
    %c0_201 = arith.constant 0 : index
    %c0_202 = arith.constant 0 : index
    %704 = vector.load %arg7[%c0_201, %c0_202] : memref<1x512xf32, #tpu.memory_space<vmem>>, vector<1x512xf32>
    %705 = vector.broadcast %704 : vector<1x512xf32> to vector<8x512xf32>
    %706 = arith.addf %703, %705 : vector<8x512xf32>
    %707 = vector.extract_strided_slice %706 {offsets = [0, 0], sizes = [8, 384], strides = [1, 1]} : vector<8x512xf32> to vector<8x384xf32>
    %708 = arith.negf %707 : vector<8x384xf32>
    %709 = math.exp %708 : vector<8x384xf32>
    %cst_203 = arith.constant 1.000000e+00 : f32
    %710 = vector.broadcast %cst_203 : f32 to vector<8x384xf32>
    %711 = arith.addf %710, %709 : vector<8x384xf32>
    %712 = arith.divf %710, %711 : vector<8x384xf32>
    %713 = vector.extract_strided_slice %712 {offsets = [0, 0], sizes = [8, 128], strides = [1, 1]} : vector<8x384xf32> to vector<8x128xf32>
    %714 = vector.extract_strided_slice %712 {offsets = [0, 128], sizes = [8, 128], strides = [1, 1]} : vector<8x384xf32> to vector<8x128xf32>
    %715 = vector.extract_strided_slice %712 {offsets = [0, 256], sizes = [8, 128], strides = [1, 1]} : vector<8x384xf32> to vector<8x128xf32>
    %716 = vector.extract_strided_slice %706 {offsets = [0, 384], sizes = [8, 128], strides = [1, 1]} : vector<8x512xf32> to vector<8x128xf32>
    %717 = math.tanh %716 : vector<8x128xf32>
    %718 = arith.mulf %714, %651 : vector<8x128xf32>
    %719 = arith.mulf %713, %717 : vector<8x128xf32>
    %720 = arith.addf %718, %719 : vector<8x128xf32>
    %721 = math.tanh %720 : vector<8x128xf32>
    %722 = arith.mulf %715, %721 : vector<8x128xf32>
    %723 = tpu.concatenate %722, %699 in 1 : vector<8x128xf32>, vector<8x128xf32> -> vector<8x256xf32>
    %724 = arith.truncf %723 : vector<8x256xf32> to vector<8x256xbf16>
    %c0_204 = arith.constant 0 : index
    %c0_205 = arith.constant 0 : index
    %725 = vector.load %arg8[%c0_204, %c0_205] : memref<256x512xbf16, #tpu.memory_space<vmem>>, vector<256x512xbf16>
    %cst_206 = arith.constant dense<0.000000e+00> : vector<8x512xf32>
    %726 = tpu.matmul %724, %725, %cst_206 {dimension_numbers = #tpu.dot_dimension_numbers<[1], [0], [0], [1], [0, 0, 1, 1], [], []>} : vector<8x256xbf16>, vector<256x512xbf16>, vector<8x512xf32> -> vector<8x512xf32>
    %c0_207 = arith.constant 0 : index
    %c0_208 = arith.constant 0 : index
    %727 = vector.load %arg9[%c0_207, %c0_208] : memref<1x512xf32, #tpu.memory_space<vmem>>, vector<1x512xf32>
    %728 = vector.broadcast %727 : vector<1x512xf32> to vector<8x512xf32>
    %729 = arith.addf %726, %728 : vector<8x512xf32>
    %730 = vector.extract_strided_slice %729 {offsets = [0, 0], sizes = [8, 384], strides = [1, 1]} : vector<8x512xf32> to vector<8x384xf32>
    %731 = arith.negf %730 : vector<8x384xf32>
    %732 = math.exp %731 : vector<8x384xf32>
    %cst_209 = arith.constant 1.000000e+00 : f32
    %733 = vector.broadcast %cst_209 : f32 to vector<8x384xf32>
    %734 = arith.addf %733, %732 : vector<8x384xf32>
    %735 = arith.divf %733, %734 : vector<8x384xf32>
    %736 = vector.extract_strided_slice %735 {offsets = [0, 0], sizes = [8, 128], strides = [1, 1]} : vector<8x384xf32> to vector<8x128xf32>
    %737 = vector.extract_strided_slice %735 {offsets = [0, 128], sizes = [8, 128], strides = [1, 1]} : vector<8x384xf32> to vector<8x128xf32>
    %738 = vector.extract_strided_slice %735 {offsets = [0, 256], sizes = [8, 128], strides = [1, 1]} : vector<8x384xf32> to vector<8x128xf32>
    %739 = vector.extract_strided_slice %729 {offsets = [0, 384], sizes = [8, 128], strides = [1, 1]} : vector<8x512xf32> to vector<8x128xf32>
    %740 = math.tanh %739 : vector<8x128xf32>
    %741 = arith.mulf %737, %697 : vector<8x128xf32>
    %742 = arith.mulf %736, %740 : vector<8x128xf32>
    %743 = arith.addf %741, %742 : vector<8x128xf32>
    %744 = math.tanh %743 : vector<8x128xf32>
    %745 = arith.mulf %738, %744 : vector<8x128xf32>
    %746 = arith.truncf %745 : vector<8x128xf32> to vector<8x128xbf16>
    %c0_210 = arith.constant 0 : index
    %c0_211 = arith.constant 0 : index
    %747 = vector.load %arg10[%c0_210, %c0_211] : memref<128x128xbf16, #tpu.memory_space<vmem>>, vector<128x128xbf16>
    %cst_212 = arith.constant dense<0.000000e+00> : vector<8x128xf32>
    %748 = tpu.matmul %746, %747, %cst_212 {dimension_numbers = #tpu.dot_dimension_numbers<[1], [0], [0], [1], [0, 0, 1, 1], [], []>} : vector<8x128xbf16>, vector<128x128xbf16>, vector<8x128xf32> -> vector<8x128xf32>
    %c0_213 = arith.constant 0 : index
    %c0_214 = arith.constant 0 : index
    %749 = vector.load %arg11[%c0_213, %c0_214] : memref<1x128xf32, #tpu.memory_space<vmem>>, vector<1x128xf32>
    %750 = vector.broadcast %749 : vector<1x128xf32> to vector<8x128xf32>
    %751 = arith.addf %748, %750 : vector<8x128xf32>
    %c0_215 = arith.constant 0 : index
    %c0_216 = arith.constant 0 : index
    %752 = vector.load %arg12[%c0_215, %c0_216] : memref<8x128xf32, #tpu.memory_space<vmem>>, vector<8x128xf32>
    tpu.vector_store %arg12[%c0_215, %c0_216], %751 {strides = array<i32>} : memref<8x128xf32, #tpu.memory_space<vmem>>, vector<8x128xf32>,
    return
  }
}

</mosaic_0001>

<bundles_post_ra>
// kernel: lstm_forward.1
= control target key start
LH: loop header
LB: loop body
LE: loop exit
PB: predicated region body
PF: predicated region fallthrough
CT: control target
= control target key end

     0   :  { %17 = vsyncpa [#allocation4], 0  ;;  %s11551_s0 = inlined_call_operand.vmem [shape: f32[8,8,16], index: 0, kind: input, shape index: {}]   ;;  %s11552_s1 = inlined_call_operand.vmem [shape: bf16[16,512], index: 1, kind: input, shape index: {}]   ;;  %s11553_s2 = inlined_call_operand.hbm [shape: bf16[128,512], index: 2, kind: input, shape index: {}]   ;;  %s11554_s3 = inlined_call_operand.vmem [shape: f32[1,512], index: 3, kind: input, shape index: {}]   ;;  %s11555_s4 = inlined_call_operand.hbm [shape: bf16[256,512], index: 4, kind: input, shape index: {}]   ;;  %s11556_s5 = inlined_call_operand.vmem [shape: f32[1,512], index: 5, kind: input, shape index: {}]   ;;  %s11557_s6 = inlined_call_operand.hbm [shape: bf16[256,512], index: 6, kind: input, shape index: {}]   ;;  %s11558_s7 = inlined_call_operand.vmem [shape: f32[1,512], index: 7, kind: input, shape index: {}]   ;;  %s11559_s8 = inlined_call_operand.hbm [shape: bf16[256,512], index: 8, kind: input, shape index: {}]   ;;  %s11560_s9 = inlined_call_operand.vmem [shape: f32[1,512], index: 9, kind: input, shape index: {}]   ;;  %s11561_s10 = inlined_call_operand.vmem [shape: bf16[128,128], index: 10, kind: input, shape index: {}]   ;;  %s11562_s11 = inlined_call_operand.vmem [shape: f32[1,128], index: 11, kind: input, shape index: {}]   ;;  %s11563_s12 = inlined_call_operand.vmem [shape: f32[8,128], index: 12, kind: output, shape index: {}]  }
   0x1   :  { %18 = vsyncpa [#allocation6], 0 }
   0x2   :  { %19 = vsyncpa [#allocation9], 0  ;;  %s7401_s21 = smov [#allocation5]   ;;  %s7402_s23 = smov [#allocation3]  }
   0x3   :  { %s43_s22 = sshll.u32 %s7401_s21, 4  ;;  %s29_s24 = sshll.u32 %s7402_s23, 4  ;;  %s44_s22 = int_to_ptr.vmem [resolvable:$true] %s43_s22  ;;  %s7476_s24 = int_to_ptr.vmem [resolvable:$true] %s29_s24 }
   0x4   :  { %s7307_s27 = scalar_lea.hbm %s11555_s4, 8192 }
   0x5   :  { %p7308_p0 = scmp.ne.s32.totalorder %s11555_s4, %s7307_s27  ;;  %p7311_p1 = scmp.lt.u32.totalorder %s7307_s27, %s11555_s4 }
   0x7   :  { %p7313_p2 = pnand %p7311_p1, %p7308_p0 }
   0x9   :  { %7316 = shalt.err (!%p7313_p2)
}
   0xa   :  { %s7317_s14 = scalar_lea.vmem %s44_s22, 8192  ;;  %p7322_p4 = scmp.lt.s32.totalorder %s44_s22, %s44_s22 }
   0xb   :  { %p7318_p3 = scmp.ne.s32.totalorder %s44_s22, %s7317_s14  ;;  %p7323_p5 = scmp.lt.s32.totalorder %s7317_s14, %s7317_s14 }
   0xd   :  { %p7324_p6 = por %p7323_p5, %p7322_p4 }
   0xf   :  { %p7325_p7 = pnand %p7324_p6, %p7318_p3 }
  0x11   :  { %7328 = shalt.err (!%p7325_p7)
}
  0x12   :  { %s7403_s15 = smov 256   ;;  %s7404_s16 = smov 16  }
  0x13   :  { %49 = dma.hbm_to_vmem [thread:$0]  %s11555_s4, 8192, %s44_s22, [#allocation6], %s7403_s15, %s7403_s15, %s7404_s16  }
  0x14   :  { %s7329_s21 = scalar_lea.hbm %s11553_s2, 4096 }
  0x15   :  { %p7330_p8 = scmp.ne.s32.totalorder %s11553_s2, %s7329_s21  ;;  %p7333_p9 = scmp.lt.u32.totalorder %s7329_s21, %s11553_s2 }
  0x17   :  { %p7335_p10 = pnand %p7333_p9, %p7330_p8 }
  0x19   :  { %7338 = shalt.err (!%p7335_p10)
}
  0x1a   :  { %s7339_s28 = scalar_lea.vmem %s7476_s24, 4096  ;;  %p7344_p12 = scmp.lt.s32.totalorder %s7476_s24, %s7476_s24 }
  0x1b   :  { %p7340_p11 = scmp.ne.s32.totalorder %s7476_s24, %s7339_s28  ;;  %p7345_p13 = scmp.lt.s32.totalorder %s7339_s28, %s7339_s28 }
  0x1d   :  { %p7346_p0 = por %p7345_p13, %p7344_p12 }
  0x1f   :  { %p7347_p1 = pnand %p7346_p0, %p7340_p11 }
  0x21   :  { %7350 = shalt.err (!%p7347_p1)
}
  0x22   :  { %35 = dma.hbm_to_vmem [thread:$0]  %s11553_s2, 4096, %s7476_s24, [#allocation4], %s7403_s15, %s7403_s15, %s7404_s16  }
  0x23   :  { %s7405_s29 = smov [#allocation7]   ;;  %s7406_s13 = smov [#allocation8]  }
  0x24   :  { %s57_s30 = sshll.u32 %s7405_s29, 4  ;;  %s71_s14 = sshll.u32 %s7406_s13, 4  ;;  %s58_s30 = int_to_ptr.vmem [resolvable:$true] %s57_s30  ;;  %s7513_s14 = int_to_ptr.vmem [resolvable:$true] %s71_s14 }
  0x25   :  { %s7351_s19 = scalar_lea.hbm %s11557_s6, 8192 }
  0x26   :  { %p7352_p2 = scmp.ne.s32.totalorder %s11557_s6, %s7351_s19  ;;  %p7355_p3 = scmp.lt.u32.totalorder %s7351_s19, %s11557_s6 }
  0x28   :  { %p7357_p4 = pnand %p7355_p3, %p7352_p2 }
  0x2a   :  { %7360 = shalt.err (!%p7357_p4)
}
  0x2b   :  { %s7361_s2 = scalar_lea.vmem %s58_s30, 8192  ;;  %p7366_p6 = scmp.lt.s32.totalorder %s58_s30, %s58_s30 }
  0x2c   :  { %p7362_p5 = scmp.ne.s32.totalorder %s58_s30, %s7361_s2  ;;  %p7367_p7 = scmp.lt.s32.totalorder %s7361_s2, %s7361_s2 }
  0x2e   :  { %p7368_p8 = por %p7367_p7, %p7366_p6 }
  0x30   :  { %p7369_p9 = pnand %p7368_p8, %p7362_p5 }
  0x32   :  { %7372 = shalt.err (!%p7369_p9)
}
  0x33   :  { %63 = dma.hbm_to_vmem [thread:$0]  %s11557_s6, 8192, %s58_s30, [#allocation6], %s7403_s15, %s7403_s15, %s7404_s16  }
  0x34   :  { %s7373_s4 = scalar_lea.hbm %s11559_s8, 8192 }
  0x35   :  { %p7374_p10 = scmp.ne.s32.totalorder %s11559_s8, %s7373_s4  ;;  %p7377_p11 = scmp.lt.u32.totalorder %s7373_s4, %s11559_s8 }
  0x37   :  { %p7379_p12 = pnand %p7377_p11, %p7374_p10 }
  0x39   :  { %7382 = shalt.err (!%p7379_p12)
}
  0x3a   :  { %s7383_s18 = scalar_lea.vmem %s7513_s14, 8192  ;;  %p7388_p0 = scmp.lt.s32.totalorder %s7513_s14, %s7513_s14 }
  0x3b   :  { %p7384_p13 = scmp.ne.s32.totalorder %s7513_s14, %s7383_s18  ;;  %p7389_p1 = scmp.lt.s32.totalorder %s7383_s18, %s7383_s18 }
  0x3d   :  { %p7390_p2 = por %p7389_p1, %p7388_p0 }
  0x3f   :  { %p7391_p3 = pnand %p7390_p2, %p7384_p13 }
  0x41   :  { %7394 = shalt.err (!%p7391_p3)
}
  0x42   :  { %77 = dma.hbm_to_vmem [thread:$0]  %s11559_s8, 8192, %s7513_s14, [#allocation9], %s7403_s15, %s7403_s15, %s7404_s16  }
  0x43   :  { %7395 = dma.done.wait [#allocation4], 4096  }
  0x44   :  { %7396 = vsyncadd [#allocation4], 4294963200 }
  0x45   :  { %7397 = dma.done.wait [#allocation6], 16384  }
  0x46   :  { %7398 = vsyncadd [#allocation6], 4294950912 }
  0x47   :  { %7399 = dma.done.wait [#allocation9], 8192  }
  0x48   :  { %7400 = vsyncadd [#allocation9], 4294959104  ;;  %v11564_v0 = vmov 0   ;;  %v5751_v1 = vld [vmem:[%s11552_s1 + $0x4] ss:$16 sps:$4 sm:$0xff]   ;;  %v98_v6 = vld [vmem:[%s11551_s0 + $0x8] sm:$0xff] }
  0x49   :  { %200 = vmatprep.mubr.bf16.mxu0 %v11564_v0  ;;  %273 = vmatprep.mubr.bf16.mxu1 %v11564_v0  ;;  %v5753_v2 = vld [vmem:[%s11552_s1 + $0xc] ss:$16 sps:$4 sm:$0xff]   ;;  %v5755_v3 = vld [vmem:[%s11552_s1] ss:$16 sps:$4 sm:$0xff]   ;;  %v5756_v4 = vld [vmem:[%s11552_s1 + $0x8] ss:$16 sps:$4 sm:$0xff]  }
  0x4a   :  { %168 = vmatprep.subr.bf16.mxu0 %v5751_v1  ;;  %v97_v5 = vld [vmem:[%s11551_s0] sm:$0xff]  ;;  %241 = vmatprep.subr.bf16.mxu1 %v5753_v2  ;;  %vm155_vm0 = vcmask 130048   ;;  %v7572_v9 = vld [vmem:[#allocation3 + $0xc] ss:$16 sps:$4 sm:$0xff]   ;;  %v5762_v11 = vld [vmem:[#allocation3 + $0x8] ss:$16 sps:$4 sm:$0xff]  }
  0x4b   :  { %169 = vmatpush1.bf16.msra.mxu0 %v5755_v3  ;;  %242 = vmatpush1.bf16.msra.mxu1 %v5756_v4  ;;  %v105_v7 = vpack.c.bf16 %v98_v6, %v97_v5  ;;  %v7570_v8 = vld [vmem:[#allocation3 + $0x4] ss:$16 sps:$4 sm:$0xff]   ;;  %v5761_v10 = vld [vmem:[#allocation3] ss:$16 sps:$4 sm:$0xff]   ;;  %v5765_v13 = vld [vmem:[#allocation3 + $0x2c] ss:$16 sps:$4 sm:$0xff]  }
  0x4c   :  { %542 = vmatprep.subr.bf16.mxu0 %v7570_v8  ;;  %v5763_v12 = vld [vmem:[#allocation3 + $0x24] ss:$16 sps:$4 sm:$0xff]   ;;  %583 = vmatprep.subr.bf16.mxu1 %v7572_v9  ;;  %v5767_v14 = vld [vmem:[#allocation3 + $0x20] ss:$16 sps:$4 sm:$0xff]   ;;  %v5768_v15 = vld [vmem:[#allocation3 + $0x28] ss:$16 sps:$4 sm:$0xff]  }
  0x4d   :  { %v99_v16 = vld [vmem:[%s11551_s0 + $0x10] sm:$0xff]  ;;  %v100_v17 = vld [vmem:[%s11551_s0 + $0x18] sm:$0xff]  ;;  %v101_v26 = vld [vmem:[%s11551_s0 + $0x20] sm:$0xff]  ;;  %vm7410_vm1 = vmmov 0  }
  0x4e   :  { %5375 = vmatmul.mubr.msk.bf16.vlgmr.msra.gmra.mrb[0].mxu0 %vm155_vm0, %v105_v7  ;;  %5379 = vmatmul.mubr.msk.bf16.vlgmr.msra.gmra.mrb[0].mxu1 %vm155_vm0, %v105_v7  ;;  %v5769_v18 = vld [vmem:[#allocation3 + $0x44] ss:$16 sps:$4 sm:$0xff]   ;;  %v106_v19 = vpack.c.bf16 %v100_v17, %v99_v16  ;;  %v5771_v20 = vld [vmem:[#allocation3 + $0x4c] ss:$16 sps:$4 sm:$0xff]   ;;  %v5773_v21 = vld [vmem:[#allocation3 + $0x40] ss:$16 sps:$4 sm:$0xff]  }
  0x4f   :  { %543 = vmatpush1.bf16.msra.mxu0 %v5761_v10  ;;  %584 = vmatpush1.bf16.msra.mxu1 %v5762_v11  ;;  %v5774_v22 = vld [vmem:[#allocation3 + $0x48] ss:$16 sps:$4 sm:$0xff]   ;;  %v5775_v23 = vld [vmem:[#allocation3 + $0x64] ss:$16 sps:$4 sm:$0xff]   ;;  %v5777_v24 = vld [vmem:[#allocation3 + $0x6c] ss:$16 sps:$4 sm:$0xff]  }
  0x50   :  { %544 = vmatprep.subr.bf16.mxu0 %v5763_v12  ;;  %585 = vmatprep.subr.bf16.mxu1 %v5765_v13  ;;  %v5779_v25 = vld [vmem:[#allocation3 + $0x60] ss:$16 sps:$4 sm:$0xff]   ;;  %v102_v27 = vld [vmem:[%s11551_s0 + $0x28] sm:$0xff]  ;;  %v5781_v29 = vld [vmem:[#allocation3 + $0x84] ss:$16 sps:$4 sm:$0xff]  }
  0x51   :  { %210 = vmatprep.mubr.bf16.mxu0 %v11564_v0  ;;  %283 = vmatprep.mubr.bf16.mxu1 %v11564_v0  ;;  %v5780_v28 = vld [vmem:[#allocation3 + $0x68] ss:$16 sps:$4 sm:$0xff]   ;;  %v5783_v30 = vld [vmem:[#allocation3 + $0x8c] ss:$16 sps:$4 sm:$0xff]   ;;  %v107_v31 = vpack.c.bf16 %v102_v27, %v101_v26  ;;  %v5785_v32 = vld [vmem:[#allocation3 + $0x80] ss:$16 sps:$4 sm:$0xff]  }
  0x52   :  { %v5786_v33 = vld [vmem:[#allocation3 + $0x88] ss:$16 sps:$4 sm:$0xff]   ;;  %v5787_v34 = vld [vmem:[#allocation3 + $0xa4] ss:$16 sps:$4 sm:$0xff]   ;;  %v5789_v35 = vld [vmem:[#allocation3 + $0xac] ss:$16 sps:$4 sm:$0xff]  }
  0x53   :  { %545 = vmatpush1.bf16.msra.mxu0 %v5767_v14  ;;  %586 = vmatpush1.bf16.msra.mxu1 %v5768_v15  ;;  %v5791_v36 = vld [vmem:[#allocation3 + $0xa0] ss:$16 sps:$4 sm:$0xff]   ;;  %v5792_v37 = vld [vmem:[#allocation3 + $0xa8] ss:$16 sps:$4 sm:$0xff]   ;;  %v7605_v40 = vld [vmem:[#allocation3 + $0xc4] ss:$16 sps:$4 sm:$0xff]  }
  0x54   :  { %546 = vmatprep.subr.bf16.mxu0 %v5769_v18  ;;  %587 = vmatprep.subr.bf16.mxu1 %v5771_v20  ;;  %v103_v38 = vld [vmem:[%s11551_s0 + $0x30] sm:$0xff]  ;;  %v104_v39 = vld [vmem:[%s11551_s0 + $0x38] sm:$0xff] }
  0x55   :  { %v7608_v41 = vld [vmem:[#allocation3 + $0xcc] ss:$16 sps:$4 sm:$0xff]   ;;  %v7610_v42 = vld [vmem:[#allocation3 + $0xc0] ss:$16 sps:$4 sm:$0xff]   ;;  %v108_v43 = vpack.c.bf16 %v104_v39, %v103_v38  ;;  %v7612_v44 = vld [vmem:[#allocation3 + $0xc8] ss:$16 sps:$4 sm:$0xff]  }
  0x56   :  { %5376 = vmatmul.mubr.msk.bf16.gmra.mrb[4].mxu0 %vm155_vm0, %v106_v19  ;;  %5380 = vmatmul.mubr.msk.bf16.gmra.mrb[4].mxu1 %vm155_vm0, %v106_v19  ;;  %v7614_v45 = vld [vmem:[#allocation3 + $0xe4] ss:$16 sps:$4 sm:$0xff]   ;;  %v7616_v46 = vld [vmem:[#allocation3 + $0xec] ss:$16 sps:$4 sm:$0xff]   ;;  %v7620_v47 = vld [vmem:[#allocation3 + $0xe0] ss:$16 sps:$4 sm:$0xff]  }
  0x57   :  { %547 = vmatpush1.bf16.msra.mxu0 %v5773_v21  ;;  %220 = vmatprep.mubr.bf16.mxu0 %v11564_v0  ;;  %v7624_v48 = vld [vmem:[#allocation3 + $0xe8] ss:$16 sps:$4 sm:$0xff]   ;;  %v7636_v49 = vld [vmem:[#allocation5 + $0x4] ss:$16 sps:$4 sm:$0xff]   ;;  %v7638_v50 = vld [vmem:[#allocation5 + $0xc] ss:$16 sps:$4 sm:$0xff]  }
  0x58   :  { %588 = vmatpush1.bf16.msra.mxu1 %v5774_v22  ;;  %548 = vmatprep.subr.bf16.mxu0 %v5775_v23  ;;  %v7640_v51 = vld [vmem:[#allocation5] ss:$16 sps:$4 sm:$0xff]   ;;  %v7642_v52 = vld [vmem:[#allocation5 + $0x8] ss:$16 sps:$4 sm:$0xff]   ;;  %v7648_v53 = vld [vmem:[#allocation5 + $0x24] ss:$16 sps:$4 sm:$0xff]  }
  0x59   :  { %589 = vmatprep.subr.bf16.mxu1 %v5777_v24  ;;  %293 = vmatprep.mubr.bf16.mxu1 %v11564_v0  ;;  %v7650_v54 = vld [vmem:[#allocation5 + $0x2c] ss:$16 sps:$4 sm:$0xff]   ;;  %v7652_v55 = vld [vmem:[#allocation5 + $0x20] ss:$16 sps:$4 sm:$0xff]   ;;  %v7654_v56 = vld [vmem:[#allocation5 + $0x28] ss:$16 sps:$4 sm:$0xff]  }
  0x5a   :  { %v7660_v57 = vld [vmem:[#allocation5 + $0x44] ss:$16 sps:$4 sm:$0xff]   ;;  %v7662_v58 = vld [vmem:[#allocation5 + $0x4c] ss:$16 sps:$4 sm:$0xff]   ;;  %v7664_v59 = vld [vmem:[#allocation5 + $0x40] ss:$16 sps:$4 sm:$0xff]  }
  0x5b   :  { %549 = vmatpush1.bf16.msra.mxu0 %v5779_v25  ;;  %v7666_v60 = vld [vmem:[#allocation5 + $0x48] ss:$16 sps:$4 sm:$0xff]   ;;  %v7672_v61 = vld [vmem:[#allocation5 + $0x64] ss:$16 sps:$4 sm:$0xff]   ;;  %v7674_v62 = vld [vmem:[#allocation5 + $0x6c] ss:$16 sps:$4 sm:$0xff]  }
  0x5c   :  { %590 = vmatpush1.bf16.msra.mxu1 %v5780_v28  ;;  %550 = vmatprep.subr.bf16.mxu0 %v5781_v29  ;;  %v7676_v63 = vld [vmem:[#allocation5 + $0x60] ss:$16 sps:$4 sm:$0xff]   ;;  %v7678_v1 = vld [vmem:[#allocation5 + $0x68] ss:$16 sps:$4 sm:$0xff]   ;;  %v7684_v2 = vld [vmem:[#allocation5 + $0x84] ss:$16 sps:$4 sm:$0xff]  }
  0x5d   :  { %591 = vmatprep.subr.bf16.mxu1 %v5783_v30  ;;  %v7686_v3 = vld [vmem:[#allocation5 + $0x8c] ss:$16 sps:$4 sm:$0xff]   ;;  %v7690_v4 = vld [vmem:[#allocation5 + $0x80] ss:$16 sps:$4 sm:$0xff]   ;;  %v7692_v5 = vld [vmem:[#allocation5 + $0x88] ss:$16 sps:$4 sm:$0xff]  }
  0x5e   :  { %5377 = vmatmul.mubr.msk.bf16.gmra.mrb[8].mxu0 %vm155_vm0, %v107_v31  ;;  %5381 = vmatmul.mubr.msk.bf16.gmra.mrb[8].mxu1 %vm155_vm0, %v107_v31  ;;  %v7696_v6 = vld [vmem:[#allocation5 + $0xa4] ss:$16 sps:$4 sm:$0xff]   ;;  %v7698_v7 = vld [vmem:[#allocation5 + $0xac] ss:$16 sps:$4 sm:$0xff]   ;;  %v7700_v10 = vld [vmem:[#allocation5 + $0xa0] ss:$16 sps:$4 sm:$0xff]  }
  0x5f   :  { %551 = vmatpush1.bf16.msra.mxu0 %v5785_v32  ;;  %230 = vmatprep.mubr.bf16.mxu0 %v11564_v0  ;;  %v7702_v11 = vld [vmem:[#allocation5 + $0xa8] ss:$16 sps:$4 sm:$0xff]   ;;  %v7708_v12 = vld [vmem:[#allocation5 + $0xc4] ss:$16 sps:$4 sm:$0xff]   ;;  %v7710_v13 = vld [vmem:[#allocation5 + $0xcc] ss:$16 sps:$4 sm:$0xff]  }
  0x60   :  { %592 = vmatpush1.bf16.msra.mxu1 %v5786_v33  ;;  %552 = vmatprep.subr.bf16.mxu0 %v5787_v34  ;;  %12210 = vst [vmem:[#allocation13_spill] sm:$0xff] %v7702_v11  ;;  %12211 = vst [vmem:[#allocation14_spill] sm:$0xff] %v7708_v12  ;;  %v7712_v14 = vld [vmem:[#allocation5 + $0xc0] ss:$16 sps:$4 sm:$0xff]   ;;  %v7714_v15 = vld [vmem:[#allocation5 + $0xc8] ss:$16 sps:$4 sm:$0xff]  }
  0x61   :  { %593 = vmatprep.subr.bf16.mxu1 %v5789_v35  ;;  %303 = vmatprep.mubr.bf16.mxu1 %v11564_v0  ;;  %12212 = vst [vmem:[#allocation15_spill] sm:$0xff] %v7710_v13  ;;  %12213 = vst [vmem:[#allocation16_spill] sm:$0xff] %v7712_v14  ;;  %v7720_v16 = vld [vmem:[#allocation5 + $0xe4] ss:$16 sps:$4 sm:$0xff]   ;;  %v7722_v17 = vld [vmem:[#allocation5 + $0xec] ss:$16 sps:$4 sm:$0xff]  }
  0x62   :  { %12214 = vst [vmem:[#allocation17_spill] sm:$0xff] %v7714_v15  ;;  %12215 = vst [vmem:[#allocation18_spill] sm:$0xff] %v7720_v16  ;;  %v7724_v18 = vld [vmem:[#allocation5 + $0xe0] ss:$16 sps:$4 sm:$0xff]   ;;  %v7726_v19 = vld [vmem:[#allocation5 + $0xe8] ss:$16 sps:$4 sm:$0xff]  }
  0x63   :  { %553 = vmatpush1.bf16.msra.mxu0 %v5791_v36  ;;  %12216 = vst [vmem:[#allocation19_spill] sm:$0xff] %v7722_v17  ;;  %12217 = vst [vmem:[#allocation20_spill] sm:$0xff] %v7724_v18  ;;  %v7732_v20 = vld [vmem:[#allocation5 + $0x104] ss:$16 sps:$4 sm:$0xff]   ;;  %v7734_v21 = vld [vmem:[#allocation5 + $0x10c] ss:$16 sps:$4 sm:$0xff]  }
  0x64   :  { %594 = vmatpush1.bf16.msra.mxu1 %v5792_v37  ;;  %554 = vmatprep.subr.bf16.mxu0 %v7605_v40  ;;  %12218 = vst [vmem:[#allocation21_spill] sm:$0xff] %v7726_v19  ;;  %12219 = vst [vmem:[#allocation22_spill] sm:$0xff] %v7732_v20  ;;  %v7736_v22 = vld [vmem:[#allocation5 + $0x100] ss:$16 sps:$4 sm:$0xff]   ;;  %v7738_v23 = vld [vmem:[#allocation5 + $0x108] ss:$16 sps:$4 sm:$0xff]  }
  0x65   :  { %595 = vmatprep.subr.bf16.mxu1 %v7608_v41  ;;  %12220 = vst [vmem:[#allocation23_spill] sm:$0xff] %v7734_v21  ;;  %12221 = vst [vmem:[#allocation24_spill] sm:$0xff] %v7736_v22  ;;  %v7744_v24 = vld [vmem:[#allocation5 + $0x124] ss:$16 sps:$4 sm:$0xff]   ;;  %v7746_v25 = vld [vmem:[#allocation5 + $0x12c] ss:$16 sps:$4 sm:$0xff]  }
  0x66   :  { %5378 = vmatmul.mubr.msk.bf16.gmra.mrb[12].mxu0 %vm155_vm0, %v108_v43  ;;  %5382 = vmatmul.mubr.msk.bf16.gmra.mrb[12].mxu1 %vm155_vm0, %v108_v43  ;;  %12222 = vst [vmem:[#allocation25_spill] sm:$0xff] %v7738_v23  ;;  %12223 = vst [vmem:[#allocation26_spill] sm:$0xff] %v7744_v24  ;;  %v7748_v26 = vld [vmem:[#allocation5 + $0x120] ss:$16 sps:$4 sm:$0xff]   ;;  %v7750_v27 = vld [vmem:[#allocation5 + $0x128] ss:$16 sps:$4 sm:$0xff]  }
  0x67   :  { %555 = vmatpush1.bf16.msra.mxu0 %v7610_v42  ;;  %574 = vmatprep.mubr.bf16.mxu0 %v11564_v0  ;;  %12224 = vst [vmem:[#allocation27_spill] sm:$0xff] %v7746_v25  ;;  %12225 = vst [vmem:[#allocation28_spill] sm:$0xff] %v7748_v26  ;;  %v7756_v28 = vld [vmem:[#allocation5 + $0x144] ss:$16 sps:$4 sm:$0xff]   ;;  %v7758_v29 = vld [vmem:[#allocation5 + $0x14c] ss:$16 sps:$4 sm:$0xff]  }
  0x68   :  { %596 = vmatpush1.bf16.msra.mxu1 %v7612_v44  ;;  %556 = vmatprep.subr.bf16.mxu0 %v7614_v45  ;;  %12226 = vst [vmem:[#allocation29_spill] sm:$0xff] %v7750_v27  ;;  %12227 = vst [vmem:[#allocation30_spill] sm:$0xff] %v7756_v28  ;;  %v7760_v30 = vld [vmem:[#allocation5 + $0x140] ss:$16 sps:$4 sm:$0xff]   ;;  %v7762_v31 = vld [vmem:[#allocation5 + $0x148] ss:$16 sps:$4 sm:$0xff]  }
  0x69   :  { %597 = vmatprep.subr.bf16.mxu1 %v7616_v46  ;;  %615 = vmatprep.mubr.bf16.mxu1 %v11564_v0  ;;  %12228 = vst [vmem:[#allocation31_spill] sm:$0xff] %v7758_v29  ;;  %12229 = vst [vmem:[#allocation32_spill] sm:$0xff] %v7760_v30  ;;  %v7768_v32 = vld [vmem:[#allocation5 + $0x164] ss:$16 sps:$4 sm:$0xff]   ;;  %v7770_v33 = vld [vmem:[#allocation5 + $0x16c] ss:$16 sps:$4 sm:$0xff]  }
  0x6a   :  { %12230 = vst [vmem:[#allocation33_spill] sm:$0xff] %v7762_v31  ;;  %12231 = vst [vmem:[#allocation34_spill] sm:$0xff] %v7768_v32  ;;  %v7772_v34 = vld [vmem:[#allocation5 + $0x160] ss:$16 sps:$4 sm:$0xff]   ;;  %v7774_v35 = vld [vmem:[#allocation5 + $0x168] ss:$16 sps:$4 sm:$0xff]  }
  0x6b   :  { %557 = vmatpush1.bf16.msra.mxu0 %v7620_v47  ;;  %12232 = vst [vmem:[#allocation35_spill] sm:$0xff] %v7770_v33  ;;  %12233 = vst [vmem:[#allocation36_spill] sm:$0xff] %v7772_v34  ;;  %v7780_v36 = vld [vmem:[#allocation5 + $0x184] ss:$16 sps:$4 sm:$0xff]   ;;  %v7782_v37 = vld [vmem:[#allocation5 + $0x18c] ss:$16 sps:$4 sm:$0xff]  }
  0x6c   :  { %598 = vmatpush1.bf16.msra.mxu1 %v7624_v48  ;;  %1060 = vmatprep.subr.bf16.mxu0 %v7636_v49  ;;  %12234 = vst [vmem:[#allocation37_spill] sm:$0xff] %v7774_v35  ;;  %12235 = vst [vmem:[#allocation38_spill] sm:$0xff] %v7780_v36  ;;  %v7784_v38 = vld [vmem:[#allocation5 + $0x180] ss:$16 sps:$4 sm:$0xff]   ;;  %v7786_v39 = vld [vmem:[#allocation5 + $0x188] ss:$16 sps:$4 sm:$0xff]  }
  0x6d   :  { %1101 = vmatprep.subr.bf16.mxu1 %v7638_v50  ;;  %12236 = vst [vmem:[#allocation39_spill] sm:$0xff] %v7782_v37  ;;  %12237 = vst [vmem:[#allocation40_spill] sm:$0xff] %v7784_v38  ;;  %v7788_v43 = vld [vmem:[#allocation5 + $0x1a4] ss:$16 sps:$4 sm:$0xff]  }
  0x6e   :  { %575 = vmatmul.mubr.bf16.vlgmr.msra.gmra.mrb[16].mxu0 %v11564_v0  ;;  %12238 = vst [vmem:[#allocation41_spill] sm:$0xff] %v7786_v39  ;;  %12239 = vst [vmem:[#allocation42_spill] sm:$0xff] %v7788_v43 }
  0x6f   :  { %616 = vmatmul.mubr.bf16.vlgmr.msra.gmra.mrb[16].mxu1 %v11564_v0  ;;  %1061 = vmatpush1.bf16.msra.mxu0 %v7640_v51  ;;  %v7792_v0 = vld [vmem:[#allocation5 + $0x1ac] ss:$16 sps:$4 sm:$0xff]  }
  0x70   :  { %1102 = vmatpush1.bf16.msra.mxu1 %v7642_v52  ;;  %1062 = vmatprep.subr.bf16.mxu0 %v7648_v53  ;;  %12240 = vst [vmem:[#allocation43_spill] sm:$0xff] %v7792_v0 }
  0x71   :  { %1103 = vmatprep.subr.bf16.mxu1 %v7650_v54 }
  0x73   :  { %1063 = vmatpush1.bf16.msra.mxu0 %v7652_v55 }
  0x74   :  { %1104 = vmatpush1.bf16.msra.mxu1 %v7654_v56  ;;  %1064 = vmatprep.subr.bf16.mxu0 %v7660_v57 }
  0x75   :  { %1105 = vmatprep.subr.bf16.mxu1 %v7662_v58 }
  0x77   :  { %1065 = vmatpush1.bf16.msra.mxu0 %v7664_v59 }
  0x78   :  { %1106 = vmatpush1.bf16.msra.mxu1 %v7666_v60  ;;  %1066 = vmatprep.subr.bf16.mxu0 %v7672_v61 }
  0x79   :  { %1107 = vmatprep.subr.bf16.mxu1 %v7674_v62 }
  0x7b   :  { %1067 = vmatpush1.bf16.msra.mxu0 %v7676_v63 }
  0x7c   :  { %1108 = vmatpush1.bf16.msra.mxu1 %v7678_v1  ;;  %1068 = vmatprep.subr.bf16.mxu0 %v7684_v2 }
  0x7d   :  { %1109 = vmatprep.subr.bf16.mxu1 %v7686_v3 }
  0x7f   :  { %1069 = vmatpush1.bf16.msra.mxu0 %v7690_v4 }
  0x80   :  { %1110 = vmatpush1.bf16.msra.mxu1 %v7692_v5  ;;  %1070 = vmatprep.subr.bf16.mxu0 %v7696_v6 }
  0x81   :  { %1111 = vmatprep.subr.bf16.mxu1 %v7698_v7 }
  0x83   :  { %1071 = vmatpush1.bf16.msra.mxu0 %v7700_v10 }
  0x84   :  { %1112 = vmatpush1.bf16.msra.mxu1 %v7702_v11  ;;  %1072 = vmatprep.subr.bf16.mxu0 %v7708_v12 }
  0x85   :  { %1113 = vmatprep.subr.bf16.mxu1 %v7710_v13 }
  0x87   :  { %1073 = vmatpush1.bf16.msra.mxu0 %v7712_v14 }
  0x88   :  { %1114 = vmatpush1.bf16.msra.mxu1 %v7714_v15  ;;  %1074 = vmatprep.subr.bf16.mxu0 %v7720_v16 }
  0x89   :  { %1115 = vmatprep.subr.bf16.mxu1 %v7722_v17 }
  0x8b   :  { %1075 = vmatpush1.bf16.msra.mxu0 %v7724_v18 }
  0x8c   :  { %1116 = vmatpush1.bf16.msra.mxu1 %v7726_v19  ;;  %1076 = vmatprep.subr.bf16.mxu0 %v7732_v20 }
  0x8d   :  { %1117 = vmatprep.subr.bf16.mxu1 %v7734_v21 }
  0x8f   :  { %1077 = vmatpush1.bf16.msra.mxu0 %v7736_v22 }
  0x90   :  { %1118 = vmatpush1.bf16.msra.mxu1 %v7738_v23  ;;  %1078 = vmatprep.subr.bf16.mxu0 %v7744_v24 }
  0x91   :  { %1119 = vmatprep.subr.bf16.mxu1 %v7746_v25 }
  0x93   :  { %1079 = vmatpush1.bf16.msra.mxu0 %v7748_v26 }
  0x94   :  { %1120 = vmatpush1.bf16.msra.mxu1 %v7750_v27  ;;  %1080 = vmatprep.subr.bf16.mxu0 %v7756_v28 }
  0x95   :  { %1121 = vmatprep.subr.bf16.mxu1 %v7758_v29 }
  0x97   :  { %1081 = vmatpush1.bf16.msra.mxu0 %v7760_v30 }
  0x98   :  { %1122 = vmatpush1.bf16.msra.mxu1 %v7762_v31  ;;  %1082 = vmatprep.subr.bf16.mxu0 %v7768_v32  ;;  %v7804_v32 = vld [vmem:[#allocation5 + $0x1cc] ss:$16 sps:$4 sm:$0xff]  }
  0x99   :  { %1123 = vmatprep.subr.bf16.mxu1 %v7770_v33  ;;  %v7802_v33 = vld [vmem:[#allocation5 + $0x1c4] ss:$16 sps:$4 sm:$0xff]   ;;  %12244 = vst [vmem:[#allocation47_spill] sm:$0xff] %v7804_v32 }
  0x9a   :  { %12243 = vst [vmem:[#allocation46_spill] sm:$0xff] %v7802_v33 }
  0x9b   :  { %1083 = vmatpush1.bf16.msra.mxu0 %v7772_v34  ;;  %v7798_v34 = vld [vmem:[#allocation5 + $0x1a8] ss:$16 sps:$4 sm:$0xff]  }
  0x9c   :  { %1124 = vmatpush1.bf16.msra.mxu1 %v7774_v35  ;;  %1084 = vmatprep.subr.bf16.mxu0 %v7780_v36  ;;  %v7796_v35 = vld [vmem:[#allocation5 + $0x1a0] ss:$16 sps:$4 sm:$0xff]   ;;  %12242 = vst [vmem:[#allocation45_spill] sm:$0xff] %v7798_v34  ;;  %v11575_v36 = vmov 0.0|0.0  }
  0x9d   :  { %1125 = vmatprep.subr.bf16.mxu1 %v7782_v37  ;;  %12241 = vst [vmem:[#allocation44_spill] sm:$0xff] %v7796_v35  ;;  %1092 = vmatprep.mubr.bf16.mxu0 %v11575_v36 }
  0x9e   :  { %1133 = vmatprep.mubr.bf16.mxu1 %v11575_v36  ;;  %v7822_v36 = vld [vmem:[#allocation5 + $0x1e0] ss:$16 sps:$4 sm:$0xff]  }
  0x9f   :  { %1085 = vmatpush1.bf16.msra.mxu0 %v7784_v38  ;;  %v7812_v38 = vld [vmem:[#allocation5 + $0x1c8] ss:$16 sps:$4 sm:$0xff]   ;;  %12249 = vst [vmem:[#allocation52_spill] sm:$0xff] %v7822_v36 }
  0xa0   :  { %1126 = vmatpush1.bf16.msra.mxu1 %v7786_v39  ;;  %1086 = vmatprep.subr.bf16.mxu0 %v7788_v43  ;;  %v7810_v39 = vld [vmem:[#allocation5 + $0x1c0] ss:$16 sps:$4 sm:$0xff]   ;;  %12246 = vst [vmem:[#allocation49_spill] sm:$0xff] %v7812_v38  ;;  %v7818_v43 = vld [vmem:[#allocation5 + $0x1ec] ss:$16 sps:$4 sm:$0xff]  }
  0xa1   :  { %1127 = vmatprep.subr.bf16.mxu1 %v7792_v0  ;;  %12245 = vst [vmem:[#allocation48_spill] sm:$0xff] %v7810_v39  ;;  %v7816_v0 = vld [vmem:[#allocation5 + $0x1e4] ss:$16 sps:$4 sm:$0xff]   ;;  %12248 = vst [vmem:[#allocation51_spill] sm:$0xff] %v7818_v43 }
  0xa2   :  { %12247 = vst [vmem:[#allocation50_spill] sm:$0xff] %v7816_v0 }
  0xa3   :  { %1087 = vmatpush1.bf16.msra.mxu0 %v7796_v35  ;;  %v7824_v35 = vld [vmem:[#allocation5 + $0x1e8] ss:$16 sps:$4 sm:$0xff]  }
  0xa4   :  { %1128 = vmatpush1.bf16.msra.mxu1 %v7798_v34  ;;  %1088 = vmatprep.subr.bf16.mxu0 %v7802_v33  ;;  %12250 = vst [vmem:[#allocation53_spill] sm:$0xff] %v7824_v35 }
  0xa5   :  { %1129 = vmatprep.subr.bf16.mxu1 %v7804_v32  ;;  %v115_v32 = vlaneseq }
  0xa7   :  { %1089 = vmatpush1.bf16.msra.mxu0 %v7810_v39  ;;  %v116_v39 = vshrl.u32 %v115_v32, 7 }
  0xa8   :  { %1130 = vmatpush1.bf16.msra.mxu1 %v7812_v38  ;;  %1090 = vmatprep.subr.bf16.mxu0 %v7816_v0 }
  0xa9   :  { %1131 = vmatprep.subr.bf16.mxu1 %v7818_v43  ;;  %v7832_v33 = vsub.s32 2, %v116_v39  ;;  %v7834_v38 = vsub.s32 3, %v116_v39  ;;  %v7836_v34 = vsub.s32 0, %v116_v39  ;;  %v113_v43 = vld [vmem:[%s11554_s3] sm:$0xf]  ;;  %v7841_v0 = vsub.s32 1, %v116_v39 }
  0xab   :  { %1091 = vmatpush1.bf16.msra.mxu0 %v7822_v36  ;;  %12251 = vst [vmem:[#allocation54_spill] sm:$0xff] %v7834_v38  ;;  %12252 = vst [vmem:[#allocation55_spill] sm:$0xff] %v7836_v34  ;;  %v7851_v32 = vrot.slane %v113_v43, %v7834_v38  ;;  %v118_v36 = vrot.slane %v113_v43, %v7836_v34  ;;  %v122_v30 = vrot.slane %v113_v43, %v7841_v0 }
  0xac   :  { %1132 = vmatpush1.bf16.msra.mxu1 %v7824_v35  ;;  %1171 = vmatprep.subr.bf16.mxu0 %v7570_v8  ;;  %12253 = vst [vmem:[#allocation56_spill] sm:$0xff] %v7841_v0  ;;  %v7844_v35 = vrot.slane %v113_v43, %v7832_v33 }
  0xad   :  { %1212 = vmatprep.subr.bf16.mxu1 %v7572_v9 }
 0x121   :  { %v7846_v8 = vpop.f32.mrb[0].mxu0  ;;  %v7848_v9 = vpop.f32.mrb[0].mxu1 }
 0x122   :  { %v204_v37 = vpop.f32.mrb[1].mxu0  ;;  %v277_v31 = vpop.f32.mrb[1].mxu1 }
 0x123   :  { %v206_v29 = vpop.f32.mrb[2].mxu0  ;;  %v279_v28 = vpop.f32.mrb[2].mxu1 }
 0x124   :  { %v7855_v39 = vadd.f32 %v206_v29, %v118_v36  ;;  %v208_v27 = vpop.f32.mrb[3].mxu0  ;;  %v7858_v26 = vadd.f32 %v279_v28, %v7844_v35  ;;  %v281_v25 = vpop.f32.mrb[3].mxu1 }
 0x125   :  { %v7860_v24 = vadd.f32 %v208_v27, %v122_v30  ;;  %v7863_v23 = vadd.f32 %v281_v25, %v7851_v32 }
 0x129   :  { %v212_v22 = vpop.f32.mrb[4].mxu0  ;;  %v285_v21 = vpop.f32.mrb[4].mxu1 }
 0x12a   :  { %v7865_v20 = vadd.f32 %v212_v22, %v118_v36  ;;  %v214_v19 = vpop.f32.mrb[5].mxu0  ;;  %v7868_v43 = vadd.f32 %v285_v21, %v7844_v35  ;;  %v287_v29 = vpop.f32.mrb[5].mxu1 }
 0x12b   :  { %v7870_v18 = vadd.f32 %v214_v19, %v122_v30  ;;  %v216_v17 = vpop.f32.mrb[6].mxu0  ;;  %v7873_v28 = vadd.f32 %v287_v29, %v7851_v32  ;;  %v289_v27 = vpop.f32.mrb[6].mxu1 }
 0x12c   :  { %12254 = vst [vmem:[#allocation57_spill] sm:$0xff] %v7865_v20  ;;  %12255 = vst [vmem:[#allocation58_spill] sm:$0xff] %v7868_v43  ;;  %v7875_v16 = vadd.f32 %v216_v17, %v118_v36  ;;  %v218_v25 = vpop.f32.mrb[7].mxu0  ;;  %v7878_v15 = vadd.f32 %v289_v27, %v7844_v35  ;;  %v291_v22 = vpop.f32.mrb[7].mxu1 }
 0x12d   :  { %12256 = vst [vmem:[#allocation59_spill] sm:$0xff] %v7870_v18  ;;  %12257 = vst [vmem:[#allocation60_spill] sm:$0xff] %v7873_v28  ;;  %v7880_v20 = vadd.f32 %v218_v25, %v122_v30  ;;  %v7883_v21 = vadd.f32 %v291_v22, %v7851_v32 }
 0x12e   :  { %12258 = vst [vmem:[#allocation61_spill] sm:$0xff] %v7875_v16  ;;  %12259 = vst [vmem:[#allocation62_spill] sm:$0xff] %v7878_v15 }
 0x12f   :  { %12260 = vst [vmem:[#allocation63_spill] sm:$0xff] %v7880_v20  ;;  %12261 = vst [vmem:[#allocation64_spill] sm:$0xff] %v7883_v21 }
 0x131   :  { %v222_v43 = vpop.f32.mrb[8].mxu0  ;;  %v295_v19 = vpop.f32.mrb[8].mxu1 }
 0x132   :  { %v7885_v18 = vadd.f32 %v222_v43, %v118_v36  ;;  %v224_v14 = vpop.f32.mrb[9].mxu0  ;;  %v7888_v29 = vadd.f32 %v295_v19, %v7844_v35  ;;  %v297_v17 = vpop.f32.mrb[9].mxu1 }
 0x133   :  { %v7890_v16 = vadd.f32 %v224_v14, %v122_v30  ;;  %v226_v28 = vpop.f32.mrb[10].mxu0  ;;  %v7893_v27 = vadd.f32 %v297_v17, %v7851_v32  ;;  %v299_v25 = vpop.f32.mrb[10].mxu1 }
 0x134   :  { %12262 = vst [vmem:[#allocation65_spill] sm:$0xff] %v7885_v18  ;;  %12263 = vst [vmem:[#allocation66_spill] sm:$0xff] %v7888_v29  ;;  %v7895_v20 = vadd.f32 %v226_v28, %v118_v36  ;;  %v228_v22 = vpop.f32.mrb[11].mxu0  ;;  %v7898_v21 = vadd.f32 %v299_v25, %v7844_v35  ;;  %v301_v43 = vpop.f32.mrb[11].mxu1 }
 0x135   :  { %12264 = vst [vmem:[#allocation67_spill] sm:$0xff] %v7890_v16  ;;  %12265 = vst [vmem:[#allocation68_spill] sm:$0xff] %v7893_v27  ;;  %v7900_v18 = vadd.f32 %v228_v22, %v122_v30  ;;  %v7903_v19 = vadd.f32 %v301_v43, %v7851_v32 }
 0x136   :  { %12266 = vst [vmem:[#allocation69_spill] sm:$0xff] %v7895_v20  ;;  %12267 = vst [vmem:[#allocation70_spill] sm:$0xff] %v7898_v21 }
 0x137   :  { %12268 = vst [vmem:[#allocation71_spill] sm:$0xff] %v7900_v18  ;;  %12269 = vst [vmem:[#allocation72_spill] sm:$0xff] %v7903_v19 }
 0x139   :  { %v232_v29 = vpop.f32.mrb[12].mxu0  ;;  %v305_v14 = vpop.f32.mrb[12].mxu1 }
 0x13a   :  { %v7905_v16 = vadd.f32 %v232_v29, %v118_v36  ;;  %v234_v15 = vpop.f32.mrb[13].mxu0  ;;  %v7908_v17 = vadd.f32 %v305_v14, %v7844_v35  ;;  %v307_v28 = vpop.f32.mrb[13].mxu1 }
 0x13b   :  { %v7910_v20 = vadd.f32 %v234_v15, %v122_v30  ;;  %v236_v27 = vpop.f32.mrb[14].mxu0  ;;  %v7913_v25 = vadd.f32 %v307_v28, %v7851_v32  ;;  %v309_v22 = vpop.f32.mrb[14].mxu1  ;;  %v203_v15 = vadd.f32 %v7846_v8, %v118_v36  ;;  %v276_v28 = vadd.f32 %v7848_v9, %v7844_v35 }
 0x13c   :  { %12270 = vst [vmem:[#allocation73_spill] sm:$0xff] %v7905_v16  ;;  %12271 = vst [vmem:[#allocation74_spill] sm:$0xff] %v7908_v17  ;;  %v7915_v18 = vadd.f32 %v236_v27, %v118_v36  ;;  %v238_v43 = vpop.f32.mrb[15].mxu0  ;;  %v7918_v19 = vadd.f32 %v309_v22, %v7844_v35  ;;  %v311_v29 = vpop.f32.mrb[15].mxu1  ;;  %v278_v27 = vadd.f32 %v277_v31, %v7851_v32 }
 0x13d   :  { %12272 = vst [vmem:[#allocation75_spill] sm:$0xff] %v7910_v20  ;;  %12273 = vst [vmem:[#allocation76_spill] sm:$0xff] %v7913_v25  ;;  %v7920_v16 = vadd.f32 %v238_v43, %v122_v30  ;;  %v7923_v14 = vadd.f32 %v311_v29, %v7851_v32  ;;  %v205_v20 = vadd.f32 %v204_v37, %v122_v30 }
 0x13e   :  { %12274 = vst [vmem:[#allocation77_spill] sm:$0xff] %v7915_v18  ;;  %12275 = vst [vmem:[#allocation78_spill] sm:$0xff] %v7918_v19 }
 0x13f   :  { %12276 = vst [vmem:[#allocation79_spill] sm:$0xff] %v7920_v16  ;;  %12277 = vst [vmem:[#allocation80_spill] sm:$0xff] %v7923_v14 }
 0x141   :  { %v576_v25 = vpop.f32.mrb[16].mxu0 }
 0x142   :  { %v624_v18 = vadd.f32 %v576_v25, %v203_v15  ;;  %v617_v17 = vpop.f32.mrb[16].mxu1  ;;  %v578_v21 = vpop.f32.mrb[17].mxu0  ;;  %v7939_v15 = vld [vmem:[#allocation3 + $0x8] ss:$16 sps:$4 sm:$0xff]  }
 0x143   :  { %v626_v22 = vadd.f32 %v617_v17, %v276_v28  ;;  %v625_v19 = vadd.f32 %v578_v21, %v205_v20  ;;  %v619_v13 = vpop.f32.mrb[17].mxu1  ;;  %v580_v43 = vpop.f32.mrb[18].mxu0  ;;  %v7942_v28 = vld [vmem:[#allocation3 + $0x24] ss:$16 sps:$4 sm:$0xff]  }
 0x144   :  { %v5415_v16 = vmul.f32 -1.442695, %v624_v18  ;;  %v627_v12 = vadd.f32 %v619_v13, %v278_v27  ;;  %v581_v29 = vpop.f32.mrb[19].mxu0  ;;  %v621_v14 = vpop.f32.mrb[18].mxu1  ;;  %v7945_v27 = vld [vmem:[#allocation3 + $0x2c] ss:$16 sps:$4 sm:$0xff]  }
 0x145   :  { %v5416_v11 = vmul.f32 -1.442695, %v625_v19  ;;  %v622_v36 = vpop.f32.mrb[19].mxu1  ;;  %v5417_v30 = vmul.f32 -1.442695, %v626_v22  ;;  %v12278_v22 = vmov 0  }
 0x146   :  { %6101 = vpow2.f32 %v5415_v16  ;;  %v7950_v43 = vld [vmem:[#allocation3 + $0x20] ss:$16 sps:$4 sm:$0xff]   ;;  %v7953_v29 = vld [vmem:[#allocation3 + $0x28] ss:$16 sps:$4 sm:$0xff]   ;;  %v7956_v36 = vld [vmem:[#allocation3 + $0x44] ss:$16 sps:$4 sm:$0xff]  }
 0x147   :  { %6103 = vpow2.f32 %v5416_v11 }
 0x148   :  { %6105 = vpow2.f32 %v5417_v30  ;;  %v7959_v30 = vld [vmem:[#allocation3 + $0x4c] ss:$16 sps:$4 sm:$0xff]  }
 0x149   :  { %6107 = vtanh.f32 %v627_v12  ;;  %v7936_v12 = vld [vmem:[#allocation3] ss:$16 sps:$4 sm:$0xff]  }
 0x150   :  { %v6102_v35 = vpop.eup %6101 }
 0x151   :  { %v637_v37 = vadd.f32 1.0, %v6102_v35  ;;  %v6104_v31 = vpop.eup %6103  ;;  %v7962_v35 = vld [vmem:[#allocation3 + $0x40] ss:$16 sps:$4 sm:$0xff]  }
 0x152   :  { %v638_v8 = vadd.f32 1.0, %v6104_v31  ;;  %v6106_v20 = vpop.eup %6105  ;;  %v7968_v31 = vld [vmem:[#allocation3 + $0x64] ss:$16 sps:$4 sm:$0xff]  }
 0x153   :  { %6109 = vrcp.f32 %v637_v37  ;;  %v6108_v9 = vpop.eup %6107  ;;  %v639_v21 = vadd.f32 1.0, %v6106_v20  ;;  %v7965_v37 = vld [vmem:[#allocation3 + $0x48] ss:$16 sps:$4 sm:$0xff]   ;;  %v7974_v20 = vld [vmem:[#allocation3 + $0x60] ss:$16 sps:$4 sm:$0xff]  }
 0x154   :  { %6111 = vrcp.f32 %v638_v8  ;;  %v7971_v8 = vld [vmem:[#allocation3 + $0x6c] ss:$16 sps:$4 sm:$0xff]  }
 0x155   :  { %6113 = vrcp.f32 %v639_v21  ;;  %v7989_v21 = vld [vmem:[#allocation3 + $0x88] ss:$16 sps:$4 sm:$0xff]  }
 0x156   :  { %12279 = vst [vmem:[#allocation81_spill] sm:$0xff] %v7989_v21 }
 0x15d   :  { %v6110_v32 = vpop.eup %6109 }
 0x15e   :  { %v648_v18 = vmul.f32 %v6110_v32, %v6108_v9  ;;  %v6112_v13 = vpop.eup %6111  ;;  %v7977_v9 = vld [vmem:[#allocation3 + $0x68] ss:$16 sps:$4 sm:$0xff]   ;;  %v7980_v32 = vld [vmem:[#allocation3 + $0x84] ss:$16 sps:$4 sm:$0xff]  }
 0x15f   :  { %v647_v17 = vmul.f32 0.0, %v6112_v13  ;;  %v6114_v11 = vpop.eup %6113  ;;  %v7986_v13 = vld [vmem:[#allocation3 + $0x80] ss:$16 sps:$4 sm:$0xff]  }
 0x161   :  { %v7929_v19 = vadd.f32 %v648_v18, %v647_v17  ;;  %v7983_v18 = vld [vmem:[#allocation3 + $0x8c] ss:$16 sps:$4 sm:$0xff]   ;;  %v7992_v17 = vld [vmem:[#allocation3 + $0xa4] ss:$16 sps:$4 sm:$0xff]  }
 0x162   :  { %12280 = vst [vmem:[#allocation82_spill] sm:$0xff] %v7992_v17 }
 0x163   :  { %6115 = vtanh.f32 %v7929_v19 }
 0x16d   :  { %v6116_v16 = vpop.eup %6115 }
 0x16e   :  { %v651_v25 = vmul.f32 %v6116_v16, %v6114_v11  ;;  %v7995_v11 = vld [vmem:[#allocation3 + $0xac] ss:$16 sps:$4 sm:$0xff]   ;;  %v7998_v16 = vld [vmem:[#allocation3 + $0xa0] ss:$16 sps:$4 sm:$0xff]  }
 0x16f   :  { %12281 = vst [vmem:[#allocation83_spill] sm:$0xff] %v7995_v11  ;;  %12282 = vst [vmem:[#allocation84_spill] sm:$0xff] %v7998_v16 }
 0x170   :  { %v7932_v14 = vpack.c.bf16 %v651_v25, %v651_v25  ;;  %v8001_v25 = vld [vmem:[#allocation3 + $0xa8] ss:$16 sps:$4 sm:$0xff]  }
 0x171   :  { %12283 = vst [vmem:[#allocation85_spill] sm:$0xff] %v8001_v25 }
 0x172   :  { %1093 = vmatmul.mubr.bf16.vlgmr.msra.gmra.mrb[20].mxu0 %v7932_v14  ;;  %1134 = vmatmul.mubr.bf16.vlgmr.msra.gmra.mrb[20].mxu1 %v7932_v14 }
 0x173   :  { %1172 = vmatpush1.bf16.msra.mxu0 %v7936_v12  ;;  %1213 = vmatpush1.bf16.msra.mxu1 %v7939_v15 }
 0x174   :  { %1173 = vmatprep.subr.bf16.mxu0 %v7942_v28  ;;  %1214 = vmatprep.subr.bf16.mxu1 %v7945_v27 }
 0x175   :  { %1203 = vmatprep.mubr.bf16.mxu0 %v12278_v22  ;;  %1244 = vmatprep.mubr.bf16.mxu1 %v12278_v22 }
 0x177   :  { %1174 = vmatpush1.bf16.msra.mxu0 %v7950_v43  ;;  %1215 = vmatpush1.bf16.msra.mxu1 %v7953_v29 }
 0x178   :  { %1175 = vmatprep.subr.bf16.mxu0 %v7956_v36  ;;  %1216 = vmatprep.subr.bf16.mxu1 %v7959_v30 }
 0x17b   :  { %1176 = vmatpush1.bf16.msra.mxu0 %v7962_v35  ;;  %1217 = vmatpush1.bf16.msra.mxu1 %v7965_v37 }
 0x17c   :  { %1177 = vmatprep.subr.bf16.mxu0 %v7968_v31  ;;  %1218 = vmatprep.subr.bf16.mxu1 %v7971_v8 }
 0x17f   :  { %1178 = vmatpush1.bf16.msra.mxu0 %v7974_v20  ;;  %1219 = vmatpush1.bf16.msra.mxu1 %v7977_v9 }
 0x180   :  { %1179 = vmatprep.subr.bf16.mxu0 %v7980_v32  ;;  %1220 = vmatprep.subr.bf16.mxu1 %v7983_v18 }
 0x183   :  { %1180 = vmatpush1.bf16.msra.mxu0 %v7986_v13  ;;  %1221 = vmatpush1.bf16.msra.mxu1 %v7989_v21 }
 0x184   :  { %1181 = vmatprep.subr.bf16.mxu0 %v7992_v17  ;;  %1222 = vmatprep.subr.bf16.mxu1 %v7995_v11  ;;  %v8010_v11 = vld [vmem:[#allocation7 + $0x4] ss:$16 sps:$4 sm:$0xff]   ;;  %v8012_v17 = vld [vmem:[#allocation7 + $0xc] ss:$16 sps:$4 sm:$0xff]  }
 0x185   :  { %12284 = vst [vmem:[#allocation86_spill] sm:$0xff] %v8010_v11  ;;  %12285 = vst [vmem:[#allocation87_spill] sm:$0xff] %v8012_v17 }
 0x187   :  { %1182 = vmatpush1.bf16.msra.mxu0 %v7998_v16  ;;  %1223 = vmatpush1.bf16.msra.mxu1 %v8001_v25  ;;  %v8016_v25 = vld [vmem:[#allocation7] ss:$16 sps:$4 sm:$0xff]  }
 0x188   :  { %1183 = vmatprep.subr.bf16.mxu0 %v7605_v40  ;;  %1224 = vmatprep.subr.bf16.mxu1 %v7608_v41  ;;  %12286 = vst [vmem:[#allocation88_spill] sm:$0xff] %v8016_v25  ;;  %v8018_v40 = vld [vmem:[#allocation7 + $0x8] ss:$16 sps:$4 sm:$0xff]   ;;  %v8022_v41 = vld [vmem:[#allocation7 + $0x24] ss:$16 sps:$4 sm:$0xff]  }
 0x189   :  { %12287 = vst [vmem:[#allocation89_spill] sm:$0xff] %v8018_v40  ;;  %12288 = vst [vmem:[#allocation90_spill] sm:$0xff] %v8022_v41 }
 0x18b   :  { %1184 = vmatpush1.bf16.msra.mxu0 %v7610_v42  ;;  %1225 = vmatpush1.bf16.msra.mxu1 %v7612_v44  ;;  %v8024_v42 = vld [vmem:[#allocation7 + $0x2c] ss:$16 sps:$4 sm:$0xff]   ;;  %v8030_v44 = vld [vmem:[#allocation7 + $0x20] ss:$16 sps:$4 sm:$0xff]  }
 0x18c   :  { %1185 = vmatprep.subr.bf16.mxu0 %v7614_v45  ;;  %1226 = vmatprep.subr.bf16.mxu1 %v7616_v46  ;;  %12289 = vst [vmem:[#allocation91_spill] sm:$0xff] %v8024_v42  ;;  %12290 = vst [vmem:[#allocation92_spill] sm:$0xff] %v8030_v44  ;;  %v8032_v45 = vld [vmem:[#allocation7 + $0x28] ss:$16 sps:$4 sm:$0xff]   ;;  %v8036_v46 = vld [vmem:[#allocation7 + $0x44] ss:$16 sps:$4 sm:$0xff]  }
 0x18d   :  { %12291 = vst [vmem:[#allocation93_spill] sm:$0xff] %v8032_v45  ;;  %12292 = vst [vmem:[#allocation94_spill] sm:$0xff] %v8036_v46 }
 0x18f   :  { %1186 = vmatpush1.bf16.msra.mxu0 %v7620_v47  ;;  %1227 = vmatpush1.bf16.msra.mxu1 %v7624_v48  ;;  %v8038_v47 = vld [vmem:[#allocation7 + $0x4c] ss:$16 sps:$4 sm:$0xff]   ;;  %v12294_v48 = vmov 0.0|0.0  }
 0x190   :  { %1688 = vmatprep.subr.bf16.mxu0 %v8010_v11  ;;  %1729 = vmatprep.subr.bf16.mxu1 %v8012_v17  ;;  %12293 = vst [vmem:[#allocation95_spill] sm:$0xff] %v8038_v47 }
 0x192   :  { %1204 = vmatmul.mubr.bf16.vlgmr.msra.gmra.mrb[24].mxu0 %v7932_v14  ;;  %1245 = vmatmul.mubr.bf16.vlgmr.msra.gmra.mrb[24].mxu1 %v7932_v14  ;;  %v8044_v14 = vld [vmem:[#allocation7 + $0x40] ss:$16 sps:$4 sm:$0xff]  }
 0x193   :  { %1689 = vmatpush1.bf16.msra.mxu0 %v8016_v25  ;;  %1730 = vmatpush1.bf16.msra.mxu1 %v8018_v40  ;;  %12295 = vst [vmem:[#allocation96_spill] sm:$0xff] %v8044_v14  ;;  %v8046_v40 = vld [vmem:[#allocation7 + $0x48] ss:$16 sps:$4 sm:$0xff]   ;;  %v8056_v25 = vld [vmem:[#allocation7 + $0x60] ss:$16 sps:$4 sm:$0xff]  }
 0x194   :  { %1690 = vmatprep.subr.bf16.mxu0 %v8022_v41  ;;  %1731 = vmatprep.subr.bf16.mxu1 %v8024_v42  ;;  %12296 = vst [vmem:[#allocation97_spill] sm:$0xff] %v8046_v40  ;;  %v8050_v42 = vld [vmem:[#allocation7 + $0x64] ss:$16 sps:$4 sm:$0xff]   ;;  %v8052_v41 = vld [vmem:[#allocation7 + $0x6c] ss:$16 sps:$4 sm:$0xff]   ;;  %12299 = vst [vmem:[#allocation100_spill] sm:$0xff] %v8056_v25 }
 0x195   :  { %1720 = vmatprep.mubr.bf16.mxu0 %v12294_v48  ;;  %1761 = vmatprep.mubr.bf16.mxu1 %v12294_v48  ;;  %12297 = vst [vmem:[#allocation98_spill] sm:$0xff] %v8050_v42  ;;  %12298 = vst [vmem:[#allocation99_spill] sm:$0xff] %v8052_v41 }
 0x197   :  { %1691 = vmatpush1.bf16.msra.mxu0 %v8030_v44  ;;  %1732 = vmatpush1.bf16.msra.mxu1 %v8032_v45  ;;  %v8058_v44 = vld [vmem:[#allocation7 + $0x68] ss:$16 sps:$4 sm:$0xff]   ;;  %v8068_v45 = vld [vmem:[#allocation7 + $0x80] ss:$16 sps:$4 sm:$0xff]  }
 0x198   :  { %1692 = vmatprep.subr.bf16.mxu0 %v8036_v46  ;;  %1733 = vmatprep.subr.bf16.mxu1 %v8038_v47  ;;  %12300 = vst [vmem:[#allocation101_spill] sm:$0xff] %v8058_v44  ;;  %v8064_v47 = vld [vmem:[#allocation7 + $0x84] ss:$16 sps:$4 sm:$0xff]   ;;  %v8066_v46 = vld [vmem:[#allocation7 + $0x8c] ss:$16 sps:$4 sm:$0xff]   ;;  %12303 = vst [vmem:[#allocation104_spill] sm:$0xff] %v8068_v45 }
 0x199   :  { %12301 = vst [vmem:[#allocation102_spill] sm:$0xff] %v8064_v47  ;;  %12302 = vst [vmem:[#allocation103_spill] sm:$0xff] %v8066_v46 }
 0x19b   :  { %1693 = vmatpush1.bf16.msra.mxu0 %v8044_v14  ;;  %1734 = vmatpush1.bf16.msra.mxu1 %v8046_v40  ;;  %v8070_v14 = vld [vmem:[#allocation7 + $0x88] ss:$16 sps:$4 sm:$0xff]  }
 0x19c   :  { %1694 = vmatprep.subr.bf16.mxu0 %v8050_v42  ;;  %1735 = vmatprep.subr.bf16.mxu1 %v8052_v41  ;;  %12304 = vst [vmem:[#allocation105_spill] sm:$0xff] %v8070_v14  ;;  %v8076_v41 = vld [vmem:[#allocation7 + $0xa4] ss:$16 sps:$4 sm:$0xff]   ;;  %v8082_v42 = vld [vmem:[#allocation7 + $0xa8] ss:$16 sps:$4 sm:$0xff]  }
 0x19d   :  { %12305 = vst [vmem:[#allocation106_spill] sm:$0xff] %v8076_v41  ;;  %12308 = vst [vmem:[#allocation109_spill] sm:$0xff] %v8082_v42 }
 0x19f   :  { %1695 = vmatpush1.bf16.msra.mxu0 %v8056_v25  ;;  %1736 = vmatpush1.bf16.msra.mxu1 %v8058_v44  ;;  %v8078_v25 = vld [vmem:[#allocation7 + $0xac] ss:$16 sps:$4 sm:$0xff]   ;;  %v8080_v44 = vld [vmem:[#allocation7 + $0xa0] ss:$16 sps:$4 sm:$0xff]  }
 0x1a0   :  { %1696 = vmatprep.subr.bf16.mxu0 %v8064_v47  ;;  %1737 = vmatprep.subr.bf16.mxu1 %v8066_v46  ;;  %12306 = vst [vmem:[#allocation107_spill] sm:$0xff] %v8078_v25  ;;  %12307 = vst [vmem:[#allocation108_spill] sm:$0xff] %v8080_v44  ;;  %v8088_v46 = vld [vmem:[#allocation7 + $0xc4] ss:$16 sps:$4 sm:$0xff]   ;;  %v8094_v47 = vld [vmem:[#allocation7 + $0xc8] ss:$16 sps:$4 sm:$0xff]  }
 0x1a1   :  { %12309 = vst [vmem:[#allocation110_spill] sm:$0xff] %v8088_v46  ;;  %12312 = vst [vmem:[#allocation113_spill] sm:$0xff] %v8094_v47 }
 0x1a3   :  { %1697 = vmatpush1.bf16.msra.mxu0 %v8068_v45  ;;  %1738 = vmatpush1.bf16.msra.mxu1 %v8070_v14  ;;  %v8090_v45 = vld [vmem:[#allocation7 + $0xcc] ss:$16 sps:$4 sm:$0xff]   ;;  %v8092_v14 = vld [vmem:[#allocation7 + $0xc0] ss:$16 sps:$4 sm:$0xff]  }
 0x1a4   :  { %1698 = vmatprep.subr.bf16.mxu0 %v8076_v41  ;;  %1739 = vmatprep.subr.bf16.mxu1 %v8078_v25  ;;  %12310 = vst [vmem:[#allocation111_spill] sm:$0xff] %v8090_v45  ;;  %12311 = vst [vmem:[#allocation112_spill] sm:$0xff] %v8092_v14  ;;  %v8100_v25 = vld [vmem:[#allocation7 + $0xe4] ss:$16 sps:$4 sm:$0xff]   ;;  %v8106_v41 = vld [vmem:[#allocation7 + $0xe8] ss:$16 sps:$4 sm:$0xff]  }
 0x1a5   :  { %12313 = vst [vmem:[#allocation114_spill] sm:$0xff] %v8100_v25  ;;  %12316 = vst [vmem:[#allocation117_spill] sm:$0xff] %v8106_v41 }
 0x1a7   :  { %1699 = vmatpush1.bf16.msra.mxu0 %v8080_v44  ;;  %1740 = vmatpush1.bf16.msra.mxu1 %v8082_v42  ;;  %v8102_v44 = vld [vmem:[#allocation7 + $0xec] ss:$16 sps:$4 sm:$0xff]   ;;  %v8104_v42 = vld [vmem:[#allocation7 + $0xe0] ss:$16 sps:$4 sm:$0xff]  }
 0x1a8   :  { %1700 = vmatprep.subr.bf16.mxu0 %v8088_v46  ;;  %1741 = vmatprep.subr.bf16.mxu1 %v8090_v45  ;;  %12314 = vst [vmem:[#allocation115_spill] sm:$0xff] %v8102_v44  ;;  %12315 = vst [vmem:[#allocation116_spill] sm:$0xff] %v8104_v42  ;;  %v8112_v45 = vld [vmem:[#allocation7 + $0x104] ss:$16 sps:$4 sm:$0xff]   ;;  %v8118_v46 = vld [vmem:[#allocation7 + $0x108] ss:$16 sps:$4 sm:$0xff]  }
 0x1a9   :  { %12317 = vst [vmem:[#allocation118_spill] sm:$0xff] %v8112_v45  ;;  %12320 = vst [vmem:[#allocation121_spill] sm:$0xff] %v8118_v46 }
 0x1ab   :  { %1701 = vmatpush1.bf16.msra.mxu0 %v8092_v14  ;;  %1742 = vmatpush1.bf16.msra.mxu1 %v8094_v47  ;;  %v8114_v14 = vld [vmem:[#allocation7 + $0x10c] ss:$16 sps:$4 sm:$0xff]   ;;  %v8116_v47 = vld [vmem:[#allocation7 + $0x100] ss:$16 sps:$4 sm:$0xff]  }
 0x1ac   :  { %1702 = vmatprep.subr.bf16.mxu0 %v8100_v25  ;;  %1743 = vmatprep.subr.bf16.mxu1 %v8102_v44  ;;  %12318 = vst [vmem:[#allocation119_spill] sm:$0xff] %v8114_v14  ;;  %12319 = vst [vmem:[#allocation120_spill] sm:$0xff] %v8116_v47  ;;  %v8124_v44 = vld [vmem:[#allocation7 + $0x124] ss:$16 sps:$4 sm:$0xff]   ;;  %v8130_v25 = vld [vmem:[#allocation7 + $0x128] ss:$16 sps:$4 sm:$0xff]  }
 0x1ad   :  { %12321 = vst [vmem:[#allocation122_spill] sm:$0xff] %v8124_v44  ;;  %12324 = vst [vmem:[#allocation125_spill] sm:$0xff] %v8130_v25 }
 0x1af   :  { %1703 = vmatpush1.bf16.msra.mxu0 %v8104_v42  ;;  %1744 = vmatpush1.bf16.msra.mxu1 %v8106_v41  ;;  %v8126_v42 = vld [vmem:[#allocation7 + $0x12c] ss:$16 sps:$4 sm:$0xff]   ;;  %v8128_v41 = vld [vmem:[#allocation7 + $0x120] ss:$16 sps:$4 sm:$0xff]  }
 0x1b0   :  { %1704 = vmatprep.subr.bf16.mxu0 %v8112_v45  ;;  %1745 = vmatprep.subr.bf16.mxu1 %v8114_v14  ;;  %12322 = vst [vmem:[#allocation123_spill] sm:$0xff] %v8126_v42  ;;  %12323 = vst [vmem:[#allocation124_spill] sm:$0xff] %v8128_v41  ;;  %v8136_v14 = vld [vmem:[#allocation7 + $0x144] ss:$16 sps:$4 sm:$0xff]   ;;  %v8142_v45 = vld [vmem:[#allocation7 + $0x148] ss:$16 sps:$4 sm:$0xff]  }
 0x1b1   :  { %12325 = vst [vmem:[#allocation126_spill] sm:$0xff] %v8136_v14  ;;  %12328 = vst [vmem:[#allocation129_spill] sm:$0xff] %v8142_v45 }
 0x1b3   :  { %1705 = vmatpush1.bf16.msra.mxu0 %v8116_v47  ;;  %1746 = vmatpush1.bf16.msra.mxu1 %v8118_v46  ;;  %v8138_v47 = vld [vmem:[#allocation7 + $0x14c] ss:$16 sps:$4 sm:$0xff]   ;;  %v8140_v46 = vld [vmem:[#allocation7 + $0x140] ss:$16 sps:$4 sm:$0xff]  }
 0x1b4   :  { %1706 = vmatprep.subr.bf16.mxu0 %v8124_v44  ;;  %1747 = vmatprep.subr.bf16.mxu1 %v8126_v42  ;;  %12326 = vst [vmem:[#allocation127_spill] sm:$0xff] %v8138_v47  ;;  %12327 = vst [vmem:[#allocation128_spill] sm:$0xff] %v8140_v46  ;;  %v8148_v42 = vld [vmem:[#allocation7 + $0x164] ss:$16 sps:$4 sm:$0xff]   ;;  %v8154_v44 = vld [vmem:[#allocation7 + $0x168] ss:$16 sps:$4 sm:$0xff]  }
 0x1b5   :  { %12329 = vst [vmem:[#allocation130_spill] sm:$0xff] %v8148_v42  ;;  %12332 = vst [vmem:[#allocation133_spill] sm:$0xff] %v8154_v44 }
 0x1b7   :  { %1707 = vmatpush1.bf16.msra.mxu0 %v8128_v41  ;;  %1748 = vmatpush1.bf16.msra.mxu1 %v8130_v25  ;;  %v8150_v41 = vld [vmem:[#allocation7 + $0x16c] ss:$16 sps:$4 sm:$0xff]   ;;  %v8152_v25 = vld [vmem:[#allocation7 + $0x160] ss:$16 sps:$4 sm:$0xff]  }
 0x1b8   :  { %1708 = vmatprep.subr.bf16.mxu0 %v8136_v14  ;;  %1749 = vmatprep.subr.bf16.mxu1 %v8138_v47  ;;  %12330 = vst [vmem:[#allocation131_spill] sm:$0xff] %v8150_v41  ;;  %12331 = vst [vmem:[#allocation132_spill] sm:$0xff] %v8152_v25  ;;  %v8160_v47 = vld [vmem:[#allocation7 + $0x184] ss:$16 sps:$4 sm:$0xff]   ;;  %v8166_v14 = vld [vmem:[#allocation7 + $0x188] ss:$16 sps:$4 sm:$0xff]  }
 0x1b9   :  { %12333 = vst [vmem:[#allocation134_spill] sm:$0xff] %v8160_v47  ;;  %12336 = vst [vmem:[#allocation137_spill] sm:$0xff] %v8166_v14 }
 0x1bb   :  { %1709 = vmatpush1.bf16.msra.mxu0 %v8140_v46  ;;  %1750 = vmatpush1.bf16.msra.mxu1 %v8142_v45  ;;  %v8162_v46 = vld [vmem:[#allocation7 + $0x18c] ss:$16 sps:$4 sm:$0xff]   ;;  %v8164_v45 = vld [vmem:[#allocation7 + $0x180] ss:$16 sps:$4 sm:$0xff]  }
 0x1bc   :  { %1710 = vmatprep.subr.bf16.mxu0 %v8148_v42  ;;  %1751 = vmatprep.subr.bf16.mxu1 %v8150_v41  ;;  %12334 = vst [vmem:[#allocation135_spill] sm:$0xff] %v8162_v46  ;;  %12335 = vst [vmem:[#allocation136_spill] sm:$0xff] %v8164_v45  ;;  %v8172_v41 = vld [vmem:[#allocation7 + $0x1a4] ss:$16 sps:$4 sm:$0xff]   ;;  %v8178_v42 = vld [vmem:[#allocation7 + $0x1a8] ss:$16 sps:$4 sm:$0xff]  }
 0x1bd   :  { %12337 = vst [vmem:[#allocation138_spill] sm:$0xff] %v8172_v41  ;;  %12340 = vst [vmem:[#allocation141_spill] sm:$0xff] %v8178_v42 }
 0x1bf   :  { %1711 = vmatpush1.bf16.msra.mxu0 %v8152_v25  ;;  %1752 = vmatpush1.bf16.msra.mxu1 %v8154_v44  ;;  %v8174_v25 = vld [vmem:[#allocation7 + $0x1ac] ss:$16 sps:$4 sm:$0xff]   ;;  %v8176_v44 = vld [vmem:[#allocation7 + $0x1a0] ss:$16 sps:$4 sm:$0xff]  }
 0x1c0   :  { %1712 = vmatprep.subr.bf16.mxu0 %v8160_v47  ;;  %1753 = vmatprep.subr.bf16.mxu1 %v8162_v46  ;;  %12338 = vst [vmem:[#allocation139_spill] sm:$0xff] %v8174_v25  ;;  %12339 = vst [vmem:[#allocation140_spill] sm:$0xff] %v8176_v44  ;;  %v8184_v46 = vld [vmem:[#allocation7 + $0x1c4] ss:$16 sps:$4 sm:$0xff]   ;;  %v8190_v47 = vld [vmem:[#allocation7 + $0x1c8] ss:$16 sps:$4 sm:$0xff]  }
 0x1c1   :  { %12341 = vst [vmem:[#allocation142_spill] sm:$0xff] %v8184_v46  ;;  %12344 = vst [vmem:[#allocation145_spill] sm:$0xff] %v8190_v47 }
 0x1c3   :  { %1713 = vmatpush1.bf16.msra.mxu0 %v8164_v45  ;;  %1754 = vmatpush1.bf16.msra.mxu1 %v8166_v14  ;;  %v8186_v45 = vld [vmem:[#allocation7 + $0x1cc] ss:$16 sps:$4 sm:$0xff]   ;;  %v8188_v14 = vld [vmem:[#allocation7 + $0x1c0] ss:$16 sps:$4 sm:$0xff]  }
 0x1c4   :  { %1714 = vmatprep.subr.bf16.mxu0 %v8172_v41  ;;  %1755 = vmatprep.subr.bf16.mxu1 %v8174_v25  ;;  %12342 = vst [vmem:[#allocation143_spill] sm:$0xff] %v8186_v45  ;;  %12343 = vst [vmem:[#allocation144_spill] sm:$0xff] %v8188_v14  ;;  %v8196_v25 = vld [vmem:[#allocation7 + $0x1e4] ss:$16 sps:$4 sm:$0xff]   ;;  %v8202_v41 = vld [vmem:[#allocation7 + $0x1e8] ss:$16 sps:$4 sm:$0xff]  }
 0x1c5   :  { %12345 = vst [vmem:[#allocation146_spill] sm:$0xff] %v8196_v25  ;;  %12348 = vst [vmem:[#allocation149_spill] sm:$0xff] %v8202_v41 }
 0x1c7   :  { %1715 = vmatpush1.bf16.msra.mxu0 %v8176_v44  ;;  %1756 = vmatpush1.bf16.msra.mxu1 %v8178_v42  ;;  %v8198_v44 = vld [vmem:[#allocation7 + $0x1ec] ss:$16 sps:$4 sm:$0xff]   ;;  %v8200_v42 = vld [vmem:[#allocation7 + $0x1e0] ss:$16 sps:$4 sm:$0xff]  }
 0x1c8   :  { %1716 = vmatprep.subr.bf16.mxu0 %v8184_v46  ;;  %1757 = vmatprep.subr.bf16.mxu1 %v8186_v45  ;;  %12346 = vst [vmem:[#allocation147_spill] sm:$0xff] %v8198_v44  ;;  %12347 = vst [vmem:[#allocation148_spill] sm:$0xff] %v8200_v42 }
 0x1cb   :  { %1717 = vmatpush1.bf16.msra.mxu0 %v8188_v14  ;;  %1758 = vmatpush1.bf16.msra.mxu1 %v8190_v47  ;;  %v718_v47 = vld [vmem:[%s11556_s5] sm:$0xf] }
 0x1cc   :  { %1718 = vmatprep.subr.bf16.mxu0 %v8196_v25  ;;  %1759 = vmatprep.subr.bf16.mxu1 %v8198_v44  ;;  %v8214_v14 = vrot.slane %v718_v47, %v7836_v34  ;;  %v8217_v45 = vrot.slane %v718_v47, %v7841_v0  ;;  %v8222_v34 = vrot.slane %v718_v47, %v7832_v33 }
 0x1cd   :  { %v8225_v0 = vrot.slane %v718_v47, %v7834_v38 }
 0x1ce   :  { %12349 = vst [vmem:[#allocation150_spill] sm:$0xff] %v8214_v14  ;;  %12350 = vst [vmem:[#allocation151_spill] sm:$0xff] %v8217_v45 }
 0x1cf   :  { %1719 = vmatpush1.bf16.msra.mxu0 %v8200_v42  ;;  %1760 = vmatpush1.bf16.msra.mxu1 %v8202_v41  ;;  %12351 = vst [vmem:[#allocation152_spill] sm:$0xff] %v8222_v34  ;;  %12352 = vst [vmem:[#allocation153_spill] sm:$0xff] %v8225_v0 }
 0x1d0   :  { %1795 = vmatprep.subr.bf16.mxu0 %v7636_v49  ;;  %1836 = vmatprep.subr.bf16.mxu1 %v7638_v50 }
 0x245   :  { %v1094_v25 = vpop.f32.mrb[20].mxu0  ;;  %v1135_v44 = vpop.f32.mrb[20].mxu1 }
 0x246   :  { %v1095_v42 = vadd.f32 %v1094_v25, %v8214_v14  ;;  %v1096_v46 = vpop.f32.mrb[21].mxu0  ;;  %v1137_v41 = vpop.f32.mrb[21].mxu1  ;;  %v1136_v25 = vadd.f32 %v1135_v44, %v8222_v34 }
 0x247   :  { %v1097_v49 = vadd.f32 %v1096_v46, %v8217_v45  ;;  %v1098_v40 = vpop.f32.mrb[22].mxu0  ;;  %v1139_v50 = vpop.f32.mrb[22].mxu1  ;;  %v1138_v14 = vadd.f32 %v1137_v41, %v8225_v0 }
 0x248   :  { %v5482_v17 = vmul.f32 -1.442695, %v1095_v42  ;;  %v1099_v11 = vpop.f32.mrb[23].mxu0  ;;  %v1140_v48 = vpop.f32.mrb[23].mxu1  ;;  %v5484_v21 = vmul.f32 -1.442695, %v1136_v25 }
 0x249   :  { %v5483_v16 = vmul.f32 -1.442695, %v1097_v49 }
 0x24a   :  { %6117 = vpow2.f32 %v5482_v17 }
 0x24b   :  { %6119 = vpow2.f32 %v5483_v16 }
 0x24c   :  { %6121 = vtanh.f32 %v1138_v14 }
 0x24d   :  { %6123 = vpow2.f32 %v5484_v21 }
 0x254   :  { %v6118_v46 = vpop.eup %6117 }
 0x255   :  { %v1151_v40 = vadd.f32 1.0, %v6118_v46  ;;  %v6120_v42 = vpop.eup %6119 }
 0x256   :  { %v1152_v11 = vadd.f32 1.0, %v6120_v42  ;;  %v6122_v17 = vpop.eup %6121 }
 0x257   :  { %6125 = vrcp.f32 %v1151_v40  ;;  %v6124_v48 = vpop.eup %6123 }
 0x258   :  { %6127 = vrcp.f32 %v1152_v11  ;;  %v1153_v47 = vadd.f32 1.0, %v6124_v48 }
 0x25a   :  { %6129 = vrcp.f32 %v1153_v47 }
 0x261   :  { %v6126_v49 = vpop.eup %6125 }
 0x262   :  { %v1162_v16 = vmul.f32 %v6126_v49, %v6122_v17  ;;  %v6128_v50 = vpop.eup %6127 }
 0x263   :  { %v1161_v45 = vmul.f32 0.0, %v6128_v50 }
 0x265   :  { %v1205_v38 = vpop.f32.mrb[24].mxu0  ;;  %v1246_v44 = vpop.f32.mrb[24].mxu1  ;;  %v8229_v34 = vadd.f32 %v1162_v16, %v1161_v45 }
 0x266   :  { %v1253_v41 = vadd.f32 %v1205_v38, %v7855_v39  ;;  %v1255_v14 = vadd.f32 %v1246_v44, %v7858_v26  ;;  %v1207_v25 = vpop.f32.mrb[25].mxu0  ;;  %v1248_v21 = vpop.f32.mrb[25].mxu1 }
 0x267   :  { %v1254_v46 = vadd.f32 %v1207_v25, %v7860_v24  ;;  %v1256_v40 = vadd.f32 %v1248_v21, %v7863_v23  ;;  %v1209_v42 = vpop.f32.mrb[26].mxu0  ;;  %v1250_v11 = vpop.f32.mrb[26].mxu1  ;;  %6131 = vtanh.f32 %v8229_v34  ;;  %v12371_v25 = vld [vmem:[#allocation31_spill] sm:$0xff] }
 0x268   :  { %v5485_v17 = vmul.f32 -1.442695, %v1253_v41  ;;  %v1210_v48 = vpop.f32.mrb[27].mxu0  ;;  %v1251_v49 = vpop.f32.mrb[27].mxu1  ;;  %v12369_v41 = vld [vmem:[#allocation29_spill] sm:$0xff]  ;;  %v12374_v42 = vld [vmem:[#allocation34_spill] sm:$0xff] }
 0x269   :  { %v5486_v45 = vmul.f32 -1.442695, %v1254_v46  ;;  %v6130_v38 = vpop.eup %6129  ;;  %v12372_v46 = vld [vmem:[#allocation32_spill] sm:$0xff]  ;;  %v12375_v11 = vld [vmem:[#allocation35_spill] sm:$0xff]  ;;  %v12377_v49 = vld [vmem:[#allocation37_spill] sm:$0xff] }
 0x26a   :  { %6133 = vpow2.f32 %v5485_v17  ;;  %v12376_v48 = vld [vmem:[#allocation36_spill] sm:$0xff] }
 0x26b   :  { %6135 = vpow2.f32 %v5486_v45  ;;  %v12378_v45 = vld [vmem:[#allocation38_spill] sm:$0xff] }
 0x26c   :  { %6137 = vtanh.f32 %v1256_v40  ;;  %v12373_v40 = vld [vmem:[#allocation33_spill] sm:$0xff] }
 0x271   :  { %v6132_v39 = vpop.eup %6131 }
 0x272   :  { %v1165_v26 = vmul.f32 %v6132_v39, %v6130_v38  ;;  %v12379_v38 = vld [vmem:[#allocation39_spill] sm:$0xff]  ;;  %v12380_v39 = vld [vmem:[#allocation40_spill] sm:$0xff] }
 0x274   :  { %v6134_v16 = vpop.eup %6133  ;;  %v1281_v47 = vpack.c.bf16 %v1165_v26, %v1165_v26  ;;  %v12381_v26 = vld [vmem:[#allocation41_spill] sm:$0xff] }
 0x275   :  { %v1266_v50 = vadd.f32 1.0, %v6134_v16  ;;  %v6136_v44 = vpop.eup %6135  ;;  %v12382_v16 = vld [vmem:[#allocation42_spill] sm:$0xff] }
 0x276   :  { %v1267_v23 = vadd.f32 1.0, %v6136_v44  ;;  %1721 = vmatmul.mubr.bf16.vlgmr.msra.gmra.mrb[28].mxu0 %v1281_v47  ;;  %1762 = vmatmul.mubr.bf16.vlgmr.msra.gmra.mrb[28].mxu1 %v1281_v47  ;;  %v6138_v24 = vpop.eup %6137  ;;  %v12385_v44 = vld [vmem:[#allocation45_spill] sm:$0xff] }
 0x277   :  { %6139 = vrcp.f32 %v1266_v50  ;;  %1796 = vmatpush1.bf16.msra.mxu0 %v7640_v51  ;;  %1837 = vmatpush1.bf16.msra.mxu1 %v7642_v52  ;;  %v12383_v50 = vld [vmem:[#allocation43_spill] sm:$0xff] }
 0x278   :  { %6141 = vrcp.f32 %v1267_v23  ;;  %1827 = vmatprep.mubr.bf16.mxu0 %v1281_v47  ;;  %1868 = vmatprep.mubr.bf16.mxu1 %v1281_v47  ;;  %v12384_v47 = vld [vmem:[#allocation44_spill] sm:$0xff]  ;;  %v12386_v23 = vld [vmem:[#allocation46_spill] sm:$0xff] }
 0x279   :  { %1797 = vmatprep.subr.bf16.mxu0 %v7648_v53  ;;  %1838 = vmatprep.subr.bf16.mxu1 %v7650_v54 }
 0x27b   :  { %1798 = vmatpush1.bf16.msra.mxu0 %v7652_v55  ;;  %1839 = vmatpush1.bf16.msra.mxu1 %v7654_v56  ;;  %v12353_v56 = vld [vmem:[#allocation13_spill] sm:$0xff] }
 0x27c   :  { %1799 = vmatprep.subr.bf16.mxu0 %v7660_v57  ;;  %1840 = vmatprep.subr.bf16.mxu1 %v7662_v58  ;;  %v12354_v57 = vld [vmem:[#allocation14_spill] sm:$0xff]  ;;  %v12355_v58 = vld [vmem:[#allocation15_spill] sm:$0xff] }
 0x27f   :  { %1800 = vmatpush1.bf16.msra.mxu0 %v7664_v59  ;;  %1841 = vmatpush1.bf16.msra.mxu1 %v7666_v60  ;;  %v12356_v59 = vld [vmem:[#allocation16_spill] sm:$0xff]  ;;  %v12357_v60 = vld [vmem:[#allocation17_spill] sm:$0xff] }
 0x280   :  { %1801 = vmatprep.subr.bf16.mxu0 %v7672_v61  ;;  %1842 = vmatprep.subr.bf16.mxu1 %v7674_v62  ;;  %v5487_v61 = vmul.f32 -1.442695, %v1255_v14  ;;  %v12358_v62 = vld [vmem:[#allocation18_spill] sm:$0xff] }
 0x281   :  { %v6140_v51 = vpop.eup %6139  ;;  %v12370_v14 = vld [vmem:[#allocation30_spill] sm:$0xff] }
 0x282   :  { %v1277_v52 = vmul.f32 %v6140_v51, %v6138_v24  ;;  %v6142_v53 = vpop.eup %6141  ;;  %6143 = vpow2.f32 %v5487_v61  ;;  %v12387_v24 = vld [vmem:[#allocation47_spill] sm:$0xff] }
 0x283   :  { %v1276_v54 = vmul.f32 %v6142_v53, %v7929_v19  ;;  %1802 = vmatpush1.bf16.msra.mxu0 %v7676_v63  ;;  %1843 = vmatpush1.bf16.msra.mxu1 %v7678_v1  ;;  %v12359_v63 = vld [vmem:[#allocation19_spill] sm:$0xff]  ;;  %v12360_v1 = vld [vmem:[#allocation20_spill] sm:$0xff] }
 0x284   :  { %1803 = vmatprep.subr.bf16.mxu0 %v7684_v2  ;;  %1844 = vmatprep.subr.bf16.mxu1 %v7686_v3  ;;  %v12361_v2 = vld [vmem:[#allocation21_spill] sm:$0xff]  ;;  %v12362_v3 = vld [vmem:[#allocation22_spill] sm:$0xff]  ;;  %v12368_v19 = vld [vmem:[#allocation28_spill] sm:$0xff] }
 0x285   :  { %v8253_v55 = vadd.f32 %v1277_v52, %v1276_v54  ;;  %v12388_v53 = vld [vmem:[#allocation48_spill] sm:$0xff]  ;;  %v12389_v54 = vld [vmem:[#allocation49_spill] sm:$0xff] }
 0x287   :  { %1804 = vmatpush1.bf16.msra.mxu0 %v7690_v4  ;;  %1845 = vmatpush1.bf16.msra.mxu1 %v7692_v5  ;;  %v12363_v4 = vld [vmem:[#allocation23_spill] sm:$0xff]  ;;  %v12364_v5 = vld [vmem:[#allocation24_spill] sm:$0xff]  ;;  %6145 = vtanh.f32 %v8253_v55 }
 0x288   :  { %1805 = vmatprep.subr.bf16.mxu0 %v7696_v6  ;;  %1846 = vmatprep.subr.bf16.mxu1 %v7698_v7  ;;  %v12365_v6 = vld [vmem:[#allocation25_spill] sm:$0xff]  ;;  %v12366_v7 = vld [vmem:[#allocation26_spill] sm:$0xff] }
 0x28b   :  { %1806 = vmatpush1.bf16.msra.mxu0 %v7700_v10  ;;  %1847 = vmatpush1.bf16.msra.mxu1 %v12353_v56  ;;  %v12367_v10 = vld [vmem:[#allocation27_spill] sm:$0xff]  ;;  %v12390_v56 = vld [vmem:[#allocation50_spill] sm:$0xff] }
 0x28c   :  { %1807 = vmatprep.subr.bf16.mxu0 %v12354_v57  ;;  %1848 = vmatprep.subr.bf16.mxu1 %v12355_v58  ;;  %v6144_v21 = vpop.eup %6143  ;;  %v12391_v57 = vld [vmem:[#allocation51_spill] sm:$0xff] }
 0x28d   :  { %v1268_v17 = vadd.f32 1.0, %v6144_v21  ;;  %v8400_v21 = vld [vmem:[#allocation8 + $0x68] ss:$16 sps:$4 sm:$0xff]  }
 0x28f   :  { %1808 = vmatpush1.bf16.msra.mxu0 %v12356_v59  ;;  %1849 = vmatpush1.bf16.msra.mxu1 %v12357_v60  ;;  %6147 = vrcp.f32 %v1268_v17  ;;  %v12392_v59 = vld [vmem:[#allocation52_spill] sm:$0xff]  ;;  %v12393_v60 = vld [vmem:[#allocation53_spill] sm:$0xff] }
 0x290   :  { %1809 = vmatprep.subr.bf16.mxu0 %v12358_v62  ;;  %1850 = vmatprep.subr.bf16.mxu1 %v12359_v63  ;;  %v8302_v62 = vld [vmem:[#allocation3 + $0x4] ss:$16 sps:$4 sm:$0xff]   ;;  %v8305_v63 = vld [vmem:[#allocation3 + $0xc] ss:$16 sps:$4 sm:$0xff]  }
 0x291   :  { %v6146_v51 = vpop.eup %6145  ;;  %v8416_v17 = vld [vmem:[#allocation8 + $0xa4] ss:$16 sps:$4 sm:$0xff]  }
 0x293   :  { %1810 = vmatpush1.bf16.msra.mxu0 %v12360_v1  ;;  %1851 = vmatpush1.bf16.msra.mxu1 %v12361_v2  ;;  %v8366_v1 = vld [vmem:[#allocation8 + $0x24] ss:$16 sps:$4 sm:$0xff]   ;;  %v8368_v2 = vld [vmem:[#allocation8 + $0x2c] ss:$16 sps:$4 sm:$0xff]  }
 0x294   :  { %1811 = vmatprep.subr.bf16.mxu0 %v12362_v3  ;;  %1852 = vmatprep.subr.bf16.mxu1 %v12363_v4  ;;  %v8372_v3 = vld [vmem:[#allocation8 + $0x20] ss:$16 sps:$4 sm:$0xff]   ;;  %v8374_v4 = vld [vmem:[#allocation8 + $0x28] ss:$16 sps:$4 sm:$0xff]  }
 0x297   :  { %1812 = vmatpush1.bf16.msra.mxu0 %v12364_v5  ;;  %1853 = vmatpush1.bf16.msra.mxu1 %v12365_v6  ;;  %v8378_v5 = vld [vmem:[#allocation8 + $0x44] ss:$16 sps:$4 sm:$0xff]   ;;  %v8380_v6 = vld [vmem:[#allocation8 + $0x4c] ss:$16 sps:$4 sm:$0xff]  }
 0x298   :  { %1813 = vmatprep.subr.bf16.mxu0 %v12366_v7  ;;  %1854 = vmatprep.subr.bf16.mxu1 %v12367_v10  ;;  %v12399_v7 = vmov 0.0|0.0   ;;  %v8386_v10 = vld [vmem:[#allocation8 + $0x40] ss:$16 sps:$4 sm:$0xff]  }
 0x299   :  { %v6148_v52 = vpop.eup %6147 }
 0x29a   :  { %v1280_v58 = vmul.f32 %v6148_v52, %v6146_v51  ;;  %v8454_v51 = vld [vmem:[#allocation8 + $0x10c] ss:$16 sps:$4 sm:$0xff]   ;;  %v8458_v52 = vld [vmem:[#allocation8 + $0x100] ss:$16 sps:$4 sm:$0xff]  }
 0x29b   :  { %1814 = vmatpush1.bf16.msra.mxu0 %v12368_v19  ;;  %1855 = vmatpush1.bf16.msra.mxu1 %v12369_v41  ;;  %v8388_v19 = vld [vmem:[#allocation8 + $0x48] ss:$16 sps:$4 sm:$0xff]   ;;  %v8392_v41 = vld [vmem:[#allocation8 + $0x64] ss:$16 sps:$4 sm:$0xff]   ;;  %12403 = vst [vmem:[#allocation16_spill] sm:$0xff] %v8454_v51  ;;  %12404 = vst [vmem:[#allocation17_spill] sm:$0xff] %v8458_v52 }
 0x29c   :  { %1815 = vmatprep.subr.bf16.mxu0 %v12370_v14  ;;  %1856 = vmatprep.subr.bf16.mxu1 %v12371_v25  ;;  %v1794_v61 = vpack.c.bf16 %v1280_v58, %v1280_v58  ;;  %v8394_v14 = vld [vmem:[#allocation8 + $0x6c] ss:$16 sps:$4 sm:$0xff]   ;;  %v8398_v25 = vld [vmem:[#allocation8 + $0x60] ss:$16 sps:$4 sm:$0xff]   ;;  %v8472_v58 = vld [vmem:[#allocation8 + $0x128] ss:$16 sps:$4 sm:$0xff]  }
 0x29d   :  { %12409 = vst [vmem:[#allocation22_spill] sm:$0xff] %v8472_v58 }
 0x29f   :  { %1816 = vmatpush1.bf16.msra.mxu0 %v12372_v46  ;;  %1857 = vmatpush1.bf16.msra.mxu1 %v12373_v40  ;;  %v8404_v46 = vld [vmem:[#allocation8 + $0x84] ss:$16 sps:$4 sm:$0xff]   ;;  %v8406_v40 = vld [vmem:[#allocation8 + $0x8c] ss:$16 sps:$4 sm:$0xff]  }
 0x2a0   :  { %1817 = vmatprep.subr.bf16.mxu0 %v12374_v42  ;;  %1858 = vmatprep.subr.bf16.mxu1 %v12375_v11  ;;  %v8410_v42 = vld [vmem:[#allocation8 + $0x80] ss:$16 sps:$4 sm:$0xff]   ;;  %v8412_v11 = vld [vmem:[#allocation8 + $0x88] ss:$16 sps:$4 sm:$0xff]  }
 0x2a3   :  { %1818 = vmatpush1.bf16.msra.mxu0 %v12376_v48  ;;  %1859 = vmatpush1.bf16.msra.mxu1 %v12377_v49  ;;  %v8418_v48 = vld [vmem:[#allocation8 + $0xac] ss:$16 sps:$4 sm:$0xff]   ;;  %v8422_v49 = vld [vmem:[#allocation8 + $0xa0] ss:$16 sps:$4 sm:$0xff]  }
 0x2a4   :  { %1819 = vmatprep.subr.bf16.mxu0 %v12378_v45  ;;  %1860 = vmatprep.subr.bf16.mxu1 %v12379_v38  ;;  %v8424_v45 = vld [vmem:[#allocation8 + $0xa8] ss:$16 sps:$4 sm:$0xff]   ;;  %v8428_v38 = vld [vmem:[#allocation8 + $0xc4] ss:$16 sps:$4 sm:$0xff]  }
 0x2a7   :  { %1820 = vmatpush1.bf16.msra.mxu0 %v12380_v39  ;;  %1861 = vmatpush1.bf16.msra.mxu1 %v12381_v26  ;;  %v8430_v39 = vld [vmem:[#allocation8 + $0xcc] ss:$16 sps:$4 sm:$0xff]   ;;  %v8434_v26 = vld [vmem:[#allocation8 + $0xc0] ss:$16 sps:$4 sm:$0xff]  }
 0x2a8   :  { %1821 = vmatprep.subr.bf16.mxu0 %v12382_v16  ;;  %1862 = vmatprep.subr.bf16.mxu1 %v12383_v50  ;;  %v8436_v16 = vld [vmem:[#allocation8 + $0xc8] ss:$16 sps:$4 sm:$0xff]   ;;  %v8440_v50 = vld [vmem:[#allocation8 + $0xe4] ss:$16 sps:$4 sm:$0xff]  }
 0x2ab   :  { %1822 = vmatpush1.bf16.msra.mxu0 %v12384_v47  ;;  %1863 = vmatpush1.bf16.msra.mxu1 %v12385_v44  ;;  %v8442_v47 = vld [vmem:[#allocation8 + $0xec] ss:$16 sps:$4 sm:$0xff]   ;;  %v8446_v44 = vld [vmem:[#allocation8 + $0xe0] ss:$16 sps:$4 sm:$0xff]  }
 0x2ac   :  { %1823 = vmatprep.subr.bf16.mxu0 %v12386_v23  ;;  %1864 = vmatprep.subr.bf16.mxu1 %v12387_v24  ;;  %12400 = vst [vmem:[#allocation13_spill] sm:$0xff] %v8446_v44  ;;  %v8448_v23 = vld [vmem:[#allocation8 + $0xe8] ss:$16 sps:$4 sm:$0xff]   ;;  %v8452_v24 = vld [vmem:[#allocation8 + $0x104] ss:$16 sps:$4 sm:$0xff]  }
 0x2ad   :  { %12401 = vst [vmem:[#allocation14_spill] sm:$0xff] %v8448_v23  ;;  %12402 = vst [vmem:[#allocation15_spill] sm:$0xff] %v8452_v24 }
 0x2af   :  { %1824 = vmatpush1.bf16.msra.mxu0 %v12388_v53  ;;  %1865 = vmatpush1.bf16.msra.mxu1 %v12389_v54  ;;  %v8460_v53 = vld [vmem:[#allocation8 + $0x108] ss:$16 sps:$4 sm:$0xff]   ;;  %v8464_v54 = vld [vmem:[#allocation8 + $0x124] ss:$16 sps:$4 sm:$0xff]  }
 0x2b0   :  { %1825 = vmatprep.subr.bf16.mxu0 %v12390_v56  ;;  %1866 = vmatprep.subr.bf16.mxu1 %v12391_v57  ;;  %12405 = vst [vmem:[#allocation18_spill] sm:$0xff] %v8460_v53  ;;  %12406 = vst [vmem:[#allocation19_spill] sm:$0xff] %v8464_v54  ;;  %v8466_v56 = vld [vmem:[#allocation8 + $0x12c] ss:$16 sps:$4 sm:$0xff]   ;;  %v8470_v57 = vld [vmem:[#allocation8 + $0x120] ss:$16 sps:$4 sm:$0xff]  }
 0x2b1   :  { %12407 = vst [vmem:[#allocation20_spill] sm:$0xff] %v8466_v56  ;;  %12408 = vst [vmem:[#allocation21_spill] sm:$0xff] %v8470_v57 }
 0x2b3   :  { %1826 = vmatpush1.bf16.msra.mxu0 %v12392_v59  ;;  %1867 = vmatpush1.bf16.msra.mxu1 %v12393_v60  ;;  %v8476_v59 = vld [vmem:[#allocation8 + $0x144] ss:$16 sps:$4 sm:$0xff]   ;;  %v8478_v60 = vld [vmem:[#allocation8 + $0x14c] ss:$16 sps:$4 sm:$0xff]  }
 0x2b4   :  { %1906 = vmatprep.subr.bf16.mxu0 %v8302_v62  ;;  %1947 = vmatprep.subr.bf16.mxu1 %v8305_v63  ;;  %12410 = vst [vmem:[#allocation23_spill] sm:$0xff] %v8476_v59  ;;  %12411 = vst [vmem:[#allocation24_spill] sm:$0xff] %v8478_v60 }
 0x2b6   :  { %1828 = vmatmul.mubr.bf16.vlgmr.msra.gmra.mrb[32].mxu0 %v1794_v61  ;;  %1869 = vmatmul.mubr.bf16.vlgmr.msra.gmra.mrb[32].mxu1 %v1794_v61 }
 0x2b7   :  { %1907 = vmatpush1.bf16.msra.mxu0 %v7936_v12  ;;  %1948 = vmatpush1.bf16.msra.mxu1 %v7939_v15  ;;  %v12394_v12 = vld [vmem:[#allocation81_spill] sm:$0xff]  ;;  %v12395_v15 = vld [vmem:[#allocation82_spill] sm:$0xff] }
 0x2b8   :  { %1908 = vmatprep.subr.bf16.mxu0 %v7942_v28  ;;  %1949 = vmatprep.subr.bf16.mxu1 %v7945_v27  ;;  %v12396_v28 = vld [vmem:[#allocation83_spill] sm:$0xff]  ;;  %v12397_v27 = vld [vmem:[#allocation84_spill] sm:$0xff] }
 0x2b9   :  { %1938 = vmatprep.mubr.bf16.mxu0 %v12278_v22  ;;  %1979 = vmatprep.mubr.bf16.mxu1 %v12278_v22 }
 0x2bb   :  { %1909 = vmatpush1.bf16.msra.mxu0 %v7950_v43  ;;  %1950 = vmatpush1.bf16.msra.mxu1 %v7953_v29  ;;  %v12398_v43 = vld [vmem:[#allocation85_spill] sm:$0xff] }
 0x2bc   :  { %1910 = vmatprep.subr.bf16.mxu0 %v7956_v36  ;;  %1951 = vmatprep.subr.bf16.mxu1 %v7959_v30  ;;  %v8332_v29 = vld [vmem:[#allocation3 + $0xc4] ss:$16 sps:$4 sm:$0xff]   ;;  %v8335_v36 = vld [vmem:[#allocation3 + $0xcc] ss:$16 sps:$4 sm:$0xff]   ;;  %v8338_v30 = vld [vmem:[#allocation3 + $0xc0] ss:$16 sps:$4 sm:$0xff]  }
 0x2bf   :  { %1911 = vmatpush1.bf16.msra.mxu0 %v7962_v35  ;;  %1952 = vmatpush1.bf16.msra.mxu1 %v7965_v37  ;;  %v8341_v35 = vld [vmem:[#allocation3 + $0xc8] ss:$16 sps:$4 sm:$0xff]   ;;  %v8344_v37 = vld [vmem:[#allocation3 + $0xe4] ss:$16 sps:$4 sm:$0xff]  }
 0x2c0   :  { %1912 = vmatprep.subr.bf16.mxu0 %v7968_v31  ;;  %1953 = vmatprep.subr.bf16.mxu1 %v7971_v8  ;;  %v8347_v31 = vld [vmem:[#allocation3 + $0xec] ss:$16 sps:$4 sm:$0xff]   ;;  %v8350_v8 = vld [vmem:[#allocation8 + $0x4] ss:$16 sps:$4 sm:$0xff]  }
 0x2c3   :  { %1913 = vmatpush1.bf16.msra.mxu0 %v7974_v20  ;;  %1954 = vmatpush1.bf16.msra.mxu1 %v7977_v9  ;;  %v8352_v20 = vld [vmem:[#allocation8 + $0xc] ss:$16 sps:$4 sm:$0xff]   ;;  %v8354_v9 = vld [vmem:[#allocation3 + $0xe0] ss:$16 sps:$4 sm:$0xff]  }
 0x2c4   :  { %1914 = vmatprep.subr.bf16.mxu0 %v7980_v32  ;;  %1955 = vmatprep.subr.bf16.mxu1 %v7983_v18  ;;  %v8357_v32 = vld [vmem:[#allocation3 + $0xe8] ss:$16 sps:$4 sm:$0xff]   ;;  %v8360_v18 = vld [vmem:[#allocation8] ss:$16 sps:$4 sm:$0xff]  }
 0x2c7   :  { %1915 = vmatpush1.bf16.msra.mxu0 %v7986_v13  ;;  %1956 = vmatpush1.bf16.msra.mxu1 %v12394_v12  ;;  %v8362_v13 = vld [vmem:[#allocation8 + $0x8] ss:$16 sps:$4 sm:$0xff]  }
 0x2c8   :  { %1916 = vmatprep.subr.bf16.mxu0 %v12395_v15  ;;  %1957 = vmatprep.subr.bf16.mxu1 %v12396_v28  ;;  %v8484_v12 = vld [vmem:[#allocation8 + $0x148] ss:$16 sps:$4 sm:$0xff]   ;;  %v8488_v15 = vld [vmem:[#allocation8 + $0x164] ss:$16 sps:$4 sm:$0xff]   ;;  %v8490_v28 = vld [vmem:[#allocation8 + $0x16c] ss:$16 sps:$4 sm:$0xff]  }
 0x2c9   :  { %12413 = vst [vmem:[#allocation26_spill] sm:$0xff] %v8484_v12  ;;  %12414 = vst [vmem:[#allocation27_spill] sm:$0xff] %v8488_v15 }
 0x2ca   :  { %12415 = vst [vmem:[#allocation28_spill] sm:$0xff] %v8490_v28 }
 0x2cb   :  { %1917 = vmatpush1.bf16.msra.mxu0 %v12397_v27  ;;  %1958 = vmatpush1.bf16.msra.mxu1 %v12398_v43  ;;  %v8494_v27 = vld [vmem:[#allocation8 + $0x160] ss:$16 sps:$4 sm:$0xff]   ;;  %v8496_v43 = vld [vmem:[#allocation8 + $0x168] ss:$16 sps:$4 sm:$0xff]  }
 0x2cc   :  { %1918 = vmatprep.subr.bf16.mxu0 %v8332_v29  ;;  %1959 = vmatprep.subr.bf16.mxu1 %v8335_v36  ;;  %12416 = vst [vmem:[#allocation29_spill] sm:$0xff] %v8494_v27  ;;  %12417 = vst [vmem:[#allocation30_spill] sm:$0xff] %v8496_v43 }
 0x2cf   :  { %1919 = vmatpush1.bf16.msra.mxu0 %v8338_v30  ;;  %1960 = vmatpush1.bf16.msra.mxu1 %v8341_v35 }
 0x2d0   :  { %1920 = vmatprep.subr.bf16.mxu0 %v8344_v37  ;;  %1961 = vmatprep.subr.bf16.mxu1 %v8347_v31 }
 0x2d3   :  { %1921 = vmatpush1.bf16.msra.mxu0 %v8354_v9  ;;  %1962 = vmatpush1.bf16.msra.mxu1 %v8357_v32 }
 0x2d4   :  { %2423 = vmatprep.subr.bf16.mxu0 %v8350_v8  ;;  %2464 = vmatprep.subr.bf16.mxu1 %v8352_v20 }
 0x2d6   :  { %1939 = vmatmul.mubr.bf16.vlgmr.msra.gmra.mrb[36].mxu0 %v1794_v61  ;;  %1980 = vmatmul.mubr.bf16.vlgmr.msra.gmra.mrb[36].mxu1 %v1794_v61  ;;  %v8482_v61 = vld [vmem:[#allocation8 + $0x140] ss:$16 sps:$4 sm:$0xff]  }
 0x2d7   :  { %2424 = vmatpush1.bf16.msra.mxu0 %v8360_v18  ;;  %2465 = vmatpush1.bf16.msra.mxu1 %v8362_v13  ;;  %12412 = vst [vmem:[#allocation25_spill] sm:$0xff] %v8482_v61 }
 0x2d8   :  { %2425 = vmatprep.subr.bf16.mxu0 %v8366_v1  ;;  %2466 = vmatprep.subr.bf16.mxu1 %v8368_v2 }
 0x2d9   :  { %2455 = vmatprep.mubr.bf16.mxu0 %v12399_v7  ;;  %2496 = vmatprep.mubr.bf16.mxu1 %v12399_v7  ;;  %v8500_v7 = vld [vmem:[#allocation8 + $0x184] ss:$16 sps:$4 sm:$0xff]  }
 0x2da   :  { %12418 = vst [vmem:[#allocation31_spill] sm:$0xff] %v8500_v7 }
 0x2db   :  { %2426 = vmatpush1.bf16.msra.mxu0 %v8372_v3  ;;  %2467 = vmatpush1.bf16.msra.mxu1 %v8374_v4 }
 0x2dc   :  { %2427 = vmatprep.subr.bf16.mxu0 %v8378_v5  ;;  %2468 = vmatprep.subr.bf16.mxu1 %v8380_v6 }
 0x2df   :  { %2428 = vmatpush1.bf16.msra.mxu0 %v8386_v10  ;;  %2469 = vmatpush1.bf16.msra.mxu1 %v8388_v19 }
 0x2e0   :  { %2429 = vmatprep.subr.bf16.mxu0 %v8392_v41  ;;  %2470 = vmatprep.subr.bf16.mxu1 %v8394_v14 }
 0x2e3   :  { %2430 = vmatpush1.bf16.msra.mxu0 %v8398_v25  ;;  %2471 = vmatpush1.bf16.msra.mxu1 %v8400_v21 }
 0x2e4   :  { %2431 = vmatprep.subr.bf16.mxu0 %v8404_v46  ;;  %2472 = vmatprep.subr.bf16.mxu1 %v8406_v40 }
 0x2e7   :  { %2432 = vmatpush1.bf16.msra.mxu0 %v8410_v42  ;;  %2473 = vmatpush1.bf16.msra.mxu1 %v8412_v11 }
 0x2e8   :  { %2433 = vmatprep.subr.bf16.mxu0 %v8416_v17  ;;  %2474 = vmatprep.subr.bf16.mxu1 %v8418_v48 }
 0x2eb   :  { %2434 = vmatpush1.bf16.msra.mxu0 %v8422_v49  ;;  %2475 = vmatpush1.bf16.msra.mxu1 %v8424_v45 }
 0x2ec   :  { %2435 = vmatprep.subr.bf16.mxu0 %v8428_v38  ;;  %2476 = vmatprep.subr.bf16.mxu1 %v8430_v39 }
 0x2ef   :  { %2436 = vmatpush1.bf16.msra.mxu0 %v8434_v26  ;;  %2477 = vmatpush1.bf16.msra.mxu1 %v8436_v16 }
 0x2f0   :  { %2437 = vmatprep.subr.bf16.mxu0 %v8440_v50  ;;  %2478 = vmatprep.subr.bf16.mxu1 %v8442_v47 }
 0x2f3   :  { %2438 = vmatpush1.bf16.msra.mxu0 %v8446_v44  ;;  %2479 = vmatpush1.bf16.msra.mxu1 %v8448_v23 }
 0x2f4   :  { %2439 = vmatprep.subr.bf16.mxu0 %v8452_v24  ;;  %2480 = vmatprep.subr.bf16.mxu1 %v8454_v51 }
 0x2f7   :  { %2440 = vmatpush1.bf16.msra.mxu0 %v8458_v52  ;;  %2481 = vmatpush1.bf16.msra.mxu1 %v8460_v53 }
 0x2f8   :  { %2441 = vmatprep.subr.bf16.mxu0 %v8464_v54  ;;  %2482 = vmatprep.subr.bf16.mxu1 %v8466_v56 }
 0x2fb   :  { %2442 = vmatpush1.bf16.msra.mxu0 %v8470_v57  ;;  %2483 = vmatpush1.bf16.msra.mxu1 %v8472_v58  ;;  %v12438_v58 = vld [vmem:[#allocation56_spill] sm:$0xff] }
 0x2fc   :  { %2443 = vmatprep.subr.bf16.mxu0 %v8476_v59  ;;  %2484 = vmatprep.subr.bf16.mxu1 %v8478_v60  ;;  %v8502_v59 = vld [vmem:[#allocation8 + $0x18c] ss:$16 sps:$4 sm:$0xff]   ;;  %v8506_v60 = vld [vmem:[#allocation8 + $0x180] ss:$16 sps:$4 sm:$0xff]  }
 0x2fd   :  { %12419 = vst [vmem:[#allocation32_spill] sm:$0xff] %v8502_v59  ;;  %12420 = vst [vmem:[#allocation33_spill] sm:$0xff] %v8506_v60 }
 0x2ff   :  { %2444 = vmatpush1.bf16.msra.mxu0 %v8482_v61  ;;  %2485 = vmatpush1.bf16.msra.mxu1 %v8484_v12  ;;  %v8508_v61 = vld [vmem:[#allocation8 + $0x188] ss:$16 sps:$4 sm:$0xff]   ;;  %v8512_v12 = vld [vmem:[#allocation8 + $0x1a4] ss:$16 sps:$4 sm:$0xff]  }
 0x300   :  { %2445 = vmatprep.subr.bf16.mxu0 %v8488_v15  ;;  %2486 = vmatprep.subr.bf16.mxu1 %v8490_v28  ;;  %12421 = vst [vmem:[#allocation34_spill] sm:$0xff] %v8508_v61  ;;  %12422 = vst [vmem:[#allocation35_spill] sm:$0xff] %v8512_v12  ;;  %v8514_v15 = vld [vmem:[#allocation8 + $0x1ac] ss:$16 sps:$4 sm:$0xff]   ;;  %v8518_v28 = vld [vmem:[#allocation8 + $0x1a0] ss:$16 sps:$4 sm:$0xff]  }
 0x301   :  { %12423 = vst [vmem:[#allocation36_spill] sm:$0xff] %v8514_v15  ;;  %12424 = vst [vmem:[#allocation37_spill] sm:$0xff] %v8518_v28 }
 0x303   :  { %2446 = vmatpush1.bf16.msra.mxu0 %v8494_v27  ;;  %2487 = vmatpush1.bf16.msra.mxu1 %v8496_v43  ;;  %v8520_v27 = vld [vmem:[#allocation8 + $0x1a8] ss:$16 sps:$4 sm:$0xff]   ;;  %v8524_v43 = vld [vmem:[#allocation8 + $0x1c4] ss:$16 sps:$4 sm:$0xff]  }
 0x304   :  { %2447 = vmatprep.subr.bf16.mxu0 %v8500_v7  ;;  %2488 = vmatprep.subr.bf16.mxu1 %v8502_v59  ;;  %12425 = vst [vmem:[#allocation38_spill] sm:$0xff] %v8520_v27  ;;  %12426 = vst [vmem:[#allocation39_spill] sm:$0xff] %v8524_v43  ;;  %v8526_v7 = vld [vmem:[#allocation8 + $0x1cc] ss:$16 sps:$4 sm:$0xff]   ;;  %v8530_v59 = vld [vmem:[#allocation8 + $0x1c0] ss:$16 sps:$4 sm:$0xff]  }
 0x305   :  { %12427 = vst [vmem:[#allocation40_spill] sm:$0xff] %v8526_v7  ;;  %12428 = vst [vmem:[#allocation41_spill] sm:$0xff] %v8530_v59 }
 0x307   :  { %2448 = vmatpush1.bf16.msra.mxu0 %v8506_v60  ;;  %2489 = vmatpush1.bf16.msra.mxu1 %v8508_v61  ;;  %v8532_v60 = vld [vmem:[#allocation8 + $0x1c8] ss:$16 sps:$4 sm:$0xff]   ;;  %v8536_v61 = vld [vmem:[#allocation8 + $0x1e4] ss:$16 sps:$4 sm:$0xff]  }
 0x308   :  { %2449 = vmatprep.subr.bf16.mxu0 %v8512_v12  ;;  %2490 = vmatprep.subr.bf16.mxu1 %v8514_v15  ;;  %12429 = vst [vmem:[#allocation42_spill] sm:$0xff] %v8532_v60  ;;  %12430 = vst [vmem:[#allocation43_spill] sm:$0xff] %v8536_v61  ;;  %v8538_v12 = vld [vmem:[#allocation8 + $0x1ec] ss:$16 sps:$4 sm:$0xff]   ;;  %v8542_v15 = vld [vmem:[#allocation8 + $0x1e0] ss:$16 sps:$4 sm:$0xff]  }
 0x309   :  { %12431 = vst [vmem:[#allocation44_spill] sm:$0xff] %v8538_v12  ;;  %12432 = vst [vmem:[#allocation45_spill] sm:$0xff] %v8542_v15 }
 0x30b   :  { %2450 = vmatpush1.bf16.msra.mxu0 %v8518_v28  ;;  %2491 = vmatpush1.bf16.msra.mxu1 %v8520_v27  ;;  %v8544_v28 = vld [vmem:[#allocation8 + $0x1e8] ss:$16 sps:$4 sm:$0xff]  }
 0x30c   :  { %2451 = vmatprep.subr.bf16.mxu0 %v8524_v43  ;;  %2492 = vmatprep.subr.bf16.mxu1 %v8526_v7  ;;  %12433 = vst [vmem:[#allocation46_spill] sm:$0xff] %v8544_v28  ;;  %v12434_v7 = vld [vmem:[#allocation86_spill] sm:$0xff]  ;;  %v12435_v43 = vld [vmem:[#allocation87_spill] sm:$0xff] }
 0x30f   :  { %2452 = vmatpush1.bf16.msra.mxu0 %v8530_v59  ;;  %2493 = vmatpush1.bf16.msra.mxu1 %v8532_v60  ;;  %v1346_v60 = vld [vmem:[%s11558_s7] sm:$0xf]  ;;  %v12436_v59 = vld [vmem:[#allocation55_spill] sm:$0xff] }
 0x310   :  { %2453 = vmatprep.subr.bf16.mxu0 %v8536_v61  ;;  %2494 = vmatprep.subr.bf16.mxu1 %v8538_v12  ;;  %v8556_v27 = vrot.slane %v1346_v60, %v12436_v59  ;;  %v8559_v57 = vrot.slane %v1346_v60, %v12438_v58  ;;  %v8564_v59 = vrot.slane %v1346_v60, %v7832_v33  ;;  %v12441_v58 = vld [vmem:[#allocation54_spill] sm:$0xff] }
 0x311   :  { %v8567_v23 = vrot.slane %v1346_v60, %v12441_v58 }
 0x312   :  { %12437 = vst [vmem:[#allocation47_spill] sm:$0xff] %v8556_v27  ;;  %12439 = vst [vmem:[#allocation48_spill] sm:$0xff] %v8559_v57 }
 0x313   :  { %2454 = vmatpush1.bf16.msra.mxu0 %v8542_v15  ;;  %2495 = vmatpush1.bf16.msra.mxu1 %v8544_v28  ;;  %12440 = vst [vmem:[#allocation49_spill] sm:$0xff] %v8564_v59  ;;  %12442 = vst [vmem:[#allocation50_spill] sm:$0xff] %v8567_v23 }
 0x314   :  { %2530 = vmatprep.subr.bf16.mxu0 %v12434_v7  ;;  %2571 = vmatprep.subr.bf16.mxu1 %v12435_v43 }
 0x349   :  { %v1722_v61 = vpop.f32.mrb[28].mxu0  ;;  %v1763_v12 = vpop.f32.mrb[28].mxu1 }
 0x34a   :  { %v1723_v15 = vadd.f32 %v1722_v61, %v8556_v27  ;;  %v1724_v56 = vpop.f32.mrb[29].mxu0  ;;  %v1765_v28 = vpop.f32.mrb[29].mxu1  ;;  %v1764_v61 = vadd.f32 %v1763_v12, %v8564_v59  ;;  %v12464_v59 = vld [vmem:[#allocation106_spill] sm:$0xff] }
 0x34b   :  { %v1725_v7 = vadd.f32 %v1724_v56, %v8559_v57  ;;  %v1726_v54 = vpop.f32.mrb[30].mxu0  ;;  %v1767_v43 = vpop.f32.mrb[30].mxu1  ;;  %v1766_v27 = vadd.f32 %v1765_v28, %v8567_v23 }
 0x34c   :  { %v5552_v53 = vmul.f32 -1.442695, %v1723_v15  ;;  %v1727_v52 = vpop.f32.mrb[31].mxu0  ;;  %v1768_v51 = vpop.f32.mrb[31].mxu1  ;;  %v5554_v44 = vmul.f32 -1.442695, %v1764_v61 }
 0x34d   :  { %v5553_v24 = vmul.f32 -1.442695, %v1725_v7 }
 0x34e   :  { %6149 = vpow2.f32 %v5552_v53 }
 0x34f   :  { %6151 = vpow2.f32 %v5553_v24 }
 0x350   :  { %6153 = vtanh.f32 %v1766_v27 }
 0x351   :  { %6155 = vpow2.f32 %v5554_v44  ;;  %v12444_v44 = vld [vmem:[#allocation88_spill] sm:$0xff] }
 0x358   :  { %v6150_v56 = vpop.eup %6149 }
 0x359   :  { %v1779_v54 = vadd.f32 1.0, %v6150_v56  ;;  %v6152_v15 = vpop.eup %6151  ;;  %v12445_v56 = vld [vmem:[#allocation89_spill] sm:$0xff] }
 0x35a   :  { %v1780_v51 = vadd.f32 1.0, %v6152_v15  ;;  %v6154_v52 = vpop.eup %6153  ;;  %v12447_v15 = vld [vmem:[#allocation91_spill] sm:$0xff] }
 0x35b   :  { %6157 = vrcp.f32 %v1779_v54  ;;  %v6156_v53 = vpop.eup %6155  ;;  %v12446_v54 = vld [vmem:[#allocation90_spill] sm:$0xff] }
 0x35c   :  { %6159 = vrcp.f32 %v1780_v51  ;;  %v1781_v60 = vadd.f32 1.0, %v6156_v53  ;;  %v12449_v51 = vld [vmem:[#allocation93_spill] sm:$0xff]  ;;  %v12451_v53 = vld [vmem:[#allocation95_spill] sm:$0xff] }
 0x35e   :  { %6161 = vrcp.f32 %v1781_v60  ;;  %v12455_v60 = vld [vmem:[#allocation99_spill] sm:$0xff] }
 0x365   :  { %v6158_v7 = vpop.eup %6157 }
 0x366   :  { %v1790_v24 = vmul.f32 %v6158_v7, %v6154_v52  ;;  %v6160_v43 = vpop.eup %6159  ;;  %v12450_v52 = vld [vmem:[#allocation94_spill] sm:$0xff]  ;;  %v12452_v7 = vld [vmem:[#allocation96_spill] sm:$0xff] }
 0x367   :  { %v1789_v57 = vmul.f32 0.0, %v6160_v43  ;;  %v12454_v43 = vld [vmem:[#allocation98_spill] sm:$0xff] }
 0x368   :  { %v6162_v12 = vpop.eup %6161 }
 0x369   :  { %v8571_v58 = vadd.f32 %v1790_v24, %v1789_v57  ;;  %v12448_v57 = vld [vmem:[#allocation92_spill] sm:$0xff]  ;;  %v12453_v24 = vld [vmem:[#allocation97_spill] sm:$0xff] }
 0x36b   :  { %12443 = vst [vmem:[#allocation51_spill] sm:$0xff] %v8571_v58  ;;  %6163 = vtanh.f32 %v8571_v58 }
 0x375   :  { %v6164_v28 = vpop.eup %6163 }
 0x376   :  { %v1793_v27 = vmul.f32 %v6164_v28, %v6162_v12  ;;  %v12456_v12 = vld [vmem:[#allocation100_spill] sm:$0xff]  ;;  %v12457_v28 = vld [vmem:[#allocation101_spill] sm:$0xff] }
 0x378   :  { %v2016_v61 = vpack.c.bf16 %v1793_v27, %v1793_v27 }
 0x37a   :  { %2456 = vmatmul.mubr.bf16.vlgmr.msra.gmra.mrb[40].mxu0 %v2016_v61  ;;  %2497 = vmatmul.mubr.bf16.vlgmr.msra.gmra.mrb[40].mxu1 %v2016_v61 }
 0x37b   :  { %2531 = vmatpush1.bf16.msra.mxu0 %v12444_v44  ;;  %2572 = vmatpush1.bf16.msra.mxu1 %v12445_v56  ;;  %v12458_v44 = vld [vmem:[#allocation102_spill] sm:$0xff]  ;;  %v12459_v56 = vld [vmem:[#allocation103_spill] sm:$0xff] }
 0x37c   :  { %2562 = vmatprep.mubr.bf16.mxu0 %v2016_v61  ;;  %2603 = vmatprep.mubr.bf16.mxu1 %v2016_v61 }
 0x37d   :  { %2532 = vmatprep.subr.bf16.mxu0 %v12446_v54  ;;  %2573 = vmatprep.subr.bf16.mxu1 %v12447_v15  ;;  %v12460_v54 = vld [vmem:[#allocation150_spill] sm:$0xff] }
 0x37f   :  { %2533 = vmatpush1.bf16.msra.mxu0 %v12448_v57  ;;  %2574 = vmatpush1.bf16.msra.mxu1 %v12449_v51 }
 0x380   :  { %2534 = vmatprep.subr.bf16.mxu0 %v12450_v52  ;;  %2575 = vmatprep.subr.bf16.mxu1 %v12451_v53  ;;  %v12461_v52 = vld [vmem:[#allocation151_spill] sm:$0xff] }
 0x383   :  { %2535 = vmatpush1.bf16.msra.mxu0 %v12452_v7  ;;  %2576 = vmatpush1.bf16.msra.mxu1 %v12453_v24 }
 0x384   :  { %2536 = vmatprep.subr.bf16.mxu0 %v12454_v43  ;;  %2577 = vmatprep.subr.bf16.mxu1 %v12455_v60  ;;  %v12462_v60 = vld [vmem:[#allocation104_spill] sm:$0xff] }
 0x387   :  { %2537 = vmatpush1.bf16.msra.mxu0 %v12456_v12  ;;  %2578 = vmatpush1.bf16.msra.mxu1 %v12457_v28  ;;  %v12463_v12 = vld [vmem:[#allocation105_spill] sm:$0xff] }
 0x388   :  { %2538 = vmatprep.subr.bf16.mxu0 %v12458_v44  ;;  %2579 = vmatprep.subr.bf16.mxu1 %v12459_v56  ;;  %v12465_v44 = vld [vmem:[#allocation107_spill] sm:$0xff]  ;;  %v12467_v56 = vld [vmem:[#allocation109_spill] sm:$0xff] }
 0x389   :  { %v1829_v27 = vpop.f32.mrb[32].mxu0  ;;  %v1870_v61 = vpop.f32.mrb[32].mxu1 }
 0x38a   :  { %v1830_v15 = vadd.f32 %v1829_v27, %v12460_v54  ;;  %v1831_v57 = vpop.f32.mrb[33].mxu0  ;;  %v1872_v51 = vpop.f32.mrb[33].mxu1  ;;  %v12466_v27 = vld [vmem:[#allocation108_spill] sm:$0xff] }
 0x38b   :  { %v1832_v53 = vadd.f32 %v1831_v57, %v12461_v52  ;;  %v1833_v7 = vpop.f32.mrb[34].mxu0  ;;  %v1874_v24 = vpop.f32.mrb[34].mxu1  ;;  %2539 = vmatpush1.bf16.msra.mxu0 %v12462_v60  ;;  %2580 = vmatpush1.bf16.msra.mxu1 %v12463_v12  ;;  %v12468_v57 = vld [vmem:[#allocation110_spill] sm:$0xff]  ;;  %v12471_v60 = vld [vmem:[#allocation112_spill] sm:$0xff] }
 0x38c   :  { %v5555_v43 = vmul.f32 -1.442695, %v1830_v15  ;;  %v1834_v28 = vpop.f32.mrb[35].mxu0  ;;  %v1875_v58 = vpop.f32.mrb[35].mxu1  ;;  %2540 = vmatprep.subr.bf16.mxu0 %v12464_v59  ;;  %2581 = vmatprep.subr.bf16.mxu1 %v12465_v44  ;;  %v12469_v15 = vld [vmem:[#allocation111_spill] sm:$0xff]  ;;  %v12470_v7 = vld [vmem:[#allocation152_spill] sm:$0xff]  ;;  %v1873_v59 = vadd.f32 %v1872_v51, %v8225_v0 }
 0x38d   :  { %v5556_v23 = vmul.f32 -1.442695, %v1832_v53  ;;  %v1871_v24 = vadd.f32 %v1870_v61, %v12470_v7  ;;  %v12472_v58 = vld [vmem:[#allocation113_spill] sm:$0xff]  ;;  %v12473_v53 = vld [vmem:[#allocation114_spill] sm:$0xff]  ;;  %v12475_v28 = vld [vmem:[#allocation116_spill] sm:$0xff] }
 0x38e   :  { %6165 = vpow2.f32 %v5555_v43  ;;  %v12474_v43 = vld [vmem:[#allocation115_spill] sm:$0xff]  ;;  %v12476_v44 = vld [vmem:[#allocation117_spill] sm:$0xff] }
 0x38f   :  { %6167 = vpow2.f32 %v5556_v23  ;;  %2541 = vmatpush1.bf16.msra.mxu0 %v12466_v27  ;;  %2582 = vmatpush1.bf16.msra.mxu1 %v12467_v56  ;;  %v5557_v23 = vmul.f32 -1.442695, %v1871_v24  ;;  %v12477_v56 = vld [vmem:[#allocation118_spill] sm:$0xff]  ;;  %v12478_v61 = vld [vmem:[#allocation119_spill] sm:$0xff] }
 0x390   :  { %2542 = vmatprep.subr.bf16.mxu0 %v12468_v57  ;;  %2583 = vmatprep.subr.bf16.mxu1 %v12469_v15  ;;  %6169 = vtanh.f32 %v1873_v59  ;;  %v12479_v15 = vld [vmem:[#allocation120_spill] sm:$0xff]  ;;  %v12481_v24 = vld [vmem:[#allocation122_spill] sm:$0xff]  ;;  %v12484_v59 = vld [vmem:[#allocation125_spill] sm:$0xff] }
 0x391   :  { %6171 = vpow2.f32 %v5557_v23 }
 0x393   :  { %2543 = vmatpush1.bf16.msra.mxu0 %v12471_v60  ;;  %2584 = vmatpush1.bf16.msra.mxu1 %v12472_v58  ;;  %v12480_v60 = vld [vmem:[#allocation121_spill] sm:$0xff]  ;;  %v12482_v58 = vld [vmem:[#allocation123_spill] sm:$0xff] }
 0x394   :  { %2544 = vmatprep.subr.bf16.mxu0 %v12473_v53  ;;  %2585 = vmatprep.subr.bf16.mxu1 %v12474_v43  ;;  %v12483_v53 = vld [vmem:[#allocation124_spill] sm:$0xff]  ;;  %v12485_v43 = vld [vmem:[#allocation126_spill] sm:$0xff] }
 0x397   :  { %2545 = vmatpush1.bf16.msra.mxu0 %v12475_v28  ;;  %2586 = vmatpush1.bf16.msra.mxu1 %v12476_v44  ;;  %v12487_v44 = vld [vmem:[#allocation128_spill] sm:$0xff] }
 0x398   :  { %v6166_v12 = vpop.eup %6165  ;;  %2546 = vmatprep.subr.bf16.mxu0 %v12477_v56  ;;  %2587 = vmatprep.subr.bf16.mxu1 %v12478_v61  ;;  %v12489_v61 = vld [vmem:[#allocation130_spill] sm:$0xff] }
 0x399   :  { %v1886_v27 = vadd.f32 1.0, %v6166_v12  ;;  %v6168_v57 = vpop.eup %6167  ;;  %v12486_v12 = vld [vmem:[#allocation127_spill] sm:$0xff] }
 0x39a   :  { %v1887_v51 = vadd.f32 1.0, %v6168_v57  ;;  %v6170_v23 = vpop.eup %6169  ;;  %v12490_v57 = vld [vmem:[#allocation131_spill] sm:$0xff] }
 0x39b   :  { %6173 = vrcp.f32 %v1886_v27  ;;  %2547 = vmatpush1.bf16.msra.mxu0 %v12479_v15  ;;  %2588 = vmatpush1.bf16.msra.mxu1 %v12480_v60  ;;  %v6172_v28 = vpop.eup %6171  ;;  %v12488_v27 = vld [vmem:[#allocation129_spill] sm:$0xff] }
 0x39c   :  { %6175 = vrcp.f32 %v1887_v51  ;;  %2548 = vmatprep.subr.bf16.mxu0 %v12481_v24  ;;  %2589 = vmatprep.subr.bf16.mxu1 %v12482_v58  ;;  %v1888_v60 = vadd.f32 1.0, %v6172_v28  ;;  %v12491_v58 = vld [vmem:[#allocation132_spill] sm:$0xff] }
 0x39e   :  { %6177 = vrcp.f32 %v1888_v60  ;;  %v12503_v60 = vld [vmem:[#allocation140_spill] sm:$0xff] }
 0x39f   :  { %2549 = vmatpush1.bf16.msra.mxu0 %v12483_v53  ;;  %2590 = vmatpush1.bf16.msra.mxu1 %v12484_v59  ;;  %v12492_v53 = vld [vmem:[#allocation133_spill] sm:$0xff] }
 0x3a0   :  { %2550 = vmatprep.subr.bf16.mxu0 %v12485_v43  ;;  %2591 = vmatprep.subr.bf16.mxu1 %v12486_v12  ;;  %v12493_v12 = vld [vmem:[#allocation134_spill] sm:$0xff] }
 0x3a3   :  { %2551 = vmatpush1.bf16.msra.mxu0 %v12487_v44  ;;  %2592 = vmatpush1.bf16.msra.mxu1 %v12488_v27  ;;  %v12494_v44 = vld [vmem:[#allocation135_spill] sm:$0xff] }
 0x3a4   :  { %2552 = vmatprep.subr.bf16.mxu0 %v12489_v61  ;;  %2593 = vmatprep.subr.bf16.mxu1 %v12490_v57  ;;  %v12495_v61 = vld [vmem:[#allocation57_spill] sm:$0xff]  ;;  %v12496_v57 = vld [vmem:[#allocation58_spill] sm:$0xff] }
 0x3a5   :  { %v6174_v56 = vpop.eup %6173 }
 0x3a6   :  { %v1897_v51 = vmul.f32 %v6174_v56, %v6170_v23  ;;  %v6176_v15 = vpop.eup %6175 }
 0x3a7   :  { %v1896_v24 = vmul.f32 %v6176_v15, %v8229_v34  ;;  %2553 = vmatpush1.bf16.msra.mxu0 %v12491_v58  ;;  %2594 = vmatpush1.bf16.msra.mxu1 %v12492_v53  ;;  %v12497_v34 = vld [vmem:[#allocation59_spill] sm:$0xff]  ;;  %v12498_v58 = vld [vmem:[#allocation60_spill] sm:$0xff] }
 0x3a8   :  { %2554 = vmatprep.subr.bf16.mxu0 %v12493_v12  ;;  %2595 = vmatprep.subr.bf16.mxu1 %v12494_v44  ;;  %v12499_v44 = vld [vmem:[#allocation136_spill] sm:$0xff] }
 0x3a9   :  { %v1940_v59 = vpop.f32.mrb[36].mxu0  ;;  %v1981_v43 = vpop.f32.mrb[36].mxu1  ;;  %v8627_v27 = vadd.f32 %v1897_v51, %v1896_v24  ;;  %v12500_v51 = vld [vmem:[#allocation137_spill] sm:$0xff] }
 0x3aa   :  { %v1988_v0 = vadd.f32 %v1940_v59, %v12495_v61  ;;  %v8631_v23 = vadd.f32 %v1981_v43, %v12496_v57  ;;  %v1942_v28 = vpop.f32.mrb[37].mxu0  ;;  %v1983_v56 = vpop.f32.mrb[37].mxu1  ;;  %v12501_v61 = vld [vmem:[#allocation138_spill] sm:$0xff]  ;;  %v12502_v57 = vld [vmem:[#allocation139_spill] sm:$0xff] }
 0x3ab   :  { %v1989_v15 = vadd.f32 %v1942_v28, %v12497_v34  ;;  %v1991_v53 = vadd.f32 %v1983_v56, %v12498_v58  ;;  %v1944_v7 = vpop.f32.mrb[38].mxu0  ;;  %v1985_v52 = vpop.f32.mrb[38].mxu1  ;;  %6179 = vtanh.f32 %v8627_v27  ;;  %2555 = vmatpush1.bf16.msra.mxu0 %v12499_v44  ;;  %2596 = vmatpush1.bf16.msra.mxu1 %v12500_v51  ;;  %v12507_v28 = vld [vmem:[#allocation144_spill] sm:$0xff]  ;;  %v12508_v56 = vld [vmem:[#allocation145_spill] sm:$0xff]  ;;  %v12510_v58 = vld [vmem:[#allocation147_spill] sm:$0xff] }
 0x3ac   :  { %v5558_v12 = vmul.f32 -1.442695, %v1988_v0  ;;  %v1945_v24 = vpop.f32.mrb[39].mxu0  ;;  %v1986_v59 = vpop.f32.mrb[39].mxu1  ;;  %2556 = vmatprep.subr.bf16.mxu0 %v12501_v61  ;;  %2597 = vmatprep.subr.bf16.mxu1 %v12502_v57  ;;  %v12504_v7 = vld [vmem:[#allocation141_spill] sm:$0xff]  ;;  %v12505_v52 = vld [vmem:[#allocation142_spill] sm:$0xff] }
 0x3ad   :  { %v5559_v43 = vmul.f32 -1.442695, %v1989_v15  ;;  %v12506_v0 = vld [vmem:[#allocation143_spill] sm:$0xff]  ;;  %v6178_v34 = vpop.eup %6177  ;;  %v12509_v15 = vld [vmem:[#allocation146_spill] sm:$0xff]  ;;  %v12511_v24 = vld [vmem:[#allocation148_spill] sm:$0xff] }
 0x3ae   :  { %6181 = vpow2.f32 %v5558_v12  ;;  %v12512_v59 = vld [vmem:[#allocation149_spill] sm:$0xff] }
 0x3af   :  { %6183 = vpow2.f32 %v5559_v43  ;;  %2557 = vmatpush1.bf16.msra.mxu0 %v12503_v60  ;;  %2598 = vmatpush1.bf16.msra.mxu1 %v12504_v7  ;;  %v8650_v57 = vld [vmem:[#allocation5 + $0x4] ss:$16 sps:$4 sm:$0xff]   ;;  %v8653_v60 = vld [vmem:[#allocation5 + $0xc] ss:$16 sps:$4 sm:$0xff]  }
 0x3b0   :  { %2558 = vmatprep.subr.bf16.mxu0 %v12505_v52  ;;  %2599 = vmatprep.subr.bf16.mxu1 %v12506_v0  ;;  %6185 = vtanh.f32 %v1991_v53  ;;  %v8656_v0 = vld [vmem:[#allocation5] ss:$16 sps:$4 sm:$0xff]   ;;  %v8665_v53 = vld [vmem:[#allocation5 + $0x2c] ss:$16 sps:$4 sm:$0xff]  }
 0x3b3   :  { %2559 = vmatpush1.bf16.msra.mxu0 %v12507_v28  ;;  %2600 = vmatpush1.bf16.msra.mxu1 %v12508_v56  ;;  %v8659_v28 = vld [vmem:[#allocation5 + $0x8] ss:$16 sps:$4 sm:$0xff]   ;;  %v8662_v56 = vld [vmem:[#allocation5 + $0x24] ss:$16 sps:$4 sm:$0xff]  }
 0x3b4   :  { %2560 = vmatprep.subr.bf16.mxu0 %v12509_v15  ;;  %2601 = vmatprep.subr.bf16.mxu1 %v12510_v58  ;;  %v8671_v15 = vld [vmem:[#allocation5 + $0x28] ss:$16 sps:$4 sm:$0xff]   ;;  %v8674_v58 = vld [vmem:[#allocation5 + $0x44] ss:$16 sps:$4 sm:$0xff]  }
 0x3b5   :  { %v6180_v44 = vpop.eup %6179  ;;  %12513 = vst [vmem:[#allocation52_spill] sm:$0xff] %v8674_v58 }
 0x3b6   :  { %v1900_v12 = vmul.f32 %v6180_v44, %v6178_v34  ;;  %v8668_v34 = vld [vmem:[#allocation5 + $0x20] ss:$16 sps:$4 sm:$0xff]   ;;  %v8677_v44 = vld [vmem:[#allocation5 + $0x4c] ss:$16 sps:$4 sm:$0xff]  }
 0x3b7   :  { %2561 = vmatpush1.bf16.msra.mxu0 %v12511_v24  ;;  %2602 = vmatpush1.bf16.msra.mxu1 %v12512_v59  ;;  %12514 = vst [vmem:[#allocation53_spill] sm:$0xff] %v8677_v44  ;;  %v8683_v59 = vld [vmem:[#allocation5 + $0x48] ss:$16 sps:$4 sm:$0xff]  }
 0x3b8   :  { %v6182_v51 = vpop.eup %6181  ;;  %v2529_v61 = vpack.c.bf16 %v1900_v12, %v1900_v12  ;;  %2637 = vmatprep.subr.bf16.mxu0 %v8650_v57  ;;  %2678 = vmatprep.subr.bf16.mxu1 %v8653_v60  ;;  %12516 = vst [vmem:[#allocation82_spill] sm:$0xff] %v8683_v59 }
 0x3b9   :  { %v2001_v43 = vadd.f32 1.0, %v6182_v51  ;;  %v6184_v7 = vpop.eup %6183  ;;  %v8680_v51 = vld [vmem:[#allocation5 + $0x40] ss:$16 sps:$4 sm:$0xff]  }
 0x3ba   :  { %v2002_v52 = vadd.f32 1.0, %v6184_v7  ;;  %2563 = vmatmul.mubr.bf16.vlgmr.msra.gmra.mrb[44].mxu0 %v2529_v61  ;;  %2604 = vmatmul.mubr.bf16.vlgmr.msra.gmra.mrb[44].mxu1 %v2529_v61  ;;  %v6186_v12 = vpop.eup %6185  ;;  %12515 = vst [vmem:[#allocation81_spill] sm:$0xff] %v8680_v51  ;;  %v8689_v7 = vld [vmem:[#allocation5 + $0x6c] ss:$16 sps:$4 sm:$0xff]  }
 0x3bb   :  { %6187 = vrcp.f32 %v2001_v43  ;;  %2638 = vmatpush1.bf16.msra.mxu0 %v8656_v0  ;;  %2669 = vmatprep.mubr.bf16.mxu0 %v2529_v61  ;;  %v8686_v43 = vld [vmem:[#allocation5 + $0x64] ss:$16 sps:$4 sm:$0xff]   ;;  %12517 = vst [vmem:[#allocation83_spill] sm:$0xff] %v8689_v7 }
 0x3bc   :  { %6189 = vrcp.f32 %v2002_v52  ;;  %2679 = vmatpush1.bf16.msra.mxu1 %v8659_v28  ;;  %2710 = vmatprep.mubr.bf16.mxu1 %v2529_v61 }
 0x3bd   :  { %2639 = vmatprep.subr.bf16.mxu0 %v8662_v56  ;;  %2680 = vmatprep.subr.bf16.mxu1 %v8665_v53 }
 0x3bf   :  { %2640 = vmatpush1.bf16.msra.mxu0 %v8668_v34 }
 0x3c0   :  { %2681 = vmatpush1.bf16.msra.mxu1 %v8671_v15  ;;  %2641 = vmatprep.subr.bf16.mxu0 %v8674_v58  ;;  %v8693_v58 = vld [vmem:[#allocation5 + $0x60] ss:$16 sps:$4 sm:$0xff]  }
 0x3c1   :  { %2682 = vmatprep.subr.bf16.mxu1 %v8677_v44 }
 0x3c3   :  { %2642 = vmatpush1.bf16.msra.mxu0 %v8680_v51  ;;  %v8696_v51 = vld [vmem:[#allocation5 + $0x68] ss:$16 sps:$4 sm:$0xff]  }
 0x3c4   :  { %2683 = vmatpush1.bf16.msra.mxu1 %v8683_v59  ;;  %2643 = vmatprep.subr.bf16.mxu0 %v8686_v43  ;;  %12518 = vst [vmem:[#allocation84_spill] sm:$0xff] %v8696_v51  ;;  %v8699_v59 = vld [vmem:[#allocation5 + $0x84] ss:$16 sps:$4 sm:$0xff]  }
 0x3c5   :  { %v6188_v24 = vpop.eup %6187  ;;  %2684 = vmatprep.subr.bf16.mxu1 %v8689_v7  ;;  %12519 = vst [vmem:[#allocation85_spill] sm:$0xff] %v8699_v59  ;;  %v8707_v7 = vld [vmem:[#allocation5 + $0x80] ss:$16 sps:$4 sm:$0xff]  }
 0x3c6   :  { %v2012_v61 = vmul.f32 %v6188_v24, %v6186_v12  ;;  %v6190_v52 = vpop.eup %6189  ;;  %v8704_v24 = vld [vmem:[#allocation5 + $0x8c] ss:$16 sps:$4 sm:$0xff]   ;;  %12521 = vst [vmem:[#allocation87_spill] sm:$0xff] %v8707_v7 }
 0x3c7   :  { %v2011_v44 = vmul.f32 %v6190_v52, %v8253_v55  ;;  %2644 = vmatpush1.bf16.msra.mxu0 %v8693_v58  ;;  %12520 = vst [vmem:[#allocation86_spill] sm:$0xff] %v8704_v24  ;;  %v8710_v55 = vld [vmem:[#allocation5 + $0x88] ss:$16 sps:$4 sm:$0xff]   ;;  %v8713_v52 = vld [vmem:[#allocation5 + $0xa4] ss:$16 sps:$4 sm:$0xff]  }
 0x3c8   :  { %2685 = vmatpush1.bf16.msra.mxu1 %v8696_v51  ;;  %2645 = vmatprep.subr.bf16.mxu0 %v8699_v59  ;;  %12522 = vst [vmem:[#allocation88_spill] sm:$0xff] %v8710_v55  ;;  %12523 = vst [vmem:[#allocation89_spill] sm:$0xff] %v8713_v52  ;;  %v8716_v51 = vld [vmem:[#allocation5 + $0xac] ss:$16 sps:$4 sm:$0xff]   ;;  %v8841_v59 = vld [vmem:[#allocation5 + $0x1e0] ss:$16 sps:$4 sm:$0xff]  }
 0x3c9   :  { %v8702_v12 = vadd.f32 %v2012_v61, %v2011_v44  ;;  %2686 = vmatprep.subr.bf16.mxu1 %v8704_v24  ;;  %12524 = vst [vmem:[#allocation90_spill] sm:$0xff] %v8716_v51  ;;  %v8719_v44 = vld [vmem:[#allocation5 + $0xa0] ss:$16 sps:$4 sm:$0xff]   ;;  %v8722_v61 = vld [vmem:[#allocation5 + $0xa8] ss:$16 sps:$4 sm:$0xff]   ;;  %12562 = vst [vmem:[#allocation128_spill] sm:$0xff] %v8841_v59 }
 0x3ca   :  { %12525 = vst [vmem:[#allocation91_spill] sm:$0xff] %v8719_v44  ;;  %12526 = vst [vmem:[#allocation92_spill] sm:$0xff] %v8722_v61  ;;  %v8735_v24 = vld [vmem:[#allocation5 + $0xc8] ss:$16 sps:$4 sm:$0xff]  }
 0x3cb   :  { %2646 = vmatpush1.bf16.msra.mxu0 %v8707_v7  ;;  %v8725_v7 = vld [vmem:[#allocation5 + $0xc4] ss:$16 sps:$4 sm:$0xff]   ;;  %12530 = vst [vmem:[#allocation96_spill] sm:$0xff] %v8735_v24 }
 0x3cc   :  { %2687 = vmatpush1.bf16.msra.mxu1 %v8710_v55  ;;  %2647 = vmatprep.subr.bf16.mxu0 %v8713_v52  ;;  %12527 = vst [vmem:[#allocation93_spill] sm:$0xff] %v8725_v7  ;;  %v8728_v55 = vld [vmem:[#allocation5 + $0xcc] ss:$16 sps:$4 sm:$0xff]   ;;  %v8731_v52 = vld [vmem:[#allocation5 + $0xc0] ss:$16 sps:$4 sm:$0xff]  }
 0x3cd   :  { %2688 = vmatprep.subr.bf16.mxu1 %v8716_v51  ;;  %12528 = vst [vmem:[#allocation94_spill] sm:$0xff] %v8728_v55  ;;  %12529 = vst [vmem:[#allocation95_spill] sm:$0xff] %v8731_v52  ;;  %v5560_v51 = vmul.f32 -1.442695, %v8631_v23  ;;  %v8750_v23 = vld [vmem:[#allocation5 + $0x104] ss:$16 sps:$4 sm:$0xff]  }
 0x3ce   :  { %12535 = vst [vmem:[#allocation101_spill] sm:$0xff] %v8750_v23 }
 0x3cf   :  { %2648 = vmatpush1.bf16.msra.mxu0 %v8719_v44  ;;  %v8738_v44 = vld [vmem:[#allocation5 + $0xe4] ss:$16 sps:$4 sm:$0xff]   ;;  %6191 = vpow2.f32 %v5560_v51 }
 0x3d0   :  { %2689 = vmatpush1.bf16.msra.mxu1 %v8722_v61  ;;  %2649 = vmatprep.subr.bf16.mxu0 %v8725_v7  ;;  %12531 = vst [vmem:[#allocation97_spill] sm:$0xff] %v8738_v44  ;;  %v8741_v61 = vld [vmem:[#allocation5 + $0xec] ss:$16 sps:$4 sm:$0xff]   ;;  %v8744_v7 = vld [vmem:[#allocation5 + $0xe0] ss:$16 sps:$4 sm:$0xff]   ;;  %6193 = vtanh.f32 %v8702_v12 }
 0x3d1   :  { %2690 = vmatprep.subr.bf16.mxu1 %v8728_v55  ;;  %12532 = vst [vmem:[#allocation98_spill] sm:$0xff] %v8741_v61  ;;  %12533 = vst [vmem:[#allocation99_spill] sm:$0xff] %v8744_v7  ;;  %v8762_v51 = vld [vmem:[#allocation5 + $0x124] ss:$16 sps:$4 sm:$0xff]   ;;  %v8789_v55 = vld [vmem:[#allocation5 + $0x16c] ss:$16 sps:$4 sm:$0xff]  }
 0x3d2   :  { %12539 = vst [vmem:[#allocation105_spill] sm:$0xff] %v8762_v51  ;;  %12548 = vst [vmem:[#allocation114_spill] sm:$0xff] %v8789_v55 }
 0x3d3   :  { %2650 = vmatpush1.bf16.msra.mxu0 %v8731_v52  ;;  %v8747_v52 = vld [vmem:[#allocation5 + $0xe8] ss:$16 sps:$4 sm:$0xff]  }
 0x3d4   :  { %2691 = vmatpush1.bf16.msra.mxu1 %v8735_v24  ;;  %2651 = vmatprep.subr.bf16.mxu0 %v8738_v44  ;;  %12534 = vst [vmem:[#allocation100_spill] sm:$0xff] %v8747_v52  ;;  %v8753_v24 = vld [vmem:[#allocation5 + $0x10c] ss:$16 sps:$4 sm:$0xff]   ;;  %v8756_v44 = vld [vmem:[#allocation5 + $0x100] ss:$16 sps:$4 sm:$0xff]  }
 0x3d5   :  { %2692 = vmatprep.subr.bf16.mxu1 %v8741_v61  ;;  %12536 = vst [vmem:[#allocation102_spill] sm:$0xff] %v8753_v24  ;;  %12537 = vst [vmem:[#allocation103_spill] sm:$0xff] %v8756_v44  ;;  %v8759_v61 = vld [vmem:[#allocation5 + $0x108] ss:$16 sps:$4 sm:$0xff]  }
 0x3d6   :  { %12538 = vst [vmem:[#allocation104_spill] sm:$0xff] %v8759_v61 }
 0x3d7   :  { %2652 = vmatpush1.bf16.msra.mxu0 %v8744_v7  ;;  %v8780_v7 = vld [vmem:[#allocation5 + $0x140] ss:$16 sps:$4 sm:$0xff]  }
 0x3d8   :  { %2693 = vmatpush1.bf16.msra.mxu1 %v8747_v52  ;;  %2653 = vmatprep.subr.bf16.mxu0 %v8750_v23  ;;  %v8765_v52 = vld [vmem:[#allocation5 + $0x12c] ss:$16 sps:$4 sm:$0xff]   ;;  %v8768_v23 = vld [vmem:[#allocation5 + $0x120] ss:$16 sps:$4 sm:$0xff]   ;;  %12545 = vst [vmem:[#allocation111_spill] sm:$0xff] %v8780_v7 }
 0x3d9   :  { %2694 = vmatprep.subr.bf16.mxu1 %v8753_v24  ;;  %12540 = vst [vmem:[#allocation106_spill] sm:$0xff] %v8765_v52  ;;  %12541 = vst [vmem:[#allocation107_spill] sm:$0xff] %v8768_v23  ;;  %v8771_v24 = vld [vmem:[#allocation5 + $0x128] ss:$16 sps:$4 sm:$0xff]  }
 0x3da   :  { %12542 = vst [vmem:[#allocation108_spill] sm:$0xff] %v8771_v24 }
 0x3db   :  { %2654 = vmatpush1.bf16.msra.mxu0 %v8756_v44  ;;  %v8774_v44 = vld [vmem:[#allocation5 + $0x144] ss:$16 sps:$4 sm:$0xff]  }
 0x3dc   :  { %2695 = vmatpush1.bf16.msra.mxu1 %v8759_v61  ;;  %2655 = vmatprep.subr.bf16.mxu0 %v8762_v51  ;;  %12543 = vst [vmem:[#allocation109_spill] sm:$0xff] %v8774_v44  ;;  %v8777_v61 = vld [vmem:[#allocation5 + $0x14c] ss:$16 sps:$4 sm:$0xff]   ;;  %v6192_v51 = vpop.eup %6191 }
 0x3dd   :  { %2696 = vmatprep.subr.bf16.mxu1 %v8765_v52  ;;  %12544 = vst [vmem:[#allocation110_spill] sm:$0xff] %v8777_v61  ;;  %v8783_v52 = vld [vmem:[#allocation5 + $0x148] ss:$16 sps:$4 sm:$0xff]  }
 0x3de   :  { %12546 = vst [vmem:[#allocation112_spill] sm:$0xff] %v8783_v52 }
 0x3df   :  { %2656 = vmatpush1.bf16.msra.mxu0 %v8768_v23  ;;  %v8786_v23 = vld [vmem:[#allocation5 + $0x164] ss:$16 sps:$4 sm:$0xff]  }
 0x3e0   :  { %2697 = vmatpush1.bf16.msra.mxu1 %v8771_v24  ;;  %2657 = vmatprep.subr.bf16.mxu0 %v8774_v44  ;;  %12547 = vst [vmem:[#allocation113_spill] sm:$0xff] %v8786_v23  ;;  %v2003_v24 = vadd.f32 1.0, %v6192_v51  ;;  %v8802_v51 = vld [vmem:[#allocation5 + $0x18c] ss:$16 sps:$4 sm:$0xff]   ;;  %v8829_v44 = vld [vmem:[#allocation5 + $0x1c0] ss:$16 sps:$4 sm:$0xff]  }
 0x3e1   :  { %2698 = vmatprep.subr.bf16.mxu1 %v8777_v61  ;;  %v8793_v61 = vld [vmem:[#allocation5 + $0x160] ss:$16 sps:$4 sm:$0xff]   ;;  %12552 = vst [vmem:[#allocation118_spill] sm:$0xff] %v8802_v51  ;;  %12561 = vst [vmem:[#allocation127_spill] sm:$0xff] %v8829_v44 }
 0x3e2   :  { %12549 = vst [vmem:[#allocation115_spill] sm:$0xff] %v8793_v61  ;;  %6195 = vrcp.f32 %v2003_v24  ;;  %v8817_v24 = vld [vmem:[#allocation5 + $0x1a0] ss:$16 sps:$4 sm:$0xff]  }
 0x3e3   :  { %2658 = vmatpush1.bf16.msra.mxu0 %v8780_v7  ;;  %v8796_v7 = vld [vmem:[#allocation5 + $0x168] ss:$16 sps:$4 sm:$0xff]   ;;  %12557 = vst [vmem:[#allocation123_spill] sm:$0xff] %v8817_v24 }
 0x3e4   :  { %2699 = vmatpush1.bf16.msra.mxu1 %v8783_v52  ;;  %2659 = vmatprep.subr.bf16.mxu0 %v8786_v23  ;;  %12550 = vst [vmem:[#allocation116_spill] sm:$0xff] %v8796_v7  ;;  %v8799_v52 = vld [vmem:[#allocation5 + $0x184] ss:$16 sps:$4 sm:$0xff]   ;;  %v8808_v23 = vld [vmem:[#allocation5 + $0x188] ss:$16 sps:$4 sm:$0xff]  }
 0x3e5   :  { %2700 = vmatprep.subr.bf16.mxu1 %v8789_v55  ;;  %12551 = vst [vmem:[#allocation117_spill] sm:$0xff] %v8799_v52  ;;  %v8805_v55 = vld [vmem:[#allocation5 + $0x180] ss:$16 sps:$4 sm:$0xff]   ;;  %12554 = vst [vmem:[#allocation120_spill] sm:$0xff] %v8808_v23 }
 0x3e6   :  { %12553 = vst [vmem:[#allocation119_spill] sm:$0xff] %v8805_v55 }
 0x3e7   :  { %2660 = vmatpush1.bf16.msra.mxu0 %v8793_v61  ;;  %v8811_v61 = vld [vmem:[#allocation5 + $0x1a4] ss:$16 sps:$4 sm:$0xff]  }
 0x3e8   :  { %2701 = vmatpush1.bf16.msra.mxu1 %v8796_v7  ;;  %2661 = vmatprep.subr.bf16.mxu0 %v8799_v52  ;;  %12555 = vst [vmem:[#allocation121_spill] sm:$0xff] %v8811_v61  ;;  %v8814_v7 = vld [vmem:[#allocation5 + $0x1ac] ss:$16 sps:$4 sm:$0xff]  }
 0x3e9   :  { %2702 = vmatprep.subr.bf16.mxu1 %v8802_v51  ;;  %12556 = vst [vmem:[#allocation122_spill] sm:$0xff] %v8814_v7  ;;  %v8820_v51 = vld [vmem:[#allocation5 + $0x1a8] ss:$16 sps:$4 sm:$0xff]   ;;  %v8826_v52 = vld [vmem:[#allocation5 + $0x1cc] ss:$16 sps:$4 sm:$0xff]  }
 0x3ea   :  { %12558 = vst [vmem:[#allocation124_spill] sm:$0xff] %v8820_v51  ;;  %12560 = vst [vmem:[#allocation126_spill] sm:$0xff] %v8826_v52 }
 0x3eb   :  { %2662 = vmatpush1.bf16.msra.mxu0 %v8805_v55  ;;  %v8823_v55 = vld [vmem:[#allocation5 + $0x1c4] ss:$16 sps:$4 sm:$0xff]  }
 0x3ec   :  { %2703 = vmatpush1.bf16.msra.mxu1 %v8808_v23  ;;  %2663 = vmatprep.subr.bf16.mxu0 %v8811_v61  ;;  %12559 = vst [vmem:[#allocation125_spill] sm:$0xff] %v8823_v55  ;;  %v6194_v23 = vpop.eup %6193 }
 0x3ed   :  { %2704 = vmatprep.subr.bf16.mxu1 %v8814_v7  ;;  %v6196_v61 = vpop.eup %6195  ;;  %v8832_v7 = vld [vmem:[#allocation5 + $0x1c8] ss:$16 sps:$4 sm:$0xff]  }
 0x3ef   :  { %2664 = vmatpush1.bf16.msra.mxu0 %v8817_v24  ;;  %v8835_v24 = vld [vmem:[#allocation5 + $0x1e4] ss:$16 sps:$4 sm:$0xff]  }
 0x3f0   :  { %2705 = vmatpush1.bf16.msra.mxu1 %v8820_v51  ;;  %2665 = vmatprep.subr.bf16.mxu0 %v8823_v55  ;;  %v2015_v51 = vmul.f32 %v6196_v61, %v6194_v23  ;;  %v8838_v55 = vld [vmem:[#allocation5 + $0x1ec] ss:$16 sps:$4 sm:$0xff]   ;;  %v8849_v61 = vld [vmem:[#allocation3] ss:$16 sps:$4 sm:$0xff]   ;;  %v8852_v23 = vld [vmem:[#allocation3 + $0x8] ss:$16 sps:$4 sm:$0xff]  }
 0x3f1   :  { %2706 = vmatprep.subr.bf16.mxu1 %v8826_v52  ;;  %v8844_v52 = vld [vmem:[#allocation5 + $0x1e8] ss:$16 sps:$4 sm:$0xff]  }
 0x3f2   :  { %12563 = vst [vmem:[#allocation129_spill] sm:$0xff] %v8844_v52 }
 0x3f3   :  { %2666 = vmatpush1.bf16.msra.mxu0 %v8829_v44  ;;  %v2636_v44 = vpack.c.bf16 %v2015_v51, %v2015_v51  ;;  %v8869_v51 = vld [vmem:[#allocation3 + $0x44] ss:$16 sps:$4 sm:$0xff]  }
 0x3f4   :  { %2707 = vmatpush1.bf16.msra.mxu1 %v8832_v7  ;;  %2667 = vmatprep.subr.bf16.mxu0 %v8835_v24  ;;  %12568 = vst [vmem:[#allocation134_spill] sm:$0xff] %v8869_v51 }
 0x3f5   :  { %2708 = vmatprep.subr.bf16.mxu1 %v8838_v55 }
 0x3f7   :  { %2668 = vmatpush1.bf16.msra.mxu0 %v8841_v59  ;;  %v8855_v59 = vld [vmem:[#allocation3 + $0x24] ss:$16 sps:$4 sm:$0xff]  }
 0x3f8   :  { %2709 = vmatpush1.bf16.msra.mxu1 %v8844_v52  ;;  %2748 = vmatprep.subr.bf16.mxu0 %v8302_v62  ;;  %12564 = vst [vmem:[#allocation130_spill] sm:$0xff] %v8855_v59  ;;  %v8858_v52 = vld [vmem:[#allocation3 + $0x2c] ss:$16 sps:$4 sm:$0xff]   ;;  %v8863_v62 = vld [vmem:[#allocation3 + $0x20] ss:$16 sps:$4 sm:$0xff]  }
 0x3f9   :  { %2789 = vmatprep.subr.bf16.mxu1 %v8305_v63  ;;  %12565 = vst [vmem:[#allocation131_spill] sm:$0xff] %v8858_v52  ;;  %12566 = vst [vmem:[#allocation132_spill] sm:$0xff] %v8863_v62  ;;  %v8866_v63 = vld [vmem:[#allocation3 + $0x28] ss:$16 sps:$4 sm:$0xff]  }
 0x3fa   :  { %2670 = vmatmul.mubr.bf16.vlgmr.msra.gmra.mrb[48].mxu0 %v2636_v44  ;;  %12567 = vst [vmem:[#allocation133_spill] sm:$0xff] %v8866_v63 }
 0x3fb   :  { %2711 = vmatmul.mubr.bf16.vlgmr.msra.gmra.mrb[48].mxu1 %v2636_v44  ;;  %2749 = vmatpush1.bf16.msra.mxu0 %v8849_v61 }
 0x3fc   :  { %2790 = vmatpush1.bf16.msra.mxu1 %v8852_v23  ;;  %2750 = vmatprep.subr.bf16.mxu0 %v8855_v59  ;;  %v8872_v59 = vld [vmem:[#allocation3 + $0x4c] ss:$16 sps:$4 sm:$0xff]  }
 0x3fd   :  { %2791 = vmatprep.subr.bf16.mxu1 %v8858_v52  ;;  %2780 = vmatprep.mubr.bf16.mxu0 %v12278_v22  ;;  %12569 = vst [vmem:[#allocation135_spill] sm:$0xff] %v8872_v59  ;;  %v8875_v52 = vld [vmem:[#allocation3 + $0x40] ss:$16 sps:$4 sm:$0xff]  }
 0x3fe   :  { %2821 = vmatprep.mubr.bf16.mxu1 %v12278_v22  ;;  %12570 = vst [vmem:[#allocation57_spill] sm:$0xff] %v8875_v52  ;;  %v8878_v22 = vld [vmem:[#allocation3 + $0x48] ss:$16 sps:$4 sm:$0xff]  }
 0x3ff   :  { %2751 = vmatpush1.bf16.msra.mxu0 %v8863_v62  ;;  %12571 = vst [vmem:[#allocation58_spill] sm:$0xff] %v8878_v22  ;;  %v8881_v62 = vld [vmem:[#allocation3 + $0x64] ss:$16 sps:$4 sm:$0xff]  }
 0x400   :  { %2792 = vmatpush1.bf16.msra.mxu1 %v8866_v63  ;;  %2752 = vmatprep.subr.bf16.mxu0 %v8869_v51  ;;  %12572 = vst [vmem:[#allocation59_spill] sm:$0xff] %v8881_v62  ;;  %v8884_v63 = vld [vmem:[#allocation3 + $0x6c] ss:$16 sps:$4 sm:$0xff]   ;;  %v8887_v51 = vld [vmem:[#allocation3 + $0x60] ss:$16 sps:$4 sm:$0xff]  }
 0x401   :  { %2793 = vmatprep.subr.bf16.mxu1 %v8872_v59  ;;  %12573 = vst [vmem:[#allocation60_spill] sm:$0xff] %v8884_v63  ;;  %12574 = vst [vmem:[#allocation136_spill] sm:$0xff] %v8887_v51  ;;  %v8890_v59 = vld [vmem:[#allocation3 + $0x68] ss:$16 sps:$4 sm:$0xff]  }
 0x402   :  { %12575 = vst [vmem:[#allocation137_spill] sm:$0xff] %v8890_v59 }
 0x403   :  { %2753 = vmatpush1.bf16.msra.mxu0 %v8875_v52  ;;  %v8893_v52 = vld [vmem:[#allocation3 + $0x84] ss:$16 sps:$4 sm:$0xff]  }
 0x404   :  { %2794 = vmatpush1.bf16.msra.mxu1 %v8878_v22  ;;  %2754 = vmatprep.subr.bf16.mxu0 %v8881_v62  ;;  %12576 = vst [vmem:[#allocation138_spill] sm:$0xff] %v8893_v52  ;;  %v8896_v22 = vld [vmem:[#allocation3 + $0x8c] ss:$16 sps:$4 sm:$0xff]   ;;  %v8899_v62 = vld [vmem:[#allocation3 + $0x80] ss:$16 sps:$4 sm:$0xff]  }
 0x405   :  { %2795 = vmatprep.subr.bf16.mxu1 %v8884_v63  ;;  %12577 = vst [vmem:[#allocation139_spill] sm:$0xff] %v8896_v22  ;;  %v8902_v63 = vld [vmem:[#allocation3 + $0x88] ss:$16 sps:$4 sm:$0xff]  }
 0x407   :  { %2755 = vmatpush1.bf16.msra.mxu0 %v8887_v51  ;;  %v8905_v51 = vld [vmem:[#allocation3 + $0xa4] ss:$16 sps:$4 sm:$0xff]  }
 0x408   :  { %2796 = vmatpush1.bf16.msra.mxu1 %v8890_v59  ;;  %2756 = vmatprep.subr.bf16.mxu0 %v8893_v52  ;;  %v8908_v59 = vld [vmem:[#allocation3 + $0xac] ss:$16 sps:$4 sm:$0xff]   ;;  %v8911_v52 = vld [vmem:[#allocation3 + $0xa0] ss:$16 sps:$4 sm:$0xff]  }
 0x409   :  { %2797 = vmatprep.subr.bf16.mxu1 %v8896_v22  ;;  %v8914_v22 = vld [vmem:[#allocation3 + $0xa8] ss:$16 sps:$4 sm:$0xff]  }
 0x40b   :  { %2757 = vmatpush1.bf16.msra.mxu0 %v8899_v62 }
 0x40c   :  { %2798 = vmatpush1.bf16.msra.mxu1 %v8902_v63  ;;  %2758 = vmatprep.subr.bf16.mxu0 %v8905_v51 }
 0x40d   :  { %2799 = vmatprep.subr.bf16.mxu1 %v8908_v59 }
 0x40f   :  { %2759 = vmatpush1.bf16.msra.mxu0 %v8911_v52 }
 0x410   :  { %2800 = vmatpush1.bf16.msra.mxu1 %v8914_v22  ;;  %2760 = vmatprep.subr.bf16.mxu0 %v8332_v29  ;;  %v12578_v29 = vld [vmem:[#allocation13_spill] sm:$0xff] }
 0x411   :  { %2801 = vmatprep.subr.bf16.mxu1 %v8335_v36  ;;  %v12579_v36 = vld [vmem:[#allocation14_spill] sm:$0xff] }
 0x413   :  { %2761 = vmatpush1.bf16.msra.mxu0 %v8338_v30  ;;  %v12580_v30 = vld [vmem:[#allocation15_spill] sm:$0xff] }
 0x414   :  { %2802 = vmatpush1.bf16.msra.mxu1 %v8341_v35  ;;  %2762 = vmatprep.subr.bf16.mxu0 %v8344_v37  ;;  %v12581_v35 = vld [vmem:[#allocation16_spill] sm:$0xff]  ;;  %v12582_v37 = vld [vmem:[#allocation17_spill] sm:$0xff] }
 0x415   :  { %2803 = vmatprep.subr.bf16.mxu1 %v8347_v31  ;;  %v12583_v31 = vld [vmem:[#allocation18_spill] sm:$0xff] }
 0x417   :  { %2763 = vmatpush1.bf16.msra.mxu0 %v8354_v9  ;;  %v12586_v9 = vld [vmem:[#allocation21_spill] sm:$0xff] }
 0x418   :  { %2804 = vmatpush1.bf16.msra.mxu1 %v8357_v32  ;;  %2860 = vmatprep.subr.bf16.mxu0 %v8350_v8  ;;  %v12584_v8 = vld [vmem:[#allocation19_spill] sm:$0xff]  ;;  %v12587_v32 = vld [vmem:[#allocation22_spill] sm:$0xff] }
 0x419   :  { %2901 = vmatprep.subr.bf16.mxu1 %v8352_v20  ;;  %v12585_v20 = vld [vmem:[#allocation20_spill] sm:$0xff] }
 0x41a   :  { %2781 = vmatmul.mubr.bf16.vlgmr.msra.gmra.mrb[52].mxu0 %v2636_v44 }
 0x41b   :  { %2822 = vmatmul.mubr.bf16.vlgmr.msra.gmra.mrb[52].mxu1 %v2636_v44  ;;  %2861 = vmatpush1.bf16.msra.mxu0 %v8360_v18  ;;  %v12588_v18 = vld [vmem:[#allocation23_spill] sm:$0xff] }
 0x41c   :  { %2902 = vmatpush1.bf16.msra.mxu1 %v8362_v13  ;;  %2862 = vmatprep.subr.bf16.mxu0 %v8366_v1  ;;  %v12589_v13 = vld [vmem:[#allocation24_spill] sm:$0xff]  ;;  %v12590_v1 = vld [vmem:[#allocation25_spill] sm:$0xff] }
 0x41d   :  { %2903 = vmatprep.subr.bf16.mxu1 %v8368_v2  ;;  %v12591_v2 = vld [vmem:[#allocation26_spill] sm:$0xff] }
 0x41f   :  { %2863 = vmatpush1.bf16.msra.mxu0 %v8372_v3  ;;  %v12592_v3 = vld [vmem:[#allocation27_spill] sm:$0xff] }
 0x420   :  { %2904 = vmatpush1.bf16.msra.mxu1 %v8374_v4  ;;  %2864 = vmatprep.subr.bf16.mxu0 %v8378_v5  ;;  %v12593_v4 = vld [vmem:[#allocation28_spill] sm:$0xff]  ;;  %v2081_v5 = vld [vmem:[%s11560_s9] sm:$0xf] }
 0x421   :  { %2905 = vmatprep.subr.bf16.mxu1 %v8380_v6  ;;  %v12594_v6 = vld [vmem:[#allocation29_spill] sm:$0xff] }
 0x423   :  { %2865 = vmatpush1.bf16.msra.mxu0 %v8386_v10  ;;  %v12595_v10 = vld [vmem:[#allocation30_spill] sm:$0xff] }
 0x424   :  { %2906 = vmatpush1.bf16.msra.mxu1 %v8388_v19  ;;  %2866 = vmatprep.subr.bf16.mxu0 %v8392_v41  ;;  %v12596_v19 = vld [vmem:[#allocation31_spill] sm:$0xff]  ;;  %v12597_v41 = vld [vmem:[#allocation32_spill] sm:$0xff] }
 0x425   :  { %2907 = vmatprep.subr.bf16.mxu1 %v8394_v14  ;;  %v12598_v14 = vld [vmem:[#allocation55_spill] sm:$0xff] }
 0x427   :  { %2867 = vmatpush1.bf16.msra.mxu0 %v8398_v25  ;;  %v8979_v25 = vrot.slane %v2081_v5, %v12598_v14 }
 0x428   :  { %2908 = vmatpush1.bf16.msra.mxu1 %v8400_v21  ;;  %2868 = vmatprep.subr.bf16.mxu0 %v8404_v46  ;;  %v12600_v21 = vld [vmem:[#allocation56_spill] sm:$0xff] }
 0x429   :  { %2909 = vmatprep.subr.bf16.mxu1 %v8406_v40  ;;  %12599 = vst [vmem:[#allocation140_spill] sm:$0xff] %v8979_v25  ;;  %v8982_v46 = vrot.slane %v2081_v5, %v12600_v21  ;;  %v12602_v40 = vld [vmem:[#allocation33_spill] sm:$0xff] }
 0x42b   :  { %2869 = vmatpush1.bf16.msra.mxu0 %v8410_v42  ;;  %12601 = vst [vmem:[#allocation141_spill] sm:$0xff] %v8982_v46  ;;  %v12603_v42 = vld [vmem:[#allocation34_spill] sm:$0xff] }
 0x42c   :  { %2910 = vmatpush1.bf16.msra.mxu1 %v8412_v11  ;;  %2870 = vmatprep.subr.bf16.mxu0 %v8416_v17  ;;  %v12604_v11 = vld [vmem:[#allocation35_spill] sm:$0xff] }
 0x42d   :  { %2911 = vmatprep.subr.bf16.mxu1 %v8418_v48 }
 0x42f   :  { %2871 = vmatpush1.bf16.msra.mxu0 %v8422_v49  ;;  %v12605_v49 = vld [vmem:[#allocation36_spill] sm:$0xff] }
 0x430   :  { %2912 = vmatpush1.bf16.msra.mxu1 %v8424_v45  ;;  %2872 = vmatprep.subr.bf16.mxu0 %v8428_v38 }
 0x431   :  { %2913 = vmatprep.subr.bf16.mxu1 %v8430_v39 }
 0x433   :  { %2873 = vmatpush1.bf16.msra.mxu0 %v8434_v26 }
 0x434   :  { %2914 = vmatpush1.bf16.msra.mxu1 %v8436_v16  ;;  %2874 = vmatprep.subr.bf16.mxu0 %v8440_v50 }
 0x435   :  { %2915 = vmatprep.subr.bf16.mxu1 %v8442_v47  ;;  %v12606_v47 = vld [vmem:[#allocation37_spill] sm:$0xff] }
 0x437   :  { %2875 = vmatpush1.bf16.msra.mxu0 %v12578_v29 }
 0x438   :  { %2916 = vmatpush1.bf16.msra.mxu1 %v12579_v36  ;;  %2876 = vmatprep.subr.bf16.mxu0 %v12580_v30  ;;  %v12607_v30 = vld [vmem:[#allocation38_spill] sm:$0xff] }
 0x439   :  { %2917 = vmatprep.subr.bf16.mxu1 %v12581_v35  ;;  %v12608_v35 = vld [vmem:[#allocation39_spill] sm:$0xff] }
 0x43b   :  { %2877 = vmatpush1.bf16.msra.mxu0 %v12582_v37 }
 0x43c   :  { %2918 = vmatpush1.bf16.msra.mxu1 %v12583_v31  ;;  %2878 = vmatprep.subr.bf16.mxu0 %v12584_v8  ;;  %v12609_v31 = vld [vmem:[#allocation40_spill] sm:$0xff]  ;;  %v8995_v8 = vrot.slane %v2081_v5, %v7832_v33  ;;  %v9007_v33 = vld [vmem:[#allocation7 + $0x4] ss:$16 sps:$4 sm:$0xff]  }
 0x43d   :  { %2919 = vmatprep.subr.bf16.mxu1 %v12585_v20  ;;  %v12611_v20 = vld [vmem:[#allocation41_spill] sm:$0xff] }
 0x43e   :  { %12610 = vst [vmem:[#allocation142_spill] sm:$0xff] %v8995_v8 }
 0x43f   :  { %2879 = vmatpush1.bf16.msra.mxu0 %v12586_v9  ;;  %v12612_v9 = vld [vmem:[#allocation42_spill] sm:$0xff] }
 0x440   :  { %2920 = vmatpush1.bf16.msra.mxu1 %v12587_v32  ;;  %2880 = vmatprep.subr.bf16.mxu0 %v12588_v18  ;;  %v12613_v32 = vld [vmem:[#allocation43_spill] sm:$0xff]  ;;  %v12614_v18 = vld [vmem:[#allocation54_spill] sm:$0xff] }
 0x441   :  { %2921 = vmatprep.subr.bf16.mxu1 %v12589_v13  ;;  %v9001_v13 = vrot.slane %v2081_v5, %v12614_v18 }
 0x443   :  { %2881 = vmatpush1.bf16.msra.mxu0 %v12590_v1  ;;  %12615 = vst [vmem:[#allocation143_spill] sm:$0xff] %v9001_v13  ;;  %v12616_v1 = vld [vmem:[#allocation44_spill] sm:$0xff] }
 0x444   :  { %2922 = vmatpush1.bf16.msra.mxu1 %v12591_v2  ;;  %2882 = vmatprep.subr.bf16.mxu0 %v12592_v3  ;;  %v12617_v3 = vld [vmem:[#allocation45_spill] sm:$0xff] }
 0x445   :  { %2923 = vmatprep.subr.bf16.mxu1 %v12593_v4  ;;  %v12618_v4 = vld [vmem:[#allocation46_spill] sm:$0xff] }
 0x447   :  { %2883 = vmatpush1.bf16.msra.mxu0 %v12594_v6 }
 0x448   :  { %2924 = vmatpush1.bf16.msra.mxu1 %v12595_v10  ;;  %2884 = vmatprep.subr.bf16.mxu0 %v12596_v19  ;;  %v9011_v10 = vld [vmem:[#allocation7 + $0xc] ss:$16 sps:$4 sm:$0xff]  }
 0x449   :  { %2925 = vmatprep.subr.bf16.mxu1 %v12597_v41 }
 0x44b   :  { %2885 = vmatpush1.bf16.msra.mxu0 %v12602_v40 }
 0x44c   :  { %2926 = vmatpush1.bf16.msra.mxu1 %v12603_v42  ;;  %2886 = vmatprep.subr.bf16.mxu0 %v12604_v11 }
 0x44d   :  { %v2457_v17 = vpop.f32.mrb[40].mxu0  ;;  %v2498_v48 = vpop.f32.mrb[40].mxu1  ;;  %2927 = vmatprep.subr.bf16.mxu1 %v12605_v49 }
 0x44e   :  { %v2458_v45 = vadd.f32 %v2457_v17, %v8979_v25  ;;  %v2459_v38 = vpop.f32.mrb[41].mxu0  ;;  %v2500_v39 = vpop.f32.mrb[41].mxu1  ;;  %v2499_v2 = vadd.f32 %v2498_v48, %v8995_v8 }
 0x44f   :  { %v2460_v26 = vadd.f32 %v2459_v38, %v8982_v46  ;;  %v2461_v16 = vpop.f32.mrb[42].mxu0  ;;  %v2502_v50 = vpop.f32.mrb[42].mxu1  ;;  %2887 = vmatpush1.bf16.msra.mxu0 %v12606_v47  ;;  %v2501_v6 = vadd.f32 %v2500_v39, %v9001_v13 }
 0x450   :  { %v5625_v44 = vmul.f32 -1.442695, %v2458_v45  ;;  %v2462_v29 = vpop.f32.mrb[43].mxu0  ;;  %v2503_v36 = vpop.f32.mrb[43].mxu1  ;;  %2928 = vmatpush1.bf16.msra.mxu1 %v12607_v30  ;;  %2888 = vmatprep.subr.bf16.mxu0 %v12608_v35  ;;  %v5627_v5 = vmul.f32 -1.442695, %v2499_v2 }
 0x451   :  { %v5626_v37 = vmul.f32 -1.442695, %v2460_v26  ;;  %2929 = vmatprep.subr.bf16.mxu1 %v12609_v31  ;;  %v12619_v29 = vld [vmem:[#allocation47_spill] sm:$0xff] }
 0x452   :  { %6197 = vpow2.f32 %v5625_v44 }
 0x453   :  { %2889 = vmatpush1.bf16.msra.mxu0 %v12611_v20  ;;  %6199 = vpow2.f32 %v5626_v37  ;;  %v12620_v37 = vld [vmem:[#allocation48_spill] sm:$0xff] }
 0x454   :  { %2930 = vmatpush1.bf16.msra.mxu1 %v12612_v9  ;;  %2890 = vmatprep.subr.bf16.mxu0 %v12613_v32  ;;  %6201 = vtanh.f32 %v2501_v6  ;;  %v12622_v6 = vld [vmem:[#allocation50_spill] sm:$0xff] }
 0x455   :  { %2931 = vmatprep.subr.bf16.mxu1 %v12616_v1  ;;  %6203 = vpow2.f32 %v5627_v5 }
 0x457   :  { %2891 = vmatpush1.bf16.msra.mxu0 %v12617_v3  ;;  %v12621_v3 = vld [vmem:[#allocation49_spill] sm:$0xff] }
 0x458   :  { %2932 = vmatpush1.bf16.msra.mxu1 %v12618_v4  ;;  %2967 = vmatprep.subr.bf16.mxu0 %v9007_v33 }
 0x459   :  { %3008 = vmatprep.subr.bf16.mxu1 %v9011_v10 }
 0x45c   :  { %v6198_v19 = vpop.eup %6197 }
 0x45d   :  { %v2514_v41 = vadd.f32 1.0, %v6198_v19  ;;  %v6200_v14 = vpop.eup %6199 }
 0x45e   :  { %v2515_v21 = vadd.f32 1.0, %v6200_v14  ;;  %v6202_v40 = vpop.eup %6201 }
 0x45f   :  { %6205 = vrcp.f32 %v2514_v41  ;;  %v6204_v42 = vpop.eup %6203 }
 0x460   :  { %6207 = vrcp.f32 %v2515_v21  ;;  %v2516_v49 = vadd.f32 1.0, %v6204_v42 }
 0x462   :  { %6209 = vrcp.f32 %v2516_v49 }
 0x469   :  { %v6206_v11 = vpop.eup %6205 }
 0x46a   :  { %v2525_v17 = vmul.f32 %v6206_v11, %v6202_v40  ;;  %v6208_v48 = vpop.eup %6207 }
 0x46b   :  { %v2524_v45 = vmul.f32 0.0, %v6208_v48 }
 0x46c   :  { %v6210_v39 = vpop.eup %6209 }
 0x46d   :  { %v9014_v38 = vadd.f32 %v2525_v17, %v2524_v45 }
 0x46f   :  { %6211 = vtanh.f32 %v9014_v38 }
 0x479   :  { %v6212_v26 = vpop.eup %6211 }
 0x47a   :  { %v2528_v16 = vmul.f32 %v6212_v26, %v6210_v39  ;;  %v12623_v39 = vld [vmem:[#allocation51_spill] sm:$0xff] }
 0x47c   :  { %v2859_v50 = vpack.c.bf16 %v2528_v16, %v2528_v16 }
 0x47e   :  { %2892 = vmatprep.mubr.bf16.mxu0 %v2859_v50  ;;  %2933 = vmatprep.mubr.bf16.mxu1 %v2859_v50 }
 0x48d   :  { %v2564_v47 = vpop.f32.mrb[44].mxu0  ;;  %v2605_v44 = vpop.f32.mrb[44].mxu1 }
 0x48e   :  { %v2565_v36 = vadd.f32 %v2564_v47, %v12619_v29  ;;  %v2566_v30 = vpop.f32.mrb[45].mxu0  ;;  %v2607_v35 = vpop.f32.mrb[45].mxu1  ;;  %v2606_v4 = vadd.f32 %v2605_v44, %v12621_v3 }
 0x48f   :  { %v2567_v31 = vadd.f32 %v2566_v30, %v12620_v37  ;;  %v2568_v20 = vpop.f32.mrb[46].mxu0  ;;  %v2609_v9 = vpop.f32.mrb[46].mxu1  ;;  %v2608_v5 = vadd.f32 %v2607_v35, %v12622_v6  ;;  %v9025_v30 = vld [vmem:[#allocation7] ss:$16 sps:$4 sm:$0xff]   ;;  %v9028_v35 = vld [vmem:[#allocation7 + $0x8] ss:$16 sps:$4 sm:$0xff]  }
 0x490   :  { %v5628_v32 = vmul.f32 -1.442695, %v2565_v36  ;;  %v2569_v18 = vpop.f32.mrb[47].mxu0  ;;  %v2610_v1 = vpop.f32.mrb[47].mxu1  ;;  %v5630_v19 = vmul.f32 -1.442695, %v2606_v4 }
 0x491   :  { %v5629_v2 = vmul.f32 -1.442695, %v2567_v31  ;;  %v9031_v31 = vld [vmem:[#allocation7 + $0x24] ss:$16 sps:$4 sm:$0xff]   ;;  %v9034_v20 = vld [vmem:[#allocation7 + $0x2c] ss:$16 sps:$4 sm:$0xff]  }
 0x492   :  { %6213 = vpow2.f32 %v5628_v32  ;;  %v9037_v9 = vld [vmem:[#allocation7 + $0x20] ss:$16 sps:$4 sm:$0xff]   ;;  %v9040_v32 = vld [vmem:[#allocation7 + $0x28] ss:$16 sps:$4 sm:$0xff]   ;;  %v9043_v18 = vld [vmem:[#allocation7 + $0x44] ss:$16 sps:$4 sm:$0xff]  }
 0x493   :  { %6215 = vpow2.f32 %v5629_v2  ;;  %v9046_v1 = vld [vmem:[#allocation7 + $0x4c] ss:$16 sps:$4 sm:$0xff]   ;;  %v9049_v2 = vld [vmem:[#allocation7 + $0x40] ss:$16 sps:$4 sm:$0xff]   ;;  %v9052_v4 = vld [vmem:[#allocation7 + $0x48] ss:$16 sps:$4 sm:$0xff]  }
 0x494   :  { %6217 = vtanh.f32 %v2608_v5  ;;  %v9055_v5 = vld [vmem:[#allocation7 + $0x64] ss:$16 sps:$4 sm:$0xff]  }
 0x495   :  { %6219 = vpow2.f32 %v5630_v19  ;;  %v9058_v19 = vld [vmem:[#allocation7 + $0x6c] ss:$16 sps:$4 sm:$0xff]  }
 0x496   :  { %12624 = vst [vmem:[#allocation144_spill] sm:$0xff] %v9058_v19 }
 0x49c   :  { %v6214_v41 = vpop.eup %6213 }
 0x49d   :  { %v2621_v14 = vadd.f32 1.0, %v6214_v41  ;;  %v6216_v21 = vpop.eup %6215  ;;  %v9061_v41 = vld [vmem:[#allocation7 + $0x60] ss:$16 sps:$4 sm:$0xff]  }
 0x49e   :  { %v2622_v40 = vadd.f32 1.0, %v6216_v21  ;;  %v6218_v42 = vpop.eup %6217  ;;  %12625 = vst [vmem:[#allocation145_spill] sm:$0xff] %v9061_v41 }
 0x49f   :  { %6221 = vrcp.f32 %v2621_v14  ;;  %v6220_v11 = vpop.eup %6219  ;;  %v9064_v14 = vld [vmem:[#allocation7 + $0x68] ss:$16 sps:$4 sm:$0xff]  }
 0x4a0   :  { %6223 = vrcp.f32 %v2622_v40  ;;  %v2623_v45 = vadd.f32 1.0, %v6220_v11  ;;  %12626 = vst [vmem:[#allocation146_spill] sm:$0xff] %v9064_v14  ;;  %v9067_v40 = vld [vmem:[#allocation7 + $0x84] ss:$16 sps:$4 sm:$0xff]  }
 0x4a1   :  { %12627 = vst [vmem:[#allocation147_spill] sm:$0xff] %v9067_v40 }
 0x4a2   :  { %6225 = vrcp.f32 %v2623_v45 }
 0x4a9   :  { %v6222_v17 = vpop.eup %6221 }
 0x4aa   :  { %v2632_v48 = vmul.f32 %v6222_v17, %v6218_v42  ;;  %v6224_v49 = vpop.eup %6223  ;;  %v9070_v42 = vld [vmem:[#allocation7 + $0x8c] ss:$16 sps:$4 sm:$0xff]  }
 0x4ab   :  { %v2631_v26 = vmul.f32 %v6224_v49, %v12623_v39  ;;  %12628 = vst [vmem:[#allocation148_spill] sm:$0xff] %v9070_v42  ;;  %v12629_v49 = vld [vmem:[#allocation151_spill] sm:$0xff] }
 0x4ac   :  { %v6226_v50 = vpop.eup %6225 }
 0x4ad   :  { %v9022_v16 = vadd.f32 %v2632_v48, %v2631_v26 }
 0x4af   :  { %6227 = vtanh.f32 %v9022_v16 }
 0x4b9   :  { %v6228_v47 = vpop.eup %6227 }
 0x4ba   :  { %v2635_v44 = vmul.f32 %v6228_v47, %v6226_v50  ;;  %v9075_v47 = vld [vmem:[#allocation7 + $0x80] ss:$16 sps:$4 sm:$0xff]  }
 0x4bb   :  { %12630 = vst [vmem:[#allocation149_spill] sm:$0xff] %v9075_v47 }
 0x4bc   :  { %v2858_v36 = vpack.c.bf16 %v2635_v44, %v2635_v44  ;;  %v9078_v44 = vld [vmem:[#allocation7 + $0x88] ss:$16 sps:$4 sm:$0xff]  }
 0x4bd   :  { %12631 = vst [vmem:[#allocation13_spill] sm:$0xff] %v9078_v44 }
 0x4be   :  { %2893 = vmatmul.mubr.bf16.vlgmr.msra.gmra.mrb[56].mxu0 %v2858_v36  ;;  %2934 = vmatmul.mubr.bf16.vlgmr.msra.gmra.mrb[56].mxu1 %v2858_v36 }
 0x4bf   :  { %2968 = vmatpush1.bf16.msra.mxu0 %v9025_v30  ;;  %3009 = vmatpush1.bf16.msra.mxu1 %v9028_v35 }
 0x4c0   :  { %2999 = vmatprep.mubr.bf16.mxu0 %v2858_v36  ;;  %3040 = vmatprep.mubr.bf16.mxu1 %v2858_v36 }
 0x4c1   :  { %2969 = vmatprep.subr.bf16.mxu0 %v9031_v31  ;;  %3010 = vmatprep.subr.bf16.mxu1 %v9034_v20 }
 0x4c3   :  { %2970 = vmatpush1.bf16.msra.mxu0 %v9037_v9  ;;  %3011 = vmatpush1.bf16.msra.mxu1 %v9040_v32 }
 0x4c4   :  { %2971 = vmatprep.subr.bf16.mxu0 %v9043_v18  ;;  %3012 = vmatprep.subr.bf16.mxu1 %v9046_v1 }
 0x4c7   :  { %2972 = vmatpush1.bf16.msra.mxu0 %v9049_v2  ;;  %3013 = vmatpush1.bf16.msra.mxu1 %v9052_v4 }
 0x4c8   :  { %2973 = vmatprep.subr.bf16.mxu0 %v9055_v5  ;;  %3014 = vmatprep.subr.bf16.mxu1 %v9058_v19 }
 0x4cb   :  { %2974 = vmatpush1.bf16.msra.mxu0 %v9061_v41  ;;  %3015 = vmatpush1.bf16.msra.mxu1 %v9064_v14  ;;  %v12667_v41 = vld [vmem:[#allocation64_spill] sm:$0xff] }
 0x4cc   :  { %2975 = vmatprep.subr.bf16.mxu0 %v9067_v40  ;;  %3016 = vmatprep.subr.bf16.mxu1 %v9070_v42 }
 0x4cd   :  { %v2671_v21 = vpop.f32.mrb[48].mxu0 }
 0x4ce   :  { %v2672_v11 = vadd.f32 %v2671_v21, %v12460_v54  ;;  %v2712_v17 = vpop.f32.mrb[48].mxu1  ;;  %v2673_v48 = vpop.f32.mrb[49].mxu0  ;;  %v9081_v21 = vld [vmem:[#allocation7 + $0xa4] ss:$16 sps:$4 sm:$0xff]  }
 0x4cf   :  { %v2674_v45 = vadd.f32 %v2673_v48, %v12629_v49  ;;  %v2714_v39 = vpop.f32.mrb[49].mxu1  ;;  %v2675_v26 = vpop.f32.mrb[50].mxu0  ;;  %2976 = vmatpush1.bf16.msra.mxu0 %v9075_v47  ;;  %3017 = vmatpush1.bf16.msra.mxu1 %v9078_v44  ;;  %12632 = vst [vmem:[#allocation14_spill] sm:$0xff] %v9081_v21  ;;  %v9084_v48 = vld [vmem:[#allocation7 + $0xac] ss:$16 sps:$4 sm:$0xff]  }
 0x4d0   :  { %v5631_v50 = vmul.f32 -1.442695, %v2672_v11  ;;  %v2716_v36 = vpop.f32.mrb[50].mxu1  ;;  %v2676_v40 = vpop.f32.mrb[51].mxu0  ;;  %2977 = vmatprep.subr.bf16.mxu0 %v9081_v21  ;;  %12633 = vst [vmem:[#allocation15_spill] sm:$0xff] %v9084_v48  ;;  %3018 = vmatprep.subr.bf16.mxu1 %v9084_v48 }
 0x4d1   :  { %v5632_v42 = vmul.f32 -1.442695, %v2674_v45  ;;  %v2717_v14 = vpop.f32.mrb[51].mxu1  ;;  %v9087_v11 = vld [vmem:[#allocation7 + $0xa0] ss:$16 sps:$4 sm:$0xff]   ;;  %v12636_v40 = vld [vmem:[#allocation152_spill] sm:$0xff] }
 0x4d2   :  { %6229 = vpow2.f32 %v5631_v50  ;;  %12634 = vst [vmem:[#allocation16_spill] sm:$0xff] %v9087_v11  ;;  %v9090_v26 = vld [vmem:[#allocation7 + $0xa8] ss:$16 sps:$4 sm:$0xff]   ;;  %v2713_v14 = vadd.f32 %v2712_v17, %v12636_v40  ;;  %v9094_v45 = vld [vmem:[#allocation7 + $0xc4] ss:$16 sps:$4 sm:$0xff]  }
 0x4d3   :  { %6231 = vpow2.f32 %v5632_v42  ;;  %2978 = vmatpush1.bf16.msra.mxu0 %v9087_v11  ;;  %12635 = vst [vmem:[#allocation17_spill] sm:$0xff] %v9090_v26  ;;  %3019 = vmatpush1.bf16.msra.mxu1 %v9090_v26  ;;  %12637 = vst [vmem:[#allocation18_spill] sm:$0xff] %v9094_v45  ;;  %v9097_v36 = vld [vmem:[#allocation7 + $0xcc] ss:$16 sps:$4 sm:$0xff]   ;;  %v9100_v50 = vld [vmem:[#allocation7 + $0xc0] ss:$16 sps:$4 sm:$0xff]  }
 0x4d4   :  { %2979 = vmatprep.subr.bf16.mxu0 %v9094_v45  ;;  %12638 = vst [vmem:[#allocation19_spill] sm:$0xff] %v9097_v36  ;;  %3020 = vmatprep.subr.bf16.mxu1 %v9097_v36  ;;  %12639 = vst [vmem:[#allocation20_spill] sm:$0xff] %v9100_v50  ;;  %v9103_v42 = vld [vmem:[#allocation7 + $0xc8] ss:$16 sps:$4 sm:$0xff]   ;;  %v5633_v11 = vmul.f32 -1.442695, %v2713_v14 }
 0x4d5   :  { %12640 = vst [vmem:[#allocation21_spill] sm:$0xff] %v9103_v42  ;;  %v9106_v26 = vld [vmem:[#allocation7 + $0xe4] ss:$16 sps:$4 sm:$0xff]   ;;  %v9109_v17 = vld [vmem:[#allocation7 + $0xec] ss:$16 sps:$4 sm:$0xff]  }
 0x4d6   :  { %12641 = vst [vmem:[#allocation22_spill] sm:$0xff] %v9106_v26  ;;  %12642 = vst [vmem:[#allocation23_spill] sm:$0xff] %v9109_v17  ;;  %v12643_v40 = vld [vmem:[#allocation153_spill] sm:$0xff]  ;;  %6233 = vpow2.f32 %v5633_v11 }
 0x4d7   :  { %2980 = vmatpush1.bf16.msra.mxu0 %v9100_v50  ;;  %3021 = vmatpush1.bf16.msra.mxu1 %v9103_v42  ;;  %v2715_v45 = vadd.f32 %v2714_v39, %v12643_v40  ;;  %v9113_v48 = vld [vmem:[#allocation7 + $0xe0] ss:$16 sps:$4 sm:$0xff]   ;;  %v9116_v50 = vld [vmem:[#allocation7 + $0xe8] ss:$16 sps:$4 sm:$0xff]   ;;  %v9119_v42 = vld [vmem:[#allocation7 + $0x104] ss:$16 sps:$4 sm:$0xff]  }
 0x4d8   :  { %2981 = vmatprep.subr.bf16.mxu0 %v9106_v26  ;;  %3022 = vmatprep.subr.bf16.mxu1 %v9109_v17  ;;  %12644 = vst [vmem:[#allocation24_spill] sm:$0xff] %v9113_v48  ;;  %12645 = vst [vmem:[#allocation25_spill] sm:$0xff] %v9116_v50  ;;  %v9122_v26 = vld [vmem:[#allocation7 + $0x10c] ss:$16 sps:$4 sm:$0xff]   ;;  %v9125_v40 = vld [vmem:[#allocation7 + $0x100] ss:$16 sps:$4 sm:$0xff]  }
 0x4d9   :  { %12646 = vst [vmem:[#allocation26_spill] sm:$0xff] %v9119_v42  ;;  %12647 = vst [vmem:[#allocation27_spill] sm:$0xff] %v9122_v26  ;;  %6235 = vtanh.f32 %v2715_v45  ;;  %v9131_v11 = vld [vmem:[#allocation7 + $0x124] ss:$16 sps:$4 sm:$0xff]   ;;  %v9137_v45 = vld [vmem:[#allocation7 + $0x120] ss:$16 sps:$4 sm:$0xff]  }
 0x4da   :  { %12648 = vst [vmem:[#allocation28_spill] sm:$0xff] %v9125_v40  ;;  %12650 = vst [vmem:[#allocation30_spill] sm:$0xff] %v9131_v11  ;;  %v9162_v21 = vld [vmem:[#allocation7 + $0x160] ss:$16 sps:$4 sm:$0xff]   ;;  %v9168_v44 = vld [vmem:[#allocation7 + $0x184] ss:$16 sps:$4 sm:$0xff]  }
 0x4db   :  { %2982 = vmatpush1.bf16.msra.mxu0 %v9113_v48  ;;  %3023 = vmatpush1.bf16.msra.mxu1 %v9116_v50  ;;  %v9128_v48 = vld [vmem:[#allocation7 + $0x108] ss:$16 sps:$4 sm:$0xff]   ;;  %12652 = vst [vmem:[#allocation32_spill] sm:$0xff] %v9137_v45  ;;  %12660 = vst [vmem:[#allocation38_spill] sm:$0xff] %v9162_v21 }
 0x4dc   :  { %v6230_v36 = vpop.eup %6229  ;;  %2983 = vmatprep.subr.bf16.mxu0 %v9119_v42  ;;  %3024 = vmatprep.subr.bf16.mxu1 %v9122_v26  ;;  %12649 = vst [vmem:[#allocation29_spill] sm:$0xff] %v9128_v48  ;;  %12662 = vst [vmem:[#allocation40_spill] sm:$0xff] %v9168_v44 }
 0x4dd   :  { %v2728_v14 = vadd.f32 1.0, %v6230_v36  ;;  %v6232_v39 = vpop.eup %6231  ;;  %v9134_v36 = vld [vmem:[#allocation7 + $0x12c] ss:$16 sps:$4 sm:$0xff]  }
 0x4de   :  { %v2729_v17 = vadd.f32 1.0, %v6232_v39  ;;  %12651 = vst [vmem:[#allocation31_spill] sm:$0xff] %v9134_v36  ;;  %v9143_v39 = vld [vmem:[#allocation7 + $0x144] ss:$16 sps:$4 sm:$0xff]  }
 0x4df   :  { %6237 = vrcp.f32 %v2728_v14  ;;  %2984 = vmatpush1.bf16.msra.mxu0 %v9125_v40  ;;  %3025 = vmatpush1.bf16.msra.mxu1 %v9128_v48  ;;  %v9140_v14 = vld [vmem:[#allocation7 + $0x128] ss:$16 sps:$4 sm:$0xff]   ;;  %12654 = vst [vmem:[#allocation56_spill] sm:$0xff] %v9143_v39  ;;  %v9149_v40 = vld [vmem:[#allocation7 + $0x140] ss:$16 sps:$4 sm:$0xff]  }
 0x4e0   :  { %6239 = vrcp.f32 %v2729_v17  ;;  %2985 = vmatprep.subr.bf16.mxu0 %v9131_v11  ;;  %3026 = vmatprep.subr.bf16.mxu1 %v9134_v36  ;;  %12653 = vst [vmem:[#allocation55_spill] sm:$0xff] %v9140_v14  ;;  %v9146_v17 = vld [vmem:[#allocation7 + $0x14c] ss:$16 sps:$4 sm:$0xff]   ;;  %v6234_v11 = vpop.eup %6233  ;;  %12656 = vst [vmem:[#allocation34_spill] sm:$0xff] %v9149_v40  ;;  %v9152_v36 = vld [vmem:[#allocation7 + $0x148] ss:$16 sps:$4 sm:$0xff]  }
 0x4e1   :  { %12655 = vst [vmem:[#allocation33_spill] sm:$0xff] %v9146_v17  ;;  %12657 = vst [vmem:[#allocation35_spill] sm:$0xff] %v9152_v36  ;;  %v2730_v42 = vadd.f32 1.0, %v6234_v11 }
 0x4e3   :  { %2986 = vmatpush1.bf16.msra.mxu0 %v9137_v45  ;;  %3027 = vmatpush1.bf16.msra.mxu1 %v9140_v14  ;;  %v6236_v48 = vpop.eup %6235  ;;  %v9155_v14 = vld [vmem:[#allocation7 + $0x164] ss:$16 sps:$4 sm:$0xff]   ;;  %6241 = vrcp.f32 %v2730_v42 }
 0x4e4   :  { %2987 = vmatprep.subr.bf16.mxu0 %v9143_v39  ;;  %3028 = vmatprep.subr.bf16.mxu1 %v9146_v17  ;;  %12658 = vst [vmem:[#allocation36_spill] sm:$0xff] %v9155_v14  ;;  %v9158_v39 = vld [vmem:[#allocation7 + $0x16c] ss:$16 sps:$4 sm:$0xff]  }
 0x4e5   :  { %12659 = vst [vmem:[#allocation37_spill] sm:$0xff] %v9158_v39 }
 0x4e7   :  { %2988 = vmatpush1.bf16.msra.mxu0 %v9149_v40  ;;  %3029 = vmatpush1.bf16.msra.mxu1 %v9152_v36  ;;  %v9165_v40 = vld [vmem:[#allocation7 + $0x168] ss:$16 sps:$4 sm:$0xff]  }
 0x4e8   :  { %2989 = vmatprep.subr.bf16.mxu0 %v9155_v14  ;;  %3030 = vmatprep.subr.bf16.mxu1 %v9158_v39  ;;  %12661 = vst [vmem:[#allocation39_spill] sm:$0xff] %v9165_v40  ;;  %v9171_v14 = vld [vmem:[#allocation7 + $0x18c] ss:$16 sps:$4 sm:$0xff]  }
 0x4e9   :  { %v6238_v45 = vpop.eup %6237  ;;  %12663 = vst [vmem:[#allocation41_spill] sm:$0xff] %v9171_v14 }
 0x4ea   :  { %v2739_v17 = vmul.f32 %v6238_v45, %v6236_v48  ;;  %v6240_v26 = vpop.eup %6239 }
 0x4eb   :  { %v2738_v50 = vmul.f32 %v6240_v26, %v8627_v27  ;;  %2990 = vmatpush1.bf16.msra.mxu0 %v9162_v21  ;;  %3031 = vmatpush1.bf16.msra.mxu1 %v9165_v40  ;;  %v12664_v27 = vld [vmem:[#allocation61_spill] sm:$0xff]  ;;  %v12665_v21 = vld [vmem:[#allocation62_spill] sm:$0xff]  ;;  %v12666_v40 = vld [vmem:[#allocation63_spill] sm:$0xff] }
 0x4ec   :  { %2991 = vmatprep.subr.bf16.mxu0 %v9168_v44  ;;  %3032 = vmatprep.subr.bf16.mxu1 %v9171_v14  ;;  %v9183_v14 = vld [vmem:[#allocation7 + $0x180] ss:$16 sps:$4 sm:$0xff]  }
 0x4ed   :  { %v2782_v36 = vpop.f32.mrb[52].mxu0  ;;  %v9174_v48 = vadd.f32 %v2739_v17, %v2738_v50  ;;  %v9186_v50 = vld [vmem:[#allocation7 + $0x188] ss:$16 sps:$4 sm:$0xff]  }
 0x4ee   :  { %v2830_v26 = vadd.f32 %v2782_v36, %v12664_v27  ;;  %v2823_v11 = vpop.f32.mrb[52].mxu1  ;;  %v2784_v45 = vpop.f32.mrb[53].mxu0  ;;  %v9204_v27 = vld [vmem:[#allocation7 + $0x1cc] ss:$16 sps:$4 sm:$0xff]  }
 0x4ef   :  { %v9178_v39 = vadd.f32 %v2823_v11, %v12665_v21  ;;  %v2831_v47 = vadd.f32 %v2784_v45, %v12666_v40  ;;  %v2825_v49 = vpop.f32.mrb[53].mxu1  ;;  %v2786_v54 = vpop.f32.mrb[54].mxu0  ;;  %6243 = vtanh.f32 %v9174_v48  ;;  %2992 = vmatpush1.bf16.msra.mxu0 %v9183_v14  ;;  %3033 = vmatpush1.bf16.msra.mxu1 %v9186_v50  ;;  %v9189_v40 = vld [vmem:[#allocation7 + $0x1a4] ss:$16 sps:$4 sm:$0xff]   ;;  %12669 = vst [vmem:[#allocation43_spill] sm:$0xff] %v9204_v27 }
 0x4f0   :  { %v5634_v44 = vmul.f32 -1.442695, %v2830_v26  ;;  %v2833_v19 = vadd.f32 %v2825_v49, %v12667_v41  ;;  %v2827_v42 = vpop.f32.mrb[54].mxu1  ;;  %v2787_v21 = vpop.f32.mrb[55].mxu0  ;;  %2993 = vmatprep.subr.bf16.mxu0 %v9189_v40  ;;  %v9192_v54 = vld [vmem:[#allocation7 + $0x1ac] ss:$16 sps:$4 sm:$0xff]  }
 0x4f1   :  { %v5635_v36 = vmul.f32 -1.442695, %v2831_v47  ;;  %v2828_v17 = vpop.f32.mrb[55].mxu1  ;;  %3034 = vmatprep.subr.bf16.mxu1 %v9192_v54  ;;  %v9195_v41 = vld [vmem:[#allocation7 + $0x1a0] ss:$16 sps:$4 sm:$0xff]   ;;  %v6242_v11 = vpop.eup %6241 }
 0x4f2   :  { %6245 = vpow2.f32 %v5634_v44  ;;  %v9198_v49 = vld [vmem:[#allocation7 + $0x1a8] ss:$16 sps:$4 sm:$0xff]   ;;  %v9201_v47 = vld [vmem:[#allocation7 + $0x1c4] ss:$16 sps:$4 sm:$0xff]   ;;  %v9207_v26 = vld [vmem:[#allocation7 + $0x1c0] ss:$16 sps:$4 sm:$0xff]  }
 0x4f3   :  { %6247 = vpow2.f32 %v5635_v36  ;;  %2994 = vmatpush1.bf16.msra.mxu0 %v9195_v41  ;;  %3035 = vmatpush1.bf16.msra.mxu1 %v9198_v49  ;;  %12668 = vst [vmem:[#allocation42_spill] sm:$0xff] %v9201_v47  ;;  %12670 = vst [vmem:[#allocation54_spill] sm:$0xff] %v9207_v26  ;;  %v9210_v44 = vld [vmem:[#allocation7 + $0x1c8] ss:$16 sps:$4 sm:$0xff]   ;;  %v9213_v45 = vld [vmem:[#allocation7 + $0x1e4] ss:$16 sps:$4 sm:$0xff]  }
 0x4f4   :  { %2995 = vmatprep.subr.bf16.mxu0 %v9201_v47  ;;  %3036 = vmatprep.subr.bf16.mxu1 %v9204_v27  ;;  %12671 = vst [vmem:[#allocation44_spill] sm:$0xff] %v9210_v44  ;;  %12672 = vst [vmem:[#allocation45_spill] sm:$0xff] %v9213_v45  ;;  %v9216_v42 = vld [vmem:[#allocation7 + $0x1ec] ss:$16 sps:$4 sm:$0xff]   ;;  %v9219_v27 = vld [vmem:[#allocation7 + $0x1e0] ss:$16 sps:$4 sm:$0xff]   ;;  %6249 = vtanh.f32 %v2833_v19 }
 0x4f5   :  { %12673 = vst [vmem:[#allocation46_spill] sm:$0xff] %v9216_v42 }
 0x4f7   :  { %2996 = vmatpush1.bf16.msra.mxu0 %v9207_v26  ;;  %3037 = vmatpush1.bf16.msra.mxu1 %v9210_v44  ;;  %v9222_v26 = vld [vmem:[#allocation7 + $0x1e8] ss:$16 sps:$4 sm:$0xff]  }
 0x4f8   :  { %2997 = vmatprep.subr.bf16.mxu0 %v9213_v45  ;;  %3038 = vmatprep.subr.bf16.mxu1 %v9216_v42 }
 0x4f9   :  { %v6244_v21 = vpop.eup %6243 }
 0x4fa   :  { %v2742_v36 = vmul.f32 %v6244_v21, %v6242_v11  ;;  %v12680_v11 = vld [vmem:[#allocation85_spill] sm:$0xff]  ;;  %v12682_v21 = vld [vmem:[#allocation87_spill] sm:$0xff] }
 0x4fb   :  { %2998 = vmatpush1.bf16.msra.mxu0 %v9219_v27  ;;  %3039 = vmatpush1.bf16.msra.mxu1 %v9222_v26 }
 0x4fc   :  { %v6246_v17 = vpop.eup %6245  ;;  %3074 = vmatprep.subr.bf16.mxu0 %v8650_v57  ;;  %3115 = vmatprep.subr.bf16.mxu1 %v8653_v60  ;;  %v2966_v45 = vpack.c.bf16 %v2742_v36, %v2742_v36  ;;  %v12674_v57 = vld [vmem:[#allocation52_spill] sm:$0xff]  ;;  %v12675_v60 = vld [vmem:[#allocation53_spill] sm:$0xff] }
 0x4fd   :  { %v2843_v44 = vadd.f32 1.0, %v6246_v17  ;;  %v6248_v47 = vpop.eup %6247  ;;  %v12683_v36 = vld [vmem:[#allocation88_spill] sm:$0xff]  ;;  %v12685_v17 = vld [vmem:[#allocation90_spill] sm:$0xff] }
 0x4fe   :  { %v2844_v42 = vadd.f32 1.0, %v6248_v47  ;;  %3000 = vmatmul.mubr.bf16.vlgmr.msra.gmra.mrb[60].mxu0 %v2966_v45  ;;  %3041 = vmatmul.mubr.bf16.vlgmr.msra.gmra.mrb[60].mxu1 %v2966_v45  ;;  %v6250_v19 = vpop.eup %6249  ;;  %v12676_v47 = vld [vmem:[#allocation81_spill] sm:$0xff] }
 0x4ff   :  { %6251 = vrcp.f32 %v2843_v44  ;;  %3075 = vmatpush1.bf16.msra.mxu0 %v8656_v0  ;;  %3116 = vmatpush1.bf16.msra.mxu1 %v8659_v28  ;;  %v12677_v0 = vld [vmem:[#allocation82_spill] sm:$0xff]  ;;  %v12678_v44 = vld [vmem:[#allocation83_spill] sm:$0xff] }
 0x500   :  { %6253 = vrcp.f32 %v2844_v42  ;;  %3106 = vmatprep.mubr.bf16.mxu0 %v2966_v45  ;;  %3147 = vmatprep.mubr.bf16.mxu1 %v2966_v45  ;;  %v12681_v45 = vld [vmem:[#allocation86_spill] sm:$0xff] }
 0x501   :  { %3076 = vmatprep.subr.bf16.mxu0 %v8662_v56  ;;  %3117 = vmatprep.subr.bf16.mxu1 %v8665_v53 }
 0x503   :  { %3077 = vmatpush1.bf16.msra.mxu0 %v8668_v34  ;;  %3118 = vmatpush1.bf16.msra.mxu1 %v8671_v15  ;;  %v12679_v15 = vld [vmem:[#allocation84_spill] sm:$0xff] }
 0x504   :  { %3078 = vmatprep.subr.bf16.mxu0 %v12674_v57  ;;  %3119 = vmatprep.subr.bf16.mxu1 %v12675_v60  ;;  %v12686_v57 = vld [vmem:[#allocation91_spill] sm:$0xff]  ;;  %v12689_v60 = vld [vmem:[#allocation94_spill] sm:$0xff] }
 0x507   :  { %3079 = vmatpush1.bf16.msra.mxu0 %v12676_v47  ;;  %3120 = vmatpush1.bf16.msra.mxu1 %v12677_v0  ;;  %v12691_v47 = vld [vmem:[#allocation96_spill] sm:$0xff]  ;;  %v5636_v0 = vmul.f32 -1.442695, %v9178_v39  ;;  %v12701_v39 = vld [vmem:[#allocation106_spill] sm:$0xff] }
 0x508   :  { %3080 = vmatprep.subr.bf16.mxu0 %v8686_v43  ;;  %3121 = vmatprep.subr.bf16.mxu1 %v12678_v44  ;;  %v12684_v43 = vld [vmem:[#allocation89_spill] sm:$0xff]  ;;  %v12693_v44 = vld [vmem:[#allocation98_spill] sm:$0xff] }
 0x509   :  { %v6252_v28 = vpop.eup %6251  ;;  %6255 = vpow2.f32 %v5636_v0 }
 0x50a   :  { %v2854_v56 = vmul.f32 %v6252_v28, %v6250_v19  ;;  %v6254_v53 = vpop.eup %6253  ;;  %v12690_v19 = vld [vmem:[#allocation95_spill] sm:$0xff]  ;;  %v12692_v28 = vld [vmem:[#allocation97_spill] sm:$0xff] }
 0x50b   :  { %v2853_v34 = vmul.f32 %v6254_v53, %v8702_v12  ;;  %3081 = vmatpush1.bf16.msra.mxu0 %v8693_v58  ;;  %3122 = vmatpush1.bf16.msra.mxu1 %v12679_v15  ;;  %v12687_v12 = vld [vmem:[#allocation92_spill] sm:$0xff]  ;;  %v12688_v58 = vld [vmem:[#allocation93_spill] sm:$0xff]  ;;  %v12697_v15 = vld [vmem:[#allocation102_spill] sm:$0xff] }
 0x50c   :  { %3082 = vmatprep.subr.bf16.mxu0 %v12680_v11  ;;  %3123 = vmatprep.subr.bf16.mxu1 %v12681_v45  ;;  %v12695_v53 = vld [vmem:[#allocation100_spill] sm:$0xff]  ;;  %v12698_v11 = vld [vmem:[#allocation103_spill] sm:$0xff] }
 0x50d   :  { %v9244_v42 = vadd.f32 %v2854_v56, %v2853_v34  ;;  %v12694_v56 = vld [vmem:[#allocation99_spill] sm:$0xff]  ;;  %v12696_v34 = vld [vmem:[#allocation101_spill] sm:$0xff]  ;;  %v12699_v45 = vld [vmem:[#allocation104_spill] sm:$0xff] }
 0x50f   :  { %3083 = vmatpush1.bf16.msra.mxu0 %v12682_v21  ;;  %3124 = vmatpush1.bf16.msra.mxu1 %v12683_v36  ;;  %v12700_v21 = vld [vmem:[#allocation105_spill] sm:$0xff]  ;;  %v12702_v36 = vld [vmem:[#allocation107_spill] sm:$0xff]  ;;  %6257 = vtanh.f32 %v9244_v42 }
 0x510   :  { %3084 = vmatprep.subr.bf16.mxu0 %v12684_v43  ;;  %3125 = vmatprep.subr.bf16.mxu1 %v12685_v17  ;;  %v12703_v43 = vld [vmem:[#allocation108_spill] sm:$0xff]  ;;  %v12704_v17 = vld [vmem:[#allocation109_spill] sm:$0xff] }
 0x513   :  { %3085 = vmatpush1.bf16.msra.mxu0 %v12686_v57  ;;  %3126 = vmatpush1.bf16.msra.mxu1 %v12687_v12  ;;  %v12705_v57 = vld [vmem:[#allocation110_spill] sm:$0xff]  ;;  %v6256_v12 = vpop.eup %6255 }
 0x514   :  { %3086 = vmatprep.subr.bf16.mxu0 %v12688_v58  ;;  %3127 = vmatprep.subr.bf16.mxu1 %v12689_v60  ;;  %v12706_v58 = vld [vmem:[#allocation111_spill] sm:$0xff]  ;;  %v12707_v60 = vld [vmem:[#allocation112_spill] sm:$0xff]  ;;  %v2845_v0 = vadd.f32 1.0, %v6256_v12 }
 0x515   :  { %v12722_v12 = vld [vmem:[#allocation127_spill] sm:$0xff] }
 0x516   :  { %6259 = vrcp.f32 %v2845_v0  ;;  %v9294_v0 = vld [vmem:[#allocation3 + $0x4] ss:$16 sps:$4 sm:$0xff]  }
 0x517   :  { %3087 = vmatpush1.bf16.msra.mxu0 %v12690_v19  ;;  %3128 = vmatpush1.bf16.msra.mxu1 %v12691_v47  ;;  %v12708_v19 = vld [vmem:[#allocation113_spill] sm:$0xff]  ;;  %v12709_v47 = vld [vmem:[#allocation114_spill] sm:$0xff] }
 0x518   :  { %3088 = vmatprep.subr.bf16.mxu0 %v12692_v28  ;;  %3129 = vmatprep.subr.bf16.mxu1 %v12693_v44  ;;  %v12710_v28 = vld [vmem:[#allocation115_spill] sm:$0xff]  ;;  %v12711_v44 = vld [vmem:[#allocation116_spill] sm:$0xff] }
 0x51b   :  { %3089 = vmatpush1.bf16.msra.mxu0 %v12694_v56  ;;  %3130 = vmatpush1.bf16.msra.mxu1 %v12695_v53  ;;  %v12712_v56 = vld [vmem:[#allocation117_spill] sm:$0xff]  ;;  %v12713_v53 = vld [vmem:[#allocation118_spill] sm:$0xff] }
 0x51c   :  { %3090 = vmatprep.subr.bf16.mxu0 %v12696_v34  ;;  %3131 = vmatprep.subr.bf16.mxu1 %v12697_v15  ;;  %v12714_v34 = vld [vmem:[#allocation119_spill] sm:$0xff]  ;;  %v12715_v15 = vld [vmem:[#allocation120_spill] sm:$0xff] }
 0x51f   :  { %3091 = vmatpush1.bf16.msra.mxu0 %v12698_v11  ;;  %3132 = vmatpush1.bf16.msra.mxu1 %v12699_v45  ;;  %v12716_v11 = vld [vmem:[#allocation121_spill] sm:$0xff]  ;;  %v12717_v45 = vld [vmem:[#allocation122_spill] sm:$0xff] }
 0x520   :  { %3092 = vmatprep.subr.bf16.mxu0 %v12700_v21  ;;  %3133 = vmatprep.subr.bf16.mxu1 %v12701_v39  ;;  %v12718_v21 = vld [vmem:[#allocation123_spill] sm:$0xff]  ;;  %v12719_v39 = vld [vmem:[#allocation124_spill] sm:$0xff] }
 0x523   :  { %3093 = vmatpush1.bf16.msra.mxu0 %v12702_v36  ;;  %3134 = vmatpush1.bf16.msra.mxu1 %v12703_v43  ;;  %v12720_v36 = vld [vmem:[#allocation125_spill] sm:$0xff]  ;;  %v12721_v43 = vld [vmem:[#allocation126_spill] sm:$0xff] }
 0x524   :  { %3094 = vmatprep.subr.bf16.mxu0 %v12704_v17  ;;  %3135 = vmatprep.subr.bf16.mxu1 %v12705_v57  ;;  %v6258_v17 = vpop.eup %6257 }
 0x525   :  { %v6260_v57 = vpop.eup %6259 }
 0x527   :  { %3095 = vmatpush1.bf16.msra.mxu0 %v12706_v58  ;;  %3136 = vmatpush1.bf16.msra.mxu1 %v12707_v60  ;;  %v2857_v58 = vmul.f32 %v6260_v57, %v6258_v17  ;;  %v12723_v60 = vld [vmem:[#allocation128_spill] sm:$0xff]  ;;  %v9330_v57 = vld [vmem:[#allocation3 + $0xc0] ss:$16 sps:$4 sm:$0xff]  }
 0x528   :  { %3096 = vmatprep.subr.bf16.mxu0 %v12708_v19  ;;  %3137 = vmatprep.subr.bf16.mxu1 %v12709_v47  ;;  %v12724_v19 = vld [vmem:[#allocation129_spill] sm:$0xff]  ;;  %v9327_v17 = vld [vmem:[#allocation3 + $0xcc] ss:$16 sps:$4 sm:$0xff]  }
 0x529   :  { %v3073_v47 = vpack.c.bf16 %v2857_v58, %v2857_v58  ;;  %v9354_v58 = vld [vmem:[#allocation8] ss:$16 sps:$4 sm:$0xff]  }
 0x52b   :  { %3097 = vmatpush1.bf16.msra.mxu0 %v12710_v28  ;;  %3138 = vmatpush1.bf16.msra.mxu1 %v12711_v44  ;;  %v9297_v28 = vld [vmem:[#allocation3 + $0xc] ss:$16 sps:$4 sm:$0xff]  }
 0x52c   :  { %3098 = vmatprep.subr.bf16.mxu0 %v12712_v56  ;;  %3139 = vmatprep.subr.bf16.mxu1 %v12713_v53  ;;  %v12728_v44 = vld [vmem:[#allocation132_spill] sm:$0xff]  ;;  %v12729_v56 = vld [vmem:[#allocation133_spill] sm:$0xff]  ;;  %v12730_v53 = vld [vmem:[#allocation134_spill] sm:$0xff] }
 0x52f   :  { %3099 = vmatpush1.bf16.msra.mxu0 %v12714_v34  ;;  %3140 = vmatpush1.bf16.msra.mxu1 %v12715_v15  ;;  %v12731_v34 = vld [vmem:[#allocation135_spill] sm:$0xff]  ;;  %v12732_v15 = vld [vmem:[#allocation57_spill] sm:$0xff] }
 0x530   :  { %3100 = vmatprep.subr.bf16.mxu0 %v12716_v11  ;;  %3141 = vmatprep.subr.bf16.mxu1 %v12717_v45  ;;  %v12735_v11 = vld [vmem:[#allocation60_spill] sm:$0xff] }
 0x531   :  { %v12736_v45 = vld [vmem:[#allocation136_spill] sm:$0xff] }
 0x533   :  { %3101 = vmatpush1.bf16.msra.mxu0 %v12718_v21  ;;  %3142 = vmatpush1.bf16.msra.mxu1 %v12719_v39  ;;  %v12737_v21 = vld [vmem:[#allocation137_spill] sm:$0xff]  ;;  %v12738_v39 = vld [vmem:[#allocation138_spill] sm:$0xff] }
 0x534   :  { %3102 = vmatprep.subr.bf16.mxu0 %v12720_v36  ;;  %3143 = vmatprep.subr.bf16.mxu1 %v12721_v43  ;;  %v12739_v36 = vld [vmem:[#allocation139_spill] sm:$0xff] }
 0x535   :  { %v9324_v43 = vld [vmem:[#allocation3 + $0xc4] ss:$16 sps:$4 sm:$0xff]  }
 0x537   :  { %3103 = vmatpush1.bf16.msra.mxu0 %v12722_v12  ;;  %3144 = vmatpush1.bf16.msra.mxu1 %v8832_v7  ;;  %v12725_v7 = vld [vmem:[#allocation130_spill] sm:$0xff] }
 0x538   :  { %3104 = vmatprep.subr.bf16.mxu0 %v8835_v24  ;;  %3145 = vmatprep.subr.bf16.mxu1 %v8838_v55  ;;  %v12726_v55 = vld [vmem:[#allocation131_spill] sm:$0xff]  ;;  %v12727_v24 = vmov 0   ;;  %v9351_v12 = vld [vmem:[#allocation8 + $0xc] ss:$16 sps:$4 sm:$0xff]  }
 0x53b   :  { %3105 = vmatpush1.bf16.msra.mxu0 %v12723_v60  ;;  %3146 = vmatpush1.bf16.msra.mxu1 %v12724_v19  ;;  %v9357_v60 = vld [vmem:[#allocation8 + $0x8] ss:$16 sps:$4 sm:$0xff]   ;;  %v9360_v19 = vld [vmem:[#allocation8 + $0x24] ss:$16 sps:$4 sm:$0xff]  }
 0x53c   :  { %3185 = vmatprep.subr.bf16.mxu0 %v9294_v0  ;;  %3226 = vmatprep.subr.bf16.mxu1 %v9297_v28 }
 0x53e   :  { %3107 = vmatmul.mubr.bf16.vlgmr.msra.gmra.mrb[64].mxu0 %v3073_v47  ;;  %3148 = vmatmul.mubr.bf16.vlgmr.msra.gmra.mrb[64].mxu1 %v3073_v47 }
 0x53f   :  { %3186 = vmatpush1.bf16.msra.mxu0 %v8849_v61  ;;  %3227 = vmatpush1.bf16.msra.mxu1 %v8852_v23  ;;  %v12733_v61 = vld [vmem:[#allocation58_spill] sm:$0xff]  ;;  %v12734_v23 = vld [vmem:[#allocation59_spill] sm:$0xff] }
 0x540   :  { %3187 = vmatprep.subr.bf16.mxu0 %v12725_v7  ;;  %3228 = vmatprep.subr.bf16.mxu1 %v12726_v55  ;;  %v9363_v7 = vld [vmem:[#allocation8 + $0x2c] ss:$16 sps:$4 sm:$0xff]   ;;  %v9366_v55 = vld [vmem:[#allocation8 + $0x20] ss:$16 sps:$4 sm:$0xff]  }
 0x541   :  { %3217 = vmatprep.mubr.bf16.mxu0 %v12727_v24  ;;  %3258 = vmatprep.mubr.bf16.mxu1 %v12727_v24  ;;  %12740 = vst [vmem:[#allocation47_spill] sm:$0xff] %v9366_v55 }
 0x543   :  { %3188 = vmatpush1.bf16.msra.mxu0 %v12728_v44  ;;  %3229 = vmatpush1.bf16.msra.mxu1 %v12729_v56  ;;  %v9372_v44 = vld [vmem:[#allocation8 + $0x44] ss:$16 sps:$4 sm:$0xff]   ;;  %v9375_v56 = vld [vmem:[#allocation8 + $0x4c] ss:$16 sps:$4 sm:$0xff]  }
 0x544   :  { %3189 = vmatprep.subr.bf16.mxu0 %v12730_v53  ;;  %3230 = vmatprep.subr.bf16.mxu1 %v12731_v34  ;;  %12742 = vst [vmem:[#allocation49_spill] sm:$0xff] %v9372_v44  ;;  %12743 = vst [vmem:[#allocation50_spill] sm:$0xff] %v9375_v56  ;;  %v9378_v53 = vld [vmem:[#allocation8 + $0x40] ss:$16 sps:$4 sm:$0xff]   ;;  %v9381_v34 = vld [vmem:[#allocation8 + $0x48] ss:$16 sps:$4 sm:$0xff]  }
 0x545   :  { %12744 = vst [vmem:[#allocation51_spill] sm:$0xff] %v9378_v53  ;;  %12745 = vst [vmem:[#allocation61_spill] sm:$0xff] %v9381_v34 }
 0x547   :  { %3190 = vmatpush1.bf16.msra.mxu0 %v12732_v15  ;;  %3231 = vmatpush1.bf16.msra.mxu1 %v12733_v61  ;;  %v9384_v15 = vld [vmem:[#allocation8 + $0x64] ss:$16 sps:$4 sm:$0xff]   ;;  %v9387_v61 = vld [vmem:[#allocation8 + $0x6c] ss:$16 sps:$4 sm:$0xff]  }
 0x548   :  { %3191 = vmatprep.subr.bf16.mxu0 %v12734_v23  ;;  %3232 = vmatprep.subr.bf16.mxu1 %v12735_v11  ;;  %12746 = vst [vmem:[#allocation62_spill] sm:$0xff] %v9384_v15  ;;  %12747 = vst [vmem:[#allocation63_spill] sm:$0xff] %v9387_v61  ;;  %v9390_v23 = vld [vmem:[#allocation8 + $0x60] ss:$16 sps:$4 sm:$0xff]   ;;  %v9393_v11 = vld [vmem:[#allocation8 + $0x68] ss:$16 sps:$4 sm:$0xff]  }
 0x549   :  { %12748 = vst [vmem:[#allocation64_spill] sm:$0xff] %v9390_v23  ;;  %12749 = vst [vmem:[#allocation52_spill] sm:$0xff] %v9393_v11 }
 0x54b   :  { %3192 = vmatpush1.bf16.msra.mxu0 %v12736_v45  ;;  %3233 = vmatpush1.bf16.msra.mxu1 %v12737_v21  ;;  %v9396_v45 = vld [vmem:[#allocation8 + $0x84] ss:$16 sps:$4 sm:$0xff]   ;;  %v9399_v21 = vld [vmem:[#allocation8 + $0x8c] ss:$16 sps:$4 sm:$0xff]  }
 0x54c   :  { %3193 = vmatprep.subr.bf16.mxu0 %v12738_v39  ;;  %3234 = vmatprep.subr.bf16.mxu1 %v12739_v36  ;;  %12750 = vst [vmem:[#allocation53_spill] sm:$0xff] %v9396_v45  ;;  %12751 = vst [vmem:[#allocation81_spill] sm:$0xff] %v9399_v21  ;;  %v9402_v39 = vld [vmem:[#allocation8 + $0x80] ss:$16 sps:$4 sm:$0xff]   ;;  %v9405_v36 = vld [vmem:[#allocation8 + $0x88] ss:$16 sps:$4 sm:$0xff]  }
 0x54d   :  { %12752 = vst [vmem:[#allocation82_spill] sm:$0xff] %v9402_v39  ;;  %12753 = vst [vmem:[#allocation83_spill] sm:$0xff] %v9405_v36 }
 0x54f   :  { %3194 = vmatpush1.bf16.msra.mxu0 %v8899_v62  ;;  %3235 = vmatpush1.bf16.msra.mxu1 %v8902_v63  ;;  %v9333_v62 = vld [vmem:[#allocation3 + $0xc8] ss:$16 sps:$4 sm:$0xff]  }
 0x550   :  { %3195 = vmatprep.subr.bf16.mxu0 %v8905_v51  ;;  %3236 = vmatprep.subr.bf16.mxu1 %v8908_v59  ;;  %v9336_v59 = vld [vmem:[#allocation3 + $0xe4] ss:$16 sps:$4 sm:$0xff]   ;;  %v9345_v63 = vld [vmem:[#allocation3 + $0xe8] ss:$16 sps:$4 sm:$0xff]  }
 0x551   :  { %v9348_v51 = vld [vmem:[#allocation8 + $0x4] ss:$16 sps:$4 sm:$0xff]  }
 0x553   :  { %3196 = vmatpush1.bf16.msra.mxu0 %v8911_v52  ;;  %3237 = vmatpush1.bf16.msra.mxu1 %v8914_v22  ;;  %v9339_v22 = vld [vmem:[#allocation3 + $0xec] ss:$16 sps:$4 sm:$0xff]   ;;  %v9342_v52 = vld [vmem:[#allocation3 + $0xe0] ss:$16 sps:$4 sm:$0xff]  }
 0x554   :  { %3197 = vmatprep.subr.bf16.mxu0 %v9324_v43  ;;  %3238 = vmatprep.subr.bf16.mxu1 %v9327_v17 }
 0x557   :  { %3198 = vmatpush1.bf16.msra.mxu0 %v9330_v57  ;;  %3239 = vmatpush1.bf16.msra.mxu1 %v9333_v62 }
 0x558   :  { %3199 = vmatprep.subr.bf16.mxu0 %v9336_v59  ;;  %3240 = vmatprep.subr.bf16.mxu1 %v9339_v22 }
 0x55b   :  { %3200 = vmatpush1.bf16.msra.mxu0 %v9342_v52  ;;  %3241 = vmatpush1.bf16.msra.mxu1 %v9345_v63 }
 0x55c   :  { %3297 = vmatprep.subr.bf16.mxu0 %v9348_v51  ;;  %3338 = vmatprep.subr.bf16.mxu1 %v9351_v12 }
 0x55e   :  { %3218 = vmatmul.mubr.bf16.vlgmr.msra.gmra.mrb[68].mxu0 %v3073_v47  ;;  %3259 = vmatmul.mubr.bf16.vlgmr.msra.gmra.mrb[68].mxu1 %v3073_v47  ;;  %v9369_v47 = vld [vmem:[#allocation8 + $0x28] ss:$16 sps:$4 sm:$0xff]  }
 0x55f   :  { %3298 = vmatpush1.bf16.msra.mxu0 %v9354_v58  ;;  %3339 = vmatpush1.bf16.msra.mxu1 %v9357_v60  ;;  %12741 = vst [vmem:[#allocation48_spill] sm:$0xff] %v9369_v47 }
 0x560   :  { %3299 = vmatprep.subr.bf16.mxu0 %v9360_v19  ;;  %3340 = vmatprep.subr.bf16.mxu1 %v9363_v7 }
 0x563   :  { %3300 = vmatpush1.bf16.msra.mxu0 %v9366_v55  ;;  %3341 = vmatpush1.bf16.msra.mxu1 %v9369_v47  ;;  %v9518_v55 = vld [vmem:[#allocation8 + $0x1c4] ss:$16 sps:$4 sm:$0xff]  }
 0x564   :  { %3301 = vmatprep.subr.bf16.mxu0 %v9372_v44  ;;  %3342 = vmatprep.subr.bf16.mxu1 %v9375_v56  ;;  %v9512_v44 = vld [vmem:[#allocation8 + $0x1a0] ss:$16 sps:$4 sm:$0xff]   ;;  %12789 = vst [vmem:[#allocation119_spill] sm:$0xff] %v9518_v55 }
 0x567   :  { %3302 = vmatpush1.bf16.msra.mxu0 %v9378_v53  ;;  %3343 = vmatpush1.bf16.msra.mxu1 %v9381_v34 }
 0x568   :  { %3303 = vmatprep.subr.bf16.mxu0 %v9384_v15  ;;  %3344 = vmatprep.subr.bf16.mxu1 %v9387_v61 }
 0x56b   :  { %3304 = vmatpush1.bf16.msra.mxu0 %v9390_v23  ;;  %3345 = vmatpush1.bf16.msra.mxu1 %v9393_v11  ;;  %v9408_v23 = vld [vmem:[#allocation8 + $0xa4] ss:$16 sps:$4 sm:$0xff]   ;;  %v9411_v11 = vld [vmem:[#allocation8 + $0xac] ss:$16 sps:$4 sm:$0xff]  }
 0x56c   :  { %3305 = vmatprep.subr.bf16.mxu0 %v9396_v45  ;;  %3346 = vmatprep.subr.bf16.mxu1 %v9399_v21  ;;  %12754 = vst [vmem:[#allocation84_spill] sm:$0xff] %v9408_v23  ;;  %12755 = vst [vmem:[#allocation85_spill] sm:$0xff] %v9411_v11  ;;  %v9414_v45 = vld [vmem:[#allocation8 + $0xa0] ss:$16 sps:$4 sm:$0xff]   ;;  %v9417_v21 = vld [vmem:[#allocation8 + $0xa8] ss:$16 sps:$4 sm:$0xff]  }
 0x56d   :  { %12756 = vst [vmem:[#allocation86_spill] sm:$0xff] %v9414_v45  ;;  %12757 = vst [vmem:[#allocation87_spill] sm:$0xff] %v9417_v21 }
 0x56f   :  { %3306 = vmatpush1.bf16.msra.mxu0 %v9402_v39  ;;  %3347 = vmatpush1.bf16.msra.mxu1 %v9405_v36  ;;  %v9420_v39 = vld [vmem:[#allocation8 + $0xc4] ss:$16 sps:$4 sm:$0xff]   ;;  %v9423_v36 = vld [vmem:[#allocation8 + $0xcc] ss:$16 sps:$4 sm:$0xff]  }
 0x570   :  { %3307 = vmatprep.subr.bf16.mxu0 %v9408_v23  ;;  %3348 = vmatprep.subr.bf16.mxu1 %v9411_v11  ;;  %12758 = vst [vmem:[#allocation88_spill] sm:$0xff] %v9420_v39  ;;  %12759 = vst [vmem:[#allocation89_spill] sm:$0xff] %v9423_v36  ;;  %v9426_v23 = vld [vmem:[#allocation8 + $0xc0] ss:$16 sps:$4 sm:$0xff]   ;;  %v9429_v11 = vld [vmem:[#allocation8 + $0xc8] ss:$16 sps:$4 sm:$0xff]  }
 0x571   :  { %12760 = vst [vmem:[#allocation90_spill] sm:$0xff] %v9426_v23  ;;  %12761 = vst [vmem:[#allocation91_spill] sm:$0xff] %v9429_v11 }
 0x573   :  { %3308 = vmatpush1.bf16.msra.mxu0 %v9414_v45  ;;  %3349 = vmatpush1.bf16.msra.mxu1 %v9417_v21  ;;  %v9432_v45 = vld [vmem:[#allocation8 + $0xe4] ss:$16 sps:$4 sm:$0xff]   ;;  %v9435_v21 = vld [vmem:[#allocation8 + $0xec] ss:$16 sps:$4 sm:$0xff]  }
 0x574   :  { %3309 = vmatprep.subr.bf16.mxu0 %v9420_v39  ;;  %3350 = vmatprep.subr.bf16.mxu1 %v9423_v36  ;;  %12762 = vst [vmem:[#allocation92_spill] sm:$0xff] %v9432_v45  ;;  %12763 = vst [vmem:[#allocation93_spill] sm:$0xff] %v9435_v21  ;;  %v9438_v39 = vld [vmem:[#allocation8 + $0xe0] ss:$16 sps:$4 sm:$0xff]   ;;  %v9441_v36 = vld [vmem:[#allocation8 + $0xe8] ss:$16 sps:$4 sm:$0xff]  }
 0x575   :  { %12764 = vst [vmem:[#allocation94_spill] sm:$0xff] %v9438_v39  ;;  %12765 = vst [vmem:[#allocation95_spill] sm:$0xff] %v9441_v36 }
 0x577   :  { %3310 = vmatpush1.bf16.msra.mxu0 %v9426_v23  ;;  %3351 = vmatpush1.bf16.msra.mxu1 %v9429_v11  ;;  %v9444_v23 = vld [vmem:[#allocation8 + $0x104] ss:$16 sps:$4 sm:$0xff]   ;;  %v9447_v11 = vld [vmem:[#allocation8 + $0x10c] ss:$16 sps:$4 sm:$0xff]  }
 0x578   :  { %3311 = vmatprep.subr.bf16.mxu0 %v9432_v45  ;;  %3352 = vmatprep.subr.bf16.mxu1 %v9435_v21  ;;  %12766 = vst [vmem:[#allocation96_spill] sm:$0xff] %v9444_v23  ;;  %12767 = vst [vmem:[#allocation97_spill] sm:$0xff] %v9447_v11  ;;  %v9450_v45 = vld [vmem:[#allocation8 + $0x100] ss:$16 sps:$4 sm:$0xff]   ;;  %v9453_v21 = vld [vmem:[#allocation8 + $0x108] ss:$16 sps:$4 sm:$0xff]  }
 0x579   :  { %12768 = vst [vmem:[#allocation98_spill] sm:$0xff] %v9450_v45  ;;  %12769 = vst [vmem:[#allocation99_spill] sm:$0xff] %v9453_v21 }
 0x57b   :  { %3312 = vmatpush1.bf16.msra.mxu0 %v9438_v39  ;;  %3353 = vmatpush1.bf16.msra.mxu1 %v9441_v36  ;;  %v9456_v39 = vld [vmem:[#allocation8 + $0x124] ss:$16 sps:$4 sm:$0xff]   ;;  %v9459_v36 = vld [vmem:[#allocation8 + $0x12c] ss:$16 sps:$4 sm:$0xff]  }
 0x57c   :  { %3313 = vmatprep.subr.bf16.mxu0 %v9444_v23  ;;  %3354 = vmatprep.subr.bf16.mxu1 %v9447_v11  ;;  %12770 = vst [vmem:[#allocation100_spill] sm:$0xff] %v9456_v39  ;;  %12771 = vst [vmem:[#allocation101_spill] sm:$0xff] %v9459_v36  ;;  %v9462_v23 = vld [vmem:[#allocation8 + $0x120] ss:$16 sps:$4 sm:$0xff]   ;;  %v9465_v11 = vld [vmem:[#allocation8 + $0x128] ss:$16 sps:$4 sm:$0xff]  }
 0x57d   :  { %12772 = vst [vmem:[#allocation102_spill] sm:$0xff] %v9462_v23  ;;  %12773 = vst [vmem:[#allocation103_spill] sm:$0xff] %v9465_v11 }
 0x57f   :  { %3314 = vmatpush1.bf16.msra.mxu0 %v9450_v45  ;;  %3355 = vmatpush1.bf16.msra.mxu1 %v9453_v21  ;;  %v9468_v45 = vld [vmem:[#allocation8 + $0x144] ss:$16 sps:$4 sm:$0xff]   ;;  %v9471_v21 = vld [vmem:[#allocation8 + $0x14c] ss:$16 sps:$4 sm:$0xff]  }
 0x580   :  { %3315 = vmatprep.subr.bf16.mxu0 %v9456_v39  ;;  %3356 = vmatprep.subr.bf16.mxu1 %v9459_v36  ;;  %12774 = vst [vmem:[#allocation104_spill] sm:$0xff] %v9468_v45  ;;  %12775 = vst [vmem:[#allocation105_spill] sm:$0xff] %v9471_v21  ;;  %v9474_v39 = vld [vmem:[#allocation8 + $0x140] ss:$16 sps:$4 sm:$0xff]   ;;  %v9477_v36 = vld [vmem:[#allocation8 + $0x148] ss:$16 sps:$4 sm:$0xff]  }
 0x581   :  { %12776 = vst [vmem:[#allocation106_spill] sm:$0xff] %v9474_v39  ;;  %12777 = vst [vmem:[#allocation107_spill] sm:$0xff] %v9477_v36 }
 0x583   :  { %3316 = vmatpush1.bf16.msra.mxu0 %v9462_v23  ;;  %3357 = vmatpush1.bf16.msra.mxu1 %v9465_v11  ;;  %v9480_v23 = vld [vmem:[#allocation8 + $0x164] ss:$16 sps:$4 sm:$0xff]   ;;  %v9483_v11 = vld [vmem:[#allocation8 + $0x16c] ss:$16 sps:$4 sm:$0xff]  }
 0x584   :  { %3317 = vmatprep.subr.bf16.mxu0 %v9468_v45  ;;  %3358 = vmatprep.subr.bf16.mxu1 %v9471_v21  ;;  %12778 = vst [vmem:[#allocation108_spill] sm:$0xff] %v9480_v23  ;;  %12779 = vst [vmem:[#allocation109_spill] sm:$0xff] %v9483_v11  ;;  %v9486_v45 = vld [vmem:[#allocation8 + $0x160] ss:$16 sps:$4 sm:$0xff]   ;;  %v9489_v21 = vld [vmem:[#allocation8 + $0x168] ss:$16 sps:$4 sm:$0xff]  }
 0x585   :  { %12780 = vst [vmem:[#allocation110_spill] sm:$0xff] %v9486_v45  ;;  %12781 = vst [vmem:[#allocation111_spill] sm:$0xff] %v9489_v21 }
 0x587   :  { %3318 = vmatpush1.bf16.msra.mxu0 %v9474_v39  ;;  %3359 = vmatpush1.bf16.msra.mxu1 %v9477_v36  ;;  %v9492_v39 = vld [vmem:[#allocation8 + $0x184] ss:$16 sps:$4 sm:$0xff]   ;;  %v9495_v36 = vld [vmem:[#allocation8 + $0x18c] ss:$16 sps:$4 sm:$0xff]  }
 0x588   :  { %3319 = vmatprep.subr.bf16.mxu0 %v9480_v23  ;;  %3360 = vmatprep.subr.bf16.mxu1 %v9483_v11  ;;  %12782 = vst [vmem:[#allocation112_spill] sm:$0xff] %v9492_v39  ;;  %12783 = vst [vmem:[#allocation113_spill] sm:$0xff] %v9495_v36  ;;  %v9498_v23 = vld [vmem:[#allocation8 + $0x180] ss:$16 sps:$4 sm:$0xff]   ;;  %v9501_v11 = vld [vmem:[#allocation8 + $0x188] ss:$16 sps:$4 sm:$0xff]  }
 0x589   :  { %12784 = vst [vmem:[#allocation114_spill] sm:$0xff] %v9498_v23  ;;  %12785 = vst [vmem:[#allocation115_spill] sm:$0xff] %v9501_v11 }
 0x58b   :  { %3320 = vmatpush1.bf16.msra.mxu0 %v9486_v45  ;;  %3361 = vmatpush1.bf16.msra.mxu1 %v9489_v21  ;;  %v9504_v45 = vld [vmem:[#allocation8 + $0x1a4] ss:$16 sps:$4 sm:$0xff]   ;;  %v9507_v21 = vld [vmem:[#allocation8 + $0x1ac] ss:$16 sps:$4 sm:$0xff]  }
 0x58c   :  { %3321 = vmatprep.subr.bf16.mxu0 %v9492_v39  ;;  %3362 = vmatprep.subr.bf16.mxu1 %v9495_v36  ;;  %12786 = vst [vmem:[#allocation116_spill] sm:$0xff] %v9504_v45  ;;  %12787 = vst [vmem:[#allocation117_spill] sm:$0xff] %v9507_v21 }
 0x58f   :  { %3322 = vmatpush1.bf16.msra.mxu0 %v9498_v23  ;;  %3363 = vmatpush1.bf16.msra.mxu1 %v9501_v11  ;;  %v9515_v11 = vld [vmem:[#allocation8 + $0x1a8] ss:$16 sps:$4 sm:$0xff]  }
 0x590   :  { %3323 = vmatprep.subr.bf16.mxu0 %v9504_v45  ;;  %3364 = vmatprep.subr.bf16.mxu1 %v9507_v21  ;;  %12788 = vst [vmem:[#allocation118_spill] sm:$0xff] %v9515_v11 }
 0x591   :  { %v2894_v39 = vpop.f32.mrb[56].mxu0  ;;  %v2935_v61 = vpop.f32.mrb[56].mxu1 }
 0x592   :  { %v2895_v36 = vadd.f32 %v2894_v39, %v8979_v25  ;;  %v2896_v15 = vpop.f32.mrb[57].mxu0  ;;  %v2937_v34 = vpop.f32.mrb[57].mxu1  ;;  %v9521_v39 = vld [vmem:[#allocation8 + $0x1cc] ss:$16 sps:$4 sm:$0xff]  }
 0x593   :  { %v2897_v23 = vadd.f32 %v2896_v15, %v8982_v46  ;;  %v2898_v53 = vpop.f32.mrb[58].mxu0  ;;  %v2939_v56 = vpop.f32.mrb[58].mxu1  ;;  %3324 = vmatpush1.bf16.msra.mxu0 %v9512_v44  ;;  %3365 = vmatpush1.bf16.msra.mxu1 %v9515_v11  ;;  %12790 = vst [vmem:[#allocation120_spill] sm:$0xff] %v9521_v39  ;;  %v9527_v15 = vld [vmem:[#allocation8 + $0x1c8] ss:$16 sps:$4 sm:$0xff]  }
 0x594   :  { %v5637_v45 = vmul.f32 -1.442695, %v2895_v36  ;;  %v2899_v21 = vpop.f32.mrb[59].mxu0  ;;  %v2940_v47 = vpop.f32.mrb[59].mxu1  ;;  %3325 = vmatprep.subr.bf16.mxu0 %v9518_v55  ;;  %3366 = vmatprep.subr.bf16.mxu1 %v9521_v39  ;;  %v9524_v53 = vld [vmem:[#allocation8 + $0x1c0] ss:$16 sps:$4 sm:$0xff]  }
 0x595   :  { %v5638_v56 = vmul.f32 -1.442695, %v2897_v23  ;;  %12791 = vst [vmem:[#allocation121_spill] sm:$0xff] %v9524_v53  ;;  %12792 = vst [vmem:[#allocation122_spill] sm:$0xff] %v9527_v15  ;;  %v9530_v47 = vld [vmem:[#allocation8 + $0x1e4] ss:$16 sps:$4 sm:$0xff]   ;;  %v2936_v23 = vadd.f32 %v2935_v61, %v8995_v8 }
 0x596   :  { %6261 = vpow2.f32 %v5637_v45  ;;  %12793 = vst [vmem:[#allocation123_spill] sm:$0xff] %v9530_v47  ;;  %v9533_v21 = vld [vmem:[#allocation8 + $0x1ec] ss:$16 sps:$4 sm:$0xff]   ;;  %v9537_v45 = vld [vmem:[#allocation8 + $0x1e0] ss:$16 sps:$4 sm:$0xff]  }
 0x597   :  { %3326 = vmatpush1.bf16.msra.mxu0 %v9524_v53  ;;  %3367 = vmatpush1.bf16.msra.mxu1 %v9527_v15  ;;  %6263 = vpow2.f32 %v5638_v56  ;;  %12794 = vst [vmem:[#allocation124_spill] sm:$0xff] %v9533_v21  ;;  %12795 = vst [vmem:[#allocation125_spill] sm:$0xff] %v9537_v45  ;;  %v9540_v36 = vld [vmem:[#allocation8 + $0x1e8] ss:$16 sps:$4 sm:$0xff]   ;;  %v2938_v56 = vadd.f32 %v2937_v34, %v9001_v13 }
 0x598   :  { %3327 = vmatprep.subr.bf16.mxu0 %v9530_v47  ;;  %3368 = vmatprep.subr.bf16.mxu1 %v9533_v21  ;;  %12796 = vst [vmem:[#allocation126_spill] sm:$0xff] %v9540_v36  ;;  %v5639_v47 = vmul.f32 -1.442695, %v2936_v23 }
 0x599   :  { %6265 = vtanh.f32 %v2938_v56 }
 0x59a   :  { %6267 = vpow2.f32 %v5639_v47 }
 0x59b   :  { %3328 = vmatpush1.bf16.msra.mxu0 %v9537_v45  ;;  %3369 = vmatpush1.bf16.msra.mxu1 %v9540_v36 }
 0x59c   :  { %3404 = vmatprep.subr.bf16.mxu0 %v9007_v33  ;;  %3445 = vmatprep.subr.bf16.mxu1 %v9011_v10 }
 0x5a0   :  { %v6262_v15 = vpop.eup %6261 }
 0x5a1   :  { %v2951_v53 = vadd.f32 1.0, %v6262_v15  ;;  %v6264_v21 = vpop.eup %6263 }
 0x5a2   :  { %v2952_v61 = vadd.f32 1.0, %v6264_v21 }
 0x5a3   :  { %6269 = vrcp.f32 %v2951_v53  ;;  %v6266_v45 = vpop.eup %6265 }
 0x5a4   :  { %6271 = vrcp.f32 %v2952_v61  ;;  %v6268_v8 = vpop.eup %6267 }
 0x5a5   :  { %v2953_v11 = vadd.f32 1.0, %v6268_v8 }
 0x5a7   :  { %6273 = vrcp.f32 %v2953_v11 }
 0x5ad   :  { %v6270_v39 = vpop.eup %6269 }
 0x5ae   :  { %v2962_v55 = vmul.f32 %v6270_v39, %v6266_v45  ;;  %v6272_v36 = vpop.eup %6271 }
 0x5af   :  { %v2961_v33 = vmul.f32 %v6272_v36, %v9014_v38 }
 0x5b1   :  { %v9547_v10 = vadd.f32 %v2962_v55, %v2961_v33  ;;  %v6274_v34 = vpop.eup %6273 }
 0x5b3   :  { %12797 = vst [vmem:[#allocation127_spill] sm:$0xff] %v9547_v10  ;;  %6275 = vtanh.f32 %v9547_v10 }
 0x5bd   :  { %v6276_v15 = vpop.eup %6275 }
 0x5be   :  { %v2965_v23 = vmul.f32 %v6276_v15, %v6274_v34 }
 0x5c0   :  { %v3296_v47 = vpack.c.bf16 %v2965_v23, %v2965_v23 }
 0x5c2   :  { %3329 = vmatprep.mubr.bf16.mxu0 %v3296_v47  ;;  %3370 = vmatprep.mubr.bf16.mxu1 %v3296_v47 }
 0x5d1   :  { %v3001_v53 = vpop.f32.mrb[60].mxu0  ;;  %v3042_v21 = vpop.f32.mrb[60].mxu1 }
 0x5d2   :  { %v3002_v56 = vadd.f32 %v3001_v53, %v12619_v29  ;;  %v3003_v39 = vpop.f32.mrb[61].mxu0  ;;  %v3044_v45 = vpop.f32.mrb[61].mxu1  ;;  %v3043_v34 = vadd.f32 %v3042_v21, %v12621_v3 }
 0x5d3   :  { %v3004_v8 = vadd.f32 %v3003_v39, %v12620_v37  ;;  %v3005_v38 = vpop.f32.mrb[62].mxu0  ;;  %v3046_v55 = vpop.f32.mrb[62].mxu1  ;;  %v3045_v15 = vadd.f32 %v3044_v45, %v12622_v6 }
 0x5d4   :  { %v5640_v36 = vmul.f32 -1.442695, %v3002_v56  ;;  %v3006_v11 = vpop.f32.mrb[63].mxu0  ;;  %v3047_v61 = vpop.f32.mrb[63].mxu1  ;;  %v5642_v23 = vmul.f32 -1.442695, %v3043_v34 }
 0x5d5   :  { %v5641_v33 = vmul.f32 -1.442695, %v3004_v8 }
 0x5d6   :  { %6277 = vpow2.f32 %v5640_v36 }
 0x5d7   :  { %6279 = vpow2.f32 %v5641_v33 }
 0x5d8   :  { %6281 = vtanh.f32 %v3045_v15 }
 0x5d9   :  { %6283 = vpow2.f32 %v5642_v23  ;;  %v12804_v23 = vld [vmem:[#allocation151_spill] sm:$0xff] }
 0x5e0   :  { %v6278_v47 = vpop.eup %6277 }
 0x5e1   :  { %v3058_v10 = vadd.f32 1.0, %v6278_v47  ;;  %v6280_v53 = vpop.eup %6279 }
 0x5e2   :  { %v3059_v39 = vadd.f32 1.0, %v6280_v53  ;;  %v6282_v38 = vpop.eup %6281 }
 0x5e3   :  { %6285 = vrcp.f32 %v3058_v10  ;;  %v6284_v56 = vpop.eup %6283 }
 0x5e4   :  { %6287 = vrcp.f32 %v3059_v39  ;;  %v3060_v36 = vadd.f32 1.0, %v6284_v56  ;;  %v12805_v39 = vld [vmem:[#allocation149_spill] sm:$0xff] }
 0x5e6   :  { %6289 = vrcp.f32 %v3060_v36  ;;  %v12808_v36 = vld [vmem:[#allocation15_spill] sm:$0xff] }
 0x5ed   :  { %v6286_v55 = vpop.eup %6285 }
 0x5ee   :  { %v3069_v11 = vmul.f32 %v6286_v55, %v6282_v38  ;;  %v6288_v8 = vpop.eup %6287  ;;  %v12806_v38 = vld [vmem:[#allocation13_spill] sm:$0xff] }
 0x5ef   :  { %v3068_v61 = vmul.f32 %v6288_v8, %v9022_v16  ;;  %v12798_v16 = vld [vmem:[#allocation144_spill] sm:$0xff]  ;;  %v12807_v8 = vld [vmem:[#allocation14_spill] sm:$0xff] }
 0x5f0   :  { %v6290_v45 = vpop.eup %6289 }
 0x5f1   :  { %v9555_v21 = vadd.f32 %v3069_v11, %v3068_v61  ;;  %v12809_v61 = vld [vmem:[#allocation16_spill] sm:$0xff] }
 0x5f3   :  { %6291 = vtanh.f32 %v9555_v21 }
 0x5fd   :  { %v6292_v33 = vpop.eup %6291 }
 0x5fe   :  { %v3072_v34 = vmul.f32 %v6292_v33, %v6290_v45  ;;  %v12810_v45 = vld [vmem:[#allocation17_spill] sm:$0xff]  ;;  %v12811_v33 = vld [vmem:[#allocation18_spill] sm:$0xff] }
 0x600   :  { %v3295_v15 = vpack.c.bf16 %v3072_v34, %v3072_v34  ;;  %v12812_v34 = vld [vmem:[#allocation19_spill] sm:$0xff] }
 0x602   :  { %3330 = vmatmul.mubr.bf16.vlgmr.msra.gmra.mrb[72].mxu0 %v3295_v15  ;;  %3371 = vmatmul.mubr.bf16.vlgmr.msra.gmra.mrb[72].mxu1 %v3295_v15 }
 0x603   :  { %3405 = vmatpush1.bf16.msra.mxu0 %v9025_v30  ;;  %3446 = vmatpush1.bf16.msra.mxu1 %v9028_v35  ;;  %v12799_v30 = vld [vmem:[#allocation145_spill] sm:$0xff]  ;;  %v12800_v35 = vld [vmem:[#allocation146_spill] sm:$0xff] }
 0x604   :  { %3436 = vmatprep.mubr.bf16.mxu0 %v3295_v15  ;;  %3477 = vmatprep.mubr.bf16.mxu1 %v3295_v15  ;;  %v12813_v15 = vld [vmem:[#allocation152_spill] sm:$0xff] }
 0x605   :  { %3406 = vmatprep.subr.bf16.mxu0 %v9031_v31  ;;  %3447 = vmatprep.subr.bf16.mxu1 %v9034_v20 }
 0x607   :  { %3407 = vmatpush1.bf16.msra.mxu0 %v9037_v9  ;;  %3448 = vmatpush1.bf16.msra.mxu1 %v9040_v32  ;;  %v12801_v9 = vld [vmem:[#allocation147_spill] sm:$0xff]  ;;  %v12802_v32 = vld [vmem:[#allocation148_spill] sm:$0xff] }
 0x608   :  { %3408 = vmatprep.subr.bf16.mxu0 %v9043_v18  ;;  %3449 = vmatprep.subr.bf16.mxu1 %v9046_v1  ;;  %v12803_v18 = vld [vmem:[#allocation150_spill] sm:$0xff] }
 0x60b   :  { %3409 = vmatpush1.bf16.msra.mxu0 %v9049_v2  ;;  %3450 = vmatpush1.bf16.msra.mxu1 %v9052_v4 }
 0x60c   :  { %3410 = vmatprep.subr.bf16.mxu0 %v9055_v5  ;;  %3451 = vmatprep.subr.bf16.mxu1 %v12798_v16 }
 0x60f   :  { %3411 = vmatpush1.bf16.msra.mxu0 %v12799_v30  ;;  %3452 = vmatpush1.bf16.msra.mxu1 %v12800_v35  ;;  %v12814_v30 = vld [vmem:[#allocation20_spill] sm:$0xff]  ;;  %v12815_v35 = vld [vmem:[#allocation21_spill] sm:$0xff] }
 0x610   :  { %3412 = vmatprep.subr.bf16.mxu0 %v12801_v9  ;;  %3453 = vmatprep.subr.bf16.mxu1 %v12802_v32  ;;  %v12817_v32 = vld [vmem:[#allocation22_spill] sm:$0xff] }
 0x611   :  { %v3108_v31 = vpop.f32.mrb[64].mxu0  ;;  %v3149_v20 = vpop.f32.mrb[64].mxu1 }
 0x612   :  { %v3109_v1 = vadd.f32 %v3108_v31, %v12803_v18  ;;  %v3110_v10 = vpop.f32.mrb[65].mxu0  ;;  %v3151_v2 = vpop.f32.mrb[65].mxu1  ;;  %v3150_v16 = vadd.f32 %v3149_v20, %v12813_v15  ;;  %v12816_v31 = vld [vmem:[#allocation153_spill] sm:$0xff]  ;;  %v12822_v20 = vld [vmem:[#allocation27_spill] sm:$0xff] }
 0x613   :  { %v3111_v4 = vadd.f32 %v3110_v10, %v12804_v23  ;;  %v3112_v47 = vpop.f32.mrb[66].mxu0  ;;  %v3153_v5 = vpop.f32.mrb[66].mxu1  ;;  %3413 = vmatpush1.bf16.msra.mxu0 %v12805_v39  ;;  %3454 = vmatpush1.bf16.msra.mxu1 %v12806_v38  ;;  %v3152_v9 = vadd.f32 %v3151_v2, %v12816_v31  ;;  %v12821_v39 = vld [vmem:[#allocation26_spill] sm:$0xff] }
 0x614   :  { %v5643_v53 = vmul.f32 -1.442695, %v3109_v1  ;;  %v3113_v56 = vpop.f32.mrb[67].mxu0  ;;  %v3154_v55 = vpop.f32.mrb[67].mxu1  ;;  %3414 = vmatprep.subr.bf16.mxu0 %v12807_v8  ;;  %3455 = vmatprep.subr.bf16.mxu1 %v12808_v36  ;;  %v12818_v1 = vld [vmem:[#allocation23_spill] sm:$0xff]  ;;  %v12819_v47 = vld [vmem:[#allocation24_spill] sm:$0xff] }
 0x615   :  { %v5644_v11 = vmul.f32 -1.442695, %v3111_v4  ;;  %v5645_v10 = vmul.f32 -1.442695, %v3150_v16  ;;  %v12820_v5 = vld [vmem:[#allocation25_spill] sm:$0xff]  ;;  %v12823_v56 = vld [vmem:[#allocation28_spill] sm:$0xff] }
 0x616   :  { %6293 = vpow2.f32 %v5643_v53  ;;  %v12824_v55 = vld [vmem:[#allocation29_spill] sm:$0xff]  ;;  %v12826_v8 = vld [vmem:[#allocation31_spill] sm:$0xff]  ;;  %v12827_v36 = vld [vmem:[#allocation32_spill] sm:$0xff] }
 0x617   :  { %6295 = vpow2.f32 %v5644_v11  ;;  %3415 = vmatpush1.bf16.msra.mxu0 %v12809_v61  ;;  %3456 = vmatpush1.bf16.msra.mxu1 %v12810_v45  ;;  %v12825_v11 = vld [vmem:[#allocation30_spill] sm:$0xff]  ;;  %v12828_v61 = vld [vmem:[#allocation55_spill] sm:$0xff]  ;;  %v12829_v45 = vld [vmem:[#allocation56_spill] sm:$0xff] }
 0x618   :  { %3416 = vmatprep.subr.bf16.mxu0 %v12811_v33  ;;  %3457 = vmatprep.subr.bf16.mxu1 %v12812_v34  ;;  %6297 = vtanh.f32 %v3152_v9  ;;  %v12830_v33 = vld [vmem:[#allocation33_spill] sm:$0xff] }
 0x619   :  { %6299 = vpow2.f32 %v5645_v10 }
 0x61b   :  { %3417 = vmatpush1.bf16.msra.mxu0 %v12814_v30  ;;  %3458 = vmatpush1.bf16.msra.mxu1 %v12815_v35  ;;  %v12831_v30 = vld [vmem:[#allocation34_spill] sm:$0xff]  ;;  %v12832_v35 = vld [vmem:[#allocation35_spill] sm:$0xff] }
 0x61c   :  { %3418 = vmatprep.subr.bf16.mxu0 %v12817_v32  ;;  %3459 = vmatprep.subr.bf16.mxu1 %v12818_v1  ;;  %v12833_v32 = vld [vmem:[#allocation36_spill] sm:$0xff]  ;;  %v12834_v1 = vld [vmem:[#allocation37_spill] sm:$0xff] }
 0x61f   :  { %3419 = vmatpush1.bf16.msra.mxu0 %v12819_v47  ;;  %3460 = vmatpush1.bf16.msra.mxu1 %v12820_v5 }
 0x620   :  { %v6294_v4 = vpop.eup %6293  ;;  %3420 = vmatprep.subr.bf16.mxu0 %v12821_v39  ;;  %3461 = vmatprep.subr.bf16.mxu1 %v12822_v20  ;;  %v12836_v39 = vld [vmem:[#allocation39_spill] sm:$0xff] }
 0x621   :  { %v3165_v53 = vadd.f32 1.0, %v6294_v4  ;;  %v6296_v38 = vpop.eup %6295 }
 0x622   :  { %v3166_v2 = vadd.f32 1.0, %v6296_v38  ;;  %v6298_v34 = vpop.eup %6297 }
 0x623   :  { %6301 = vrcp.f32 %v3165_v53  ;;  %3421 = vmatpush1.bf16.msra.mxu0 %v12823_v56  ;;  %3462 = vmatpush1.bf16.msra.mxu1 %v12824_v55  ;;  %v6300_v16 = vpop.eup %6299  ;;  %v12835_v53 = vld [vmem:[#allocation38_spill] sm:$0xff]  ;;  %v12838_v56 = vld [vmem:[#allocation41_spill] sm:$0xff] }
 0x624   :  { %6303 = vrcp.f32 %v3166_v2  ;;  %3422 = vmatprep.subr.bf16.mxu0 %v12825_v11  ;;  %3463 = vmatprep.subr.bf16.mxu1 %v12826_v8  ;;  %v3167_v47 = vadd.f32 1.0, %v6300_v16  ;;  %v12837_v2 = vld [vmem:[#allocation40_spill] sm:$0xff]  ;;  %v12839_v11 = vld [vmem:[#allocation65_spill] sm:$0xff] }
 0x625   :  { %v12842_v16 = vld [vmem:[#allocation68_spill] sm:$0xff] }
 0x626   :  { %6305 = vrcp.f32 %v3167_v47  ;;  %v12843_v47 = vld [vmem:[#allocation42_spill] sm:$0xff] }
 0x627   :  { %3423 = vmatpush1.bf16.msra.mxu0 %v12827_v36  ;;  %3464 = vmatpush1.bf16.msra.mxu1 %v12828_v61  ;;  %v12840_v36 = vld [vmem:[#allocation66_spill] sm:$0xff] }
 0x628   :  { %3424 = vmatprep.subr.bf16.mxu0 %v12829_v45  ;;  %3465 = vmatprep.subr.bf16.mxu1 %v12830_v33 }
 0x62b   :  { %3425 = vmatpush1.bf16.msra.mxu0 %v12831_v30  ;;  %3466 = vmatpush1.bf16.msra.mxu1 %v12832_v35 }
 0x62c   :  { %3426 = vmatprep.subr.bf16.mxu0 %v12833_v32  ;;  %3467 = vmatprep.subr.bf16.mxu1 %v12834_v1 }
 0x62d   :  { %v6302_v9 = vpop.eup %6301 }
 0x62e   :  { %v3176_v10 = vmul.f32 %v6302_v9, %v6298_v34  ;;  %v6304_v4 = vpop.eup %6303 }
 0x62f   :  { %v3175_v5 = vmul.f32 %v6304_v4, %v9174_v48  ;;  %3427 = vmatpush1.bf16.msra.mxu0 %v12835_v53  ;;  %3468 = vmatpush1.bf16.msra.mxu1 %v12836_v39  ;;  %v12841_v48 = vld [vmem:[#allocation67_spill] sm:$0xff]  ;;  %v12847_v39 = vld [vmem:[#allocation45_spill] sm:$0xff] }
 0x630   :  { %3428 = vmatprep.subr.bf16.mxu0 %v12837_v2  ;;  %3469 = vmatprep.subr.bf16.mxu1 %v12838_v56  ;;  %v6306_v53 = vpop.eup %6305  ;;  %v9634_v2 = vld [vmem:[#allocation5 + $0x4] ss:$16 sps:$4 sm:$0xff]   ;;  %v9637_v56 = vld [vmem:[#allocation5 + $0xc] ss:$16 sps:$4 sm:$0xff]  }
 0x631   :  { %v3219_v20 = vpop.f32.mrb[68].mxu0  ;;  %v3260_v38 = vpop.f32.mrb[68].mxu1  ;;  %v9611_v55 = vadd.f32 %v3176_v10, %v3175_v5  ;;  %v12844_v5 = vld [vmem:[#allocation43_spill] sm:$0xff] }
 0x632   :  { %v3267_v8 = vadd.f32 %v3219_v20, %v12839_v11  ;;  %v9615_v61 = vadd.f32 %v3260_v38, %v12840_v36  ;;  %v3221_v45 = vpop.f32.mrb[69].mxu0  ;;  %v3262_v33 = vpop.f32.mrb[69].mxu1  ;;  %v9640_v36 = vld [vmem:[#allocation5] ss:$16 sps:$4 sm:$0xff]  }
 0x633   :  { %v3268_v34 = vadd.f32 %v3221_v45, %v12841_v48  ;;  %v3270_v30 = vadd.f32 %v3262_v33, %v12842_v16  ;;  %v3223_v35 = vpop.f32.mrb[70].mxu0  ;;  %v3264_v9 = vpop.f32.mrb[70].mxu1  ;;  %6307 = vtanh.f32 %v9611_v55  ;;  %3429 = vmatpush1.bf16.msra.mxu0 %v9183_v14  ;;  %3470 = vmatpush1.bf16.msra.mxu1 %v9186_v50  ;;  %v12845_v14 = vld [vmem:[#allocation54_spill] sm:$0xff]  ;;  %v12846_v50 = vld [vmem:[#allocation44_spill] sm:$0xff]  ;;  %v9652_v33 = vld [vmem:[#allocation5 + $0x20] ss:$16 sps:$4 sm:$0xff]  }
 0x634   :  { %v5646_v32 = vmul.f32 -1.442695, %v3267_v8  ;;  %v3224_v1 = vpop.f32.mrb[71].mxu0  ;;  %v3265_v10 = vpop.f32.mrb[71].mxu1  ;;  %3430 = vmatprep.subr.bf16.mxu0 %v9189_v40  ;;  %3471 = vmatprep.subr.bf16.mxu1 %v9192_v54  ;;  %v12848_v40 = vld [vmem:[#allocation46_spill] sm:$0xff] }
 0x635   :  { %v5647_v4 = vmul.f32 -1.442695, %v3268_v34  ;;  %v9649_v45 = vld [vmem:[#allocation5 + $0x2c] ss:$16 sps:$4 sm:$0xff]   ;;  %v9655_v48 = vld [vmem:[#allocation5 + $0x28] ss:$16 sps:$4 sm:$0xff]  }
 0x636   :  { %6309 = vpow2.f32 %v5646_v32  ;;  %v9658_v34 = vld [vmem:[#allocation5 + $0x44] ss:$16 sps:$4 sm:$0xff]   ;;  %v9661_v16 = vld [vmem:[#allocation5 + $0x4c] ss:$16 sps:$4 sm:$0xff]   ;;  %v9664_v35 = vld [vmem:[#allocation5 + $0x40] ss:$16 sps:$4 sm:$0xff]  }
 0x637   :  { %6311 = vpow2.f32 %v5647_v4  ;;  %3431 = vmatpush1.bf16.msra.mxu0 %v9195_v41  ;;  %3472 = vmatpush1.bf16.msra.mxu1 %v9198_v49  ;;  %v9667_v32 = vld [vmem:[#allocation5 + $0x48] ss:$16 sps:$4 sm:$0xff]   ;;  %v9670_v1 = vld [vmem:[#allocation5 + $0x64] ss:$16 sps:$4 sm:$0xff]   ;;  %v9673_v4 = vld [vmem:[#allocation5 + $0x6c] ss:$16 sps:$4 sm:$0xff]  }
 0x638   :  { %3432 = vmatprep.subr.bf16.mxu0 %v12843_v47  ;;  %3473 = vmatprep.subr.bf16.mxu1 %v12844_v5  ;;  %6313 = vtanh.f32 %v3270_v30 }
 0x63b   :  { %3433 = vmatpush1.bf16.msra.mxu0 %v12845_v14  ;;  %3474 = vmatpush1.bf16.msra.mxu1 %v12846_v50  ;;  %v9677_v14 = vld [vmem:[#allocation5 + $0x60] ss:$16 sps:$4 sm:$0xff]   ;;  %v9680_v50 = vld [vmem:[#allocation5 + $0x68] ss:$16 sps:$4 sm:$0xff]  }
 0x63c   :  { %3434 = vmatprep.subr.bf16.mxu0 %v12847_v39  ;;  %3475 = vmatprep.subr.bf16.mxu1 %v12848_v40  ;;  %v9688_v40 = vld [vmem:[#allocation5 + $0x8c] ss:$16 sps:$4 sm:$0xff]  }
 0x63d   :  { %v6308_v54 = vpop.eup %6307 }
 0x63e   :  { %v3179_v20 = vmul.f32 %v6308_v54, %v6306_v53  ;;  %v9683_v53 = vld [vmem:[#allocation5 + $0x84] ss:$16 sps:$4 sm:$0xff]   ;;  %v9691_v54 = vld [vmem:[#allocation5 + $0x80] ss:$16 sps:$4 sm:$0xff]  }
 0x63f   :  { %3435 = vmatpush1.bf16.msra.mxu0 %v9219_v27  ;;  %3476 = vmatpush1.bf16.msra.mxu1 %v9222_v26  ;;  %v9643_v27 = vld [vmem:[#allocation5 + $0x8] ss:$16 sps:$4 sm:$0xff]   ;;  %v9646_v26 = vld [vmem:[#allocation5 + $0x24] ss:$16 sps:$4 sm:$0xff]  }
 0x640   :  { %v6310_v38 = vpop.eup %6309  ;;  %v3403_v49 = vpack.c.bf16 %v3179_v20, %v3179_v20  ;;  %3511 = vmatprep.subr.bf16.mxu0 %v9634_v2  ;;  %3552 = vmatprep.subr.bf16.mxu1 %v9637_v56  ;;  %v9697_v20 = vld [vmem:[#allocation5 + $0xa4] ss:$16 sps:$4 sm:$0xff]  }
 0x641   :  { %v3280_v41 = vadd.f32 1.0, %v6310_v38  ;;  %v6312_v11 = vpop.eup %6311  ;;  %v9700_v38 = vld [vmem:[#allocation5 + $0xac] ss:$16 sps:$4 sm:$0xff]  }
 0x642   :  { %v3281_v8 = vadd.f32 1.0, %v6312_v11  ;;  %3437 = vmatmul.mubr.bf16.vlgmr.msra.gmra.mrb[76].mxu0 %v3403_v49  ;;  %3478 = vmatmul.mubr.bf16.vlgmr.msra.gmra.mrb[76].mxu1 %v3403_v49  ;;  %v6314_v30 = vpop.eup %6313  ;;  %v9709_v11 = vld [vmem:[#allocation5 + $0xc4] ss:$16 sps:$4 sm:$0xff]  }
 0x643   :  { %6315 = vrcp.f32 %v3280_v41  ;;  %3512 = vmatpush1.bf16.msra.mxu0 %v9640_v36  ;;  %3543 = vmatprep.mubr.bf16.mxu0 %v3403_v49  ;;  %v9703_v41 = vld [vmem:[#allocation5 + $0xa0] ss:$16 sps:$4 sm:$0xff]   ;;  %12850 = vst [vmem:[#allocation129_spill] sm:$0xff] %v9709_v11 }
 0x644   :  { %6317 = vrcp.f32 %v3281_v8  ;;  %3553 = vmatpush1.bf16.msra.mxu1 %v9643_v27  ;;  %3584 = vmatprep.mubr.bf16.mxu1 %v3403_v49  ;;  %v9706_v49 = vld [vmem:[#allocation5 + $0xa8] ss:$16 sps:$4 sm:$0xff]   ;;  %v9712_v8 = vld [vmem:[#allocation5 + $0xcc] ss:$16 sps:$4 sm:$0xff]  }
 0x645   :  { %3513 = vmatprep.subr.bf16.mxu0 %v9646_v26  ;;  %3554 = vmatprep.subr.bf16.mxu1 %v9649_v45  ;;  %12849 = vst [vmem:[#allocation128_spill] sm:$0xff] %v9706_v49  ;;  %12851 = vst [vmem:[#allocation130_spill] sm:$0xff] %v9712_v8 }
 0x647   :  { %3514 = vmatpush1.bf16.msra.mxu0 %v9652_v33 }
 0x648   :  { %3555 = vmatpush1.bf16.msra.mxu1 %v9655_v48  ;;  %3515 = vmatprep.subr.bf16.mxu0 %v9658_v34 }
 0x649   :  { %3556 = vmatprep.subr.bf16.mxu1 %v9661_v16 }
 0x64b   :  { %3516 = vmatpush1.bf16.msra.mxu0 %v9664_v35 }
 0x64c   :  { %3557 = vmatpush1.bf16.msra.mxu1 %v9667_v32  ;;  %3517 = vmatprep.subr.bf16.mxu0 %v9670_v1 }
 0x64d   :  { %v6316_v9 = vpop.eup %6315  ;;  %3558 = vmatprep.subr.bf16.mxu1 %v9673_v4 }
 0x64e   :  { %v3291_v10 = vmul.f32 %v6316_v9, %v6314_v30  ;;  %v6318_v47 = vpop.eup %6317  ;;  %v9715_v30 = vld [vmem:[#allocation5 + $0xc0] ss:$16 sps:$4 sm:$0xff]   ;;  %v5648_v9 = vmul.f32 -1.442695, %v9615_v61  ;;  %v9734_v61 = vld [vmem:[#allocation5 + $0x104] ss:$16 sps:$4 sm:$0xff]  }
 0x64f   :  { %v3290_v5 = vmul.f32 %v6318_v47, %v9244_v42  ;;  %3518 = vmatpush1.bf16.msra.mxu0 %v9677_v14  ;;  %v9694_v42 = vld [vmem:[#allocation5 + $0x88] ss:$16 sps:$4 sm:$0xff]   ;;  %12852 = vst [vmem:[#allocation131_spill] sm:$0xff] %v9715_v30  ;;  %v9722_v47 = vld [vmem:[#allocation5 + $0xe4] ss:$16 sps:$4 sm:$0xff]   ;;  %12858 = vst [vmem:[#allocation58_spill] sm:$0xff] %v9734_v61 }
 0x650   :  { %3559 = vmatpush1.bf16.msra.mxu1 %v9680_v50  ;;  %3519 = vmatprep.subr.bf16.mxu0 %v9683_v53  ;;  %12854 = vst [vmem:[#allocation133_spill] sm:$0xff] %v9722_v47  ;;  %6319 = vpow2.f32 %v5648_v9  ;;  %v9746_v9 = vld [vmem:[#allocation5 + $0x124] ss:$16 sps:$4 sm:$0xff]  }
 0x651   :  { %v9686_v39 = vadd.f32 %v3291_v10, %v3290_v5  ;;  %3560 = vmatprep.subr.bf16.mxu1 %v9688_v40  ;;  %v9719_v10 = vld [vmem:[#allocation5 + $0xc8] ss:$16 sps:$4 sm:$0xff]   ;;  %v9725_v5 = vld [vmem:[#allocation5 + $0xec] ss:$16 sps:$4 sm:$0xff]   ;;  %12862 = vst [vmem:[#allocation137_spill] sm:$0xff] %v9746_v9 }
 0x652   :  { %12853 = vst [vmem:[#allocation132_spill] sm:$0xff] %v9719_v10  ;;  %12855 = vst [vmem:[#allocation134_spill] sm:$0xff] %v9725_v5 }
 0x653   :  { %3520 = vmatpush1.bf16.msra.mxu0 %v9691_v54  ;;  %6321 = vtanh.f32 %v9686_v39 }
 0x654   :  { %3561 = vmatpush1.bf16.msra.mxu1 %v9694_v42  ;;  %3521 = vmatprep.subr.bf16.mxu0 %v9697_v20 }
 0x655   :  { %3562 = vmatprep.subr.bf16.mxu1 %v9700_v38 }
 0x657   :  { %3522 = vmatpush1.bf16.msra.mxu0 %v9703_v41 }
 0x658   :  { %3563 = vmatpush1.bf16.msra.mxu1 %v9706_v49  ;;  %3523 = vmatprep.subr.bf16.mxu0 %v9709_v11  ;;  %v9728_v11 = vld [vmem:[#allocation5 + $0xe0] ss:$16 sps:$4 sm:$0xff]  }
 0x659   :  { %3564 = vmatprep.subr.bf16.mxu1 %v9712_v8  ;;  %12856 = vst [vmem:[#allocation135_spill] sm:$0xff] %v9728_v11  ;;  %v9773_v8 = vld [vmem:[#allocation5 + $0x16c] ss:$16 sps:$4 sm:$0xff]   ;;  %v9825_v49 = vld [vmem:[#allocation5 + $0x1e0] ss:$16 sps:$4 sm:$0xff]  }
 0x65a   :  { %12871 = vst [vmem:[#allocation13_spill] sm:$0xff] %v9773_v8  ;;  %12885 = vst [vmem:[#allocation27_spill] sm:$0xff] %v9825_v49 }
 0x65b   :  { %3524 = vmatpush1.bf16.msra.mxu0 %v9715_v30  ;;  %v9731_v30 = vld [vmem:[#allocation5 + $0xe8] ss:$16 sps:$4 sm:$0xff]  }
 0x65c   :  { %3565 = vmatpush1.bf16.msra.mxu1 %v9719_v10  ;;  %3525 = vmatprep.subr.bf16.mxu0 %v9722_v47  ;;  %12857 = vst [vmem:[#allocation57_spill] sm:$0xff] %v9731_v30  ;;  %v9737_v10 = vld [vmem:[#allocation5 + $0x10c] ss:$16 sps:$4 sm:$0xff]   ;;  %v9740_v47 = vld [vmem:[#allocation5 + $0x100] ss:$16 sps:$4 sm:$0xff]  }
 0x65d   :  { %3566 = vmatprep.subr.bf16.mxu1 %v9725_v5  ;;  %12859 = vst [vmem:[#allocation59_spill] sm:$0xff] %v9737_v10  ;;  %12860 = vst [vmem:[#allocation60_spill] sm:$0xff] %v9740_v47  ;;  %v9743_v5 = vld [vmem:[#allocation5 + $0x108] ss:$16 sps:$4 sm:$0xff]  }
 0x65e   :  { %12861 = vst [vmem:[#allocation136_spill] sm:$0xff] %v9743_v5 }
 0x65f   :  { %3526 = vmatpush1.bf16.msra.mxu0 %v9728_v11  ;;  %v9764_v11 = vld [vmem:[#allocation5 + $0x140] ss:$16 sps:$4 sm:$0xff]  }
 0x660   :  { %3567 = vmatpush1.bf16.msra.mxu1 %v9731_v30  ;;  %3527 = vmatprep.subr.bf16.mxu0 %v9734_v61  ;;  %v9749_v30 = vld [vmem:[#allocation5 + $0x12c] ss:$16 sps:$4 sm:$0xff]   ;;  %v9752_v61 = vld [vmem:[#allocation5 + $0x120] ss:$16 sps:$4 sm:$0xff]   ;;  %12868 = vst [vmem:[#allocation147_spill] sm:$0xff] %v9764_v11 }
 0x661   :  { %3568 = vmatprep.subr.bf16.mxu1 %v9737_v10  ;;  %12863 = vst [vmem:[#allocation138_spill] sm:$0xff] %v9749_v30  ;;  %12864 = vst [vmem:[#allocation139_spill] sm:$0xff] %v9752_v61  ;;  %v9755_v10 = vld [vmem:[#allocation5 + $0x128] ss:$16 sps:$4 sm:$0xff]  }
 0x662   :  { %12865 = vst [vmem:[#allocation144_spill] sm:$0xff] %v9755_v10 }
 0x663   :  { %3528 = vmatpush1.bf16.msra.mxu0 %v9740_v47  ;;  %v9758_v47 = vld [vmem:[#allocation5 + $0x144] ss:$16 sps:$4 sm:$0xff]  }
 0x664   :  { %3569 = vmatpush1.bf16.msra.mxu1 %v9743_v5  ;;  %3529 = vmatprep.subr.bf16.mxu0 %v9746_v9  ;;  %12866 = vst [vmem:[#allocation145_spill] sm:$0xff] %v9758_v47  ;;  %v9761_v5 = vld [vmem:[#allocation5 + $0x14c] ss:$16 sps:$4 sm:$0xff]   ;;  %v6320_v9 = vpop.eup %6319 }
 0x665   :  { %3570 = vmatprep.subr.bf16.mxu1 %v9749_v30  ;;  %12867 = vst [vmem:[#allocation146_spill] sm:$0xff] %v9761_v5  ;;  %v9767_v30 = vld [vmem:[#allocation5 + $0x148] ss:$16 sps:$4 sm:$0xff]  }
 0x666   :  { %12869 = vst [vmem:[#allocation148_spill] sm:$0xff] %v9767_v30 }
 0x667   :  { %3530 = vmatpush1.bf16.msra.mxu0 %v9752_v61  ;;  %v9770_v61 = vld [vmem:[#allocation5 + $0x164] ss:$16 sps:$4 sm:$0xff]  }
 0x668   :  { %3571 = vmatpush1.bf16.msra.mxu1 %v9755_v10  ;;  %3531 = vmatprep.subr.bf16.mxu0 %v9758_v47  ;;  %12870 = vst [vmem:[#allocation149_spill] sm:$0xff] %v9770_v61  ;;  %v3282_v10 = vadd.f32 1.0, %v6320_v9  ;;  %v9786_v9 = vld [vmem:[#allocation5 + $0x18c] ss:$16 sps:$4 sm:$0xff]   ;;  %v9813_v47 = vld [vmem:[#allocation5 + $0x1c0] ss:$16 sps:$4 sm:$0xff]  }
 0x669   :  { %3572 = vmatprep.subr.bf16.mxu1 %v9761_v5  ;;  %v9777_v5 = vld [vmem:[#allocation5 + $0x160] ss:$16 sps:$4 sm:$0xff]   ;;  %12875 = vst [vmem:[#allocation17_spill] sm:$0xff] %v9786_v9  ;;  %12884 = vst [vmem:[#allocation26_spill] sm:$0xff] %v9813_v47 }
 0x66a   :  { %12872 = vst [vmem:[#allocation14_spill] sm:$0xff] %v9777_v5  ;;  %6323 = vrcp.f32 %v3282_v10  ;;  %v9801_v10 = vld [vmem:[#allocation5 + $0x1a0] ss:$16 sps:$4 sm:$0xff]  }
 0x66b   :  { %3532 = vmatpush1.bf16.msra.mxu0 %v9764_v11  ;;  %v9780_v11 = vld [vmem:[#allocation5 + $0x168] ss:$16 sps:$4 sm:$0xff]   ;;  %12880 = vst [vmem:[#allocation22_spill] sm:$0xff] %v9801_v10 }
 0x66c   :  { %3573 = vmatpush1.bf16.msra.mxu1 %v9767_v30  ;;  %3533 = vmatprep.subr.bf16.mxu0 %v9770_v61  ;;  %12873 = vst [vmem:[#allocation15_spill] sm:$0xff] %v9780_v11  ;;  %v9783_v30 = vld [vmem:[#allocation5 + $0x184] ss:$16 sps:$4 sm:$0xff]   ;;  %v9792_v61 = vld [vmem:[#allocation5 + $0x188] ss:$16 sps:$4 sm:$0xff]  }
 0x66d   :  { %3574 = vmatprep.subr.bf16.mxu1 %v9773_v8  ;;  %12874 = vst [vmem:[#allocation16_spill] sm:$0xff] %v9783_v30  ;;  %v9789_v8 = vld [vmem:[#allocation5 + $0x180] ss:$16 sps:$4 sm:$0xff]   ;;  %12877 = vst [vmem:[#allocation19_spill] sm:$0xff] %v9792_v61 }
 0x66e   :  { %12876 = vst [vmem:[#allocation18_spill] sm:$0xff] %v9789_v8 }
 0x66f   :  { %3534 = vmatpush1.bf16.msra.mxu0 %v9777_v5  ;;  %v9795_v5 = vld [vmem:[#allocation5 + $0x1a4] ss:$16 sps:$4 sm:$0xff]  }
 0x670   :  { %3575 = vmatpush1.bf16.msra.mxu1 %v9780_v11  ;;  %3535 = vmatprep.subr.bf16.mxu0 %v9783_v30  ;;  %12878 = vst [vmem:[#allocation20_spill] sm:$0xff] %v9795_v5  ;;  %v9798_v11 = vld [vmem:[#allocation5 + $0x1ac] ss:$16 sps:$4 sm:$0xff]  }
 0x671   :  { %3576 = vmatprep.subr.bf16.mxu1 %v9786_v9  ;;  %12879 = vst [vmem:[#allocation21_spill] sm:$0xff] %v9798_v11  ;;  %v9804_v9 = vld [vmem:[#allocation5 + $0x1a8] ss:$16 sps:$4 sm:$0xff]   ;;  %v9810_v30 = vld [vmem:[#allocation5 + $0x1cc] ss:$16 sps:$4 sm:$0xff]  }
 0x672   :  { %12881 = vst [vmem:[#allocation23_spill] sm:$0xff] %v9804_v9  ;;  %12883 = vst [vmem:[#allocation25_spill] sm:$0xff] %v9810_v30 }
 0x673   :  { %3536 = vmatpush1.bf16.msra.mxu0 %v9789_v8  ;;  %v9807_v8 = vld [vmem:[#allocation5 + $0x1c4] ss:$16 sps:$4 sm:$0xff]  }
 0x674   :  { %3577 = vmatpush1.bf16.msra.mxu1 %v9792_v61  ;;  %3537 = vmatprep.subr.bf16.mxu0 %v9795_v5  ;;  %12882 = vst [vmem:[#allocation24_spill] sm:$0xff] %v9807_v8  ;;  %v6322_v61 = vpop.eup %6321 }
 0x675   :  { %3578 = vmatprep.subr.bf16.mxu1 %v9798_v11  ;;  %v6324_v5 = vpop.eup %6323  ;;  %v9816_v11 = vld [vmem:[#allocation5 + $0x1c8] ss:$16 sps:$4 sm:$0xff]  }
 0x677   :  { %3538 = vmatpush1.bf16.msra.mxu0 %v9801_v10  ;;  %v9819_v10 = vld [vmem:[#allocation5 + $0x1e4] ss:$16 sps:$4 sm:$0xff]  }
 0x678   :  { %3579 = vmatpush1.bf16.msra.mxu1 %v9804_v9  ;;  %3539 = vmatprep.subr.bf16.mxu0 %v9807_v8  ;;  %v3294_v9 = vmul.f32 %v6324_v5, %v6322_v61  ;;  %v9822_v8 = vld [vmem:[#allocation5 + $0x1ec] ss:$16 sps:$4 sm:$0xff]   ;;  %v9833_v5 = vld [vmem:[#allocation3] ss:$16 sps:$4 sm:$0xff]   ;;  %v9836_v61 = vld [vmem:[#allocation3 + $0x8] ss:$16 sps:$4 sm:$0xff]  }
 0x679   :  { %3580 = vmatprep.subr.bf16.mxu1 %v9810_v30  ;;  %v9828_v30 = vld [vmem:[#allocation5 + $0x1e8] ss:$16 sps:$4 sm:$0xff]  }
 0x67a   :  { %12886 = vst [vmem:[#allocation28_spill] sm:$0xff] %v9828_v30 }
 0x67b   :  { %3540 = vmatpush1.bf16.msra.mxu0 %v9813_v47  ;;  %v3510_v47 = vpack.c.bf16 %v3294_v9, %v3294_v9  ;;  %v9853_v9 = vld [vmem:[#allocation3 + $0x44] ss:$16 sps:$4 sm:$0xff]  }
 0x67c   :  { %3581 = vmatpush1.bf16.msra.mxu1 %v9816_v11  ;;  %3541 = vmatprep.subr.bf16.mxu0 %v9819_v10  ;;  %12891 = vst [vmem:[#allocation55_spill] sm:$0xff] %v9853_v9 }
 0x67d   :  { %3582 = vmatprep.subr.bf16.mxu1 %v9822_v8 }
 0x67f   :  { %3542 = vmatpush1.bf16.msra.mxu0 %v9825_v49  ;;  %v9839_v49 = vld [vmem:[#allocation3 + $0x24] ss:$16 sps:$4 sm:$0xff]  }
 0x680   :  { %3583 = vmatpush1.bf16.msra.mxu1 %v9828_v30  ;;  %3622 = vmatprep.subr.bf16.mxu0 %v9294_v0  ;;  %12887 = vst [vmem:[#allocation29_spill] sm:$0xff] %v9839_v49  ;;  %v9842_v30 = vld [vmem:[#allocation3 + $0x2c] ss:$16 sps:$4 sm:$0xff]   ;;  %v9847_v0 = vld [vmem:[#allocation3 + $0x20] ss:$16 sps:$4 sm:$0xff]  }
 0x681   :  { %3663 = vmatprep.subr.bf16.mxu1 %v9297_v28  ;;  %12888 = vst [vmem:[#allocation30_spill] sm:$0xff] %v9842_v30  ;;  %12889 = vst [vmem:[#allocation31_spill] sm:$0xff] %v9847_v0  ;;  %v9850_v28 = vld [vmem:[#allocation3 + $0x28] ss:$16 sps:$4 sm:$0xff]  }
 0x682   :  { %3544 = vmatmul.mubr.bf16.vlgmr.msra.gmra.mrb[80].mxu0 %v3510_v47  ;;  %12890 = vst [vmem:[#allocation32_spill] sm:$0xff] %v9850_v28 }
 0x683   :  { %3585 = vmatmul.mubr.bf16.vlgmr.msra.gmra.mrb[80].mxu1 %v3510_v47  ;;  %3623 = vmatpush1.bf16.msra.mxu0 %v9833_v5 }
 0x684   :  { %3664 = vmatpush1.bf16.msra.mxu1 %v9836_v61  ;;  %3624 = vmatprep.subr.bf16.mxu0 %v9839_v49  ;;  %v9856_v49 = vld [vmem:[#allocation3 + $0x4c] ss:$16 sps:$4 sm:$0xff]  }
 0x685   :  { %3665 = vmatprep.subr.bf16.mxu1 %v9842_v30  ;;  %3654 = vmatprep.mubr.bf16.mxu0 %v12727_v24  ;;  %12892 = vst [vmem:[#allocation56_spill] sm:$0xff] %v9856_v49  ;;  %v9859_v30 = vld [vmem:[#allocation3 + $0x40] ss:$16 sps:$4 sm:$0xff]  }
 0x686   :  { %3695 = vmatprep.mubr.bf16.mxu1 %v12727_v24  ;;  %12893 = vst [vmem:[#allocation33_spill] sm:$0xff] %v9859_v30  ;;  %v9862_v24 = vld [vmem:[#allocation3 + $0x48] ss:$16 sps:$4 sm:$0xff]  }
 0x687   :  { %3625 = vmatpush1.bf16.msra.mxu0 %v9847_v0  ;;  %12894 = vst [vmem:[#allocation34_spill] sm:$0xff] %v9862_v24  ;;  %v9865_v0 = vld [vmem:[#allocation3 + $0x64] ss:$16 sps:$4 sm:$0xff]  }
 0x688   :  { %3666 = vmatpush1.bf16.msra.mxu1 %v9850_v28  ;;  %3626 = vmatprep.subr.bf16.mxu0 %v9853_v9  ;;  %12895 = vst [vmem:[#allocation35_spill] sm:$0xff] %v9865_v0  ;;  %v9868_v28 = vld [vmem:[#allocation3 + $0x6c] ss:$16 sps:$4 sm:$0xff]   ;;  %v9871_v9 = vld [vmem:[#allocation3 + $0x60] ss:$16 sps:$4 sm:$0xff]  }
 0x689   :  { %3667 = vmatprep.subr.bf16.mxu1 %v9856_v49  ;;  %12896 = vst [vmem:[#allocation36_spill] sm:$0xff] %v9868_v28  ;;  %12897 = vst [vmem:[#allocation37_spill] sm:$0xff] %v9871_v9  ;;  %v9874_v49 = vld [vmem:[#allocation3 + $0x68] ss:$16 sps:$4 sm:$0xff]  }
 0x68a   :  { %12898 = vst [vmem:[#allocation38_spill] sm:$0xff] %v9874_v49 }
 0x68b   :  { %3627 = vmatpush1.bf16.msra.mxu0 %v9859_v30  ;;  %v9877_v30 = vld [vmem:[#allocation3 + $0x84] ss:$16 sps:$4 sm:$0xff]  }
 0x68c   :  { %3668 = vmatpush1.bf16.msra.mxu1 %v9862_v24  ;;  %3628 = vmatprep.subr.bf16.mxu0 %v9865_v0  ;;  %12899 = vst [vmem:[#allocation39_spill] sm:$0xff] %v9877_v30  ;;  %v9880_v24 = vld [vmem:[#allocation3 + $0x8c] ss:$16 sps:$4 sm:$0xff]   ;;  %v9883_v0 = vld [vmem:[#allocation3 + $0x80] ss:$16 sps:$4 sm:$0xff]  }
 0x68d   :  { %3669 = vmatprep.subr.bf16.mxu1 %v9868_v28  ;;  %12900 = vst [vmem:[#allocation40_spill] sm:$0xff] %v9880_v24  ;;  %v9886_v28 = vld [vmem:[#allocation3 + $0x88] ss:$16 sps:$4 sm:$0xff]  }
 0x68f   :  { %3629 = vmatpush1.bf16.msra.mxu0 %v9871_v9  ;;  %v9889_v9 = vld [vmem:[#allocation3 + $0xa4] ss:$16 sps:$4 sm:$0xff]  }
 0x690   :  { %3670 = vmatpush1.bf16.msra.mxu1 %v9874_v49  ;;  %3630 = vmatprep.subr.bf16.mxu0 %v9877_v30  ;;  %v9892_v49 = vld [vmem:[#allocation3 + $0xac] ss:$16 sps:$4 sm:$0xff]   ;;  %v9895_v30 = vld [vmem:[#allocation3 + $0xa0] ss:$16 sps:$4 sm:$0xff]  }
 0x691   :  { %3671 = vmatprep.subr.bf16.mxu1 %v9880_v24  ;;  %v9898_v24 = vld [vmem:[#allocation3 + $0xa8] ss:$16 sps:$4 sm:$0xff]  }
 0x692   :  { %12901 = vst [vmem:[#allocation41_spill] sm:$0xff] %v9898_v24 }
 0x693   :  { %3631 = vmatpush1.bf16.msra.mxu0 %v9883_v0 }
 0x694   :  { %3672 = vmatpush1.bf16.msra.mxu1 %v9886_v28  ;;  %3632 = vmatprep.subr.bf16.mxu0 %v9889_v9 }
 0x695   :  { %3673 = vmatprep.subr.bf16.mxu1 %v9892_v49 }
 0x697   :  { %3633 = vmatpush1.bf16.msra.mxu0 %v9895_v30 }
 0x698   :  { %3674 = vmatpush1.bf16.msra.mxu1 %v9898_v24  ;;  %3634 = vmatprep.subr.bf16.mxu0 %v9324_v43  ;;  %v12902_v43 = vld [vmem:[#allocation47_spill] sm:$0xff]  ;;  %v12952_v24 = vld [vmem:[#allocation120_spill] sm:$0xff] }
 0x699   :  { %3675 = vmatprep.subr.bf16.mxu1 %v9327_v17  ;;  %v12903_v17 = vld [vmem:[#allocation48_spill] sm:$0xff] }
 0x69b   :  { %3635 = vmatpush1.bf16.msra.mxu0 %v9330_v57  ;;  %v12904_v57 = vld [vmem:[#allocation49_spill] sm:$0xff] }
 0x69c   :  { %3676 = vmatpush1.bf16.msra.mxu1 %v9333_v62  ;;  %3636 = vmatprep.subr.bf16.mxu0 %v9336_v59  ;;  %v12905_v62 = vld [vmem:[#allocation50_spill] sm:$0xff]  ;;  %v12906_v59 = vld [vmem:[#allocation51_spill] sm:$0xff] }
 0x69d   :  { %3677 = vmatprep.subr.bf16.mxu1 %v9339_v22  ;;  %v12907_v22 = vld [vmem:[#allocation61_spill] sm:$0xff] }
 0x69f   :  { %3637 = vmatpush1.bf16.msra.mxu0 %v9342_v52  ;;  %v12908_v52 = vld [vmem:[#allocation62_spill] sm:$0xff] }
 0x6a0   :  { %3678 = vmatpush1.bf16.msra.mxu1 %v9345_v63  ;;  %3734 = vmatprep.subr.bf16.mxu0 %v9348_v51  ;;  %v12909_v63 = vld [vmem:[#allocation63_spill] sm:$0xff]  ;;  %v12910_v51 = vld [vmem:[#allocation64_spill] sm:$0xff] }
 0x6a1   :  { %3775 = vmatprep.subr.bf16.mxu1 %v9351_v12  ;;  %v12911_v12 = vld [vmem:[#allocation52_spill] sm:$0xff] }
 0x6a2   :  { %3655 = vmatmul.mubr.bf16.vlgmr.msra.gmra.mrb[84].mxu0 %v3510_v47 }
 0x6a3   :  { %3696 = vmatmul.mubr.bf16.vlgmr.msra.gmra.mrb[84].mxu1 %v3510_v47  ;;  %3735 = vmatpush1.bf16.msra.mxu0 %v9354_v58  ;;  %v12912_v58 = vld [vmem:[#allocation53_spill] sm:$0xff]  ;;  %v12916_v47 = vld [vmem:[#allocation84_spill] sm:$0xff] }
 0x6a4   :  { %3776 = vmatpush1.bf16.msra.mxu1 %v9357_v60  ;;  %3736 = vmatprep.subr.bf16.mxu0 %v9360_v19  ;;  %v12913_v60 = vld [vmem:[#allocation81_spill] sm:$0xff]  ;;  %v12914_v19 = vld [vmem:[#allocation82_spill] sm:$0xff] }
 0x6a5   :  { %3777 = vmatprep.subr.bf16.mxu1 %v9363_v7  ;;  %v12915_v7 = vld [vmem:[#allocation83_spill] sm:$0xff] }
 0x6a7   :  { %3737 = vmatpush1.bf16.msra.mxu0 %v12902_v43  ;;  %v12917_v43 = vld [vmem:[#allocation85_spill] sm:$0xff] }
 0x6a8   :  { %3778 = vmatpush1.bf16.msra.mxu1 %v12903_v17  ;;  %3738 = vmatprep.subr.bf16.mxu0 %v12904_v57  ;;  %v12918_v17 = vld [vmem:[#allocation86_spill] sm:$0xff]  ;;  %v12919_v57 = vld [vmem:[#allocation87_spill] sm:$0xff] }
 0x6a9   :  { %3779 = vmatprep.subr.bf16.mxu1 %v12905_v62  ;;  %v12920_v62 = vld [vmem:[#allocation88_spill] sm:$0xff] }
 0x6ab   :  { %3739 = vmatpush1.bf16.msra.mxu0 %v12906_v59  ;;  %v12921_v59 = vld [vmem:[#allocation89_spill] sm:$0xff] }
 0x6ac   :  { %3780 = vmatpush1.bf16.msra.mxu1 %v12907_v22  ;;  %3740 = vmatprep.subr.bf16.mxu0 %v12908_v52  ;;  %v12922_v22 = vld [vmem:[#allocation90_spill] sm:$0xff]  ;;  %v12923_v52 = vld [vmem:[#allocation91_spill] sm:$0xff] }
 0x6ad   :  { %3781 = vmatprep.subr.bf16.mxu1 %v12909_v63  ;;  %v12924_v63 = vld [vmem:[#allocation92_spill] sm:$0xff] }
 0x6af   :  { %3741 = vmatpush1.bf16.msra.mxu0 %v12910_v51  ;;  %v12925_v51 = vld [vmem:[#allocation93_spill] sm:$0xff] }
 0x6b0   :  { %3782 = vmatpush1.bf16.msra.mxu1 %v12911_v12  ;;  %3742 = vmatprep.subr.bf16.mxu0 %v12912_v58  ;;  %v12926_v12 = vld [vmem:[#allocation94_spill] sm:$0xff]  ;;  %v12927_v58 = vld [vmem:[#allocation95_spill] sm:$0xff] }
 0x6b1   :  { %3783 = vmatprep.subr.bf16.mxu1 %v12913_v60  ;;  %v12928_v60 = vld [vmem:[#allocation96_spill] sm:$0xff] }
 0x6b3   :  { %3743 = vmatpush1.bf16.msra.mxu0 %v12914_v19  ;;  %v12929_v19 = vld [vmem:[#allocation97_spill] sm:$0xff] }
 0x6b4   :  { %3784 = vmatpush1.bf16.msra.mxu1 %v12915_v7  ;;  %3744 = vmatprep.subr.bf16.mxu0 %v12916_v47  ;;  %v12930_v7 = vld [vmem:[#allocation98_spill] sm:$0xff]  ;;  %v12931_v47 = vld [vmem:[#allocation99_spill] sm:$0xff] }
 0x6b5   :  { %3785 = vmatprep.subr.bf16.mxu1 %v12917_v43  ;;  %v12932_v43 = vld [vmem:[#allocation100_spill] sm:$0xff] }
 0x6b7   :  { %3745 = vmatpush1.bf16.msra.mxu0 %v12918_v17  ;;  %v12933_v17 = vld [vmem:[#allocation101_spill] sm:$0xff] }
 0x6b8   :  { %3786 = vmatpush1.bf16.msra.mxu1 %v12919_v57  ;;  %3746 = vmatprep.subr.bf16.mxu0 %v12920_v62  ;;  %v12934_v57 = vld [vmem:[#allocation102_spill] sm:$0xff]  ;;  %v12935_v62 = vld [vmem:[#allocation103_spill] sm:$0xff] }
 0x6b9   :  { %3787 = vmatprep.subr.bf16.mxu1 %v12921_v59  ;;  %v12936_v59 = vld [vmem:[#allocation104_spill] sm:$0xff] }
 0x6bb   :  { %3747 = vmatpush1.bf16.msra.mxu0 %v12922_v22  ;;  %v12937_v22 = vld [vmem:[#allocation105_spill] sm:$0xff] }
 0x6bc   :  { %3788 = vmatpush1.bf16.msra.mxu1 %v12923_v52  ;;  %3748 = vmatprep.subr.bf16.mxu0 %v12924_v63  ;;  %v12938_v52 = vld [vmem:[#allocation106_spill] sm:$0xff]  ;;  %v12939_v63 = vld [vmem:[#allocation107_spill] sm:$0xff] }
 0x6bd   :  { %3789 = vmatprep.subr.bf16.mxu1 %v12925_v51  ;;  %v12940_v51 = vld [vmem:[#allocation108_spill] sm:$0xff] }
 0x6bf   :  { %3749 = vmatpush1.bf16.msra.mxu0 %v12926_v12  ;;  %v12941_v12 = vld [vmem:[#allocation109_spill] sm:$0xff] }
 0x6c0   :  { %3790 = vmatpush1.bf16.msra.mxu1 %v12927_v58  ;;  %3750 = vmatprep.subr.bf16.mxu0 %v12928_v60  ;;  %v12942_v58 = vld [vmem:[#allocation110_spill] sm:$0xff]  ;;  %v12943_v60 = vld [vmem:[#allocation111_spill] sm:$0xff] }
 0x6c1   :  { %3791 = vmatprep.subr.bf16.mxu1 %v12929_v19  ;;  %v12944_v19 = vld [vmem:[#allocation112_spill] sm:$0xff] }
 0x6c3   :  { %3751 = vmatpush1.bf16.msra.mxu0 %v12930_v7  ;;  %v12945_v7 = vld [vmem:[#allocation113_spill] sm:$0xff] }
 0x6c4   :  { %3792 = vmatpush1.bf16.msra.mxu1 %v12931_v47  ;;  %3752 = vmatprep.subr.bf16.mxu0 %v12932_v43  ;;  %v12946_v47 = vld [vmem:[#allocation114_spill] sm:$0xff]  ;;  %v12947_v43 = vld [vmem:[#allocation115_spill] sm:$0xff] }
 0x6c5   :  { %3793 = vmatprep.subr.bf16.mxu1 %v12933_v17  ;;  %v12948_v17 = vld [vmem:[#allocation116_spill] sm:$0xff] }
 0x6c7   :  { %3753 = vmatpush1.bf16.msra.mxu0 %v12934_v57 }
 0x6c8   :  { %3794 = vmatpush1.bf16.msra.mxu1 %v12935_v62  ;;  %3754 = vmatprep.subr.bf16.mxu0 %v12936_v59  ;;  %v12949_v59 = vld [vmem:[#allocation117_spill] sm:$0xff] }
 0x6c9   :  { %3795 = vmatprep.subr.bf16.mxu1 %v12937_v22 }
 0x6cb   :  { %3755 = vmatpush1.bf16.msra.mxu0 %v12938_v52 }
 0x6cc   :  { %3796 = vmatpush1.bf16.msra.mxu1 %v12939_v63  ;;  %3756 = vmatprep.subr.bf16.mxu0 %v12940_v51 }
 0x6cd   :  { %3797 = vmatprep.subr.bf16.mxu1 %v12941_v12 }
 0x6cf   :  { %3757 = vmatpush1.bf16.msra.mxu0 %v12942_v58 }
 0x6d0   :  { %3798 = vmatpush1.bf16.msra.mxu1 %v12943_v60  ;;  %3758 = vmatprep.subr.bf16.mxu0 %v12944_v19 }
 0x6d1   :  { %3799 = vmatprep.subr.bf16.mxu1 %v12945_v7 }
 0x6d3   :  { %3759 = vmatpush1.bf16.msra.mxu0 %v12946_v47  ;;  %v12950_v47 = vld [vmem:[#allocation118_spill] sm:$0xff] }
 0x6d4   :  { %3800 = vmatpush1.bf16.msra.mxu1 %v12947_v43  ;;  %3760 = vmatprep.subr.bf16.mxu0 %v12948_v17  ;;  %v12951_v43 = vld [vmem:[#allocation119_spill] sm:$0xff] }
 0x6d5   :  { %v3331_v57 = vpop.f32.mrb[72].mxu0  ;;  %v3372_v62 = vpop.f32.mrb[72].mxu1  ;;  %3801 = vmatprep.subr.bf16.mxu1 %v12949_v59  ;;  %v12954_v59 = vld [vmem:[#allocation122_spill] sm:$0xff] }
 0x6d6   :  { %v3332_v22 = vadd.f32 %v3331_v57, %v8979_v25  ;;  %v3333_v52 = vpop.f32.mrb[73].mxu0  ;;  %v3374_v63 = vpop.f32.mrb[73].mxu1  ;;  %v12953_v57 = vld [vmem:[#allocation121_spill] sm:$0xff] }
 0x6d7   :  { %v3334_v51 = vadd.f32 %v3333_v52, %v8982_v46  ;;  %v3335_v12 = vpop.f32.mrb[74].mxu0  ;;  %v3376_v58 = vpop.f32.mrb[74].mxu1  ;;  %3761 = vmatpush1.bf16.msra.mxu0 %v9512_v44  ;;  %v12955_v52 = vld [vmem:[#allocation123_spill] sm:$0xff]  ;;  %v12957_v44 = vld [vmem:[#allocation142_spill] sm:$0xff] }
 0x6d8   :  { %v5649_v60 = vmul.f32 -1.442695, %v3332_v22  ;;  %v3336_v19 = vpop.f32.mrb[75].mxu0  ;;  %v3377_v7 = vpop.f32.mrb[75].mxu1  ;;  %3802 = vmatpush1.bf16.msra.mxu1 %v12950_v47  ;;  %3762 = vmatprep.subr.bf16.mxu0 %v12951_v43  ;;  %v12956_v12 = vld [vmem:[#allocation124_spill] sm:$0xff]  ;;  %v3373_v22 = vadd.f32 %v3372_v62, %v12957_v44  ;;  %v12958_v58 = vld [vmem:[#allocation125_spill] sm:$0xff] }
 0x6d9   :  { %v5650_v17 = vmul.f32 -1.442695, %v3334_v51  ;;  %3803 = vmatprep.subr.bf16.mxu1 %v12952_v24  ;;  %v12959_v19 = vld [vmem:[#allocation126_spill] sm:$0xff]  ;;  %v9976_v7 = vld [vmem:[#allocation7 + $0x4] ss:$16 sps:$4 sm:$0xff]   ;;  %v3375_v24 = vadd.f32 %v3374_v63, %v9001_v13 }
 0x6da   :  { %6325 = vpow2.f32 %v5649_v60  ;;  %12960 = vst [vmem:[#allocation65_spill] sm:$0xff] %v9976_v7  ;;  %v9980_v51 = vld [vmem:[#allocation7 + $0xc] ss:$16 sps:$4 sm:$0xff]   ;;  %v5651_v60 = vmul.f32 -1.442695, %v3373_v22  ;;  %v12962_v63 = vld [vmem:[#allocation127_spill] sm:$0xff] }
 0x6db   :  { %3763 = vmatpush1.bf16.msra.mxu0 %v12953_v57  ;;  %6327 = vpow2.f32 %v5650_v17  ;;  %12961 = vst [vmem:[#allocation66_spill] sm:$0xff] %v9980_v51 }
 0x6dc   :  { %3804 = vmatpush1.bf16.msra.mxu1 %v12954_v59  ;;  %3764 = vmatprep.subr.bf16.mxu0 %v12955_v52  ;;  %6329 = vtanh.f32 %v3375_v24 }
 0x6dd   :  { %3805 = vmatprep.subr.bf16.mxu1 %v12956_v12  ;;  %6331 = vpow2.f32 %v5651_v60 }
 0x6df   :  { %3765 = vmatpush1.bf16.msra.mxu0 %v12958_v58 }
 0x6e0   :  { %3806 = vmatpush1.bf16.msra.mxu1 %v12959_v19  ;;  %3841 = vmatprep.subr.bf16.mxu0 %v9976_v7 }
 0x6e1   :  { %3882 = vmatprep.subr.bf16.mxu1 %v9980_v51 }
 0x6e4   :  { %v6326_v47 = vpop.eup %6325 }
 0x6e5   :  { %v3388_v43 = vadd.f32 1.0, %v6326_v47  ;;  %v6328_v17 = vpop.eup %6327 }
 0x6e6   :  { %v3389_v62 = vadd.f32 1.0, %v6328_v17  ;;  %v6330_v57 = vpop.eup %6329 }
 0x6e7   :  { %6333 = vrcp.f32 %v3388_v43  ;;  %v6332_v59 = vpop.eup %6331 }
 0x6e8   :  { %6335 = vrcp.f32 %v3389_v62  ;;  %v3390_v19 = vadd.f32 1.0, %v6332_v59 }
 0x6ea   :  { %6337 = vrcp.f32 %v3390_v19 }
 0x6f1   :  { %v6334_v52 = vpop.eup %6333 }
 0x6f2   :  { %v3399_v12 = vmul.f32 %v6334_v52, %v6330_v57  ;;  %v6336_v58 = vpop.eup %6335 }
 0x6f3   :  { %v3398_v13 = vmul.f32 %v6336_v58, %v12962_v63 }
 0x6f4   :  { %v6338_v22 = vpop.eup %6337 }
 0x6f5   :  { %v9984_v7 = vadd.f32 %v3399_v12, %v3398_v13 }
 0x6f7   :  { %12963 = vst [vmem:[#allocation67_spill] sm:$0xff] %v9984_v7  ;;  %6339 = vtanh.f32 %v9984_v7 }
 0x701   :  { %v6340_v24 = vpop.eup %6339 }
 0x702   :  { %v3402_v47 = vmul.f32 %v6340_v24, %v6338_v22 }
 0x704   :  { %v3733_v60 = vpack.c.bf16 %v3402_v47, %v3402_v47 }
 0x706   :  { %3766 = vmatprep.mubr.bf16.mxu0 %v3733_v60  ;;  %3807 = vmatprep.mubr.bf16.mxu1 %v3733_v60 }
 0x715   :  { %v3438_v43 = vpop.f32.mrb[76].mxu0  ;;  %v3479_v17 = vpop.f32.mrb[76].mxu1 }
 0x716   :  { %v3439_v62 = vadd.f32 %v3438_v43, %v12619_v29  ;;  %v3440_v57 = vpop.f32.mrb[77].mxu0  ;;  %v3481_v52 = vpop.f32.mrb[77].mxu1  ;;  %v3480_v22 = vadd.f32 %v3479_v17, %v12621_v3 }
 0x717   :  { %v3441_v59 = vadd.f32 %v3440_v57, %v12620_v37  ;;  %v3442_v58 = vpop.f32.mrb[78].mxu0  ;;  %v3483_v13 = vpop.f32.mrb[78].mxu1  ;;  %v3482_v24 = vadd.f32 %v3481_v52, %v12622_v6 }
 0x718   :  { %v5652_v12 = vmul.f32 -1.442695, %v3439_v62  ;;  %v3443_v19 = vpop.f32.mrb[79].mxu0  ;;  %v3484_v63 = vpop.f32.mrb[79].mxu1  ;;  %v5654_v47 = vmul.f32 -1.442695, %v3480_v22 }
 0x719   :  { %v5653_v7 = vmul.f32 -1.442695, %v3441_v59 }
 0x71a   :  { %6341 = vpow2.f32 %v5652_v12 }
 0x71b   :  { %6343 = vpow2.f32 %v5653_v7 }
 0x71c   :  { %6345 = vtanh.f32 %v3482_v24 }
 0x71d   :  { %6347 = vpow2.f32 %v5654_v47  ;;  %v9998_v47 = vld [vmem:[#allocation7 + $0x8] ss:$16 sps:$4 sm:$0xff]  }
 0x724   :  { %v6342_v60 = vpop.eup %6341 }
 0x725   :  { %v3495_v51 = vadd.f32 1.0, %v6342_v60  ;;  %v6344_v43 = vpop.eup %6343  ;;  %v10004_v60 = vld [vmem:[#allocation7 + $0x2c] ss:$16 sps:$4 sm:$0xff]  }
 0x726   :  { %v3496_v57 = vadd.f32 1.0, %v6344_v43  ;;  %v6346_v58 = vpop.eup %6345  ;;  %12964 = vst [vmem:[#allocation68_spill] sm:$0xff] %v10004_v60  ;;  %v10007_v43 = vld [vmem:[#allocation7 + $0x20] ss:$16 sps:$4 sm:$0xff]  }
 0x727   :  { %6349 = vrcp.f32 %v3495_v51  ;;  %v6348_v62 = vpop.eup %6347  ;;  %v9995_v51 = vld [vmem:[#allocation7] ss:$16 sps:$4 sm:$0xff]   ;;  %12965 = vst [vmem:[#allocation42_spill] sm:$0xff] %v10007_v43 }
 0x728   :  { %6351 = vrcp.f32 %v3496_v57  ;;  %v3497_v12 = vadd.f32 1.0, %v6348_v62  ;;  %v10010_v57 = vld [vmem:[#allocation7 + $0x28] ss:$16 sps:$4 sm:$0xff]   ;;  %v10016_v62 = vld [vmem:[#allocation7 + $0x4c] ss:$16 sps:$4 sm:$0xff]  }
 0x729   :  { %12966 = vst [vmem:[#allocation43_spill] sm:$0xff] %v10010_v57  ;;  %12968 = vst [vmem:[#allocation44_spill] sm:$0xff] %v10016_v62 }
 0x72a   :  { %6353 = vrcp.f32 %v3497_v12  ;;  %v10028_v12 = vld [vmem:[#allocation7 + $0x6c] ss:$16 sps:$4 sm:$0xff]  }
 0x72b   :  { %12972 = vst [vmem:[#allocation48_spill] sm:$0xff] %v10028_v12 }
 0x731   :  { %v6350_v13 = vpop.eup %6349 }
 0x732   :  { %v3506_v19 = vmul.f32 %v6350_v13, %v6346_v58  ;;  %v6352_v59 = vpop.eup %6351  ;;  %v10013_v58 = vld [vmem:[#allocation7 + $0x44] ss:$16 sps:$4 sm:$0xff]   ;;  %v10019_v13 = vld [vmem:[#allocation7 + $0x40] ss:$16 sps:$4 sm:$0xff]  }
 0x733   :  { %v3505_v7 = vmul.f32 %v6352_v59, %v9555_v21  ;;  %v10001_v21 = vld [vmem:[#allocation7 + $0x24] ss:$16 sps:$4 sm:$0xff]   ;;  %12967 = vst [vmem:[#allocation54_spill] sm:$0xff] %v10013_v58  ;;  %12969 = vst [vmem:[#allocation45_spill] sm:$0xff] %v10019_v13 }
 0x734   :  { %v6354_v52 = vpop.eup %6353  ;;  %v10025_v59 = vld [vmem:[#allocation7 + $0x64] ss:$16 sps:$4 sm:$0xff]  }
 0x735   :  { %v9992_v17 = vadd.f32 %v3506_v19, %v3505_v7  ;;  %v10022_v19 = vld [vmem:[#allocation7 + $0x48] ss:$16 sps:$4 sm:$0xff]   ;;  %12971 = vst [vmem:[#allocation47_spill] sm:$0xff] %v10025_v59  ;;  %v10031_v7 = vld [vmem:[#allocation7 + $0x60] ss:$16 sps:$4 sm:$0xff]  }
 0x736   :  { %12970 = vst [vmem:[#allocation46_spill] sm:$0xff] %v10022_v19  ;;  %12973 = vst [vmem:[#allocation49_spill] sm:$0xff] %v10031_v7 }
 0x737   :  { %6355 = vtanh.f32 %v9992_v17 }
 0x741   :  { %v6356_v63 = vpop.eup %6355 }
 0x742   :  { %v3509_v22 = vmul.f32 %v6356_v63, %v6354_v52  ;;  %v10034_v52 = vld [vmem:[#allocation7 + $0x68] ss:$16 sps:$4 sm:$0xff]  }
 0x743   :  { %12974 = vst [vmem:[#allocation50_spill] sm:$0xff] %v10034_v52 }
 0x744   :  { %v3732_v24 = vpack.c.bf16 %v3509_v22, %v3509_v22  ;;  %v10037_v22 = vld [vmem:[#allocation7 + $0x84] ss:$16 sps:$4 sm:$0xff]  }
 0x745   :  { %12975 = vst [vmem:[#allocation51_spill] sm:$0xff] %v10037_v22 }
 0x746   :  { %3767 = vmatmul.mubr.bf16.vlgmr.msra.gmra.mrb[88].mxu0 %v3732_v24  ;;  %3808 = vmatmul.mubr.bf16.vlgmr.msra.gmra.mrb[88].mxu1 %v3732_v24 }
 0x747   :  { %3842 = vmatpush1.bf16.msra.mxu0 %v9995_v51  ;;  %3883 = vmatpush1.bf16.msra.mxu1 %v9998_v47 }
 0x748   :  { %3873 = vmatprep.mubr.bf16.mxu0 %v3732_v24  ;;  %3914 = vmatprep.mubr.bf16.mxu1 %v3732_v24  ;;  %v10040_v24 = vld [vmem:[#allocation7 + $0x8c] ss:$16 sps:$4 sm:$0xff]  }
 0x749   :  { %3843 = vmatprep.subr.bf16.mxu0 %v10001_v21  ;;  %3884 = vmatprep.subr.bf16.mxu1 %v10004_v60  ;;  %12976 = vst [vmem:[#allocation61_spill] sm:$0xff] %v10040_v24 }
 0x74b   :  { %3844 = vmatpush1.bf16.msra.mxu0 %v10007_v43  ;;  %3885 = vmatpush1.bf16.msra.mxu1 %v10010_v57  ;;  %v10045_v57 = vld [vmem:[#allocation7 + $0x80] ss:$16 sps:$4 sm:$0xff]  }
 0x74c   :  { %3845 = vmatprep.subr.bf16.mxu0 %v10013_v58  ;;  %3886 = vmatprep.subr.bf16.mxu1 %v10016_v62  ;;  %12977 = vst [vmem:[#allocation62_spill] sm:$0xff] %v10045_v57 }
 0x74f   :  { %3846 = vmatpush1.bf16.msra.mxu0 %v10019_v13  ;;  %3887 = vmatpush1.bf16.msra.mxu1 %v10022_v19 }
 0x750   :  { %3847 = vmatprep.subr.bf16.mxu0 %v10025_v59  ;;  %3888 = vmatprep.subr.bf16.mxu1 %v10028_v12 }
 0x753   :  { %3848 = vmatpush1.bf16.msra.mxu0 %v10031_v7  ;;  %3889 = vmatpush1.bf16.msra.mxu1 %v10034_v52  ;;  %v10048_v52 = vld [vmem:[#allocation7 + $0x88] ss:$16 sps:$4 sm:$0xff]  }
 0x754   :  { %3849 = vmatprep.subr.bf16.mxu0 %v10037_v22  ;;  %3890 = vmatprep.subr.bf16.mxu1 %v10040_v24  ;;  %12978 = vst [vmem:[#allocation63_spill] sm:$0xff] %v10048_v52 }
 0x755   :  { %v3545_v63 = vpop.f32.mrb[80].mxu0 }
 0x756   :  { %v3546_v59 = vadd.f32 %v3545_v63, %v12803_v18  ;;  %v3586_v12 = vpop.f32.mrb[80].mxu1  ;;  %v3547_v19 = vpop.f32.mrb[81].mxu0  ;;  %v10051_v63 = vld [vmem:[#allocation7 + $0xa4] ss:$16 sps:$4 sm:$0xff]  }
 0x757   :  { %v3548_v13 = vadd.f32 %v3547_v19, %v12804_v23  ;;  %v3588_v7 = vpop.f32.mrb[81].mxu1  ;;  %v3549_v62 = vpop.f32.mrb[82].mxu0  ;;  %3850 = vmatpush1.bf16.msra.mxu0 %v10045_v57  ;;  %3891 = vmatpush1.bf16.msra.mxu1 %v10048_v52  ;;  %12979 = vst [vmem:[#allocation64_spill] sm:$0xff] %v10051_v63  ;;  %v10054_v19 = vld [vmem:[#allocation7 + $0xac] ss:$16 sps:$4 sm:$0xff]  }
 0x758   :  { %v5655_v58 = vmul.f32 -1.442695, %v3546_v59  ;;  %v3590_v22 = vpop.f32.mrb[82].mxu1  ;;  %v3550_v43 = vpop.f32.mrb[83].mxu0  ;;  %3851 = vmatprep.subr.bf16.mxu0 %v10051_v63  ;;  %12980 = vst [vmem:[#allocation52_spill] sm:$0xff] %v10054_v19  ;;  %3892 = vmatprep.subr.bf16.mxu1 %v10054_v19  ;;  %v13012_v23 = vld [vmem:[#allocation72_spill] sm:$0xff] }
 0x759   :  { %v5656_v24 = vmul.f32 -1.442695, %v3548_v13  ;;  %v3591_v60 = vpop.f32.mrb[83].mxu1  ;;  %v10057_v62 = vld [vmem:[#allocation7 + $0xa0] ss:$16 sps:$4 sm:$0xff]  }
 0x75a   :  { %6357 = vpow2.f32 %v5655_v58  ;;  %12981 = vst [vmem:[#allocation53_spill] sm:$0xff] %v10057_v62  ;;  %v10060_v59 = vld [vmem:[#allocation7 + $0xa8] ss:$16 sps:$4 sm:$0xff]   ;;  %v3587_v60 = vadd.f32 %v3586_v12, %v12813_v15  ;;  %v10064_v43 = vld [vmem:[#allocation7 + $0xc4] ss:$16 sps:$4 sm:$0xff]   ;;  %v3589_v15 = vadd.f32 %v3588_v7, %v12816_v31 }
 0x75b   :  { %6359 = vpow2.f32 %v5656_v24  ;;  %3852 = vmatpush1.bf16.msra.mxu0 %v10057_v62  ;;  %12982 = vst [vmem:[#allocation81_spill] sm:$0xff] %v10060_v59  ;;  %3893 = vmatpush1.bf16.msra.mxu1 %v10060_v59  ;;  %12983 = vst [vmem:[#allocation82_spill] sm:$0xff] %v10064_v43  ;;  %v10067_v13 = vld [vmem:[#allocation7 + $0xcc] ss:$16 sps:$4 sm:$0xff]   ;;  %v10070_v58 = vld [vmem:[#allocation7 + $0xc0] ss:$16 sps:$4 sm:$0xff]  }
 0x75c   :  { %3853 = vmatprep.subr.bf16.mxu0 %v10064_v43  ;;  %12984 = vst [vmem:[#allocation83_spill] sm:$0xff] %v10067_v13  ;;  %3894 = vmatprep.subr.bf16.mxu1 %v10067_v13  ;;  %12985 = vst [vmem:[#allocation84_spill] sm:$0xff] %v10070_v58  ;;  %v10073_v22 = vld [vmem:[#allocation7 + $0xc8] ss:$16 sps:$4 sm:$0xff]   ;;  %v5657_v24 = vmul.f32 -1.442695, %v3587_v60 }
 0x75d   :  { %12986 = vst [vmem:[#allocation85_spill] sm:$0xff] %v10073_v22  ;;  %v10076_v59 = vld [vmem:[#allocation7 + $0xe4] ss:$16 sps:$4 sm:$0xff]   ;;  %v10079_v12 = vld [vmem:[#allocation7 + $0xec] ss:$16 sps:$4 sm:$0xff]  }
 0x75e   :  { %12987 = vst [vmem:[#allocation86_spill] sm:$0xff] %v10076_v59  ;;  %12988 = vst [vmem:[#allocation87_spill] sm:$0xff] %v10079_v12  ;;  %v10083_v43 = vld [vmem:[#allocation7 + $0xe0] ss:$16 sps:$4 sm:$0xff]   ;;  %6361 = vpow2.f32 %v5657_v24  ;;  %v10104_v24 = vld [vmem:[#allocation7 + $0x12c] ss:$16 sps:$4 sm:$0xff]  }
 0x75f   :  { %3854 = vmatpush1.bf16.msra.mxu0 %v10070_v58  ;;  %3895 = vmatpush1.bf16.msra.mxu1 %v10073_v22  ;;  %12989 = vst [vmem:[#allocation88_spill] sm:$0xff] %v10083_v43  ;;  %v10086_v58 = vld [vmem:[#allocation7 + $0xe8] ss:$16 sps:$4 sm:$0xff]   ;;  %v10089_v22 = vld [vmem:[#allocation7 + $0x104] ss:$16 sps:$4 sm:$0xff]   ;;  %6363 = vtanh.f32 %v3589_v15  ;;  %12996 = vst [vmem:[#allocation95_spill] sm:$0xff] %v10104_v24 }
 0x760   :  { %3855 = vmatprep.subr.bf16.mxu0 %v10076_v59  ;;  %3896 = vmatprep.subr.bf16.mxu1 %v10079_v12  ;;  %12990 = vst [vmem:[#allocation89_spill] sm:$0xff] %v10086_v58  ;;  %12991 = vst [vmem:[#allocation90_spill] sm:$0xff] %v10089_v22  ;;  %v10092_v59 = vld [vmem:[#allocation7 + $0x10c] ss:$16 sps:$4 sm:$0xff]   ;;  %v10095_v31 = vld [vmem:[#allocation7 + $0x100] ss:$16 sps:$4 sm:$0xff]  }
 0x761   :  { %12992 = vst [vmem:[#allocation91_spill] sm:$0xff] %v10092_v59  ;;  %12993 = vst [vmem:[#allocation92_spill] sm:$0xff] %v10095_v31  ;;  %v10107_v15 = vld [vmem:[#allocation7 + $0x120] ss:$16 sps:$4 sm:$0xff]   ;;  %v10138_v19 = vld [vmem:[#allocation7 + $0x184] ss:$16 sps:$4 sm:$0xff]  }
 0x762   :  { %12997 = vst [vmem:[#allocation96_spill] sm:$0xff] %v10107_v15  ;;  %v10132_v62 = vld [vmem:[#allocation7 + $0x160] ss:$16 sps:$4 sm:$0xff]   ;;  %13007 = vst [vmem:[#allocation106_spill] sm:$0xff] %v10138_v19 }
 0x763   :  { %3856 = vmatpush1.bf16.msra.mxu0 %v10083_v43  ;;  %3897 = vmatpush1.bf16.msra.mxu1 %v10086_v58  ;;  %v10098_v43 = vld [vmem:[#allocation7 + $0x108] ss:$16 sps:$4 sm:$0xff]   ;;  %13005 = vst [vmem:[#allocation104_spill] sm:$0xff] %v10132_v62 }
 0x764   :  { %v6358_v13 = vpop.eup %6357  ;;  %3857 = vmatprep.subr.bf16.mxu0 %v10089_v22  ;;  %3898 = vmatprep.subr.bf16.mxu1 %v10092_v59  ;;  %12994 = vst [vmem:[#allocation93_spill] sm:$0xff] %v10098_v43 }
 0x765   :  { %v3602_v60 = vadd.f32 1.0, %v6358_v13  ;;  %v6360_v7 = vpop.eup %6359  ;;  %v10101_v13 = vld [vmem:[#allocation7 + $0x124] ss:$16 sps:$4 sm:$0xff]  }
 0x766   :  { %v3603_v12 = vadd.f32 1.0, %v6360_v7  ;;  %12995 = vst [vmem:[#allocation94_spill] sm:$0xff] %v10101_v13  ;;  %v10113_v7 = vld [vmem:[#allocation7 + $0x144] ss:$16 sps:$4 sm:$0xff]  }
 0x767   :  { %6365 = vrcp.f32 %v3602_v60  ;;  %3858 = vmatpush1.bf16.msra.mxu0 %v10095_v31  ;;  %3899 = vmatpush1.bf16.msra.mxu1 %v10098_v43  ;;  %v10110_v60 = vld [vmem:[#allocation7 + $0x128] ss:$16 sps:$4 sm:$0xff]   ;;  %12999 = vst [vmem:[#allocation98_spill] sm:$0xff] %v10113_v7  ;;  %v10119_v31 = vld [vmem:[#allocation7 + $0x140] ss:$16 sps:$4 sm:$0xff]  }
 0x768   :  { %6367 = vrcp.f32 %v3603_v12  ;;  %3859 = vmatprep.subr.bf16.mxu0 %v10101_v13  ;;  %3900 = vmatprep.subr.bf16.mxu1 %v10104_v24  ;;  %12998 = vst [vmem:[#allocation97_spill] sm:$0xff] %v10110_v60  ;;  %v10116_v12 = vld [vmem:[#allocation7 + $0x14c] ss:$16 sps:$4 sm:$0xff]   ;;  %v6362_v13 = vpop.eup %6361  ;;  %13001 = vst [vmem:[#allocation100_spill] sm:$0xff] %v10119_v31  ;;  %v10122_v24 = vld [vmem:[#allocation7 + $0x148] ss:$16 sps:$4 sm:$0xff]  }
 0x769   :  { %13000 = vst [vmem:[#allocation99_spill] sm:$0xff] %v10116_v12  ;;  %v6364_v43 = vpop.eup %6363  ;;  %13002 = vst [vmem:[#allocation101_spill] sm:$0xff] %v10122_v24  ;;  %v3604_v22 = vadd.f32 1.0, %v6362_v13 }
 0x76b   :  { %3860 = vmatpush1.bf16.msra.mxu0 %v10107_v15  ;;  %3901 = vmatpush1.bf16.msra.mxu1 %v10110_v60  ;;  %v10125_v60 = vld [vmem:[#allocation7 + $0x164] ss:$16 sps:$4 sm:$0xff]   ;;  %6369 = vrcp.f32 %v3604_v22 }
 0x76c   :  { %3861 = vmatprep.subr.bf16.mxu0 %v10113_v7  ;;  %3902 = vmatprep.subr.bf16.mxu1 %v10116_v12  ;;  %13003 = vst [vmem:[#allocation102_spill] sm:$0xff] %v10125_v60  ;;  %v10128_v7 = vld [vmem:[#allocation7 + $0x16c] ss:$16 sps:$4 sm:$0xff]  }
 0x76d   :  { %13004 = vst [vmem:[#allocation103_spill] sm:$0xff] %v10128_v7 }
 0x76f   :  { %3862 = vmatpush1.bf16.msra.mxu0 %v10119_v31  ;;  %3903 = vmatpush1.bf16.msra.mxu1 %v10122_v24  ;;  %v10135_v31 = vld [vmem:[#allocation7 + $0x168] ss:$16 sps:$4 sm:$0xff]  }
 0x770   :  { %3863 = vmatprep.subr.bf16.mxu0 %v10125_v60  ;;  %3904 = vmatprep.subr.bf16.mxu1 %v10128_v7  ;;  %13006 = vst [vmem:[#allocation105_spill] sm:$0xff] %v10135_v31  ;;  %v10141_v60 = vld [vmem:[#allocation7 + $0x18c] ss:$16 sps:$4 sm:$0xff]  }
 0x771   :  { %v6366_v15 = vpop.eup %6365  ;;  %13008 = vst [vmem:[#allocation107_spill] sm:$0xff] %v10141_v60 }
 0x772   :  { %v3613_v12 = vmul.f32 %v6366_v15, %v6364_v43  ;;  %v6368_v59 = vpop.eup %6367 }
 0x773   :  { %v3612_v58 = vmul.f32 %v6368_v59, %v9611_v55  ;;  %3864 = vmatpush1.bf16.msra.mxu0 %v10132_v62  ;;  %3905 = vmatpush1.bf16.msra.mxu1 %v10135_v31  ;;  %v13009_v55 = vld [vmem:[#allocation69_spill] sm:$0xff]  ;;  %v13010_v62 = vld [vmem:[#allocation70_spill] sm:$0xff]  ;;  %v13011_v31 = vld [vmem:[#allocation71_spill] sm:$0xff] }
 0x774   :  { %3865 = vmatprep.subr.bf16.mxu0 %v10138_v19  ;;  %3906 = vmatprep.subr.bf16.mxu1 %v10141_v60  ;;  %v10153_v60 = vld [vmem:[#allocation7 + $0x180] ss:$16 sps:$4 sm:$0xff]  }
 0x775   :  { %v3656_v24 = vpop.f32.mrb[84].mxu0  ;;  %v10144_v43 = vadd.f32 %v3613_v12, %v3612_v58  ;;  %v10156_v58 = vld [vmem:[#allocation7 + $0x188] ss:$16 sps:$4 sm:$0xff]  }
 0x776   :  { %v3704_v59 = vadd.f32 %v3656_v24, %v13009_v55  ;;  %v3697_v13 = vpop.f32.mrb[84].mxu1  ;;  %v3658_v15 = vpop.f32.mrb[85].mxu0  ;;  %v10174_v55 = vld [vmem:[#allocation7 + $0x1cc] ss:$16 sps:$4 sm:$0xff]  }
 0x777   :  { %v10148_v7 = vadd.f32 %v3697_v13, %v13010_v62  ;;  %v3705_v63 = vadd.f32 %v3658_v15, %v13011_v31  ;;  %v3699_v52 = vpop.f32.mrb[85].mxu1  ;;  %v3660_v57 = vpop.f32.mrb[86].mxu0  ;;  %6371 = vtanh.f32 %v10144_v43  ;;  %3866 = vmatpush1.bf16.msra.mxu0 %v10153_v60  ;;  %3907 = vmatpush1.bf16.msra.mxu1 %v10156_v58  ;;  %v10159_v31 = vld [vmem:[#allocation7 + $0x1a4] ss:$16 sps:$4 sm:$0xff]   ;;  %13014 = vst [vmem:[#allocation109_spill] sm:$0xff] %v10174_v55 }
 0x778   :  { %v5658_v19 = vmul.f32 -1.442695, %v3704_v59  ;;  %v3707_v18 = vadd.f32 %v3699_v52, %v13012_v23  ;;  %v3701_v22 = vpop.f32.mrb[86].mxu1  ;;  %v3661_v62 = vpop.f32.mrb[87].mxu0  ;;  %3867 = vmatprep.subr.bf16.mxu0 %v10159_v31  ;;  %v10162_v57 = vld [vmem:[#allocation7 + $0x1ac] ss:$16 sps:$4 sm:$0xff]  }
 0x779   :  { %v5659_v24 = vmul.f32 -1.442695, %v3705_v63  ;;  %v3702_v12 = vpop.f32.mrb[87].mxu1  ;;  %3908 = vmatprep.subr.bf16.mxu1 %v10162_v57  ;;  %v10165_v23 = vld [vmem:[#allocation7 + $0x1a0] ss:$16 sps:$4 sm:$0xff]   ;;  %v6370_v13 = vpop.eup %6369 }
 0x77a   :  { %6373 = vpow2.f32 %v5658_v19  ;;  %v10168_v52 = vld [vmem:[#allocation7 + $0x1a8] ss:$16 sps:$4 sm:$0xff]   ;;  %v10171_v63 = vld [vmem:[#allocation7 + $0x1c4] ss:$16 sps:$4 sm:$0xff]   ;;  %v10177_v59 = vld [vmem:[#allocation7 + $0x1c0] ss:$16 sps:$4 sm:$0xff]  }
 0x77b   :  { %6375 = vpow2.f32 %v5659_v24  ;;  %3868 = vmatpush1.bf16.msra.mxu0 %v10165_v23  ;;  %3909 = vmatpush1.bf16.msra.mxu1 %v10168_v52  ;;  %13013 = vst [vmem:[#allocation108_spill] sm:$0xff] %v10171_v63  ;;  %13015 = vst [vmem:[#allocation110_spill] sm:$0xff] %v10177_v59  ;;  %v10180_v19 = vld [vmem:[#allocation7 + $0x1c8] ss:$16 sps:$4 sm:$0xff]   ;;  %v10183_v15 = vld [vmem:[#allocation7 + $0x1e4] ss:$16 sps:$4 sm:$0xff]  }
 0x77c   :  { %3869 = vmatprep.subr.bf16.mxu0 %v10171_v63  ;;  %3910 = vmatprep.subr.bf16.mxu1 %v10174_v55  ;;  %13016 = vst [vmem:[#allocation111_spill] sm:$0xff] %v10180_v19  ;;  %13017 = vst [vmem:[#allocation112_spill] sm:$0xff] %v10183_v15  ;;  %v10186_v22 = vld [vmem:[#allocation7 + $0x1ec] ss:$16 sps:$4 sm:$0xff]   ;;  %v10189_v55 = vld [vmem:[#allocation7 + $0x1e0] ss:$16 sps:$4 sm:$0xff]   ;;  %6377 = vtanh.f32 %v3707_v18 }
 0x77d   :  { %13018 = vst [vmem:[#allocation113_spill] sm:$0xff] %v10186_v22 }
 0x77f   :  { %3870 = vmatpush1.bf16.msra.mxu0 %v10177_v59  ;;  %3911 = vmatpush1.bf16.msra.mxu1 %v10180_v19  ;;  %v10192_v59 = vld [vmem:[#allocation7 + $0x1e8] ss:$16 sps:$4 sm:$0xff]  }
 0x780   :  { %3871 = vmatprep.subr.bf16.mxu0 %v10183_v15  ;;  %3912 = vmatprep.subr.bf16.mxu1 %v10186_v22 }
 0x781   :  { %v6372_v62 = vpop.eup %6371 }
 0x782   :  { %v3616_v24 = vmul.f32 %v6372_v62, %v6370_v13  ;;  %v13039_v13 = vld [vmem:[#allocation148_spill] sm:$0xff] }
 0x783   :  { %3872 = vmatpush1.bf16.msra.mxu0 %v10189_v55  ;;  %3913 = vmatpush1.bf16.msra.mxu1 %v10192_v59 }
 0x784   :  { %v6374_v12 = vpop.eup %6373  ;;  %3948 = vmatprep.subr.bf16.mxu0 %v9634_v2  ;;  %3989 = vmatprep.subr.bf16.mxu1 %v9637_v56  ;;  %v3840_v15 = vpack.c.bf16 %v3616_v24, %v3616_v24  ;;  %v13042_v24 = vld [vmem:[#allocation14_spill] sm:$0xff] }
 0x785   :  { %v3717_v19 = vadd.f32 1.0, %v6374_v12  ;;  %v6376_v63 = vpop.eup %6375  ;;  %v13043_v12 = vld [vmem:[#allocation15_spill] sm:$0xff] }
 0x786   :  { %v3718_v22 = vadd.f32 1.0, %v6376_v63  ;;  %3874 = vmatmul.mubr.bf16.vlgmr.msra.gmra.mrb[92].mxu0 %v3840_v15  ;;  %3915 = vmatmul.mubr.bf16.vlgmr.msra.gmra.mrb[92].mxu1 %v3840_v15  ;;  %v6378_v18 = vpop.eup %6377 }
 0x787   :  { %6379 = vrcp.f32 %v3717_v19  ;;  %3949 = vmatpush1.bf16.msra.mxu0 %v9640_v36  ;;  %3990 = vmatpush1.bf16.msra.mxu1 %v9643_v27  ;;  %v13038_v19 = vld [vmem:[#allocation147_spill] sm:$0xff] }
 0x788   :  { %6381 = vrcp.f32 %v3718_v22  ;;  %3980 = vmatprep.mubr.bf16.mxu0 %v3840_v15  ;;  %4021 = vmatprep.mubr.bf16.mxu1 %v3840_v15  ;;  %v13040_v15 = vld [vmem:[#allocation149_spill] sm:$0xff] }
 0x789   :  { %3950 = vmatprep.subr.bf16.mxu0 %v9646_v26  ;;  %3991 = vmatprep.subr.bf16.mxu1 %v9649_v45  ;;  %v13019_v45 = vld [vmem:[#allocation128_spill] sm:$0xff]  ;;  %v13041_v22 = vld [vmem:[#allocation13_spill] sm:$0xff] }
 0x78b   :  { %3951 = vmatpush1.bf16.msra.mxu0 %v9652_v33  ;;  %3992 = vmatpush1.bf16.msra.mxu1 %v9655_v48  ;;  %v13020_v33 = vld [vmem:[#allocation129_spill] sm:$0xff]  ;;  %v13021_v48 = vld [vmem:[#allocation130_spill] sm:$0xff] }
 0x78c   :  { %3952 = vmatprep.subr.bf16.mxu0 %v9658_v34  ;;  %3993 = vmatprep.subr.bf16.mxu1 %v9661_v16  ;;  %v13022_v34 = vld [vmem:[#allocation131_spill] sm:$0xff]  ;;  %v13023_v16 = vld [vmem:[#allocation132_spill] sm:$0xff] }
 0x78f   :  { %3953 = vmatpush1.bf16.msra.mxu0 %v9664_v35  ;;  %3994 = vmatpush1.bf16.msra.mxu1 %v9667_v32  ;;  %v5660_v35 = vmul.f32 -1.442695, %v10148_v7  ;;  %v13024_v32 = vld [vmem:[#allocation133_spill] sm:$0xff]  ;;  %v13037_v7 = vld [vmem:[#allocation146_spill] sm:$0xff] }
 0x790   :  { %3954 = vmatprep.subr.bf16.mxu0 %v9670_v1  ;;  %3995 = vmatprep.subr.bf16.mxu1 %v9673_v4  ;;  %v13025_v1 = vld [vmem:[#allocation134_spill] sm:$0xff]  ;;  %v13026_v4 = vld [vmem:[#allocation135_spill] sm:$0xff] }
 0x791   :  { %v6380_v2 = vpop.eup %6379  ;;  %6383 = vpow2.f32 %v5660_v35 }
 0x792   :  { %v3728_v56 = vmul.f32 %v6380_v2, %v6378_v18  ;;  %v6382_v36 = vpop.eup %6381  ;;  %v13044_v18 = vld [vmem:[#allocation16_spill] sm:$0xff]  ;;  %v13045_v2 = vld [vmem:[#allocation17_spill] sm:$0xff] }
 0x793   :  { %v3727_v27 = vmul.f32 %v6382_v36, %v9686_v39  ;;  %3955 = vmatpush1.bf16.msra.mxu0 %v9677_v14  ;;  %3996 = vmatpush1.bf16.msra.mxu1 %v9680_v50  ;;  %v13027_v14 = vld [vmem:[#allocation57_spill] sm:$0xff]  ;;  %v13028_v50 = vld [vmem:[#allocation58_spill] sm:$0xff]  ;;  %v13030_v39 = vld [vmem:[#allocation60_spill] sm:$0xff] }
 0x794   :  { %3956 = vmatprep.subr.bf16.mxu0 %v9683_v53  ;;  %3997 = vmatprep.subr.bf16.mxu1 %v9688_v40  ;;  %v13029_v53 = vld [vmem:[#allocation59_spill] sm:$0xff]  ;;  %v13031_v40 = vld [vmem:[#allocation136_spill] sm:$0xff] }
 0x795   :  { %v10214_v26 = vadd.f32 %v3728_v56, %v3727_v27  ;;  %v13046_v56 = vld [vmem:[#allocation18_spill] sm:$0xff]  ;;  %v13047_v36 = vld [vmem:[#allocation19_spill] sm:$0xff]  ;;  %v13048_v27 = vld [vmem:[#allocation20_spill] sm:$0xff] }
 0x797   :  { %3957 = vmatpush1.bf16.msra.mxu0 %v9691_v54  ;;  %3998 = vmatpush1.bf16.msra.mxu1 %v9694_v42  ;;  %v13032_v54 = vld [vmem:[#allocation137_spill] sm:$0xff]  ;;  %v13033_v42 = vld [vmem:[#allocation138_spill] sm:$0xff]  ;;  %6385 = vtanh.f32 %v10214_v26 }
 0x798   :  { %3958 = vmatprep.subr.bf16.mxu0 %v9697_v20  ;;  %3999 = vmatprep.subr.bf16.mxu1 %v9700_v38  ;;  %v13034_v20 = vld [vmem:[#allocation139_spill] sm:$0xff]  ;;  %v13035_v38 = vld [vmem:[#allocation144_spill] sm:$0xff] }
 0x79b   :  { %3959 = vmatpush1.bf16.msra.mxu0 %v9703_v41  ;;  %4000 = vmatpush1.bf16.msra.mxu1 %v13019_v45  ;;  %v13036_v41 = vld [vmem:[#allocation145_spill] sm:$0xff]  ;;  %v6384_v63 = vpop.eup %6383 }
 0x79c   :  { %3960 = vmatprep.subr.bf16.mxu0 %v13020_v33  ;;  %4001 = vmatprep.subr.bf16.mxu1 %v13021_v48  ;;  %v3719_v62 = vadd.f32 1.0, %v6384_v63  ;;  %v13049_v45 = vld [vmem:[#allocation21_spill] sm:$0xff]  ;;  %v13050_v33 = vld [vmem:[#allocation22_spill] sm:$0xff]  ;;  %v13051_v48 = vld [vmem:[#allocation23_spill] sm:$0xff] }
 0x79d   :  { %v13068_v63 = vld [vmem:[#allocation37_spill] sm:$0xff] }
 0x79e   :  { %6387 = vrcp.f32 %v3719_v62  ;;  %v10294_v62 = vld [vmem:[#allocation3 + $0xc4] ss:$16 sps:$4 sm:$0xff]  }
 0x79f   :  { %3961 = vmatpush1.bf16.msra.mxu0 %v13022_v34  ;;  %4002 = vmatpush1.bf16.msra.mxu1 %v13023_v16  ;;  %v13052_v34 = vld [vmem:[#allocation24_spill] sm:$0xff]  ;;  %v13053_v16 = vld [vmem:[#allocation25_spill] sm:$0xff] }
 0x7a0   :  { %3962 = vmatprep.subr.bf16.mxu0 %v13024_v32  ;;  %4003 = vmatprep.subr.bf16.mxu1 %v13025_v1  ;;  %v13054_v1 = vld [vmem:[#allocation26_spill] sm:$0xff] }
 0x7a1   :  { %v6386_v35 = vpop.eup %6385 }
 0x7a3   :  { %3963 = vmatpush1.bf16.msra.mxu0 %v13026_v4  ;;  %4004 = vmatpush1.bf16.msra.mxu1 %v13027_v14  ;;  %v13055_v14 = vld [vmem:[#allocation27_spill] sm:$0xff] }
 0x7a4   :  { %3964 = vmatprep.subr.bf16.mxu0 %v13028_v50  ;;  %4005 = vmatprep.subr.bf16.mxu1 %v13029_v53  ;;  %v13056_v50 = vld [vmem:[#allocation28_spill] sm:$0xff] }
 0x7a7   :  { %3965 = vmatpush1.bf16.msra.mxu0 %v13030_v39  ;;  %4006 = vmatpush1.bf16.msra.mxu1 %v13031_v40  ;;  %v10264_v39 = vld [vmem:[#allocation3 + $0x4] ss:$16 sps:$4 sm:$0xff]   ;;  %v10267_v40 = vld [vmem:[#allocation3 + $0xc] ss:$16 sps:$4 sm:$0xff]  }
 0x7a8   :  { %3966 = vmatprep.subr.bf16.mxu0 %v13032_v54  ;;  %4007 = vmatprep.subr.bf16.mxu1 %v13033_v42  ;;  %v6388_v32 = vpop.eup %6387  ;;  %v13060_v54 = vld [vmem:[#allocation31_spill] sm:$0xff]  ;;  %v13061_v42 = vld [vmem:[#allocation32_spill] sm:$0xff] }
 0x7a9   :  { %v3731_v4 = vmul.f32 %v6388_v32, %v6386_v35  ;;  %v10348_v35 = vld [vmem:[#allocation8 + $0x40] ss:$16 sps:$4 sm:$0xff]   ;;  %v10351_v32 = vld [vmem:[#allocation8 + $0x48] ss:$16 sps:$4 sm:$0xff]  }
 0x7ab   :  { %3967 = vmatpush1.bf16.msra.mxu0 %v13034_v20  ;;  %4008 = vmatpush1.bf16.msra.mxu1 %v13035_v38  ;;  %v3947_v53 = vpack.c.bf16 %v3731_v4, %v3731_v4  ;;  %v13062_v20 = vld [vmem:[#allocation55_spill] sm:$0xff]  ;;  %v13063_v38 = vld [vmem:[#allocation56_spill] sm:$0xff] }
 0x7ac   :  { %3968 = vmatprep.subr.bf16.mxu0 %v13036_v41  ;;  %4009 = vmatprep.subr.bf16.mxu1 %v13037_v7  ;;  %v13064_v41 = vld [vmem:[#allocation33_spill] sm:$0xff]  ;;  %v13067_v7 = vld [vmem:[#allocation36_spill] sm:$0xff] }
 0x7ad   :  { %v10357_v4 = vld [vmem:[#allocation8 + $0x6c] ss:$16 sps:$4 sm:$0xff]  }
 0x7af   :  { %3969 = vmatpush1.bf16.msra.mxu0 %v13038_v19  ;;  %4010 = vmatpush1.bf16.msra.mxu1 %v13039_v13  ;;  %v13069_v19 = vld [vmem:[#allocation38_spill] sm:$0xff]  ;;  %v13070_v13 = vld [vmem:[#allocation39_spill] sm:$0xff] }
 0x7b0   :  { %3970 = vmatprep.subr.bf16.mxu0 %v13040_v15  ;;  %4011 = vmatprep.subr.bf16.mxu1 %v13041_v22  ;;  %v13071_v15 = vld [vmem:[#allocation40_spill] sm:$0xff]  ;;  %v13072_v22 = vld [vmem:[#allocation41_spill] sm:$0xff] }
 0x7b3   :  { %3971 = vmatpush1.bf16.msra.mxu0 %v13042_v24  ;;  %4012 = vmatpush1.bf16.msra.mxu1 %v13043_v12  ;;  %v10297_v24 = vld [vmem:[#allocation3 + $0xcc] ss:$16 sps:$4 sm:$0xff]   ;;  %v10300_v12 = vld [vmem:[#allocation3 + $0xc0] ss:$16 sps:$4 sm:$0xff]  }
 0x7b4   :  { %3972 = vmatprep.subr.bf16.mxu0 %v13044_v18  ;;  %4013 = vmatprep.subr.bf16.mxu1 %v13045_v2  ;;  %v10318_v18 = vld [vmem:[#allocation8 + $0x4] ss:$16 sps:$4 sm:$0xff]   ;;  %v10321_v2 = vld [vmem:[#allocation8 + $0xc] ss:$16 sps:$4 sm:$0xff]  }
 0x7b7   :  { %3973 = vmatpush1.bf16.msra.mxu0 %v13046_v56  ;;  %4014 = vmatpush1.bf16.msra.mxu1 %v13047_v36  ;;  %v10324_v56 = vld [vmem:[#allocation8] ss:$16 sps:$4 sm:$0xff]   ;;  %v10327_v36 = vld [vmem:[#allocation8 + $0x8] ss:$16 sps:$4 sm:$0xff]  }
 0x7b8   :  { %3974 = vmatprep.subr.bf16.mxu0 %v13048_v27  ;;  %4015 = vmatprep.subr.bf16.mxu1 %v13049_v45  ;;  %v10330_v27 = vld [vmem:[#allocation8 + $0x24] ss:$16 sps:$4 sm:$0xff]   ;;  %v10333_v45 = vld [vmem:[#allocation8 + $0x2c] ss:$16 sps:$4 sm:$0xff]  }
 0x7bb   :  { %3975 = vmatpush1.bf16.msra.mxu0 %v13050_v33  ;;  %4016 = vmatpush1.bf16.msra.mxu1 %v13051_v48  ;;  %v10336_v33 = vld [vmem:[#allocation8 + $0x20] ss:$16 sps:$4 sm:$0xff]   ;;  %v10339_v48 = vld [vmem:[#allocation8 + $0x28] ss:$16 sps:$4 sm:$0xff]  }
 0x7bc   :  { %3976 = vmatprep.subr.bf16.mxu0 %v13052_v34  ;;  %4017 = vmatprep.subr.bf16.mxu1 %v13053_v16  ;;  %v10342_v34 = vld [vmem:[#allocation8 + $0x44] ss:$16 sps:$4 sm:$0xff]   ;;  %v10345_v16 = vld [vmem:[#allocation8 + $0x4c] ss:$16 sps:$4 sm:$0xff]  }
 0x7bf   :  { %3977 = vmatpush1.bf16.msra.mxu0 %v13054_v1  ;;  %4018 = vmatpush1.bf16.msra.mxu1 %v9816_v11  ;;  %v13057_v11 = vld [vmem:[#allocation29_spill] sm:$0xff] }
 0x7c0   :  { %3978 = vmatprep.subr.bf16.mxu0 %v9819_v10  ;;  %4019 = vmatprep.subr.bf16.mxu1 %v9822_v8  ;;  %v13058_v8 = vld [vmem:[#allocation30_spill] sm:$0xff]  ;;  %v13059_v10 = vmov 0   ;;  %v10354_v1 = vld [vmem:[#allocation8 + $0x64] ss:$16 sps:$4 sm:$0xff]  }
 0x7c3   :  { %3979 = vmatpush1.bf16.msra.mxu0 %v13055_v14  ;;  %4020 = vmatpush1.bf16.msra.mxu1 %v13056_v50  ;;  %v10360_v14 = vld [vmem:[#allocation8 + $0x60] ss:$16 sps:$4 sm:$0xff]   ;;  %v10363_v50 = vld [vmem:[#allocation8 + $0x68] ss:$16 sps:$4 sm:$0xff]  }
 0x7c4   :  { %4059 = vmatprep.subr.bf16.mxu0 %v10264_v39  ;;  %4100 = vmatprep.subr.bf16.mxu1 %v10267_v40 }
 0x7c6   :  { %3981 = vmatmul.mubr.bf16.vlgmr.msra.gmra.mrb[96].mxu0 %v3947_v53  ;;  %4022 = vmatmul.mubr.bf16.vlgmr.msra.gmra.mrb[96].mxu1 %v3947_v53 }
 0x7c7   :  { %4060 = vmatpush1.bf16.msra.mxu0 %v9833_v5  ;;  %4101 = vmatpush1.bf16.msra.mxu1 %v9836_v61  ;;  %v13065_v5 = vld [vmem:[#allocation34_spill] sm:$0xff]  ;;  %v13066_v61 = vld [vmem:[#allocation35_spill] sm:$0xff] }
 0x7c8   :  { %4061 = vmatprep.subr.bf16.mxu0 %v13057_v11  ;;  %4102 = vmatprep.subr.bf16.mxu1 %v13058_v8  ;;  %v10369_v11 = vld [vmem:[#allocation8 + $0x8c] ss:$16 sps:$4 sm:$0xff]   ;;  %v10372_v8 = vld [vmem:[#allocation8 + $0x80] ss:$16 sps:$4 sm:$0xff]  }
 0x7c9   :  { %4091 = vmatprep.mubr.bf16.mxu0 %v13059_v10  ;;  %4132 = vmatprep.mubr.bf16.mxu1 %v13059_v10  ;;  %13073 = vst [vmem:[#allocation114_spill] sm:$0xff] %v10369_v11  ;;  %13074 = vst [vmem:[#allocation115_spill] sm:$0xff] %v10372_v8 }
 0x7cb   :  { %4062 = vmatpush1.bf16.msra.mxu0 %v13060_v54  ;;  %4103 = vmatpush1.bf16.msra.mxu1 %v13061_v42  ;;  %v10375_v54 = vld [vmem:[#allocation8 + $0x88] ss:$16 sps:$4 sm:$0xff]   ;;  %v10378_v42 = vld [vmem:[#allocation8 + $0xa4] ss:$16 sps:$4 sm:$0xff]  }
 0x7cc   :  { %4063 = vmatprep.subr.bf16.mxu0 %v13062_v20  ;;  %4104 = vmatprep.subr.bf16.mxu1 %v13063_v38  ;;  %13075 = vst [vmem:[#allocation116_spill] sm:$0xff] %v10375_v54  ;;  %13076 = vst [vmem:[#allocation117_spill] sm:$0xff] %v10378_v42  ;;  %v10381_v20 = vld [vmem:[#allocation8 + $0xac] ss:$16 sps:$4 sm:$0xff]   ;;  %v10384_v38 = vld [vmem:[#allocation8 + $0xa0] ss:$16 sps:$4 sm:$0xff]  }
 0x7cd   :  { %13077 = vst [vmem:[#allocation118_spill] sm:$0xff] %v10381_v20  ;;  %13078 = vst [vmem:[#allocation119_spill] sm:$0xff] %v10384_v38 }
 0x7cf   :  { %4064 = vmatpush1.bf16.msra.mxu0 %v13064_v41  ;;  %4105 = vmatpush1.bf16.msra.mxu1 %v13065_v5  ;;  %v10387_v41 = vld [vmem:[#allocation8 + $0xa8] ss:$16 sps:$4 sm:$0xff]   ;;  %v10390_v5 = vld [vmem:[#allocation8 + $0xc4] ss:$16 sps:$4 sm:$0xff]  }
 0x7d0   :  { %4065 = vmatprep.subr.bf16.mxu0 %v13066_v61  ;;  %4106 = vmatprep.subr.bf16.mxu1 %v13067_v7  ;;  %13079 = vst [vmem:[#allocation120_spill] sm:$0xff] %v10387_v41  ;;  %13080 = vst [vmem:[#allocation121_spill] sm:$0xff] %v10390_v5  ;;  %v10393_v61 = vld [vmem:[#allocation8 + $0xcc] ss:$16 sps:$4 sm:$0xff]   ;;  %v10396_v7 = vld [vmem:[#allocation8 + $0xc0] ss:$16 sps:$4 sm:$0xff]  }
 0x7d1   :  { %13081 = vst [vmem:[#allocation122_spill] sm:$0xff] %v10393_v61  ;;  %13082 = vst [vmem:[#allocation123_spill] sm:$0xff] %v10396_v7 }
 0x7d3   :  { %4066 = vmatpush1.bf16.msra.mxu0 %v13068_v63  ;;  %4107 = vmatpush1.bf16.msra.mxu1 %v13069_v19  ;;  %v10399_v63 = vld [vmem:[#allocation8 + $0xc8] ss:$16 sps:$4 sm:$0xff]   ;;  %v10402_v19 = vld [vmem:[#allocation8 + $0xe4] ss:$16 sps:$4 sm:$0xff]  }
 0x7d4   :  { %4067 = vmatprep.subr.bf16.mxu0 %v13070_v13  ;;  %4108 = vmatprep.subr.bf16.mxu1 %v13071_v15  ;;  %13083 = vst [vmem:[#allocation124_spill] sm:$0xff] %v10399_v63  ;;  %13084 = vst [vmem:[#allocation125_spill] sm:$0xff] %v10402_v19  ;;  %v10405_v13 = vld [vmem:[#allocation8 + $0xec] ss:$16 sps:$4 sm:$0xff]   ;;  %v10408_v15 = vld [vmem:[#allocation8 + $0xe0] ss:$16 sps:$4 sm:$0xff]  }
 0x7d5   :  { %13085 = vst [vmem:[#allocation126_spill] sm:$0xff] %v10405_v13  ;;  %13086 = vst [vmem:[#allocation127_spill] sm:$0xff] %v10408_v15 }
 0x7d7   :  { %4068 = vmatpush1.bf16.msra.mxu0 %v9883_v0  ;;  %4109 = vmatpush1.bf16.msra.mxu1 %v9886_v28  ;;  %v10303_v0 = vld [vmem:[#allocation3 + $0xc8] ss:$16 sps:$4 sm:$0xff]   ;;  %v10312_v28 = vld [vmem:[#allocation3 + $0xe0] ss:$16 sps:$4 sm:$0xff]  }
 0x7d8   :  { %4069 = vmatprep.subr.bf16.mxu0 %v9889_v9  ;;  %4110 = vmatprep.subr.bf16.mxu1 %v9892_v49  ;;  %v10306_v49 = vld [vmem:[#allocation3 + $0xe4] ss:$16 sps:$4 sm:$0xff]   ;;  %v10315_v9 = vld [vmem:[#allocation3 + $0xe8] ss:$16 sps:$4 sm:$0xff]  }
 0x7db   :  { %4070 = vmatpush1.bf16.msra.mxu0 %v9895_v30  ;;  %4111 = vmatpush1.bf16.msra.mxu1 %v13072_v22  ;;  %v10309_v30 = vld [vmem:[#allocation3 + $0xec] ss:$16 sps:$4 sm:$0xff]   ;;  %v10411_v22 = vld [vmem:[#allocation8 + $0xe8] ss:$16 sps:$4 sm:$0xff]  }
 0x7dc   :  { %4071 = vmatprep.subr.bf16.mxu0 %v10294_v62  ;;  %4112 = vmatprep.subr.bf16.mxu1 %v10297_v24  ;;  %13087 = vst [vmem:[#allocation69_spill] sm:$0xff] %v10411_v22 }
 0x7df   :  { %4072 = vmatpush1.bf16.msra.mxu0 %v10300_v12  ;;  %4113 = vmatpush1.bf16.msra.mxu1 %v10303_v0 }
 0x7e0   :  { %4073 = vmatprep.subr.bf16.mxu0 %v10306_v49  ;;  %4114 = vmatprep.subr.bf16.mxu1 %v10309_v30 }
 0x7e3   :  { %4074 = vmatpush1.bf16.msra.mxu0 %v10312_v28  ;;  %4115 = vmatpush1.bf16.msra.mxu1 %v10315_v9 }
 0x7e4   :  { %4171 = vmatprep.subr.bf16.mxu0 %v10318_v18  ;;  %4212 = vmatprep.subr.bf16.mxu1 %v10321_v2 }
 0x7e6   :  { %4092 = vmatmul.mubr.bf16.vlgmr.msra.gmra.mrb[100].mxu0 %v3947_v53  ;;  %4133 = vmatmul.mubr.bf16.vlgmr.msra.gmra.mrb[100].mxu1 %v3947_v53  ;;  %v10366_v53 = vld [vmem:[#allocation8 + $0x84] ss:$16 sps:$4 sm:$0xff]  }
 0x7e7   :  { %4172 = vmatpush1.bf16.msra.mxu0 %v10324_v56  ;;  %4213 = vmatpush1.bf16.msra.mxu1 %v10327_v36 }
 0x7e8   :  { %4173 = vmatprep.subr.bf16.mxu0 %v10330_v27  ;;  %4214 = vmatprep.subr.bf16.mxu1 %v10333_v45 }
 0x7eb   :  { %4174 = vmatpush1.bf16.msra.mxu0 %v10336_v33  ;;  %4215 = vmatpush1.bf16.msra.mxu1 %v10339_v48 }
 0x7ec   :  { %4175 = vmatprep.subr.bf16.mxu0 %v10342_v34  ;;  %4216 = vmatprep.subr.bf16.mxu1 %v10345_v16 }
 0x7ef   :  { %4176 = vmatpush1.bf16.msra.mxu0 %v10348_v35  ;;  %4217 = vmatpush1.bf16.msra.mxu1 %v10351_v32 }
 0x7f0   :  { %4177 = vmatprep.subr.bf16.mxu0 %v10354_v1  ;;  %4218 = vmatprep.subr.bf16.mxu1 %v10357_v4 }
 0x7f3   :  { %4178 = vmatpush1.bf16.msra.mxu0 %v10360_v14  ;;  %4219 = vmatpush1.bf16.msra.mxu1 %v10363_v50 }
 0x7f4   :  { %4179 = vmatprep.subr.bf16.mxu0 %v10366_v53  ;;  %4220 = vmatprep.subr.bf16.mxu1 %v10369_v11 }
 0x7f7   :  { %4180 = vmatpush1.bf16.msra.mxu0 %v10372_v8  ;;  %4221 = vmatpush1.bf16.msra.mxu1 %v10375_v54  ;;  %v10488_v8 = vld [vmem:[#allocation8 + $0x1c4] ss:$16 sps:$4 sm:$0xff]  }
 0x7f8   :  { %4181 = vmatprep.subr.bf16.mxu0 %v10378_v42  ;;  %4222 = vmatprep.subr.bf16.mxu1 %v10381_v20  ;;  %v10482_v42 = vld [vmem:[#allocation8 + $0x1a0] ss:$16 sps:$4 sm:$0xff]   ;;  %13112 = vst [vmem:[#allocation149_spill] sm:$0xff] %v10488_v8 }
 0x7f9   :  { %13110 = vst [vmem:[#allocation147_spill] sm:$0xff] %v10482_v42 }
 0x7fb   :  { %4182 = vmatpush1.bf16.msra.mxu0 %v10384_v38  ;;  %4223 = vmatpush1.bf16.msra.mxu1 %v10387_v41 }
 0x7fc   :  { %4183 = vmatprep.subr.bf16.mxu0 %v10390_v5  ;;  %4224 = vmatprep.subr.bf16.mxu1 %v10393_v61 }
 0x7ff   :  { %4184 = vmatpush1.bf16.msra.mxu0 %v10396_v7  ;;  %4225 = vmatpush1.bf16.msra.mxu1 %v10399_v63  ;;  %v10414_v7 = vld [vmem:[#allocation8 + $0x104] ss:$16 sps:$4 sm:$0xff]   ;;  %v10417_v63 = vld [vmem:[#allocation8 + $0x10c] ss:$16 sps:$4 sm:$0xff]  }
 0x800   :  { %4185 = vmatprep.subr.bf16.mxu0 %v10402_v19  ;;  %4226 = vmatprep.subr.bf16.mxu1 %v10405_v13  ;;  %13088 = vst [vmem:[#allocation70_spill] sm:$0xff] %v10414_v7  ;;  %13089 = vst [vmem:[#allocation71_spill] sm:$0xff] %v10417_v63  ;;  %v10420_v19 = vld [vmem:[#allocation8 + $0x100] ss:$16 sps:$4 sm:$0xff]   ;;  %v10423_v13 = vld [vmem:[#allocation8 + $0x108] ss:$16 sps:$4 sm:$0xff]  }
 0x801   :  { %13090 = vst [vmem:[#allocation72_spill] sm:$0xff] %v10420_v19  ;;  %13091 = vst [vmem:[#allocation128_spill] sm:$0xff] %v10423_v13 }
 0x803   :  { %4186 = vmatpush1.bf16.msra.mxu0 %v10408_v15  ;;  %4227 = vmatpush1.bf16.msra.mxu1 %v10411_v22  ;;  %v10426_v15 = vld [vmem:[#allocation8 + $0x124] ss:$16 sps:$4 sm:$0xff]   ;;  %v10429_v22 = vld [vmem:[#allocation8 + $0x12c] ss:$16 sps:$4 sm:$0xff]  }
 0x804   :  { %4187 = vmatprep.subr.bf16.mxu0 %v10414_v7  ;;  %4228 = vmatprep.subr.bf16.mxu1 %v10417_v63  ;;  %13092 = vst [vmem:[#allocation129_spill] sm:$0xff] %v10426_v15  ;;  %13093 = vst [vmem:[#allocation130_spill] sm:$0xff] %v10429_v22  ;;  %v10432_v7 = vld [vmem:[#allocation8 + $0x120] ss:$16 sps:$4 sm:$0xff]   ;;  %v10435_v63 = vld [vmem:[#allocation8 + $0x128] ss:$16 sps:$4 sm:$0xff]  }
 0x805   :  { %13094 = vst [vmem:[#allocation131_spill] sm:$0xff] %v10432_v7  ;;  %13095 = vst [vmem:[#allocation132_spill] sm:$0xff] %v10435_v63 }
 0x807   :  { %4188 = vmatpush1.bf16.msra.mxu0 %v10420_v19  ;;  %4229 = vmatpush1.bf16.msra.mxu1 %v10423_v13  ;;  %v10438_v19 = vld [vmem:[#allocation8 + $0x144] ss:$16 sps:$4 sm:$0xff]   ;;  %v10441_v13 = vld [vmem:[#allocation8 + $0x14c] ss:$16 sps:$4 sm:$0xff]  }
 0x808   :  { %4189 = vmatprep.subr.bf16.mxu0 %v10426_v15  ;;  %4230 = vmatprep.subr.bf16.mxu1 %v10429_v22  ;;  %13096 = vst [vmem:[#allocation133_spill] sm:$0xff] %v10438_v19  ;;  %13097 = vst [vmem:[#allocation134_spill] sm:$0xff] %v10441_v13  ;;  %v10444_v15 = vld [vmem:[#allocation8 + $0x140] ss:$16 sps:$4 sm:$0xff]   ;;  %v10447_v22 = vld [vmem:[#allocation8 + $0x148] ss:$16 sps:$4 sm:$0xff]  }
 0x809   :  { %13098 = vst [vmem:[#allocation135_spill] sm:$0xff] %v10444_v15  ;;  %13099 = vst [vmem:[#allocation57_spill] sm:$0xff] %v10447_v22 }
 0x80b   :  { %4190 = vmatpush1.bf16.msra.mxu0 %v10432_v7  ;;  %4231 = vmatpush1.bf16.msra.mxu1 %v10435_v63  ;;  %v10450_v7 = vld [vmem:[#allocation8 + $0x164] ss:$16 sps:$4 sm:$0xff]   ;;  %v10453_v63 = vld [vmem:[#allocation8 + $0x16c] ss:$16 sps:$4 sm:$0xff]  }
 0x80c   :  { %4191 = vmatprep.subr.bf16.mxu0 %v10438_v19  ;;  %4232 = vmatprep.subr.bf16.mxu1 %v10441_v13  ;;  %13100 = vst [vmem:[#allocation58_spill] sm:$0xff] %v10450_v7  ;;  %13101 = vst [vmem:[#allocation59_spill] sm:$0xff] %v10453_v63  ;;  %v10456_v19 = vld [vmem:[#allocation8 + $0x160] ss:$16 sps:$4 sm:$0xff]   ;;  %v10459_v13 = vld [vmem:[#allocation8 + $0x168] ss:$16 sps:$4 sm:$0xff]  }
 0x80d   :  { %13102 = vst [vmem:[#allocation60_spill] sm:$0xff] %v10456_v19  ;;  %13103 = vst [vmem:[#allocation136_spill] sm:$0xff] %v10459_v13 }
 0x80f   :  { %4192 = vmatpush1.bf16.msra.mxu0 %v10444_v15  ;;  %4233 = vmatpush1.bf16.msra.mxu1 %v10447_v22  ;;  %v10462_v15 = vld [vmem:[#allocation8 + $0x184] ss:$16 sps:$4 sm:$0xff]   ;;  %v10465_v22 = vld [vmem:[#allocation8 + $0x18c] ss:$16 sps:$4 sm:$0xff]  }
 0x810   :  { %4193 = vmatprep.subr.bf16.mxu0 %v10450_v7  ;;  %4234 = vmatprep.subr.bf16.mxu1 %v10453_v63  ;;  %13104 = vst [vmem:[#allocation137_spill] sm:$0xff] %v10462_v15  ;;  %13105 = vst [vmem:[#allocation138_spill] sm:$0xff] %v10465_v22  ;;  %v10468_v7 = vld [vmem:[#allocation8 + $0x180] ss:$16 sps:$4 sm:$0xff]   ;;  %v10471_v63 = vld [vmem:[#allocation8 + $0x188] ss:$16 sps:$4 sm:$0xff]  }
 0x811   :  { %13106 = vst [vmem:[#allocation139_spill] sm:$0xff] %v10468_v7  ;;  %13107 = vst [vmem:[#allocation144_spill] sm:$0xff] %v10471_v63 }
 0x813   :  { %4194 = vmatpush1.bf16.msra.mxu0 %v10456_v19  ;;  %4235 = vmatpush1.bf16.msra.mxu1 %v10459_v13  ;;  %v10474_v19 = vld [vmem:[#allocation8 + $0x1a4] ss:$16 sps:$4 sm:$0xff]   ;;  %v10477_v13 = vld [vmem:[#allocation8 + $0x1ac] ss:$16 sps:$4 sm:$0xff]  }
 0x814   :  { %4195 = vmatprep.subr.bf16.mxu0 %v10462_v15  ;;  %4236 = vmatprep.subr.bf16.mxu1 %v10465_v22  ;;  %13108 = vst [vmem:[#allocation145_spill] sm:$0xff] %v10474_v19  ;;  %13109 = vst [vmem:[#allocation146_spill] sm:$0xff] %v10477_v13 }
 0x817   :  { %4196 = vmatpush1.bf16.msra.mxu0 %v10468_v7  ;;  %4237 = vmatpush1.bf16.msra.mxu1 %v10471_v63  ;;  %v10485_v63 = vld [vmem:[#allocation8 + $0x1a8] ss:$16 sps:$4 sm:$0xff]  }
 0x818   :  { %4197 = vmatprep.subr.bf16.mxu0 %v10474_v19  ;;  %4238 = vmatprep.subr.bf16.mxu1 %v10477_v13  ;;  %13111 = vst [vmem:[#allocation148_spill] sm:$0xff] %v10485_v63 }
 0x819   :  { %v3768_v15 = vpop.f32.mrb[88].mxu0  ;;  %v3809_v61 = vpop.f32.mrb[88].mxu1 }
 0x81a   :  { %v3769_v22 = vadd.f32 %v3768_v15, %v8979_v25  ;;  %v3770_v5 = vpop.f32.mrb[89].mxu0  ;;  %v3811_v41 = vpop.f32.mrb[89].mxu1  ;;  %v10491_v15 = vld [vmem:[#allocation8 + $0x1cc] ss:$16 sps:$4 sm:$0xff]  }
 0x81b   :  { %v3771_v7 = vadd.f32 %v3770_v5, %v8982_v46  ;;  %v3772_v38 = vpop.f32.mrb[90].mxu0  ;;  %v3813_v20 = vpop.f32.mrb[90].mxu1  ;;  %4198 = vmatpush1.bf16.msra.mxu0 %v10482_v42  ;;  %4239 = vmatpush1.bf16.msra.mxu1 %v10485_v63  ;;  %13113 = vst [vmem:[#allocation13_spill] sm:$0xff] %v10491_v15  ;;  %v10497_v5 = vld [vmem:[#allocation8 + $0x1c8] ss:$16 sps:$4 sm:$0xff]  }
 0x81c   :  { %v5661_v19 = vmul.f32 -1.442695, %v3769_v22  ;;  %v3773_v13 = vpop.f32.mrb[91].mxu0  ;;  %v3814_v54 = vpop.f32.mrb[91].mxu1  ;;  %4199 = vmatprep.subr.bf16.mxu0 %v10488_v8  ;;  %4240 = vmatprep.subr.bf16.mxu1 %v10491_v15  ;;  %v10494_v38 = vld [vmem:[#allocation8 + $0x1c0] ss:$16 sps:$4 sm:$0xff]  }
 0x81d   :  { %v5662_v20 = vmul.f32 -1.442695, %v3771_v7  ;;  %13114 = vst [vmem:[#allocation14_spill] sm:$0xff] %v10494_v38  ;;  %13115 = vst [vmem:[#allocation15_spill] sm:$0xff] %v10497_v5  ;;  %v10500_v54 = vld [vmem:[#allocation8 + $0x1e4] ss:$16 sps:$4 sm:$0xff]   ;;  %v3810_v7 = vadd.f32 %v3809_v61, %v12957_v44 }
 0x81e   :  { %6389 = vpow2.f32 %v5661_v19  ;;  %13116 = vst [vmem:[#allocation16_spill] sm:$0xff] %v10500_v54  ;;  %v10503_v13 = vld [vmem:[#allocation8 + $0x1ec] ss:$16 sps:$4 sm:$0xff]   ;;  %v10507_v19 = vld [vmem:[#allocation8 + $0x1e0] ss:$16 sps:$4 sm:$0xff]  }
 0x81f   :  { %4200 = vmatpush1.bf16.msra.mxu0 %v10494_v38  ;;  %4241 = vmatpush1.bf16.msra.mxu1 %v10497_v5  ;;  %6391 = vpow2.f32 %v5662_v20  ;;  %13117 = vst [vmem:[#allocation17_spill] sm:$0xff] %v10503_v13  ;;  %13118 = vst [vmem:[#allocation18_spill] sm:$0xff] %v10507_v19  ;;  %v10510_v22 = vld [vmem:[#allocation8 + $0x1e8] ss:$16 sps:$4 sm:$0xff]   ;;  %v13120_v5 = vld [vmem:[#allocation65_spill] sm:$0xff] }
 0x820   :  { %4201 = vmatprep.subr.bf16.mxu0 %v10500_v54  ;;  %4242 = vmatprep.subr.bf16.mxu1 %v10503_v13  ;;  %13119 = vst [vmem:[#allocation19_spill] sm:$0xff] %v10510_v22  ;;  %v13121_v20 = vld [vmem:[#allocation66_spill] sm:$0xff]  ;;  %v13122_v38 = vld [vmem:[#allocation143_spill] sm:$0xff]  ;;  %v5663_v15 = vmul.f32 -1.442695, %v3810_v7 }
 0x821   :  { %v3812_v54 = vadd.f32 %v3811_v41, %v13122_v38 }
 0x823   :  { %4202 = vmatpush1.bf16.msra.mxu0 %v10507_v19  ;;  %4243 = vmatpush1.bf16.msra.mxu1 %v10510_v22  ;;  %6393 = vtanh.f32 %v3812_v54 }
 0x824   :  { %4278 = vmatprep.subr.bf16.mxu0 %v13120_v5  ;;  %4319 = vmatprep.subr.bf16.mxu1 %v13121_v20  ;;  %6395 = vpow2.f32 %v5663_v15  ;;  %v13123_v5 = vld [vmem:[#allocation67_spill] sm:$0xff] }
 0x828   :  { %v6390_v8 = vpop.eup %6389 }
 0x829   :  { %v3825_v63 = vadd.f32 1.0, %v6390_v8  ;;  %v6392_v13 = vpop.eup %6391 }
 0x82a   :  { %v3826_v61 = vadd.f32 1.0, %v6392_v13 }
 0x82b   :  { %6397 = vrcp.f32 %v3825_v63 }
 0x82c   :  { %6399 = vrcp.f32 %v3826_v61 }
 0x82d   :  { %v6394_v19 = vpop.eup %6393 }
 0x82e   :  { %v6396_v44 = vpop.eup %6395 }
 0x82f   :  { %v3827_v25 = vadd.f32 1.0, %v6396_v44 }
 0x831   :  { %6401 = vrcp.f32 %v3827_v25 }
 0x835   :  { %v6398_v42 = vpop.eup %6397 }
 0x836   :  { %v3836_v46 = vmul.f32 %v6398_v42, %v6394_v19  ;;  %v6400_v22 = vpop.eup %6399 }
 0x837   :  { %v3835_v11 = vmul.f32 %v6400_v22, %v13123_v5 }
 0x839   :  { %v10517_v20 = vadd.f32 %v3836_v46, %v3835_v11 }
 0x83b   :  { %13124 = vst [vmem:[#allocation20_spill] sm:$0xff] %v10517_v20  ;;  %6403 = vtanh.f32 %v10517_v20  ;;  %v6402_v8 = vpop.eup %6401 }
 0x845   :  { %v6404_v41 = vpop.eup %6403 }
 0x846   :  { %v3839_v54 = vmul.f32 %v6404_v41, %v6402_v8 }
 0x848   :  { %v4170_v15 = vpack.c.bf16 %v3839_v54, %v3839_v54 }
 0x84a   :  { %4203 = vmatprep.mubr.bf16.mxu0 %v4170_v15  ;;  %4244 = vmatprep.mubr.bf16.mxu1 %v4170_v15 }
 0x859   :  { %v3875_v63 = vpop.f32.mrb[92].mxu0  ;;  %v3916_v13 = vpop.f32.mrb[92].mxu1 }
 0x85a   :  { %v3876_v7 = vadd.f32 %v3875_v63, %v12619_v29  ;;  %v3877_v42 = vpop.f32.mrb[93].mxu0  ;;  %v3918_v19 = vpop.f32.mrb[93].mxu1  ;;  %v3917_v8 = vadd.f32 %v3916_v13, %v12621_v3 }
 0x85b   :  { %v3878_v44 = vadd.f32 %v3877_v42, %v12620_v37  ;;  %v3879_v22 = vpop.f32.mrb[94].mxu0  ;;  %v3920_v46 = vpop.f32.mrb[94].mxu1  ;;  %v3919_v41 = vadd.f32 %v3918_v19, %v12622_v6 }
 0x85c   :  { %v5664_v11 = vmul.f32 -1.442695, %v3876_v7  ;;  %v3880_v25 = vpop.f32.mrb[95].mxu0  ;;  %v3921_v61 = vpop.f32.mrb[95].mxu1  ;;  %v5666_v54 = vmul.f32 -1.442695, %v3917_v8 }
 0x85d   :  { %v5665_v5 = vmul.f32 -1.442695, %v3878_v44 }
 0x85e   :  { %6405 = vpow2.f32 %v5664_v11 }
 0x85f   :  { %6407 = vpow2.f32 %v5665_v5 }
 0x860   :  { %6409 = vtanh.f32 %v3919_v41 }
 0x861   :  { %6411 = vpow2.f32 %v5666_v54  ;;  %v13127_v54 = vld [vmem:[#allocation43_spill] sm:$0xff] }
 0x868   :  { %v6406_v15 = vpop.eup %6405 }
 0x869   :  { %v3932_v20 = vadd.f32 1.0, %v6406_v15  ;;  %v6408_v63 = vpop.eup %6407  ;;  %v13128_v15 = vld [vmem:[#allocation54_spill] sm:$0xff] }
 0x86a   :  { %v3933_v42 = vadd.f32 1.0, %v6408_v63  ;;  %v6410_v22 = vpop.eup %6409  ;;  %v13129_v63 = vld [vmem:[#allocation44_spill] sm:$0xff] }
 0x86b   :  { %6413 = vrcp.f32 %v3932_v20  ;;  %v6412_v7 = vpop.eup %6411  ;;  %v13126_v20 = vld [vmem:[#allocation42_spill] sm:$0xff] }
 0x86c   :  { %6415 = vrcp.f32 %v3933_v42  ;;  %v3934_v11 = vadd.f32 1.0, %v6412_v7  ;;  %v13130_v42 = vld [vmem:[#allocation45_spill] sm:$0xff] }
 0x86d   :  { %v13134_v7 = vld [vmem:[#allocation49_spill] sm:$0xff] }
 0x86e   :  { %6417 = vrcp.f32 %v3934_v11  ;;  %v13137_v11 = vld [vmem:[#allocation61_spill] sm:$0xff] }
 0x875   :  { %v6414_v46 = vpop.eup %6413 }
 0x876   :  { %v3943_v25 = vmul.f32 %v6414_v46, %v6410_v22  ;;  %v6416_v44 = vpop.eup %6415  ;;  %v13131_v22 = vld [vmem:[#allocation46_spill] sm:$0xff] }
 0x877   :  { %v3942_v61 = vmul.f32 %v6416_v44, %v9992_v17  ;;  %v13125_v17 = vld [vmem:[#allocation68_spill] sm:$0xff]  ;;  %v13136_v44 = vld [vmem:[#allocation51_spill] sm:$0xff] }
 0x878   :  { %v6418_v19 = vpop.eup %6417 }
 0x879   :  { %v10525_v13 = vadd.f32 %v3943_v25, %v3942_v61  ;;  %v13138_v61 = vld [vmem:[#allocation150_spill] sm:$0xff] }
 0x87b   :  { %6419 = vtanh.f32 %v10525_v13 }
 0x885   :  { %v6420_v5 = vpop.eup %6419 }
 0x886   :  { %v3946_v8 = vmul.f32 %v6420_v5, %v6418_v19 }
 0x888   :  { %v4169_v41 = vpack.c.bf16 %v3946_v8, %v3946_v8 }
 0x88a   :  { %4204 = vmatmul.mubr.bf16.vlgmr.msra.gmra.mrb[104].mxu0 %v4169_v41  ;;  %4245 = vmatmul.mubr.bf16.vlgmr.msra.gmra.mrb[104].mxu1 %v4169_v41 }
 0x88b   :  { %4279 = vmatpush1.bf16.msra.mxu0 %v9995_v51  ;;  %4320 = vmatpush1.bf16.msra.mxu1 %v9998_v47  ;;  %v13132_v51 = vld [vmem:[#allocation47_spill] sm:$0xff]  ;;  %v13133_v47 = vld [vmem:[#allocation48_spill] sm:$0xff] }
 0x88c   :  { %4310 = vmatprep.mubr.bf16.mxu0 %v4169_v41  ;;  %4351 = vmatprep.mubr.bf16.mxu1 %v4169_v41  ;;  %v13139_v41 = vld [vmem:[#allocation151_spill] sm:$0xff] }
 0x88d   :  { %4280 = vmatprep.subr.bf16.mxu0 %v10001_v21  ;;  %4321 = vmatprep.subr.bf16.mxu1 %v13125_v17  ;;  %v13135_v21 = vld [vmem:[#allocation50_spill] sm:$0xff] }
 0x88f   :  { %4281 = vmatpush1.bf16.msra.mxu0 %v13126_v20  ;;  %4322 = vmatpush1.bf16.msra.mxu1 %v13127_v54 }
 0x890   :  { %4282 = vmatprep.subr.bf16.mxu0 %v13128_v15  ;;  %4323 = vmatprep.subr.bf16.mxu1 %v13129_v63  ;;  %v13140_v63 = vld [vmem:[#allocation62_spill] sm:$0xff] }
 0x893   :  { %4283 = vmatpush1.bf16.msra.mxu0 %v13130_v42  ;;  %4324 = vmatpush1.bf16.msra.mxu1 %v13131_v22  ;;  %v13141_v42 = vld [vmem:[#allocation63_spill] sm:$0xff] }
 0x894   :  { %4284 = vmatprep.subr.bf16.mxu0 %v13132_v51  ;;  %4325 = vmatprep.subr.bf16.mxu1 %v13133_v47 }
 0x897   :  { %4285 = vmatpush1.bf16.msra.mxu0 %v13134_v7  ;;  %4326 = vmatpush1.bf16.msra.mxu1 %v13135_v21  ;;  %v13142_v7 = vld [vmem:[#allocation64_spill] sm:$0xff] }
 0x898   :  { %4286 = vmatprep.subr.bf16.mxu0 %v13136_v44  ;;  %4327 = vmatprep.subr.bf16.mxu1 %v13137_v11  ;;  %v13143_v21 = vld [vmem:[#allocation52_spill] sm:$0xff]  ;;  %v13145_v44 = vld [vmem:[#allocation81_spill] sm:$0xff]  ;;  %v13146_v11 = vld [vmem:[#allocation82_spill] sm:$0xff] }
 0x899   :  { %v3982_v46 = vpop.f32.mrb[96].mxu0  ;;  %v4023_v25 = vpop.f32.mrb[96].mxu1 }
 0x89a   :  { %v3983_v19 = vadd.f32 %v3982_v46, %v13138_v61  ;;  %v3984_v5 = vpop.f32.mrb[97].mxu0  ;;  %v4025_v8 = vpop.f32.mrb[97].mxu1  ;;  %v13144_v46 = vld [vmem:[#allocation53_spill] sm:$0xff] }
 0x89b   :  { %v3985_v17 = vadd.f32 %v3984_v5, %v13139_v41  ;;  %v3986_v20 = vpop.f32.mrb[98].mxu0  ;;  %v4027_v54 = vpop.f32.mrb[98].mxu1  ;;  %4287 = vmatpush1.bf16.msra.mxu0 %v13140_v63  ;;  %4328 = vmatpush1.bf16.msra.mxu1 %v13141_v42  ;;  %v13148_v5 = vld [vmem:[#allocation152_spill] sm:$0xff]  ;;  %v13150_v63 = vld [vmem:[#allocation85_spill] sm:$0xff] }
 0x89c   :  { %v5667_v15 = vmul.f32 -1.442695, %v3983_v19  ;;  %v3987_v22 = vpop.f32.mrb[99].mxu0  ;;  %v4028_v51 = vpop.f32.mrb[99].mxu1  ;;  %4288 = vmatprep.subr.bf16.mxu0 %v13142_v7  ;;  %4329 = vmatprep.subr.bf16.mxu1 %v13143_v21  ;;  %v13147_v19 = vld [vmem:[#allocation83_spill] sm:$0xff]  ;;  %v4024_v20 = vadd.f32 %v4023_v25, %v13148_v5  ;;  %v13149_v54 = vld [vmem:[#allocation84_spill] sm:$0xff] }
 0x89d   :  { %v5668_v47 = vmul.f32 -1.442695, %v3985_v17  ;;  %v13151_v17 = vld [vmem:[#allocation153_spill] sm:$0xff]  ;;  %v13152_v22 = vld [vmem:[#allocation86_spill] sm:$0xff]  ;;  %v13154_v7 = vld [vmem:[#allocation88_spill] sm:$0xff] }
 0x89e   :  { %6421 = vpow2.f32 %v5667_v15  ;;  %v4026_v42 = vadd.f32 %v4025_v8, %v13151_v17  ;;  %v13153_v15 = vld [vmem:[#allocation87_spill] sm:$0xff]  ;;  %v5669_v51 = vmul.f32 -1.442695, %v4024_v20  ;;  %v13155_v21 = vld [vmem:[#allocation89_spill] sm:$0xff]  ;;  %v13160_v20 = vld [vmem:[#allocation94_spill] sm:$0xff] }
 0x89f   :  { %6423 = vpow2.f32 %v5668_v47  ;;  %4289 = vmatpush1.bf16.msra.mxu0 %v13144_v46  ;;  %4330 = vmatpush1.bf16.msra.mxu1 %v13145_v44  ;;  %v13156_v44 = vld [vmem:[#allocation90_spill] sm:$0xff]  ;;  %v13157_v25 = vld [vmem:[#allocation91_spill] sm:$0xff] }
 0x8a0   :  { %4290 = vmatprep.subr.bf16.mxu0 %v13146_v11  ;;  %4331 = vmatprep.subr.bf16.mxu1 %v13147_v19  ;;  %6425 = vtanh.f32 %v4026_v42  ;;  %v13158_v19 = vld [vmem:[#allocation92_spill] sm:$0xff]  ;;  %v13163_v42 = vld [vmem:[#allocation97_spill] sm:$0xff] }
 0x8a1   :  { %6427 = vpow2.f32 %v5669_v51 }
 0x8a3   :  { %4291 = vmatpush1.bf16.msra.mxu0 %v13149_v54  ;;  %4332 = vmatpush1.bf16.msra.mxu1 %v13150_v63  ;;  %v13159_v54 = vld [vmem:[#allocation93_spill] sm:$0xff]  ;;  %v13161_v63 = vld [vmem:[#allocation95_spill] sm:$0xff] }
 0x8a4   :  { %4292 = vmatprep.subr.bf16.mxu0 %v13152_v22  ;;  %4333 = vmatprep.subr.bf16.mxu1 %v13153_v15  ;;  %v13162_v22 = vld [vmem:[#allocation96_spill] sm:$0xff]  ;;  %v13164_v15 = vld [vmem:[#allocation98_spill] sm:$0xff] }
 0x8a7   :  { %4293 = vmatpush1.bf16.msra.mxu0 %v13154_v7  ;;  %4334 = vmatpush1.bf16.msra.mxu1 %v13155_v21  ;;  %v13166_v21 = vld [vmem:[#allocation100_spill] sm:$0xff] }
 0x8a8   :  { %v6422_v47 = vpop.eup %6421  ;;  %4294 = vmatprep.subr.bf16.mxu0 %v13156_v44  ;;  %4335 = vmatprep.subr.bf16.mxu1 %v13157_v25  ;;  %v13168_v25 = vld [vmem:[#allocation102_spill] sm:$0xff] }
 0x8a9   :  { %v4039_v46 = vadd.f32 1.0, %v6422_v47  ;;  %v6424_v11 = vpop.eup %6423  ;;  %v13165_v47 = vld [vmem:[#allocation99_spill] sm:$0xff] }
 0x8aa   :  { %v4040_v8 = vadd.f32 1.0, %v6424_v11  ;;  %v6426_v51 = vpop.eup %6425  ;;  %v13169_v11 = vld [vmem:[#allocation103_spill] sm:$0xff] }
 0x8ab   :  { %6429 = vrcp.f32 %v4039_v46  ;;  %4295 = vmatpush1.bf16.msra.mxu0 %v13158_v19  ;;  %4336 = vmatpush1.bf16.msra.mxu1 %v13159_v54  ;;  %v6428_v7 = vpop.eup %6427  ;;  %v13167_v46 = vld [vmem:[#allocation101_spill] sm:$0xff] }
 0x8ac   :  { %6431 = vrcp.f32 %v4040_v8  ;;  %4296 = vmatprep.subr.bf16.mxu0 %v13160_v20  ;;  %4337 = vmatprep.subr.bf16.mxu1 %v13161_v63  ;;  %v4041_v54 = vadd.f32 1.0, %v6428_v7  ;;  %v13170_v63 = vld [vmem:[#allocation104_spill] sm:$0xff] }
 0x8ae   :  { %6433 = vrcp.f32 %v4041_v54  ;;  %v13182_v54 = vld [vmem:[#allocation112_spill] sm:$0xff] }
 0x8af   :  { %4297 = vmatpush1.bf16.msra.mxu0 %v13162_v22  ;;  %4338 = vmatpush1.bf16.msra.mxu1 %v13163_v42  ;;  %v13171_v22 = vld [vmem:[#allocation105_spill] sm:$0xff] }
 0x8b0   :  { %4298 = vmatprep.subr.bf16.mxu0 %v13164_v15  ;;  %4339 = vmatprep.subr.bf16.mxu1 %v13165_v47  ;;  %v13172_v47 = vld [vmem:[#allocation106_spill] sm:$0xff] }
 0x8b3   :  { %4299 = vmatpush1.bf16.msra.mxu0 %v13166_v21  ;;  %4340 = vmatpush1.bf16.msra.mxu1 %v13167_v46  ;;  %v13173_v21 = vld [vmem:[#allocation107_spill] sm:$0xff] }
 0x8b4   :  { %4300 = vmatprep.subr.bf16.mxu0 %v13168_v25  ;;  %4341 = vmatprep.subr.bf16.mxu1 %v13169_v11  ;;  %v13174_v25 = vld [vmem:[#allocation73_spill] sm:$0xff]  ;;  %v13175_v11 = vld [vmem:[#allocation74_spill] sm:$0xff] }
 0x8b5   :  { %v6430_v44 = vpop.eup %6429 }
 0x8b6   :  { %v4050_v8 = vmul.f32 %v6430_v44, %v6426_v51  ;;  %v6432_v19 = vpop.eup %6431 }
 0x8b7   :  { %v4049_v20 = vmul.f32 %v6432_v19, %v10144_v43  ;;  %4301 = vmatpush1.bf16.msra.mxu0 %v13170_v63  ;;  %4342 = vmatpush1.bf16.msra.mxu1 %v13171_v22  ;;  %v13176_v43 = vld [vmem:[#allocation75_spill] sm:$0xff]  ;;  %v13177_v63 = vld [vmem:[#allocation76_spill] sm:$0xff] }
 0x8b8   :  { %4302 = vmatprep.subr.bf16.mxu0 %v13172_v47  ;;  %4343 = vmatprep.subr.bf16.mxu1 %v13173_v21 }
 0x8b9   :  { %v4093_v42 = vpop.f32.mrb[100].mxu0  ;;  %v4134_v15 = vpop.f32.mrb[100].mxu1  ;;  %v10581_v46 = vadd.f32 %v4050_v8, %v4049_v20 }
 0x8ba   :  { %v4141_v17 = vadd.f32 %v4093_v42, %v13174_v25  ;;  %v10585_v51 = vadd.f32 %v4134_v15, %v13175_v11  ;;  %v4095_v7 = vpop.f32.mrb[101].mxu0  ;;  %v4136_v44 = vpop.f32.mrb[101].mxu1  ;;  %v10604_v25 = vld [vmem:[#allocation5 + $0x4] ss:$16 sps:$4 sm:$0xff]   ;;  %v10607_v11 = vld [vmem:[#allocation5 + $0xc] ss:$16 sps:$4 sm:$0xff]  }
 0x8bb   :  { %v4142_v19 = vadd.f32 %v4095_v7, %v13176_v43  ;;  %v4144_v22 = vadd.f32 %v4136_v44, %v13177_v63  ;;  %v4097_v5 = vpop.f32.mrb[102].mxu0  ;;  %v4138_v41 = vpop.f32.mrb[102].mxu1  ;;  %6435 = vtanh.f32 %v10581_v46  ;;  %4303 = vmatpush1.bf16.msra.mxu0 %v10153_v60  ;;  %4344 = vmatpush1.bf16.msra.mxu1 %v10156_v58  ;;  %v13180_v60 = vld [vmem:[#allocation110_spill] sm:$0xff]  ;;  %v13181_v58 = vld [vmem:[#allocation111_spill] sm:$0xff] }
 0x8bc   :  { %v5670_v47 = vmul.f32 -1.442695, %v4141_v17  ;;  %v4098_v8 = vpop.f32.mrb[103].mxu0  ;;  %v4139_v20 = vpop.f32.mrb[103].mxu1  ;;  %4304 = vmatprep.subr.bf16.mxu0 %v10159_v31  ;;  %4345 = vmatprep.subr.bf16.mxu1 %v10162_v57  ;;  %v13178_v41 = vld [vmem:[#allocation108_spill] sm:$0xff]  ;;  %v13179_v5 = vld [vmem:[#allocation109_spill] sm:$0xff] }
 0x8bd   :  { %v5671_v42 = vmul.f32 -1.442695, %v4142_v19  ;;  %v6434_v17 = vpop.eup %6433  ;;  %v13183_v31 = vld [vmem:[#allocation113_spill] sm:$0xff]  ;;  %v10619_v19 = vld [vmem:[#allocation5 + $0x2c] ss:$16 sps:$4 sm:$0xff]  }
 0x8be   :  { %6437 = vpow2.f32 %v5670_v47  ;;  %v10610_v43 = vld [vmem:[#allocation5] ss:$16 sps:$4 sm:$0xff]   ;;  %v10628_v47 = vld [vmem:[#allocation5 + $0x44] ss:$16 sps:$4 sm:$0xff]   ;;  %v10631_v8 = vld [vmem:[#allocation5 + $0x4c] ss:$16 sps:$4 sm:$0xff]  }
 0x8bf   :  { %6439 = vpow2.f32 %v5671_v42  ;;  %4305 = vmatpush1.bf16.msra.mxu0 %v10165_v23  ;;  %4346 = vmatpush1.bf16.msra.mxu1 %v10168_v52  ;;  %v10622_v63 = vld [vmem:[#allocation5 + $0x20] ss:$16 sps:$4 sm:$0xff]  }
 0x8c0   :  { %4306 = vmatprep.subr.bf16.mxu0 %v13178_v41  ;;  %4347 = vmatprep.subr.bf16.mxu1 %v13179_v5  ;;  %6441 = vtanh.f32 %v4144_v22  ;;  %v10625_v22 = vld [vmem:[#allocation5 + $0x28] ss:$16 sps:$4 sm:$0xff]   ;;  %v10634_v42 = vld [vmem:[#allocation5 + $0x40] ss:$16 sps:$4 sm:$0xff]  }
 0x8c1   :  { %v10637_v5 = vld [vmem:[#allocation5 + $0x48] ss:$16 sps:$4 sm:$0xff]  }
 0x8c3   :  { %4307 = vmatpush1.bf16.msra.mxu0 %v13180_v60  ;;  %4348 = vmatpush1.bf16.msra.mxu1 %v13181_v58  ;;  %v10640_v60 = vld [vmem:[#allocation5 + $0x64] ss:$16 sps:$4 sm:$0xff]  }
 0x8c4   :  { %4308 = vmatprep.subr.bf16.mxu0 %v13182_v54  ;;  %4349 = vmatprep.subr.bf16.mxu1 %v13183_v31 }
 0x8c5   :  { %v6436_v57 = vpop.eup %6435 }
 0x8c6   :  { %v4053_v15 = vmul.f32 %v6436_v57, %v6434_v17  ;;  %v10643_v17 = vld [vmem:[#allocation5 + $0x6c] ss:$16 sps:$4 sm:$0xff]   ;;  %v10647_v57 = vld [vmem:[#allocation5 + $0x60] ss:$16 sps:$4 sm:$0xff]  }
 0x8c7   :  { %4309 = vmatpush1.bf16.msra.mxu0 %v10189_v55  ;;  %4350 = vmatpush1.bf16.msra.mxu1 %v10192_v59  ;;  %v10613_v55 = vld [vmem:[#allocation5 + $0x8] ss:$16 sps:$4 sm:$0xff]   ;;  %v10616_v59 = vld [vmem:[#allocation5 + $0x24] ss:$16 sps:$4 sm:$0xff]  }
 0x8c8   :  { %v6438_v21 = vpop.eup %6437  ;;  %v4277_v52 = vpack.c.bf16 %v4053_v15, %v4053_v15  ;;  %4385 = vmatprep.subr.bf16.mxu0 %v10604_v25  ;;  %4426 = vmatprep.subr.bf16.mxu1 %v10607_v11  ;;  %v10650_v15 = vld [vmem:[#allocation5 + $0x68] ss:$16 sps:$4 sm:$0xff]  }
 0x8c9   :  { %v4154_v23 = vadd.f32 1.0, %v6438_v21  ;;  %v6440_v7 = vpop.eup %6439  ;;  %v10653_v21 = vld [vmem:[#allocation5 + $0x84] ss:$16 sps:$4 sm:$0xff]  }
 0x8ca   :  { %v4155_v44 = vadd.f32 1.0, %v6440_v7  ;;  %4311 = vmatmul.mubr.bf16.vlgmr.msra.gmra.mrb[108].mxu0 %v4277_v52  ;;  %4352 = vmatmul.mubr.bf16.vlgmr.msra.gmra.mrb[108].mxu1 %v4277_v52  ;;  %v6442_v20 = vpop.eup %6441  ;;  %v10661_v7 = vld [vmem:[#allocation5 + $0x80] ss:$16 sps:$4 sm:$0xff]  }
 0x8cb   :  { %6443 = vrcp.f32 %v4154_v23  ;;  %4386 = vmatpush1.bf16.msra.mxu0 %v10610_v43  ;;  %4417 = vmatprep.mubr.bf16.mxu0 %v4277_v52  ;;  %13184 = vst [vmem:[#allocation21_spill] sm:$0xff] %v10661_v7 }
 0x8cc   :  { %6445 = vrcp.f32 %v4155_v44  ;;  %4427 = vmatpush1.bf16.msra.mxu1 %v10613_v55  ;;  %4458 = vmatprep.mubr.bf16.mxu1 %v4277_v52  ;;  %v10658_v52 = vld [vmem:[#allocation5 + $0x8c] ss:$16 sps:$4 sm:$0xff]   ;;  %v10667_v44 = vld [vmem:[#allocation5 + $0xa4] ss:$16 sps:$4 sm:$0xff]  }
 0x8cd   :  { %4387 = vmatprep.subr.bf16.mxu0 %v10616_v59  ;;  %4428 = vmatprep.subr.bf16.mxu1 %v10619_v19  ;;  %13186 = vst [vmem:[#allocation23_spill] sm:$0xff] %v10667_v44 }
 0x8cf   :  { %4388 = vmatpush1.bf16.msra.mxu0 %v10622_v63 }
 0x8d0   :  { %4429 = vmatpush1.bf16.msra.mxu1 %v10625_v22  ;;  %4389 = vmatprep.subr.bf16.mxu0 %v10628_v47 }
 0x8d1   :  { %4430 = vmatprep.subr.bf16.mxu1 %v10631_v8 }
 0x8d3   :  { %4390 = vmatpush1.bf16.msra.mxu0 %v10634_v42 }
 0x8d4   :  { %4431 = vmatpush1.bf16.msra.mxu1 %v10637_v5  ;;  %4391 = vmatprep.subr.bf16.mxu0 %v10640_v60 }
 0x8d5   :  { %v6444_v41 = vpop.eup %6443  ;;  %4432 = vmatprep.subr.bf16.mxu1 %v10643_v17 }
 0x8d6   :  { %v4165_v58 = vmul.f32 %v6444_v41, %v6442_v20  ;;  %v6446_v54 = vpop.eup %6445  ;;  %v10670_v20 = vld [vmem:[#allocation5 + $0xac] ss:$16 sps:$4 sm:$0xff]   ;;  %v10673_v41 = vld [vmem:[#allocation5 + $0xa0] ss:$16 sps:$4 sm:$0xff]  }
 0x8d7   :  { %v4164_v31 = vmul.f32 %v6446_v54, %v10214_v26  ;;  %4392 = vmatpush1.bf16.msra.mxu0 %v10647_v57  ;;  %v10664_v26 = vld [vmem:[#allocation5 + $0x88] ss:$16 sps:$4 sm:$0xff]   ;;  %13187 = vst [vmem:[#allocation24_spill] sm:$0xff] %v10670_v20  ;;  %13188 = vst [vmem:[#allocation25_spill] sm:$0xff] %v10673_v41  ;;  %v10679_v54 = vld [vmem:[#allocation5 + $0xc4] ss:$16 sps:$4 sm:$0xff]  }
 0x8d8   :  { %4433 = vmatpush1.bf16.msra.mxu1 %v10650_v15  ;;  %4393 = vmatprep.subr.bf16.mxu0 %v10653_v21  ;;  %13185 = vst [vmem:[#allocation22_spill] sm:$0xff] %v10664_v26  ;;  %13190 = vst [vmem:[#allocation27_spill] sm:$0xff] %v10679_v54 }
 0x8d9   :  { %v10656_v23 = vadd.f32 %v4165_v58, %v4164_v31  ;;  %4434 = vmatprep.subr.bf16.mxu1 %v10658_v52  ;;  %v10676_v58 = vld [vmem:[#allocation5 + $0xa8] ss:$16 sps:$4 sm:$0xff]   ;;  %v10682_v31 = vld [vmem:[#allocation5 + $0xcc] ss:$16 sps:$4 sm:$0xff]  }
 0x8da   :  { %13189 = vst [vmem:[#allocation26_spill] sm:$0xff] %v10676_v58  ;;  %13191 = vst [vmem:[#allocation28_spill] sm:$0xff] %v10682_v31 }
 0x8db   :  { %4394 = vmatpush1.bf16.msra.mxu0 %v10661_v7  ;;  %v10795_v7 = vld [vmem:[#allocation5 + $0x1e0] ss:$16 sps:$4 sm:$0xff]  }
 0x8dc   :  { %4435 = vmatpush1.bf16.msra.mxu1 %v10664_v26  ;;  %4395 = vmatprep.subr.bf16.mxu0 %v10667_v44  ;;  %v10685_v44 = vld [vmem:[#allocation5 + $0xc0] ss:$16 sps:$4 sm:$0xff]   ;;  %v10689_v26 = vld [vmem:[#allocation5 + $0xc8] ss:$16 sps:$4 sm:$0xff]   ;;  %13228 = vst [vmem:[#allocation53_spill] sm:$0xff] %v10795_v7 }
 0x8dd   :  { %4436 = vmatprep.subr.bf16.mxu1 %v10670_v20  ;;  %13192 = vst [vmem:[#allocation29_spill] sm:$0xff] %v10685_v44  ;;  %v5672_v20 = vmul.f32 -1.442695, %v10585_v51  ;;  %13193 = vst [vmem:[#allocation30_spill] sm:$0xff] %v10689_v26  ;;  %v10704_v51 = vld [vmem:[#allocation5 + $0x104] ss:$16 sps:$4 sm:$0xff]  }
 0x8de   :  { %13198 = vst [vmem:[#allocation33_spill] sm:$0xff] %v10704_v51 }
 0x8df   :  { %4396 = vmatpush1.bf16.msra.mxu0 %v10673_v41  ;;  %v10692_v41 = vld [vmem:[#allocation5 + $0xe4] ss:$16 sps:$4 sm:$0xff]   ;;  %6447 = vpow2.f32 %v5672_v20 }
 0x8e0   :  { %4437 = vmatpush1.bf16.msra.mxu1 %v10676_v58  ;;  %4397 = vmatprep.subr.bf16.mxu0 %v10679_v54  ;;  %13194 = vst [vmem:[#allocation31_spill] sm:$0xff] %v10692_v41  ;;  %v10695_v58 = vld [vmem:[#allocation5 + $0xec] ss:$16 sps:$4 sm:$0xff]   ;;  %v10698_v54 = vld [vmem:[#allocation5 + $0xe0] ss:$16 sps:$4 sm:$0xff]   ;;  %6449 = vtanh.f32 %v10656_v23 }
 0x8e1   :  { %4438 = vmatprep.subr.bf16.mxu1 %v10682_v31  ;;  %13195 = vst [vmem:[#allocation32_spill] sm:$0xff] %v10695_v58  ;;  %13196 = vst [vmem:[#allocation55_spill] sm:$0xff] %v10698_v54  ;;  %v10716_v20 = vld [vmem:[#allocation5 + $0x124] ss:$16 sps:$4 sm:$0xff]   ;;  %v10743_v31 = vld [vmem:[#allocation5 + $0x16c] ss:$16 sps:$4 sm:$0xff]  }
 0x8e2   :  { %13202 = vst [vmem:[#allocation37_spill] sm:$0xff] %v10716_v20  ;;  %13211 = vst [vmem:[#allocation68_spill] sm:$0xff] %v10743_v31 }
 0x8e3   :  { %4398 = vmatpush1.bf16.msra.mxu0 %v10685_v44  ;;  %v10701_v44 = vld [vmem:[#allocation5 + $0xe8] ss:$16 sps:$4 sm:$0xff]  }
 0x8e4   :  { %4439 = vmatpush1.bf16.msra.mxu1 %v10689_v26  ;;  %4399 = vmatprep.subr.bf16.mxu0 %v10692_v41  ;;  %13197 = vst [vmem:[#allocation56_spill] sm:$0xff] %v10701_v44  ;;  %v10707_v26 = vld [vmem:[#allocation5 + $0x10c] ss:$16 sps:$4 sm:$0xff]   ;;  %v10710_v41 = vld [vmem:[#allocation5 + $0x100] ss:$16 sps:$4 sm:$0xff]  }
 0x8e5   :  { %4440 = vmatprep.subr.bf16.mxu1 %v10695_v58  ;;  %13199 = vst [vmem:[#allocation34_spill] sm:$0xff] %v10707_v26  ;;  %13200 = vst [vmem:[#allocation35_spill] sm:$0xff] %v10710_v41  ;;  %v10713_v58 = vld [vmem:[#allocation5 + $0x108] ss:$16 sps:$4 sm:$0xff]  }
 0x8e6   :  { %13201 = vst [vmem:[#allocation36_spill] sm:$0xff] %v10713_v58 }
 0x8e7   :  { %4400 = vmatpush1.bf16.msra.mxu0 %v10698_v54  ;;  %v10734_v54 = vld [vmem:[#allocation5 + $0x140] ss:$16 sps:$4 sm:$0xff]  }
 0x8e8   :  { %4441 = vmatpush1.bf16.msra.mxu1 %v10701_v44  ;;  %4401 = vmatprep.subr.bf16.mxu0 %v10704_v51  ;;  %v10719_v44 = vld [vmem:[#allocation5 + $0x12c] ss:$16 sps:$4 sm:$0xff]   ;;  %v10722_v51 = vld [vmem:[#allocation5 + $0x120] ss:$16 sps:$4 sm:$0xff]   ;;  %13208 = vst [vmem:[#allocation66_spill] sm:$0xff] %v10734_v54 }
 0x8e9   :  { %4442 = vmatprep.subr.bf16.mxu1 %v10707_v26  ;;  %13203 = vst [vmem:[#allocation38_spill] sm:$0xff] %v10719_v44  ;;  %13204 = vst [vmem:[#allocation39_spill] sm:$0xff] %v10722_v51  ;;  %v10725_v26 = vld [vmem:[#allocation5 + $0x128] ss:$16 sps:$4 sm:$0xff]  }
 0x8ea   :  { %13205 = vst [vmem:[#allocation40_spill] sm:$0xff] %v10725_v26 }
 0x8eb   :  { %4402 = vmatpush1.bf16.msra.mxu0 %v10710_v41  ;;  %v10728_v41 = vld [vmem:[#allocation5 + $0x144] ss:$16 sps:$4 sm:$0xff]  }
 0x8ec   :  { %4443 = vmatpush1.bf16.msra.mxu1 %v10713_v58  ;;  %4403 = vmatprep.subr.bf16.mxu0 %v10716_v20  ;;  %13206 = vst [vmem:[#allocation41_spill] sm:$0xff] %v10728_v41  ;;  %v10731_v58 = vld [vmem:[#allocation5 + $0x14c] ss:$16 sps:$4 sm:$0xff]   ;;  %v6448_v20 = vpop.eup %6447 }
 0x8ed   :  { %4444 = vmatprep.subr.bf16.mxu1 %v10719_v44  ;;  %13207 = vst [vmem:[#allocation65_spill] sm:$0xff] %v10731_v58  ;;  %v10737_v44 = vld [vmem:[#allocation5 + $0x148] ss:$16 sps:$4 sm:$0xff]  }
 0x8ee   :  { %13209 = vst [vmem:[#allocation143_spill] sm:$0xff] %v10737_v44 }
 0x8ef   :  { %4404 = vmatpush1.bf16.msra.mxu0 %v10722_v51  ;;  %v10740_v51 = vld [vmem:[#allocation5 + $0x164] ss:$16 sps:$4 sm:$0xff]  }
 0x8f0   :  { %4445 = vmatpush1.bf16.msra.mxu1 %v10725_v26  ;;  %4405 = vmatprep.subr.bf16.mxu0 %v10728_v41  ;;  %13210 = vst [vmem:[#allocation67_spill] sm:$0xff] %v10740_v51  ;;  %v4156_v26 = vadd.f32 1.0, %v6448_v20  ;;  %v10756_v20 = vld [vmem:[#allocation5 + $0x18c] ss:$16 sps:$4 sm:$0xff]   ;;  %v10783_v41 = vld [vmem:[#allocation5 + $0x1c0] ss:$16 sps:$4 sm:$0xff]  }
 0x8f1   :  { %4446 = vmatprep.subr.bf16.mxu1 %v10731_v58  ;;  %v10747_v58 = vld [vmem:[#allocation5 + $0x160] ss:$16 sps:$4 sm:$0xff]   ;;  %13215 = vst [vmem:[#allocation44_spill] sm:$0xff] %v10756_v20  ;;  %13224 = vst [vmem:[#allocation62_spill] sm:$0xff] %v10783_v41 }
 0x8f2   :  { %13212 = vst [vmem:[#allocation42_spill] sm:$0xff] %v10747_v58  ;;  %6451 = vrcp.f32 %v4156_v26  ;;  %v10771_v26 = vld [vmem:[#allocation5 + $0x1a0] ss:$16 sps:$4 sm:$0xff]  }
 0x8f3   :  { %4406 = vmatpush1.bf16.msra.mxu0 %v10734_v54  ;;  %v10750_v54 = vld [vmem:[#allocation5 + $0x168] ss:$16 sps:$4 sm:$0xff]   ;;  %13220 = vst [vmem:[#allocation49_spill] sm:$0xff] %v10771_v26 }
 0x8f4   :  { %4447 = vmatpush1.bf16.msra.mxu1 %v10737_v44  ;;  %4407 = vmatprep.subr.bf16.mxu0 %v10740_v51  ;;  %13213 = vst [vmem:[#allocation43_spill] sm:$0xff] %v10750_v54  ;;  %v10753_v44 = vld [vmem:[#allocation5 + $0x184] ss:$16 sps:$4 sm:$0xff]   ;;  %v10762_v51 = vld [vmem:[#allocation5 + $0x188] ss:$16 sps:$4 sm:$0xff]  }
 0x8f5   :  { %4448 = vmatprep.subr.bf16.mxu1 %v10743_v31  ;;  %13214 = vst [vmem:[#allocation54_spill] sm:$0xff] %v10753_v44  ;;  %v10759_v31 = vld [vmem:[#allocation5 + $0x180] ss:$16 sps:$4 sm:$0xff]   ;;  %13217 = vst [vmem:[#allocation46_spill] sm:$0xff] %v10762_v51 }
 0x8f6   :  { %13216 = vst [vmem:[#allocation45_spill] sm:$0xff] %v10759_v31 }
 0x8f7   :  { %4408 = vmatpush1.bf16.msra.mxu0 %v10747_v58  ;;  %v10765_v58 = vld [vmem:[#allocation5 + $0x1a4] ss:$16 sps:$4 sm:$0xff]  }
 0x8f8   :  { %4449 = vmatpush1.bf16.msra.mxu1 %v10750_v54  ;;  %4409 = vmatprep.subr.bf16.mxu0 %v10753_v44  ;;  %13218 = vst [vmem:[#allocation47_spill] sm:$0xff] %v10765_v58  ;;  %v10768_v54 = vld [vmem:[#allocation5 + $0x1ac] ss:$16 sps:$4 sm:$0xff]  }
 0x8f9   :  { %4450 = vmatprep.subr.bf16.mxu1 %v10756_v20  ;;  %13219 = vst [vmem:[#allocation48_spill] sm:$0xff] %v10768_v54  ;;  %v10774_v20 = vld [vmem:[#allocation5 + $0x1a8] ss:$16 sps:$4 sm:$0xff]   ;;  %v10780_v44 = vld [vmem:[#allocation5 + $0x1cc] ss:$16 sps:$4 sm:$0xff]  }
 0x8fa   :  { %13221 = vst [vmem:[#allocation50_spill] sm:$0xff] %v10774_v20  ;;  %13223 = vst [vmem:[#allocation61_spill] sm:$0xff] %v10780_v44 }
 0x8fb   :  { %4410 = vmatpush1.bf16.msra.mxu0 %v10759_v31  ;;  %v10777_v31 = vld [vmem:[#allocation5 + $0x1c4] ss:$16 sps:$4 sm:$0xff]  }
 0x8fc   :  { %4451 = vmatpush1.bf16.msra.mxu1 %v10762_v51  ;;  %4411 = vmatprep.subr.bf16.mxu0 %v10765_v58  ;;  %13222 = vst [vmem:[#allocation51_spill] sm:$0xff] %v10777_v31  ;;  %v6450_v51 = vpop.eup %6449 }
 0x8fd   :  { %4452 = vmatprep.subr.bf16.mxu1 %v10768_v54  ;;  %v6452_v58 = vpop.eup %6451  ;;  %v10786_v54 = vld [vmem:[#allocation5 + $0x1c8] ss:$16 sps:$4 sm:$0xff]  }
 0x8fe   :  { %13225 = vst [vmem:[#allocation63_spill] sm:$0xff] %v10786_v54 }
 0x8ff   :  { %4412 = vmatpush1.bf16.msra.mxu0 %v10771_v26  ;;  %v10789_v26 = vld [vmem:[#allocation5 + $0x1e4] ss:$16 sps:$4 sm:$0xff]  }
 0x900   :  { %4453 = vmatpush1.bf16.msra.mxu1 %v10774_v20  ;;  %4413 = vmatprep.subr.bf16.mxu0 %v10777_v31  ;;  %13226 = vst [vmem:[#allocation64_spill] sm:$0xff] %v10789_v26  ;;  %v4168_v20 = vmul.f32 %v6452_v58, %v6450_v51  ;;  %v10792_v31 = vld [vmem:[#allocation5 + $0x1ec] ss:$16 sps:$4 sm:$0xff]   ;;  %v7157_v58 = vld [vmem:[#allocation3] ss:$16 sps:$4 sm:$0xff]  }
 0x901   :  { %4454 = vmatprep.subr.bf16.mxu1 %v10780_v44  ;;  %13227 = vst [vmem:[#allocation52_spill] sm:$0xff] %v10792_v31  ;;  %v10798_v44 = vld [vmem:[#allocation5 + $0x1e8] ss:$16 sps:$4 sm:$0xff]  }
 0x902   :  { %13229 = vst [vmem:[#allocation81_spill] sm:$0xff] %v10798_v44  ;;  %v7158_v51 = vld [vmem:[#allocation3 + $0x8] ss:$16 sps:$4 sm:$0xff]  }
 0x903   :  { %4414 = vmatpush1.bf16.msra.mxu0 %v10783_v41  ;;  %v4384_v41 = vpack.c.bf16 %v4168_v20, %v4168_v20  ;;  %v7162_v20 = vld [vmem:[#allocation3 + $0x28] ss:$16 sps:$4 sm:$0xff]  }
 0x904   :  { %4455 = vmatpush1.bf16.msra.mxu1 %v10786_v54  ;;  %4415 = vmatprep.subr.bf16.mxu0 %v10789_v26  ;;  %v7160_v26 = vld [vmem:[#allocation3 + $0x2c] ss:$16 sps:$4 sm:$0xff]   ;;  %v7170_v54 = vld [vmem:[#allocation3 + $0x68] ss:$16 sps:$4 sm:$0xff]  }
 0x905   :  { %4456 = vmatprep.subr.bf16.mxu1 %v10792_v31  ;;  %v7159_v31 = vld [vmem:[#allocation3 + $0x24] ss:$16 sps:$4 sm:$0xff]  }
 0x907   :  { %4416 = vmatpush1.bf16.msra.mxu0 %v10795_v7  ;;  %v7165_v7 = vld [vmem:[#allocation3 + $0x40] ss:$16 sps:$4 sm:$0xff]  }
 0x908   :  { %4457 = vmatpush1.bf16.msra.mxu1 %v10798_v44  ;;  %4496 = vmatprep.subr.bf16.mxu0 %v10264_v39  ;;  %v7161_v44 = vld [vmem:[#allocation3 + $0x20] ss:$16 sps:$4 sm:$0xff]   ;;  %v7163_v39 = vld [vmem:[#allocation3 + $0x44] ss:$16 sps:$4 sm:$0xff]  }
 0x909   :  { %4537 = vmatprep.subr.bf16.mxu1 %v10267_v40  ;;  %v7164_v40 = vld [vmem:[#allocation3 + $0x4c] ss:$16 sps:$4 sm:$0xff]  }
 0x90a   :  { %4418 = vmatmul.mubr.bf16.vlgmr.msra.gmra.mrb[112].mxu0 %v4384_v41 }
 0x90b   :  { %4459 = vmatmul.mubr.bf16.vlgmr.msra.gmra.mrb[112].mxu1 %v4384_v41  ;;  %4497 = vmatpush1.bf16.msra.mxu0 %v7157_v58  ;;  %v7166_v58 = vld [vmem:[#allocation3 + $0x48] ss:$16 sps:$4 sm:$0xff]  }
 0x90c   :  { %4538 = vmatpush1.bf16.msra.mxu1 %v7158_v51  ;;  %4498 = vmatprep.subr.bf16.mxu0 %v7159_v31  ;;  %v7167_v51 = vld [vmem:[#allocation3 + $0x64] ss:$16 sps:$4 sm:$0xff]   ;;  %v7168_v31 = vld [vmem:[#allocation3 + $0x6c] ss:$16 sps:$4 sm:$0xff]  }
 0x90d   :  { %4539 = vmatprep.subr.bf16.mxu1 %v7160_v26  ;;  %4528 = vmatprep.mubr.bf16.mxu0 %v13059_v10  ;;  %v7169_v26 = vld [vmem:[#allocation3 + $0x60] ss:$16 sps:$4 sm:$0xff]  }
 0x90e   :  { %4569 = vmatprep.mubr.bf16.mxu1 %v13059_v10  ;;  %v7171_v10 = vld [vmem:[#allocation3 + $0x84] ss:$16 sps:$4 sm:$0xff]  }
 0x90f   :  { %4499 = vmatpush1.bf16.msra.mxu0 %v7161_v44  ;;  %v7172_v44 = vld [vmem:[#allocation3 + $0x8c] ss:$16 sps:$4 sm:$0xff]  }
 0x910   :  { %4540 = vmatpush1.bf16.msra.mxu1 %v7162_v20  ;;  %4500 = vmatprep.subr.bf16.mxu0 %v7163_v39  ;;  %v7173_v20 = vld [vmem:[#allocation3 + $0x80] ss:$16 sps:$4 sm:$0xff]   ;;  %v7174_v39 = vld [vmem:[#allocation3 + $0x88] ss:$16 sps:$4 sm:$0xff]  }
 0x911   :  { %4541 = vmatprep.subr.bf16.mxu1 %v7164_v40  ;;  %v7175_v40 = vld [vmem:[#allocation3 + $0xa4] ss:$16 sps:$4 sm:$0xff]  }
 0x913   :  { %4501 = vmatpush1.bf16.msra.mxu0 %v7165_v7  ;;  %v7176_v7 = vld [vmem:[#allocation3 + $0xac] ss:$16 sps:$4 sm:$0xff]  }
 0x914   :  { %4542 = vmatpush1.bf16.msra.mxu1 %v7166_v58  ;;  %4502 = vmatprep.subr.bf16.mxu0 %v7167_v51  ;;  %v7177_v58 = vld [vmem:[#allocation3 + $0xa0] ss:$16 sps:$4 sm:$0xff]   ;;  %v7178_v51 = vld [vmem:[#allocation3 + $0xa8] ss:$16 sps:$4 sm:$0xff]  }
 0x915   :  { %4543 = vmatprep.subr.bf16.mxu1 %v7168_v31  ;;  %v13257_v31 = vld [vmem:[#allocation58_spill] sm:$0xff] }
 0x917   :  { %4503 = vmatpush1.bf16.msra.mxu0 %v7169_v26  ;;  %v13258_v26 = vld [vmem:[#allocation59_spill] sm:$0xff] }
 0x918   :  { %4544 = vmatpush1.bf16.msra.mxu1 %v7170_v54  ;;  %4504 = vmatprep.subr.bf16.mxu0 %v7171_v10  ;;  %v13256_v54 = vld [vmem:[#allocation57_spill] sm:$0xff]  ;;  %v13259_v10 = vld [vmem:[#allocation60_spill] sm:$0xff] }
 0x919   :  { %4545 = vmatprep.subr.bf16.mxu1 %v7172_v44  ;;  %v13260_v44 = vld [vmem:[#allocation136_spill] sm:$0xff] }
 0x91b   :  { %4505 = vmatpush1.bf16.msra.mxu0 %v7173_v20  ;;  %v13261_v20 = vld [vmem:[#allocation137_spill] sm:$0xff] }
 0x91c   :  { %4546 = vmatpush1.bf16.msra.mxu1 %v7174_v39  ;;  %4506 = vmatprep.subr.bf16.mxu0 %v7175_v40  ;;  %v13262_v39 = vld [vmem:[#allocation138_spill] sm:$0xff]  ;;  %v13263_v40 = vld [vmem:[#allocation139_spill] sm:$0xff] }
 0x91d   :  { %4547 = vmatprep.subr.bf16.mxu1 %v7176_v7  ;;  %v13264_v7 = vld [vmem:[#allocation144_spill] sm:$0xff] }
 0x91f   :  { %4507 = vmatpush1.bf16.msra.mxu0 %v7177_v58  ;;  %v13265_v58 = vld [vmem:[#allocation145_spill] sm:$0xff] }
 0x920   :  { %4548 = vmatpush1.bf16.msra.mxu1 %v7178_v51  ;;  %4508 = vmatprep.subr.bf16.mxu0 %v10294_v62  ;;  %v13230_v62 = vld [vmem:[#allocation114_spill] sm:$0xff] }
 0x921   :  { %4549 = vmatprep.subr.bf16.mxu1 %v10297_v24  ;;  %v13231_v24 = vld [vmem:[#allocation115_spill] sm:$0xff] }
 0x923   :  { %4509 = vmatpush1.bf16.msra.mxu0 %v10300_v12  ;;  %v13232_v12 = vld [vmem:[#allocation116_spill] sm:$0xff] }
 0x924   :  { %4550 = vmatpush1.bf16.msra.mxu1 %v10303_v0  ;;  %4510 = vmatprep.subr.bf16.mxu0 %v10306_v49  ;;  %v13233_v0 = vld [vmem:[#allocation117_spill] sm:$0xff]  ;;  %v13234_v49 = vld [vmem:[#allocation118_spill] sm:$0xff] }
 0x925   :  { %4551 = vmatprep.subr.bf16.mxu1 %v10309_v30  ;;  %v13235_v30 = vld [vmem:[#allocation119_spill] sm:$0xff] }
 0x927   :  { %4511 = vmatpush1.bf16.msra.mxu0 %v10312_v28  ;;  %v13236_v28 = vld [vmem:[#allocation120_spill] sm:$0xff] }
 0x928   :  { %4552 = vmatpush1.bf16.msra.mxu1 %v10315_v9  ;;  %4608 = vmatprep.subr.bf16.mxu0 %v10318_v18  ;;  %v13237_v9 = vld [vmem:[#allocation121_spill] sm:$0xff]  ;;  %v13238_v18 = vld [vmem:[#allocation122_spill] sm:$0xff] }
 0x929   :  { %4649 = vmatprep.subr.bf16.mxu1 %v10321_v2  ;;  %v13239_v2 = vld [vmem:[#allocation123_spill] sm:$0xff] }
 0x92a   :  { %4529 = vmatmul.mubr.bf16.vlgmr.msra.gmra.mrb[116].mxu0 %v4384_v41 }
 0x92b   :  { %4570 = vmatmul.mubr.bf16.vlgmr.msra.gmra.mrb[116].mxu1 %v4384_v41  ;;  %4609 = vmatpush1.bf16.msra.mxu0 %v10324_v56  ;;  %v13240_v56 = vld [vmem:[#allocation124_spill] sm:$0xff]  ;;  %v13255_v41 = vld [vmem:[#allocation135_spill] sm:$0xff] }
 0x92c   :  { %4650 = vmatpush1.bf16.msra.mxu1 %v10327_v36  ;;  %4610 = vmatprep.subr.bf16.mxu0 %v10330_v27  ;;  %v13241_v36 = vld [vmem:[#allocation125_spill] sm:$0xff]  ;;  %v13242_v27 = vld [vmem:[#allocation126_spill] sm:$0xff] }
 0x92d   :  { %4651 = vmatprep.subr.bf16.mxu1 %v10333_v45  ;;  %v13243_v45 = vld [vmem:[#allocation127_spill] sm:$0xff] }
 0x92f   :  { %4611 = vmatpush1.bf16.msra.mxu0 %v10336_v33  ;;  %v13244_v33 = vld [vmem:[#allocation69_spill] sm:$0xff] }
 0x930   :  { %4652 = vmatpush1.bf16.msra.mxu1 %v10339_v48  ;;  %4612 = vmatprep.subr.bf16.mxu0 %v10342_v34  ;;  %v13245_v48 = vld [vmem:[#allocation70_spill] sm:$0xff]  ;;  %v13246_v34 = vld [vmem:[#allocation71_spill] sm:$0xff] }
 0x931   :  { %4653 = vmatprep.subr.bf16.mxu1 %v10345_v16  ;;  %v13247_v16 = vld [vmem:[#allocation72_spill] sm:$0xff] }
 0x933   :  { %4613 = vmatpush1.bf16.msra.mxu0 %v10348_v35  ;;  %v13248_v35 = vld [vmem:[#allocation128_spill] sm:$0xff] }
 0x934   :  { %4654 = vmatpush1.bf16.msra.mxu1 %v10351_v32  ;;  %4614 = vmatprep.subr.bf16.mxu0 %v10354_v1  ;;  %v13249_v32 = vld [vmem:[#allocation129_spill] sm:$0xff]  ;;  %v13250_v1 = vld [vmem:[#allocation130_spill] sm:$0xff] }
 0x935   :  { %4655 = vmatprep.subr.bf16.mxu1 %v10357_v4  ;;  %v13251_v4 = vld [vmem:[#allocation131_spill] sm:$0xff] }
 0x937   :  { %4615 = vmatpush1.bf16.msra.mxu0 %v10360_v14  ;;  %v13252_v14 = vld [vmem:[#allocation132_spill] sm:$0xff] }
 0x938   :  { %4656 = vmatpush1.bf16.msra.mxu1 %v10363_v50  ;;  %4616 = vmatprep.subr.bf16.mxu0 %v10366_v53  ;;  %v13253_v50 = vld [vmem:[#allocation133_spill] sm:$0xff]  ;;  %v13254_v53 = vld [vmem:[#allocation134_spill] sm:$0xff] }
 0x939   :  { %4657 = vmatprep.subr.bf16.mxu1 %v13230_v62 }
 0x93b   :  { %4617 = vmatpush1.bf16.msra.mxu0 %v13231_v24  ;;  %v13266_v24 = vld [vmem:[#allocation146_spill] sm:$0xff] }
 0x93c   :  { %4658 = vmatpush1.bf16.msra.mxu1 %v13232_v12  ;;  %4618 = vmatprep.subr.bf16.mxu0 %v13233_v0  ;;  %v13267_v12 = vld [vmem:[#allocation140_spill] sm:$0xff] }
 0x93d   :  { %4659 = vmatprep.subr.bf16.mxu1 %v13234_v49 }
 0x93f   :  { %4619 = vmatpush1.bf16.msra.mxu0 %v13235_v30 }
 0x940   :  { %4660 = vmatpush1.bf16.msra.mxu1 %v13236_v28  ;;  %4620 = vmatprep.subr.bf16.mxu0 %v13237_v9  ;;  %v13268_v28 = vld [vmem:[#allocation141_spill] sm:$0xff] }
 0x941   :  { %4661 = vmatprep.subr.bf16.mxu1 %v13238_v18 }
 0x943   :  { %4621 = vmatpush1.bf16.msra.mxu0 %v13239_v2 }
 0x944   :  { %4662 = vmatpush1.bf16.msra.mxu1 %v13240_v56  ;;  %4622 = vmatprep.subr.bf16.mxu0 %v13241_v36  ;;  %v13269_v56 = vld [vmem:[#allocation147_spill] sm:$0xff] }
 0x945   :  { %4663 = vmatprep.subr.bf16.mxu1 %v13242_v27 }
 0x947   :  { %4623 = vmatpush1.bf16.msra.mxu0 %v13243_v45 }
 0x948   :  { %4664 = vmatpush1.bf16.msra.mxu1 %v13244_v33  ;;  %4624 = vmatprep.subr.bf16.mxu0 %v13245_v48  ;;  %v13270_v33 = vld [vmem:[#allocation148_spill] sm:$0xff]  ;;  %v13271_v48 = vld [vmem:[#allocation149_spill] sm:$0xff] }
 0x949   :  { %4665 = vmatprep.subr.bf16.mxu1 %v13246_v34 }
 0x94b   :  { %4625 = vmatpush1.bf16.msra.mxu0 %v13247_v16  ;;  %v13272_v16 = vld [vmem:[#allocation13_spill] sm:$0xff] }
 0x94c   :  { %4666 = vmatpush1.bf16.msra.mxu1 %v13248_v35  ;;  %4626 = vmatprep.subr.bf16.mxu0 %v13249_v32  ;;  %v13273_v35 = vld [vmem:[#allocation14_spill] sm:$0xff]  ;;  %v13274_v32 = vld [vmem:[#allocation15_spill] sm:$0xff] }
 0x94d   :  { %4667 = vmatprep.subr.bf16.mxu1 %v13250_v1  ;;  %v13275_v1 = vld [vmem:[#allocation16_spill] sm:$0xff] }
 0x94f   :  { %4627 = vmatpush1.bf16.msra.mxu0 %v13251_v4  ;;  %v13276_v4 = vld [vmem:[#allocation17_spill] sm:$0xff] }
 0x950   :  { %4668 = vmatpush1.bf16.msra.mxu1 %v13252_v14  ;;  %4628 = vmatprep.subr.bf16.mxu0 %v13253_v50  ;;  %v13277_v14 = vld [vmem:[#allocation142_spill] sm:$0xff] }
 0x951   :  { %4669 = vmatprep.subr.bf16.mxu1 %v13254_v53  ;;  %v13278_v53 = vld [vmem:[#allocation18_spill] sm:$0xff] }
 0x953   :  { %4629 = vmatpush1.bf16.msra.mxu0 %v13255_v41  ;;  %v13279_v41 = vld [vmem:[#allocation19_spill] sm:$0xff] }
 0x954   :  { %4670 = vmatpush1.bf16.msra.mxu1 %v13256_v54  ;;  %4630 = vmatprep.subr.bf16.mxu0 %v13257_v31  ;;  %v10880_v54 = vld [vmem:[#allocation7 + $0x4] ss:$16 sps:$4 sm:$0xff]  }
 0x955   :  { %4671 = vmatprep.subr.bf16.mxu1 %v13258_v26  ;;  %v10884_v26 = vld [vmem:[#allocation7 + $0xc] ss:$16 sps:$4 sm:$0xff]  }
 0x957   :  { %4631 = vmatpush1.bf16.msra.mxu0 %v13259_v10 }
 0x958   :  { %4672 = vmatpush1.bf16.msra.mxu1 %v13260_v44  ;;  %4632 = vmatprep.subr.bf16.mxu0 %v13261_v20 }
 0x959   :  { %4673 = vmatprep.subr.bf16.mxu1 %v13262_v39 }
 0x95b   :  { %4633 = vmatpush1.bf16.msra.mxu0 %v13263_v40 }
 0x95c   :  { %4674 = vmatpush1.bf16.msra.mxu1 %v13264_v7  ;;  %4634 = vmatprep.subr.bf16.mxu0 %v13265_v58 }
 0x95d   :  { %v4205_v51 = vpop.f32.mrb[104].mxu0  ;;  %v4246_v62 = vpop.f32.mrb[104].mxu1  ;;  %4675 = vmatprep.subr.bf16.mxu1 %v13266_v24 }
 0x95e   :  { %v4206_v0 = vadd.f32 %v4205_v51, %v13267_v12  ;;  %v4207_v49 = vpop.f32.mrb[105].mxu0  ;;  %v4248_v30 = vpop.f32.mrb[105].mxu1  ;;  %v4247_v50 = vadd.f32 %v4246_v62, %v13277_v14 }
 0x95f   :  { %v4208_v9 = vadd.f32 %v4207_v49, %v13268_v28  ;;  %v4209_v18 = vpop.f32.mrb[106].mxu0  ;;  %v4250_v2 = vpop.f32.mrb[106].mxu1  ;;  %4635 = vmatpush1.bf16.msra.mxu0 %v13269_v56  ;;  %v4249_v31 = vadd.f32 %v4248_v30, %v13122_v38  ;;  %v13280_v49 = vld [vmem:[#allocation20_spill] sm:$0xff] }
 0x960   :  { %v5673_v36 = vmul.f32 -1.442695, %v4206_v0  ;;  %v4210_v27 = vpop.f32.mrb[107].mxu0  ;;  %v4251_v45 = vpop.f32.mrb[107].mxu1  ;;  %4676 = vmatpush1.bf16.msra.mxu1 %v13270_v33  ;;  %4636 = vmatprep.subr.bf16.mxu0 %v13271_v48  ;;  %v5675_v10 = vmul.f32 -1.442695, %v4247_v50 }
 0x961   :  { %v5674_v34 = vmul.f32 -1.442695, %v4208_v9  ;;  %4677 = vmatprep.subr.bf16.mxu1 %v13272_v16 }
 0x962   :  { %6453 = vpow2.f32 %v5673_v36 }
 0x963   :  { %4637 = vmatpush1.bf16.msra.mxu0 %v13273_v35  ;;  %6455 = vpow2.f32 %v5674_v34 }
 0x964   :  { %4678 = vmatpush1.bf16.msra.mxu1 %v13274_v32  ;;  %4638 = vmatprep.subr.bf16.mxu0 %v13275_v1  ;;  %6457 = vtanh.f32 %v4249_v31 }
 0x965   :  { %4679 = vmatprep.subr.bf16.mxu1 %v13276_v4  ;;  %6459 = vpow2.f32 %v5675_v10 }
 0x967   :  { %4639 = vmatpush1.bf16.msra.mxu0 %v13278_v53 }
 0x968   :  { %4680 = vmatpush1.bf16.msra.mxu1 %v13279_v41  ;;  %4715 = vmatprep.subr.bf16.mxu0 %v10880_v54 }
 0x969   :  { %4756 = vmatprep.subr.bf16.mxu1 %v10884_v26 }
 0x96c   :  { %v6454_v44 = vpop.eup %6453 }
 0x96d   :  { %v4262_v20 = vadd.f32 1.0, %v6454_v44  ;;  %v6456_v39 = vpop.eup %6455 }
 0x96e   :  { %v4263_v40 = vadd.f32 1.0, %v6456_v39  ;;  %v6458_v7 = vpop.eup %6457 }
 0x96f   :  { %6461 = vrcp.f32 %v4262_v20  ;;  %v6460_v58 = vpop.eup %6459 }
 0x970   :  { %6463 = vrcp.f32 %v4263_v40  ;;  %v4264_v0 = vadd.f32 1.0, %v6460_v58 }
 0x972   :  { %6465 = vrcp.f32 %v4264_v0 }
 0x979   :  { %v6462_v51 = vpop.eup %6461 }
 0x97a   :  { %v4273_v62 = vmul.f32 %v6462_v51, %v6458_v7  ;;  %v6464_v24 = vpop.eup %6463 }
 0x97b   :  { %v4272_v30 = vmul.f32 %v6464_v24, %v13280_v49 }
 0x97c   :  { %v6466_v18 = vpop.eup %6465 }
 0x97d   :  { %v10888_v9 = vadd.f32 %v4273_v62, %v4272_v30 }
 0x97f   :  { %6467 = vtanh.f32 %v10888_v9 }
 0x989   :  { %v6468_v2 = vpop.eup %6467 }
 0x98a   :  { %v4276_v56 = vmul.f32 %v6468_v2, %v6466_v18 }
 0x98c   :  { %v4607_v36 = vpack.c.bf16 %v4276_v56, %v4276_v56 }
 0x98e   :  { %4640 = vmatprep.mubr.bf16.mxu0 %v4607_v36  ;;  %4681 = vmatprep.mubr.bf16.mxu1 %v4607_v36 }
 0x99d   :  { %v4312_v27 = vpop.f32.mrb[108].mxu0  ;;  %v4353_v45 = vpop.f32.mrb[108].mxu1 }
 0x99e   :  { %v4313_v33 = vadd.f32 %v4312_v27, %v12619_v29  ;;  %v4314_v48 = vpop.f32.mrb[109].mxu0  ;;  %v4355_v34 = vpop.f32.mrb[109].mxu1  ;;  %v4354_v41 = vadd.f32 %v4353_v45, %v12621_v3  ;;  %v10899_v27 = vld [vmem:[#allocation7] ss:$16 sps:$4 sm:$0xff]   ;;  %v10902_v45 = vld [vmem:[#allocation7 + $0x8] ss:$16 sps:$4 sm:$0xff]  }
 0x99f   :  { %v4315_v16 = vadd.f32 %v4314_v48, %v12620_v37  ;;  %v4316_v35 = vpop.f32.mrb[110].mxu0  ;;  %v4357_v32 = vpop.f32.mrb[110].mxu1  ;;  %v4356_v31 = vadd.f32 %v4355_v34, %v12622_v6  ;;  %v10911_v48 = vld [vmem:[#allocation7 + $0x20] ss:$16 sps:$4 sm:$0xff]   ;;  %v10914_v34 = vld [vmem:[#allocation7 + $0x28] ss:$16 sps:$4 sm:$0xff]  }
 0x9a0   :  { %v5676_v1 = vmul.f32 -1.442695, %v4313_v33  ;;  %v4317_v4 = vpop.f32.mrb[111].mxu0  ;;  %v4358_v50 = vpop.f32.mrb[111].mxu1  ;;  %v5678_v10 = vmul.f32 -1.442695, %v4354_v41 }
 0x9a1   :  { %v5677_v53 = vmul.f32 -1.442695, %v4315_v16  ;;  %v10908_v33 = vld [vmem:[#allocation7 + $0x2c] ss:$16 sps:$4 sm:$0xff]   ;;  %v10917_v16 = vld [vmem:[#allocation7 + $0x44] ss:$16 sps:$4 sm:$0xff]  }
 0x9a2   :  { %6469 = vpow2.f32 %v5676_v1  ;;  %v10920_v35 = vld [vmem:[#allocation7 + $0x4c] ss:$16 sps:$4 sm:$0xff]   ;;  %v10923_v32 = vld [vmem:[#allocation7 + $0x40] ss:$16 sps:$4 sm:$0xff]   ;;  %v10926_v1 = vld [vmem:[#allocation7 + $0x48] ss:$16 sps:$4 sm:$0xff]  }
 0x9a3   :  { %6471 = vpow2.f32 %v5677_v53  ;;  %v10929_v4 = vld [vmem:[#allocation7 + $0x64] ss:$16 sps:$4 sm:$0xff]   ;;  %v10932_v50 = vld [vmem:[#allocation7 + $0x6c] ss:$16 sps:$4 sm:$0xff]   ;;  %v10935_v53 = vld [vmem:[#allocation7 + $0x60] ss:$16 sps:$4 sm:$0xff]  }
 0x9a4   :  { %6473 = vtanh.f32 %v4356_v31  ;;  %v10938_v41 = vld [vmem:[#allocation7 + $0x68] ss:$16 sps:$4 sm:$0xff]  }
 0x9a5   :  { %6475 = vpow2.f32 %v5678_v10  ;;  %13281 = vst [vmem:[#allocation82_spill] sm:$0xff] %v10938_v41  ;;  %v10941_v10 = vld [vmem:[#allocation7 + $0x84] ss:$16 sps:$4 sm:$0xff]  }
 0x9a6   :  { %13282 = vst [vmem:[#allocation83_spill] sm:$0xff] %v10941_v10 }
 0x9ac   :  { %v6470_v44 = vpop.eup %6469 }
 0x9ad   :  { %v4369_v20 = vadd.f32 1.0, %v6470_v44  ;;  %v6472_v39 = vpop.eup %6471  ;;  %v10944_v44 = vld [vmem:[#allocation7 + $0x8c] ss:$16 sps:$4 sm:$0xff]  }
 0x9ae   :  { %v4370_v40 = vadd.f32 1.0, %v6472_v39  ;;  %v6474_v7 = vpop.eup %6473  ;;  %13283 = vst [vmem:[#allocation84_spill] sm:$0xff] %v10944_v44 }
 0x9af   :  { %6477 = vrcp.f32 %v4369_v20  ;;  %v6476_v58 = vpop.eup %6475 }
 0x9b0   :  { %6479 = vrcp.f32 %v4370_v40  ;;  %v4371_v0 = vadd.f32 1.0, %v6476_v58 }
 0x9b2   :  { %6481 = vrcp.f32 %v4371_v0  ;;  %v10949_v0 = vld [vmem:[#allocation7 + $0x80] ss:$16 sps:$4 sm:$0xff]  }
 0x9b3   :  { %13285 = vst [vmem:[#allocation85_spill] sm:$0xff] %v10949_v0 }
 0x9b9   :  { %v6478_v51 = vpop.eup %6477 }
 0x9ba   :  { %v4380_v62 = vmul.f32 %v6478_v51, %v6474_v7  ;;  %v6480_v24 = vpop.eup %6479  ;;  %v13284_v7 = vld [vmem:[#allocation151_spill] sm:$0xff] }
 0x9bb   :  { %v4379_v49 = vmul.f32 %v6480_v24, %v10525_v13  ;;  %v10905_v13 = vld [vmem:[#allocation7 + $0x24] ss:$16 sps:$4 sm:$0xff]  }
 0x9bc   :  { %v6482_v18 = vpop.eup %6481 }
 0x9bd   :  { %v10896_v30 = vadd.f32 %v4380_v62, %v4379_v49  ;;  %v10952_v49 = vld [vmem:[#allocation7 + $0x88] ss:$16 sps:$4 sm:$0xff]  }
 0x9be   :  { %13286 = vst [vmem:[#allocation86_spill] sm:$0xff] %v10952_v49 }
 0x9bf   :  { %6483 = vtanh.f32 %v10896_v30 }
 0x9c9   :  { %v6484_v2 = vpop.eup %6483 }
 0x9ca   :  { %v4383_v56 = vmul.f32 %v6484_v2, %v6482_v18 }
 0x9cc   :  { %v4606_v36 = vpack.c.bf16 %v4383_v56, %v4383_v56 }
 0x9ce   :  { %4641 = vmatmul.mubr.bf16.vlgmr.msra.gmra.mrb[120].mxu0 %v4606_v36  ;;  %4682 = vmatmul.mubr.bf16.vlgmr.msra.gmra.mrb[120].mxu1 %v4606_v36 }
 0x9cf   :  { %4716 = vmatpush1.bf16.msra.mxu0 %v10899_v27  ;;  %4757 = vmatpush1.bf16.msra.mxu1 %v10902_v45 }
 0x9d0   :  { %4747 = vmatprep.mubr.bf16.mxu0 %v4606_v36  ;;  %4788 = vmatprep.mubr.bf16.mxu1 %v4606_v36 }
 0x9d1   :  { %4717 = vmatprep.subr.bf16.mxu0 %v10905_v13  ;;  %4758 = vmatprep.subr.bf16.mxu1 %v10908_v33 }
 0x9d3   :  { %4718 = vmatpush1.bf16.msra.mxu0 %v10911_v48  ;;  %4759 = vmatpush1.bf16.msra.mxu1 %v10914_v34 }
 0x9d4   :  { %4719 = vmatprep.subr.bf16.mxu0 %v10917_v16  ;;  %4760 = vmatprep.subr.bf16.mxu1 %v10920_v35 }
 0x9d7   :  { %4720 = vmatpush1.bf16.msra.mxu0 %v10923_v32  ;;  %4761 = vmatpush1.bf16.msra.mxu1 %v10926_v1 }
 0x9d8   :  { %4721 = vmatprep.subr.bf16.mxu0 %v10929_v4  ;;  %4762 = vmatprep.subr.bf16.mxu1 %v10932_v50 }
 0x9db   :  { %4722 = vmatpush1.bf16.msra.mxu0 %v10935_v53  ;;  %4763 = vmatpush1.bf16.msra.mxu1 %v10938_v41  ;;  %v11055_v41 = vld [vmem:[#allocation7 + $0x180] ss:$16 sps:$4 sm:$0xff]  }
 0x9dc   :  { %4723 = vmatprep.subr.bf16.mxu0 %v10941_v10  ;;  %4764 = vmatprep.subr.bf16.mxu1 %v10944_v44  ;;  %v13321_v44 = vld [vmem:[#allocation80_spill] sm:$0xff] }
 0x9dd   :  { %v4419_v31 = vpop.f32.mrb[112].mxu0 }
 0x9de   :  { %v4420_v20 = vadd.f32 %v4419_v31, %v13138_v61  ;;  %v4460_v39 = vpop.f32.mrb[112].mxu1  ;;  %v4421_v40 = vpop.f32.mrb[113].mxu0  ;;  %v10955_v31 = vld [vmem:[#allocation7 + $0xa4] ss:$16 sps:$4 sm:$0xff]  }
 0x9df   :  { %v4422_v58 = vadd.f32 %v4421_v40, %v13284_v7  ;;  %v4462_v51 = vpop.f32.mrb[113].mxu1  ;;  %v4423_v62 = vpop.f32.mrb[114].mxu0  ;;  %4724 = vmatpush1.bf16.msra.mxu0 %v10949_v0  ;;  %4765 = vmatpush1.bf16.msra.mxu1 %v10952_v49  ;;  %13287 = vst [vmem:[#allocation87_spill] sm:$0xff] %v10955_v31  ;;  %v10958_v40 = vld [vmem:[#allocation7 + $0xac] ss:$16 sps:$4 sm:$0xff]   ;;  %v13320_v0 = vld [vmem:[#allocation79_spill] sm:$0xff] }
 0x9e0   :  { %v5679_v24 = vmul.f32 -1.442695, %v4420_v20  ;;  %v4464_v18 = vpop.f32.mrb[114].mxu1  ;;  %v4424_v2 = vpop.f32.mrb[115].mxu0  ;;  %4725 = vmatprep.subr.bf16.mxu0 %v10955_v31  ;;  %13288 = vst [vmem:[#allocation88_spill] sm:$0xff] %v10958_v40  ;;  %4766 = vmatprep.subr.bf16.mxu1 %v10958_v40 }
 0x9e1   :  { %v5680_v56 = vmul.f32 -1.442695, %v4422_v58  ;;  %v4465_v36 = vpop.f32.mrb[115].mxu1  ;;  %v10961_v20 = vld [vmem:[#allocation7 + $0xa0] ss:$16 sps:$4 sm:$0xff]   ;;  %v13291_v58 = vld [vmem:[#allocation152_spill] sm:$0xff] }
 0x9e2   :  { %6485 = vpow2.f32 %v5679_v24  ;;  %13289 = vst [vmem:[#allocation89_spill] sm:$0xff] %v10961_v20  ;;  %v10964_v62 = vld [vmem:[#allocation7 + $0xa8] ss:$16 sps:$4 sm:$0xff]   ;;  %v4461_v18 = vadd.f32 %v4460_v39, %v13291_v58  ;;  %v10968_v2 = vld [vmem:[#allocation7 + $0xc4] ss:$16 sps:$4 sm:$0xff]  }
 0x9e3   :  { %6487 = vpow2.f32 %v5680_v56  ;;  %4726 = vmatpush1.bf16.msra.mxu0 %v10961_v20  ;;  %13290 = vst [vmem:[#allocation90_spill] sm:$0xff] %v10964_v62  ;;  %4767 = vmatpush1.bf16.msra.mxu1 %v10964_v62  ;;  %13292 = vst [vmem:[#allocation91_spill] sm:$0xff] %v10968_v2  ;;  %v10971_v36 = vld [vmem:[#allocation7 + $0xcc] ss:$16 sps:$4 sm:$0xff]   ;;  %v10974_v24 = vld [vmem:[#allocation7 + $0xc0] ss:$16 sps:$4 sm:$0xff]  }
 0x9e4   :  { %4727 = vmatprep.subr.bf16.mxu0 %v10968_v2  ;;  %13293 = vst [vmem:[#allocation92_spill] sm:$0xff] %v10971_v36  ;;  %4768 = vmatprep.subr.bf16.mxu1 %v10971_v36  ;;  %13294 = vst [vmem:[#allocation93_spill] sm:$0xff] %v10974_v24  ;;  %v10977_v56 = vld [vmem:[#allocation7 + $0xc8] ss:$16 sps:$4 sm:$0xff]   ;;  %v5681_v20 = vmul.f32 -1.442695, %v4461_v18 }
 0x9e5   :  { %13295 = vst [vmem:[#allocation94_spill] sm:$0xff] %v10977_v56  ;;  %v10980_v62 = vld [vmem:[#allocation7 + $0xe4] ss:$16 sps:$4 sm:$0xff]   ;;  %v10983_v39 = vld [vmem:[#allocation7 + $0xec] ss:$16 sps:$4 sm:$0xff]  }
 0x9e6   :  { %13296 = vst [vmem:[#allocation95_spill] sm:$0xff] %v10980_v62  ;;  %13297 = vst [vmem:[#allocation96_spill] sm:$0xff] %v10983_v39  ;;  %v13298_v58 = vld [vmem:[#allocation153_spill] sm:$0xff]  ;;  %6489 = vpow2.f32 %v5681_v20 }
 0x9e7   :  { %4728 = vmatpush1.bf16.msra.mxu0 %v10974_v24  ;;  %4769 = vmatpush1.bf16.msra.mxu1 %v10977_v56  ;;  %v4463_v2 = vadd.f32 %v4462_v51, %v13298_v58  ;;  %v10987_v40 = vld [vmem:[#allocation7 + $0xe0] ss:$16 sps:$4 sm:$0xff]   ;;  %v10990_v24 = vld [vmem:[#allocation7 + $0xe8] ss:$16 sps:$4 sm:$0xff]   ;;  %v10993_v56 = vld [vmem:[#allocation7 + $0x104] ss:$16 sps:$4 sm:$0xff]  }
 0x9e8   :  { %4729 = vmatprep.subr.bf16.mxu0 %v10980_v62  ;;  %4770 = vmatprep.subr.bf16.mxu1 %v10983_v39  ;;  %13299 = vst [vmem:[#allocation97_spill] sm:$0xff] %v10987_v40  ;;  %13300 = vst [vmem:[#allocation98_spill] sm:$0xff] %v10990_v24  ;;  %v10996_v62 = vld [vmem:[#allocation7 + $0x10c] ss:$16 sps:$4 sm:$0xff]   ;;  %v10999_v58 = vld [vmem:[#allocation7 + $0x100] ss:$16 sps:$4 sm:$0xff]  }
 0x9e9   :  { %13301 = vst [vmem:[#allocation99_spill] sm:$0xff] %v10993_v56  ;;  %13302 = vst [vmem:[#allocation100_spill] sm:$0xff] %v10996_v62  ;;  %6491 = vtanh.f32 %v4463_v2  ;;  %v11005_v20 = vld [vmem:[#allocation7 + $0x124] ss:$16 sps:$4 sm:$0xff]   ;;  %v11011_v2 = vld [vmem:[#allocation7 + $0x120] ss:$16 sps:$4 sm:$0xff]  }
 0x9ea   :  { %13303 = vst [vmem:[#allocation101_spill] sm:$0xff] %v10999_v58  ;;  %13305 = vst [vmem:[#allocation103_spill] sm:$0xff] %v11005_v20  ;;  %v11036_v31 = vld [vmem:[#allocation7 + $0x160] ss:$16 sps:$4 sm:$0xff]   ;;  %v11042_v49 = vld [vmem:[#allocation7 + $0x184] ss:$16 sps:$4 sm:$0xff]  }
 0x9eb   :  { %4730 = vmatpush1.bf16.msra.mxu0 %v10987_v40  ;;  %4771 = vmatpush1.bf16.msra.mxu1 %v10990_v24  ;;  %v11002_v40 = vld [vmem:[#allocation7 + $0x108] ss:$16 sps:$4 sm:$0xff]   ;;  %13307 = vst [vmem:[#allocation105_spill] sm:$0xff] %v11011_v2  ;;  %13315 = vst [vmem:[#allocation109_spill] sm:$0xff] %v11036_v31 }
 0x9ec   :  { %v6486_v36 = vpop.eup %6485  ;;  %4731 = vmatprep.subr.bf16.mxu0 %v10993_v56  ;;  %4772 = vmatprep.subr.bf16.mxu1 %v10996_v62  ;;  %13304 = vst [vmem:[#allocation102_spill] sm:$0xff] %v11002_v40  ;;  %13317 = vst [vmem:[#allocation111_spill] sm:$0xff] %v11042_v49 }
 0x9ed   :  { %v4476_v18 = vadd.f32 1.0, %v6486_v36  ;;  %v6488_v51 = vpop.eup %6487  ;;  %v11008_v36 = vld [vmem:[#allocation7 + $0x12c] ss:$16 sps:$4 sm:$0xff]  }
 0x9ee   :  { %v4477_v39 = vadd.f32 1.0, %v6488_v51  ;;  %13306 = vst [vmem:[#allocation104_spill] sm:$0xff] %v11008_v36  ;;  %v11017_v51 = vld [vmem:[#allocation7 + $0x144] ss:$16 sps:$4 sm:$0xff]  }
 0x9ef   :  { %6493 = vrcp.f32 %v4476_v18  ;;  %4732 = vmatpush1.bf16.msra.mxu0 %v10999_v58  ;;  %4773 = vmatpush1.bf16.msra.mxu1 %v11002_v40  ;;  %v11014_v18 = vld [vmem:[#allocation7 + $0x128] ss:$16 sps:$4 sm:$0xff]   ;;  %13309 = vst [vmem:[#allocation107_spill] sm:$0xff] %v11017_v51  ;;  %v11023_v58 = vld [vmem:[#allocation7 + $0x140] ss:$16 sps:$4 sm:$0xff]  }
 0x9f0   :  { %6495 = vrcp.f32 %v4477_v39  ;;  %4733 = vmatprep.subr.bf16.mxu0 %v11005_v20  ;;  %4774 = vmatprep.subr.bf16.mxu1 %v11008_v36  ;;  %13308 = vst [vmem:[#allocation106_spill] sm:$0xff] %v11014_v18  ;;  %v11020_v39 = vld [vmem:[#allocation7 + $0x14c] ss:$16 sps:$4 sm:$0xff]   ;;  %v6490_v20 = vpop.eup %6489  ;;  %13311 = vst [vmem:[#allocation74_spill] sm:$0xff] %v11023_v58  ;;  %v11026_v36 = vld [vmem:[#allocation7 + $0x148] ss:$16 sps:$4 sm:$0xff]  }
 0x9f1   :  { %13310 = vst [vmem:[#allocation73_spill] sm:$0xff] %v11020_v39  ;;  %13312 = vst [vmem:[#allocation75_spill] sm:$0xff] %v11026_v36  ;;  %v4478_v56 = vadd.f32 1.0, %v6490_v20 }
 0x9f3   :  { %4734 = vmatpush1.bf16.msra.mxu0 %v11011_v2  ;;  %4775 = vmatpush1.bf16.msra.mxu1 %v11014_v18  ;;  %v6492_v40 = vpop.eup %6491  ;;  %v11029_v18 = vld [vmem:[#allocation7 + $0x164] ss:$16 sps:$4 sm:$0xff]   ;;  %6497 = vrcp.f32 %v4478_v56 }
 0x9f4   :  { %4735 = vmatprep.subr.bf16.mxu0 %v11017_v51  ;;  %4776 = vmatprep.subr.bf16.mxu1 %v11020_v39  ;;  %13313 = vst [vmem:[#allocation76_spill] sm:$0xff] %v11029_v18  ;;  %v11032_v51 = vld [vmem:[#allocation7 + $0x16c] ss:$16 sps:$4 sm:$0xff]  }
 0x9f5   :  { %13314 = vst [vmem:[#allocation108_spill] sm:$0xff] %v11032_v51 }
 0x9f7   :  { %4736 = vmatpush1.bf16.msra.mxu0 %v11023_v58  ;;  %4777 = vmatpush1.bf16.msra.mxu1 %v11026_v36  ;;  %v11039_v58 = vld [vmem:[#allocation7 + $0x168] ss:$16 sps:$4 sm:$0xff]  }
 0x9f8   :  { %4737 = vmatprep.subr.bf16.mxu0 %v11029_v18  ;;  %4778 = vmatprep.subr.bf16.mxu1 %v11032_v51  ;;  %13316 = vst [vmem:[#allocation110_spill] sm:$0xff] %v11039_v58  ;;  %v11045_v18 = vld [vmem:[#allocation7 + $0x18c] ss:$16 sps:$4 sm:$0xff]  }
 0x9f9   :  { %v6494_v2 = vpop.eup %6493 }
 0x9fa   :  { %v4487_v39 = vmul.f32 %v6494_v2, %v6492_v40  ;;  %v6496_v62 = vpop.eup %6495 }
 0x9fb   :  { %v4486_v24 = vmul.f32 %v6496_v62, %v10581_v46  ;;  %4738 = vmatpush1.bf16.msra.mxu0 %v11036_v31  ;;  %4779 = vmatpush1.bf16.msra.mxu1 %v11039_v58  ;;  %v13318_v46 = vld [vmem:[#allocation77_spill] sm:$0xff]  ;;  %v13319_v31 = vld [vmem:[#allocation78_spill] sm:$0xff] }
 0x9fc   :  { %4739 = vmatprep.subr.bf16.mxu0 %v11042_v49  ;;  %4780 = vmatprep.subr.bf16.mxu1 %v11045_v18 }
 0x9fd   :  { %v4530_v36 = vpop.f32.mrb[116].mxu0  ;;  %v11048_v40 = vadd.f32 %v4487_v39, %v4486_v24  ;;  %v11058_v24 = vld [vmem:[#allocation7 + $0x188] ss:$16 sps:$4 sm:$0xff]  }
 0x9fe   :  { %v4578_v62 = vadd.f32 %v4530_v36, %v13318_v46  ;;  %v4571_v20 = vpop.f32.mrb[116].mxu1  ;;  %v4532_v2 = vpop.f32.mrb[117].mxu0  ;;  %v11076_v46 = vld [vmem:[#allocation7 + $0x1cc] ss:$16 sps:$4 sm:$0xff]  }
 0x9ff   :  { %v4580_v51 = vadd.f32 %v4571_v20, %v13319_v31  ;;  %v4579_v58 = vadd.f32 %v4532_v2, %v13320_v0  ;;  %v4573_v7 = vpop.f32.mrb[117].mxu1  ;;  %v4534_v61 = vpop.f32.mrb[118].mxu0  ;;  %6499 = vtanh.f32 %v11048_v40  ;;  %4740 = vmatpush1.bf16.msra.mxu0 %v11055_v41  ;;  %4781 = vmatpush1.bf16.msra.mxu1 %v11058_v24  ;;  %v11061_v0 = vld [vmem:[#allocation7 + $0x1a4] ss:$16 sps:$4 sm:$0xff]   ;;  %13323 = vst [vmem:[#allocation113_spill] sm:$0xff] %v11076_v46 }
 0xa00   :  { %v5682_v49 = vmul.f32 -1.442695, %v4578_v62  ;;  %v4581_v10 = vadd.f32 %v4573_v7, %v13321_v44  ;;  %v4575_v56 = vpop.f32.mrb[118].mxu1  ;;  %v4535_v36 = vpop.f32.mrb[119].mxu0  ;;  %4741 = vmatprep.subr.bf16.mxu0 %v11061_v0  ;;  %v11064_v61 = vld [vmem:[#allocation7 + $0x1ac] ss:$16 sps:$4 sm:$0xff]  }
 0xa01   :  { %v5683_v31 = vmul.f32 -1.442695, %v4579_v58  ;;  %v4576_v39 = vpop.f32.mrb[119].mxu1  ;;  %4782 = vmatprep.subr.bf16.mxu1 %v11064_v61  ;;  %v11067_v44 = vld [vmem:[#allocation7 + $0x1a0] ss:$16 sps:$4 sm:$0xff]   ;;  %v6498_v20 = vpop.eup %6497 }
 0xa02   :  { %6501 = vpow2.f32 %v5682_v49  ;;  %v11070_v7 = vld [vmem:[#allocation7 + $0x1a8] ss:$16 sps:$4 sm:$0xff]   ;;  %v11073_v58 = vld [vmem:[#allocation7 + $0x1c4] ss:$16 sps:$4 sm:$0xff]   ;;  %v11079_v62 = vld [vmem:[#allocation7 + $0x1c0] ss:$16 sps:$4 sm:$0xff]  }
 0xa03   :  { %6503 = vpow2.f32 %v5683_v31  ;;  %4742 = vmatpush1.bf16.msra.mxu0 %v11067_v44  ;;  %4783 = vmatpush1.bf16.msra.mxu1 %v11070_v7  ;;  %13322 = vst [vmem:[#allocation112_spill] sm:$0xff] %v11073_v58  ;;  %13324 = vst [vmem:[#allocation114_spill] sm:$0xff] %v11079_v62  ;;  %v11082_v49 = vld [vmem:[#allocation7 + $0x1c8] ss:$16 sps:$4 sm:$0xff]   ;;  %v5684_v2 = vmul.f32 -1.442695, %v4580_v51 }
 0xa04   :  { %4743 = vmatprep.subr.bf16.mxu0 %v11073_v58  ;;  %4784 = vmatprep.subr.bf16.mxu1 %v11076_v46  ;;  %13325 = vst [vmem:[#allocation115_spill] sm:$0xff] %v11082_v49  ;;  %v11085_v56 = vld [vmem:[#allocation7 + $0x1e4] ss:$16 sps:$4 sm:$0xff]   ;;  %v11088_v36 = vld [vmem:[#allocation7 + $0x1ec] ss:$16 sps:$4 sm:$0xff]  }
 0xa05   :  { %13326 = vst [vmem:[#allocation116_spill] sm:$0xff] %v11085_v56  ;;  %v11091_v58 = vld [vmem:[#allocation7 + $0x1e0] ss:$16 sps:$4 sm:$0xff]   ;;  %6505 = vpow2.f32 %v5684_v2 }
 0xa06   :  { %6507 = vtanh.f32 %v4581_v10  ;;  %v13337_v10 = vld [vmem:[#allocation31_spill] sm:$0xff] }
 0xa07   :  { %4744 = vmatpush1.bf16.msra.mxu0 %v11079_v62  ;;  %4785 = vmatpush1.bf16.msra.mxu1 %v11082_v49  ;;  %v11094_v62 = vld [vmem:[#allocation7 + $0x1e8] ss:$16 sps:$4 sm:$0xff]  }
 0xa08   :  { %4745 = vmatprep.subr.bf16.mxu0 %v11085_v56  ;;  %4786 = vmatprep.subr.bf16.mxu1 %v11088_v36 }
 0xa09   :  { %v6500_v31 = vpop.eup %6499 }
 0xa0a   :  { %v4490_v39 = vmul.f32 %v6500_v31, %v6498_v20  ;;  %v13340_v31 = vld [vmem:[#allocation56_spill] sm:$0xff] }
 0xa0b   :  { %4746 = vmatpush1.bf16.msra.mxu0 %v11091_v58  ;;  %4787 = vmatpush1.bf16.msra.mxu1 %v11094_v62 }
 0xa0c   :  { %v6502_v46 = vpop.eup %6501  ;;  %4822 = vmatprep.subr.bf16.mxu0 %v10604_v25  ;;  %4863 = vmatprep.subr.bf16.mxu1 %v10607_v11  ;;  %v4714_v56 = vpack.c.bf16 %v4490_v39, %v4490_v39  ;;  %v13341_v39 = vld [vmem:[#allocation33_spill] sm:$0xff] }
 0xa0d   :  { %v4591_v51 = vadd.f32 1.0, %v6502_v46  ;;  %v6504_v49 = vpop.eup %6503  ;;  %v13338_v46 = vld [vmem:[#allocation32_spill] sm:$0xff] }
 0xa0e   :  { %v4592_v20 = vadd.f32 1.0, %v6504_v49  ;;  %4748 = vmatmul.mubr.bf16.vlgmr.msra.gmra.mrb[124].mxu0 %v4714_v56  ;;  %4789 = vmatmul.mubr.bf16.vlgmr.msra.gmra.mrb[124].mxu1 %v4714_v56 }
 0xa0f   :  { %6509 = vrcp.f32 %v4591_v51  ;;  %4823 = vmatpush1.bf16.msra.mxu0 %v10610_v43  ;;  %4864 = vmatpush1.bf16.msra.mxu1 %v10613_v55  ;;  %v6506_v25 = vpop.eup %6505  ;;  %v13342_v51 = vld [vmem:[#allocation34_spill] sm:$0xff] }
 0xa10   :  { %6511 = vrcp.f32 %v4592_v20  ;;  %4854 = vmatprep.mubr.bf16.mxu0 %v4714_v56  ;;  %4895 = vmatprep.mubr.bf16.mxu1 %v4714_v56  ;;  %v6508_v11 = vpop.eup %6507  ;;  %v13339_v56 = vld [vmem:[#allocation55_spill] sm:$0xff] }
 0xa11   :  { %4824 = vmatprep.subr.bf16.mxu0 %v10616_v59  ;;  %4865 = vmatprep.subr.bf16.mxu1 %v10619_v19  ;;  %v4593_v19 = vadd.f32 1.0, %v6506_v25  ;;  %v13343_v20 = vld [vmem:[#allocation35_spill] sm:$0xff]  ;;  %v13344_v25 = vld [vmem:[#allocation36_spill] sm:$0xff] }
 0xa13   :  { %4825 = vmatpush1.bf16.msra.mxu0 %v10622_v63  ;;  %4866 = vmatpush1.bf16.msra.mxu1 %v10625_v22  ;;  %6513 = vrcp.f32 %v4593_v19  ;;  %v13349_v19 = vld [vmem:[#allocation41_spill] sm:$0xff] }
 0xa14   :  { %4826 = vmatprep.subr.bf16.mxu0 %v10628_v47  ;;  %4867 = vmatprep.subr.bf16.mxu1 %v10631_v8  ;;  %v13327_v47 = vld [vmem:[#allocation21_spill] sm:$0xff]  ;;  %v13328_v8 = vld [vmem:[#allocation22_spill] sm:$0xff] }
 0xa17   :  { %4827 = vmatpush1.bf16.msra.mxu0 %v10634_v42  ;;  %4868 = vmatpush1.bf16.msra.mxu1 %v10637_v5  ;;  %v13329_v42 = vld [vmem:[#allocation23_spill] sm:$0xff]  ;;  %v13330_v5 = vld [vmem:[#allocation24_spill] sm:$0xff] }
 0xa18   :  { %4828 = vmatprep.subr.bf16.mxu0 %v10640_v60  ;;  %4869 = vmatprep.subr.bf16.mxu1 %v10643_v17  ;;  %v13331_v60 = vld [vmem:[#allocation25_spill] sm:$0xff]  ;;  %v13332_v17 = vld [vmem:[#allocation26_spill] sm:$0xff] }
 0xa19   :  { %v6510_v43 = vpop.eup %6509 }
 0xa1a   :  { %v4602_v55 = vmul.f32 %v6510_v43, %v6508_v11  ;;  %v6512_v59 = vpop.eup %6511  ;;  %v13345_v11 = vld [vmem:[#allocation37_spill] sm:$0xff]  ;;  %v13346_v43 = vld [vmem:[#allocation38_spill] sm:$0xff] }
 0xa1b   :  { %v4601_v63 = vmul.f32 %v6512_v59, %v10656_v23  ;;  %4829 = vmatpush1.bf16.msra.mxu0 %v10647_v57  ;;  %4870 = vmatpush1.bf16.msra.mxu1 %v10650_v15  ;;  %v13333_v57 = vld [vmem:[#allocation27_spill] sm:$0xff]  ;;  %v13334_v15 = vld [vmem:[#allocation28_spill] sm:$0xff]  ;;  %v13336_v23 = vld [vmem:[#allocation30_spill] sm:$0xff] }
 0xa1c   :  { %4830 = vmatprep.subr.bf16.mxu0 %v10653_v21  ;;  %4871 = vmatprep.subr.bf16.mxu1 %v10658_v52  ;;  %v13335_v21 = vld [vmem:[#allocation29_spill] sm:$0xff]  ;;  %v13348_v59 = vld [vmem:[#allocation40_spill] sm:$0xff] }
 0xa1d   :  { %v4603_v22 = vadd.f32 %v4602_v55, %v4601_v63  ;;  %v6514_v52 = vpop.eup %6513  ;;  %v13347_v55 = vld [vmem:[#allocation39_spill] sm:$0xff]  ;;  %v13350_v63 = vld [vmem:[#allocation65_spill] sm:$0xff] }
 0xa1f   :  { %6515 = vtanh.f32 %v4603_v22  ;;  %4831 = vmatpush1.bf16.msra.mxu0 %v13327_v47  ;;  %4872 = vmatpush1.bf16.msra.mxu1 %v13328_v8  ;;  %v13351_v22 = vld [vmem:[#allocation66_spill] sm:$0xff]  ;;  %v13352_v47 = vld [vmem:[#allocation143_spill] sm:$0xff] }
 0xa20   :  { %4832 = vmatprep.subr.bf16.mxu0 %v13329_v42  ;;  %4873 = vmatprep.subr.bf16.mxu1 %v13330_v5  ;;  %v13353_v8 = vld [vmem:[#allocation67_spill] sm:$0xff]  ;;  %v13354_v42 = vld [vmem:[#allocation68_spill] sm:$0xff]  ;;  %v13355_v5 = vld [vmem:[#allocation42_spill] sm:$0xff] }
 0xa23   :  { %4833 = vmatpush1.bf16.msra.mxu0 %v13331_v60  ;;  %4874 = vmatpush1.bf16.msra.mxu1 %v13332_v17  ;;  %v13356_v60 = vld [vmem:[#allocation43_spill] sm:$0xff]  ;;  %v13357_v17 = vld [vmem:[#allocation54_spill] sm:$0xff] }
 0xa24   :  { %4834 = vmatprep.subr.bf16.mxu0 %v13333_v57  ;;  %4875 = vmatprep.subr.bf16.mxu1 %v13334_v15  ;;  %v13358_v57 = vld [vmem:[#allocation44_spill] sm:$0xff]  ;;  %v13359_v15 = vld [vmem:[#allocation45_spill] sm:$0xff] }
 0xa27   :  { %4835 = vmatpush1.bf16.msra.mxu0 %v13335_v21  ;;  %4876 = vmatpush1.bf16.msra.mxu1 %v13336_v23  ;;  %v13360_v21 = vld [vmem:[#allocation46_spill] sm:$0xff]  ;;  %v13361_v23 = vld [vmem:[#allocation47_spill] sm:$0xff] }
 0xa28   :  { %4836 = vmatprep.subr.bf16.mxu0 %v13337_v10  ;;  %4877 = vmatprep.subr.bf16.mxu1 %v13338_v46  ;;  %v13363_v10 = vld [vmem:[#allocation49_spill] sm:$0xff]  ;;  %v13364_v46 = vld [vmem:[#allocation50_spill] sm:$0xff] }
 0xa29   :  { %v6516_v49 = vpop.eup %6515 }
 0xa2a   :  { %v4605_v2 = vmul.f32 %v6516_v49, %v6514_v52  ;;  %v13362_v52 = vld [vmem:[#allocation48_spill] sm:$0xff]  ;;  %v13365_v49 = vld [vmem:[#allocation51_spill] sm:$0xff] }
 0xa2b   :  { %4837 = vmatpush1.bf16.msra.mxu0 %v13339_v56  ;;  %4878 = vmatpush1.bf16.msra.mxu1 %v13340_v31  ;;  %v13366_v56 = vld [vmem:[#allocation61_spill] sm:$0xff]  ;;  %v13367_v31 = vld [vmem:[#allocation62_spill] sm:$0xff] }
 0xa2c   :  { %4838 = vmatprep.subr.bf16.mxu0 %v13341_v39  ;;  %4879 = vmatprep.subr.bf16.mxu1 %v13342_v51  ;;  %v13368_v39 = vld [vmem:[#allocation63_spill] sm:$0xff]  ;;  %v13369_v51 = vld [vmem:[#allocation64_spill] sm:$0xff] }
 0xa2f   :  { %4839 = vmatpush1.bf16.msra.mxu0 %v13343_v20  ;;  %4880 = vmatpush1.bf16.msra.mxu1 %v13344_v25  ;;  %v13370_v20 = vld [vmem:[#allocation52_spill] sm:$0xff]  ;;  %v13371_v25 = vld [vmem:[#allocation53_spill] sm:$0xff] }
 0xa30   :  { %4840 = vmatprep.subr.bf16.mxu0 %v13345_v11  ;;  %4881 = vmatprep.subr.bf16.mxu1 %v13346_v43  ;;  %v13372_v11 = vld [vmem:[#allocation81_spill] sm:$0xff]  ;;  %v4821_v43 = vpack.c.bf16 %v4605_v2, %v4605_v2  ;;  %v11177_v2 = vld [vmem:[#allocation8 + $0x2c] ss:$16 sps:$4 sm:$0xff]  }
 0xa33   :  { %4841 = vmatpush1.bf16.msra.mxu0 %v13347_v55  ;;  %4882 = vmatpush1.bf16.msra.mxu1 %v13348_v59  ;;  %v11162_v55 = vld [vmem:[#allocation8 + $0x4] ss:$16 sps:$4 sm:$0xff]   ;;  %v11165_v59 = vld [vmem:[#allocation8 + $0xc] ss:$16 sps:$4 sm:$0xff]  }
 0xa34   :  { %4842 = vmatprep.subr.bf16.mxu0 %v13349_v19  ;;  %4883 = vmatprep.subr.bf16.mxu1 %v13350_v63  ;;  %v11168_v19 = vld [vmem:[#allocation8] ss:$16 sps:$4 sm:$0xff]   ;;  %v11171_v63 = vld [vmem:[#allocation8 + $0x8] ss:$16 sps:$4 sm:$0xff]  }
 0xa37   :  { %4843 = vmatpush1.bf16.msra.mxu0 %v13351_v22  ;;  %4884 = vmatpush1.bf16.msra.mxu1 %v13352_v47  ;;  %v11174_v22 = vld [vmem:[#allocation8 + $0x24] ss:$16 sps:$4 sm:$0xff]   ;;  %v11180_v47 = vld [vmem:[#allocation8 + $0x20] ss:$16 sps:$4 sm:$0xff]  }
 0xa38   :  { %4844 = vmatprep.subr.bf16.mxu0 %v13353_v8  ;;  %4885 = vmatprep.subr.bf16.mxu1 %v13354_v42  ;;  %v11183_v8 = vld [vmem:[#allocation8 + $0x28] ss:$16 sps:$4 sm:$0xff]   ;;  %v11186_v42 = vld [vmem:[#allocation8 + $0x44] ss:$16 sps:$4 sm:$0xff]  }
 0xa3b   :  { %4845 = vmatpush1.bf16.msra.mxu0 %v13355_v5  ;;  %4886 = vmatpush1.bf16.msra.mxu1 %v13356_v60  ;;  %v11189_v5 = vld [vmem:[#allocation8 + $0x4c] ss:$16 sps:$4 sm:$0xff]   ;;  %v11192_v60 = vld [vmem:[#allocation8 + $0x40] ss:$16 sps:$4 sm:$0xff]  }
 0xa3c   :  { %4846 = vmatprep.subr.bf16.mxu0 %v13357_v17  ;;  %4887 = vmatprep.subr.bf16.mxu1 %v13358_v57  ;;  %v11195_v17 = vld [vmem:[#allocation8 + $0x48] ss:$16 sps:$4 sm:$0xff]   ;;  %v11198_v57 = vld [vmem:[#allocation8 + $0x64] ss:$16 sps:$4 sm:$0xff]  }
 0xa3f   :  { %4847 = vmatpush1.bf16.msra.mxu0 %v13359_v15  ;;  %4888 = vmatpush1.bf16.msra.mxu1 %v13360_v21  ;;  %v11201_v15 = vld [vmem:[#allocation8 + $0x6c] ss:$16 sps:$4 sm:$0xff]   ;;  %v11204_v21 = vld [vmem:[#allocation8 + $0x60] ss:$16 sps:$4 sm:$0xff]  }
 0xa40   :  { %4848 = vmatprep.subr.bf16.mxu0 %v13361_v23  ;;  %4889 = vmatprep.subr.bf16.mxu1 %v13362_v52  ;;  %13373 = vst [vmem:[#allocation117_spill] sm:$0xff] %v11201_v15  ;;  %13374 = vst [vmem:[#allocation118_spill] sm:$0xff] %v11204_v21  ;;  %v11207_v23 = vld [vmem:[#allocation8 + $0x68] ss:$16 sps:$4 sm:$0xff]   ;;  %v11210_v52 = vld [vmem:[#allocation8 + $0x84] ss:$16 sps:$4 sm:$0xff]  }
 0xa41   :  { %13375 = vst [vmem:[#allocation119_spill] sm:$0xff] %v11207_v23  ;;  %13376 = vst [vmem:[#allocation120_spill] sm:$0xff] %v11210_v52 }
 0xa43   :  { %4849 = vmatpush1.bf16.msra.mxu0 %v13363_v10  ;;  %4890 = vmatpush1.bf16.msra.mxu1 %v13364_v46  ;;  %v11213_v10 = vld [vmem:[#allocation8 + $0x8c] ss:$16 sps:$4 sm:$0xff]   ;;  %v11216_v46 = vld [vmem:[#allocation8 + $0x80] ss:$16 sps:$4 sm:$0xff]  }
 0xa44   :  { %4850 = vmatprep.subr.bf16.mxu0 %v13365_v49  ;;  %4891 = vmatprep.subr.bf16.mxu1 %v13366_v56  ;;  %13377 = vst [vmem:[#allocation121_spill] sm:$0xff] %v11213_v10  ;;  %13378 = vst [vmem:[#allocation122_spill] sm:$0xff] %v11216_v46  ;;  %v11219_v49 = vld [vmem:[#allocation8 + $0x88] ss:$16 sps:$4 sm:$0xff]   ;;  %v11222_v56 = vld [vmem:[#allocation8 + $0xa4] ss:$16 sps:$4 sm:$0xff]  }
 0xa45   :  { %13379 = vst [vmem:[#allocation123_spill] sm:$0xff] %v11219_v49  ;;  %13380 = vst [vmem:[#allocation124_spill] sm:$0xff] %v11222_v56 }
 0xa47   :  { %4851 = vmatpush1.bf16.msra.mxu0 %v13367_v31  ;;  %4892 = vmatpush1.bf16.msra.mxu1 %v13368_v39  ;;  %v11225_v31 = vld [vmem:[#allocation8 + $0xac] ss:$16 sps:$4 sm:$0xff]   ;;  %v11228_v39 = vld [vmem:[#allocation8 + $0xa0] ss:$16 sps:$4 sm:$0xff]  }
 0xa48   :  { %4852 = vmatprep.subr.bf16.mxu0 %v13369_v51  ;;  %4893 = vmatprep.subr.bf16.mxu1 %v13370_v20  ;;  %13381 = vst [vmem:[#allocation125_spill] sm:$0xff] %v11225_v31  ;;  %13382 = vst [vmem:[#allocation126_spill] sm:$0xff] %v11228_v39  ;;  %v11231_v51 = vld [vmem:[#allocation8 + $0xa8] ss:$16 sps:$4 sm:$0xff]   ;;  %v11234_v20 = vld [vmem:[#allocation8 + $0xc4] ss:$16 sps:$4 sm:$0xff]  }
 0xa49   :  { %13383 = vst [vmem:[#allocation127_spill] sm:$0xff] %v11231_v51  ;;  %13384 = vst [vmem:[#allocation69_spill] sm:$0xff] %v11234_v20 }
 0xa4b   :  { %4853 = vmatpush1.bf16.msra.mxu0 %v13371_v25  ;;  %4894 = vmatpush1.bf16.msra.mxu1 %v13372_v11  ;;  %v11237_v25 = vld [vmem:[#allocation8 + $0xcc] ss:$16 sps:$4 sm:$0xff]   ;;  %v11240_v11 = vld [vmem:[#allocation8 + $0xc0] ss:$16 sps:$4 sm:$0xff]  }
 0xa4c   :  { %4930 = vmatprep.subr.bf16.mxu0 %v11162_v55  ;;  %4971 = vmatprep.subr.bf16.mxu1 %v11165_v59  ;;  %13385 = vst [vmem:[#allocation70_spill] sm:$0xff] %v11237_v25  ;;  %13386 = vst [vmem:[#allocation71_spill] sm:$0xff] %v11240_v11 }
 0xa4e   :  { %4855 = vmatmul.mubr.bf16.vlgmr.msra.gmra.mrb[128].mxu0 %v4821_v43  ;;  %4896 = vmatmul.mubr.bf16.vlgmr.msra.gmra.mrb[128].mxu1 %v4821_v43  ;;  %v11243_v43 = vld [vmem:[#allocation8 + $0xc8] ss:$16 sps:$4 sm:$0xff]  }
 0xa4f   :  { %4931 = vmatpush1.bf16.msra.mxu0 %v11168_v19  ;;  %4972 = vmatpush1.bf16.msra.mxu1 %v11171_v63  ;;  %13387 = vst [vmem:[#allocation72_spill] sm:$0xff] %v11243_v43 }
 0xa50   :  { %4932 = vmatprep.subr.bf16.mxu0 %v11174_v22  ;;  %4973 = vmatprep.subr.bf16.mxu1 %v11177_v2 }
 0xa53   :  { %4933 = vmatpush1.bf16.msra.mxu0 %v11180_v47  ;;  %4974 = vmatpush1.bf16.msra.mxu1 %v11183_v8 }
 0xa54   :  { %4934 = vmatprep.subr.bf16.mxu0 %v11186_v42  ;;  %4975 = vmatprep.subr.bf16.mxu1 %v11189_v5 }
 0xa57   :  { %4935 = vmatpush1.bf16.msra.mxu0 %v11192_v60  ;;  %4976 = vmatpush1.bf16.msra.mxu1 %v11195_v17 }
 0xa58   :  { %4936 = vmatprep.subr.bf16.mxu0 %v11198_v57  ;;  %4977 = vmatprep.subr.bf16.mxu1 %v11201_v15 }
 0xa5b   :  { %4937 = vmatpush1.bf16.msra.mxu0 %v11204_v21  ;;  %4978 = vmatpush1.bf16.msra.mxu1 %v11207_v23 }
 0xa5c   :  { %4938 = vmatprep.subr.bf16.mxu0 %v11210_v52  ;;  %4979 = vmatprep.subr.bf16.mxu1 %v11213_v10 }
 0xa5f   :  { %4939 = vmatpush1.bf16.msra.mxu0 %v11216_v46  ;;  %4980 = vmatpush1.bf16.msra.mxu1 %v11219_v49 }
 0xa60   :  { %4940 = vmatprep.subr.bf16.mxu0 %v11222_v56  ;;  %4981 = vmatprep.subr.bf16.mxu1 %v11225_v31 }
 0xa63   :  { %4941 = vmatpush1.bf16.msra.mxu0 %v11228_v39  ;;  %4982 = vmatpush1.bf16.msra.mxu1 %v11231_v51  ;;  %v11246_v39 = vld [vmem:[#allocation8 + $0xe4] ss:$16 sps:$4 sm:$0xff]   ;;  %v11249_v51 = vld [vmem:[#allocation8 + $0xec] ss:$16 sps:$4 sm:$0xff]  }
 0xa64   :  { %4942 = vmatprep.subr.bf16.mxu0 %v11234_v20  ;;  %4983 = vmatprep.subr.bf16.mxu1 %v11237_v25  ;;  %13388 = vst [vmem:[#allocation128_spill] sm:$0xff] %v11246_v39  ;;  %13389 = vst [vmem:[#allocation129_spill] sm:$0xff] %v11249_v51  ;;  %v11252_v20 = vld [vmem:[#allocation8 + $0xe0] ss:$16 sps:$4 sm:$0xff]   ;;  %v11255_v25 = vld [vmem:[#allocation8 + $0xe8] ss:$16 sps:$4 sm:$0xff]  }
 0xa65   :  { %13390 = vst [vmem:[#allocation130_spill] sm:$0xff] %v11252_v20  ;;  %13391 = vst [vmem:[#allocation131_spill] sm:$0xff] %v11255_v25 }
 0xa67   :  { %4943 = vmatpush1.bf16.msra.mxu0 %v11240_v11  ;;  %4984 = vmatpush1.bf16.msra.mxu1 %v11243_v43  ;;  %v11258_v11 = vld [vmem:[#allocation8 + $0x104] ss:$16 sps:$4 sm:$0xff]   ;;  %v11261_v43 = vld [vmem:[#allocation8 + $0x10c] ss:$16 sps:$4 sm:$0xff]  }
 0xa68   :  { %4944 = vmatprep.subr.bf16.mxu0 %v11246_v39  ;;  %4985 = vmatprep.subr.bf16.mxu1 %v11249_v51  ;;  %13392 = vst [vmem:[#allocation132_spill] sm:$0xff] %v11258_v11  ;;  %13393 = vst [vmem:[#allocation133_spill] sm:$0xff] %v11261_v43  ;;  %v11264_v39 = vld [vmem:[#allocation8 + $0x100] ss:$16 sps:$4 sm:$0xff]   ;;  %v11267_v51 = vld [vmem:[#allocation8 + $0x108] ss:$16 sps:$4 sm:$0xff]  }
 0xa69   :  { %13394 = vst [vmem:[#allocation134_spill] sm:$0xff] %v11264_v39  ;;  %13395 = vst [vmem:[#allocation135_spill] sm:$0xff] %v11267_v51 }
 0xa6b   :  { %4945 = vmatpush1.bf16.msra.mxu0 %v11252_v20  ;;  %4986 = vmatpush1.bf16.msra.mxu1 %v11255_v25  ;;  %v11270_v20 = vld [vmem:[#allocation8 + $0x124] ss:$16 sps:$4 sm:$0xff]   ;;  %v11273_v25 = vld [vmem:[#allocation8 + $0x12c] ss:$16 sps:$4 sm:$0xff]  }
 0xa6c   :  { %4946 = vmatprep.subr.bf16.mxu0 %v11258_v11  ;;  %4987 = vmatprep.subr.bf16.mxu1 %v11261_v43  ;;  %13396 = vst [vmem:[#allocation57_spill] sm:$0xff] %v11270_v20  ;;  %13397 = vst [vmem:[#allocation58_spill] sm:$0xff] %v11273_v25  ;;  %v11276_v11 = vld [vmem:[#allocation8 + $0x120] ss:$16 sps:$4 sm:$0xff]   ;;  %v11279_v43 = vld [vmem:[#allocation8 + $0x128] ss:$16 sps:$4 sm:$0xff]  }
 0xa6d   :  { %13398 = vst [vmem:[#allocation59_spill] sm:$0xff] %v11276_v11  ;;  %13399 = vst [vmem:[#allocation60_spill] sm:$0xff] %v11279_v43 }
 0xa6f   :  { %4947 = vmatpush1.bf16.msra.mxu0 %v11264_v39  ;;  %4988 = vmatpush1.bf16.msra.mxu1 %v11267_v51  ;;  %v11282_v39 = vld [vmem:[#allocation8 + $0x144] ss:$16 sps:$4 sm:$0xff]   ;;  %v11285_v51 = vld [vmem:[#allocation8 + $0x14c] ss:$16 sps:$4 sm:$0xff]  }
 0xa70   :  { %4948 = vmatprep.subr.bf16.mxu0 %v11270_v20  ;;  %4989 = vmatprep.subr.bf16.mxu1 %v11273_v25  ;;  %13400 = vst [vmem:[#allocation136_spill] sm:$0xff] %v11282_v39  ;;  %13401 = vst [vmem:[#allocation137_spill] sm:$0xff] %v11285_v51  ;;  %v11288_v20 = vld [vmem:[#allocation8 + $0x140] ss:$16 sps:$4 sm:$0xff]   ;;  %v11291_v25 = vld [vmem:[#allocation8 + $0x148] ss:$16 sps:$4 sm:$0xff]  }
 0xa71   :  { %13402 = vst [vmem:[#allocation138_spill] sm:$0xff] %v11288_v20  ;;  %13403 = vst [vmem:[#allocation139_spill] sm:$0xff] %v11291_v25 }
 0xa73   :  { %4949 = vmatpush1.bf16.msra.mxu0 %v11276_v11  ;;  %4990 = vmatpush1.bf16.msra.mxu1 %v11279_v43  ;;  %v11294_v11 = vld [vmem:[#allocation8 + $0x164] ss:$16 sps:$4 sm:$0xff]   ;;  %v11297_v43 = vld [vmem:[#allocation8 + $0x16c] ss:$16 sps:$4 sm:$0xff]  }
 0xa74   :  { %4950 = vmatprep.subr.bf16.mxu0 %v11282_v39  ;;  %4991 = vmatprep.subr.bf16.mxu1 %v11285_v51  ;;  %13404 = vst [vmem:[#allocation144_spill] sm:$0xff] %v11294_v11  ;;  %13405 = vst [vmem:[#allocation145_spill] sm:$0xff] %v11297_v43  ;;  %v11300_v39 = vld [vmem:[#allocation8 + $0x160] ss:$16 sps:$4 sm:$0xff]   ;;  %v11303_v51 = vld [vmem:[#allocation8 + $0x168] ss:$16 sps:$4 sm:$0xff]  }
 0xa75   :  { %13406 = vst [vmem:[#allocation146_spill] sm:$0xff] %v11300_v39  ;;  %13407 = vst [vmem:[#allocation140_spill] sm:$0xff] %v11303_v51 }
 0xa77   :  { %4951 = vmatpush1.bf16.msra.mxu0 %v11288_v20  ;;  %4992 = vmatpush1.bf16.msra.mxu1 %v11291_v25  ;;  %v11306_v20 = vld [vmem:[#allocation8 + $0x184] ss:$16 sps:$4 sm:$0xff]   ;;  %v11309_v25 = vld [vmem:[#allocation8 + $0x18c] ss:$16 sps:$4 sm:$0xff]  }
 0xa78   :  { %4952 = vmatprep.subr.bf16.mxu0 %v11294_v11  ;;  %4993 = vmatprep.subr.bf16.mxu1 %v11297_v43  ;;  %13408 = vst [vmem:[#allocation141_spill] sm:$0xff] %v11306_v20  ;;  %13409 = vst [vmem:[#allocation147_spill] sm:$0xff] %v11309_v25  ;;  %v11312_v11 = vld [vmem:[#allocation8 + $0x180] ss:$16 sps:$4 sm:$0xff]   ;;  %v11315_v43 = vld [vmem:[#allocation8 + $0x188] ss:$16 sps:$4 sm:$0xff]  }
 0xa79   :  { %13410 = vst [vmem:[#allocation148_spill] sm:$0xff] %v11312_v11  ;;  %13411 = vst [vmem:[#allocation149_spill] sm:$0xff] %v11315_v43 }
 0xa7b   :  { %4953 = vmatpush1.bf16.msra.mxu0 %v11300_v39  ;;  %4994 = vmatpush1.bf16.msra.mxu1 %v11303_v51  ;;  %v11318_v39 = vld [vmem:[#allocation8 + $0x1a4] ss:$16 sps:$4 sm:$0xff]   ;;  %v11321_v51 = vld [vmem:[#allocation8 + $0x1ac] ss:$16 sps:$4 sm:$0xff]  }
 0xa7c   :  { %4954 = vmatprep.subr.bf16.mxu0 %v11306_v20  ;;  %4995 = vmatprep.subr.bf16.mxu1 %v11309_v25  ;;  %13412 = vst [vmem:[#allocation13_spill] sm:$0xff] %v11318_v39  ;;  %13413 = vst [vmem:[#allocation14_spill] sm:$0xff] %v11321_v51  ;;  %v11324_v20 = vld [vmem:[#allocation8 + $0x1a0] ss:$16 sps:$4 sm:$0xff]   ;;  %v11327_v25 = vld [vmem:[#allocation8 + $0x1a8] ss:$16 sps:$4 sm:$0xff]  }
 0xa7d   :  { %13414 = vst [vmem:[#allocation15_spill] sm:$0xff] %v11324_v20  ;;  %13415 = vst [vmem:[#allocation16_spill] sm:$0xff] %v11327_v25 }
 0xa7f   :  { %4955 = vmatpush1.bf16.msra.mxu0 %v11312_v11  ;;  %4996 = vmatpush1.bf16.msra.mxu1 %v11315_v43  ;;  %v11330_v11 = vld [vmem:[#allocation8 + $0x1c4] ss:$16 sps:$4 sm:$0xff]   ;;  %v11333_v43 = vld [vmem:[#allocation8 + $0x1cc] ss:$16 sps:$4 sm:$0xff]  }
 0xa80   :  { %4956 = vmatprep.subr.bf16.mxu0 %v11318_v39  ;;  %4997 = vmatprep.subr.bf16.mxu1 %v11321_v51  ;;  %13416 = vst [vmem:[#allocation17_spill] sm:$0xff] %v11330_v11  ;;  %13417 = vst [vmem:[#allocation142_spill] sm:$0xff] %v11333_v43  ;;  %v11336_v39 = vld [vmem:[#allocation8 + $0x1c0] ss:$16 sps:$4 sm:$0xff]   ;;  %v11339_v51 = vld [vmem:[#allocation8 + $0x1c8] ss:$16 sps:$4 sm:$0xff]  }
 0xa81   :  { %13418 = vst [vmem:[#allocation18_spill] sm:$0xff] %v11336_v39  ;;  %13419 = vst [vmem:[#allocation19_spill] sm:$0xff] %v11339_v51 }
 0xa83   :  { %4957 = vmatpush1.bf16.msra.mxu0 %v11324_v20  ;;  %4998 = vmatpush1.bf16.msra.mxu1 %v11327_v25  ;;  %v11342_v20 = vld [vmem:[#allocation8 + $0x1e4] ss:$16 sps:$4 sm:$0xff]   ;;  %v11345_v25 = vld [vmem:[#allocation8 + $0x1ec] ss:$16 sps:$4 sm:$0xff]  }
 0xa84   :  { %4958 = vmatprep.subr.bf16.mxu0 %v11330_v11  ;;  %4999 = vmatprep.subr.bf16.mxu1 %v11333_v43  ;;  %13420 = vst [vmem:[#allocation20_spill] sm:$0xff] %v11342_v20  ;;  %13421 = vst [vmem:[#allocation77_spill] sm:$0xff] %v11345_v25  ;;  %v11348_v11 = vld [vmem:[#allocation8 + $0x1e0] ss:$16 sps:$4 sm:$0xff]   ;;  %v11351_v43 = vld [vmem:[#allocation8 + $0x1e8] ss:$16 sps:$4 sm:$0xff]  }
 0xa85   :  { %13422 = vst [vmem:[#allocation78_spill] sm:$0xff] %v11348_v11  ;;  %13423 = vst [vmem:[#allocation79_spill] sm:$0xff] %v11351_v43 }
 0xa87   :  { %4959 = vmatpush1.bf16.msra.mxu0 %v11336_v39  ;;  %5000 = vmatpush1.bf16.msra.mxu1 %v11339_v51 }
 0xa88   :  { %4960 = vmatprep.subr.bf16.mxu0 %v11342_v20  ;;  %5001 = vmatprep.subr.bf16.mxu1 %v11345_v25 }
 0xa8b   :  { %4961 = vmatpush1.bf16.msra.mxu0 %v11348_v11  ;;  %5002 = vmatpush1.bf16.msra.mxu1 %v11351_v43 }
 0xa8c   :  { %5037 = vmatprep.subr.bf16.mxu0 %v10880_v54  ;;  %5078 = vmatprep.subr.bf16.mxu1 %v10884_v26 }
 0xaa1   :  { %v4642_v51 = vpop.f32.mrb[120].mxu0  ;;  %v4683_v39 = vpop.f32.mrb[120].mxu1 }
 0xaa2   :  { %v4643_v20 = vadd.f32 %v4642_v51, %v13267_v12  ;;  %v4644_v31 = vpop.f32.mrb[121].mxu0  ;;  %v4685_v56 = vpop.f32.mrb[121].mxu1  ;;  %v4684_v54 = vadd.f32 %v4683_v39, %v13277_v14 }
 0xaa3   :  { %v4645_v25 = vadd.f32 %v4644_v31, %v13268_v28  ;;  %v4646_v49 = vpop.f32.mrb[122].mxu0  ;;  %v4687_v46 = vpop.f32.mrb[122].mxu1  ;;  %v4686_v26 = vadd.f32 %v4685_v56, %v13122_v38 }
 0xaa4   :  { %v5685_v10 = vmul.f32 -1.442695, %v4643_v20  ;;  %v4647_v11 = vpop.f32.mrb[123].mxu0  ;;  %v4688_v52 = vpop.f32.mrb[123].mxu1  ;;  %v5687_v43 = vmul.f32 -1.442695, %v4684_v54 }
 0xaa5   :  { %v5686_v23 = vmul.f32 -1.442695, %v4645_v25 }
 0xaa6   :  { %6517 = vpow2.f32 %v5685_v10 }
 0xaa7   :  { %6519 = vpow2.f32 %v5686_v23 }
 0xaa8   :  { %6521 = vtanh.f32 %v4686_v26 }
 0xaa9   :  { %6523 = vpow2.f32 %v5687_v43 }
 0xab0   :  { %v6518_v21 = vpop.eup %6517 }
 0xab1   :  { %v4699_v15 = vadd.f32 1.0, %v6518_v21  ;;  %v6520_v51 = vpop.eup %6519 }
 0xab2   :  { %v4700_v31 = vadd.f32 1.0, %v6520_v51  ;;  %v6522_v46 = vpop.eup %6521 }
 0xab3   :  { %6525 = vrcp.f32 %v4699_v15  ;;  %v6524_v49 = vpop.eup %6523 }
 0xab4   :  { %6527 = vrcp.f32 %v4700_v31  ;;  %v4701_v10 = vadd.f32 1.0, %v6524_v49 }
 0xab6   :  { %6529 = vrcp.f32 %v4701_v10 }
 0xabd   :  { %v6526_v20 = vpop.eup %6525 }
 0xabe   :  { %v4710_v52 = vmul.f32 %v6526_v20, %v6522_v46  ;;  %v6528_v25 = vpop.eup %6527 }
 0xabf   :  { %v4709_v23 = vmul.f32 %v6528_v25, %v10888_v9 }
 0xac0   :  { %v6530_v21 = vpop.eup %6529 }
 0xac1   :  { %v11361_v39 = vadd.f32 %v4710_v52, %v4709_v23 }
 0xac3   :  { %6531 = vtanh.f32 %v11361_v39 }
 0xacd   :  { %v6532_v56 = vpop.eup %6531 }
 0xace   :  { %v4713_v11 = vmul.f32 %v6532_v56, %v6530_v21 }
 0xad0   :  { %v4929_v43 = vpack.c.bf16 %v4713_v11, %v4713_v11 }
 0xad2   :  { %4962 = vmatprep.mubr.bf16.mxu0 %v4929_v43  ;;  %5003 = vmatprep.mubr.bf16.mxu1 %v4929_v43 }
 0xae1   :  { %v4749_v15 = vpop.f32.mrb[124].mxu0  ;;  %v4790_v54 = vpop.f32.mrb[124].mxu1 }
 0xae2   :  { %v4750_v26 = vadd.f32 %v4749_v15, %v12619_v29  ;;  %v4751_v51 = vpop.f32.mrb[125].mxu0  ;;  %v4792_v31 = vpop.f32.mrb[125].mxu1  ;;  %v4791_v23 = vadd.f32 %v4790_v54, %v12621_v3 }
 0xae3   :  { %v4752_v46 = vadd.f32 %v4751_v51, %v12620_v37  ;;  %v4753_v9 = vpop.f32.mrb[126].mxu0  ;;  %v4794_v49 = vpop.f32.mrb[126].mxu1  ;;  %v4793_v21 = vadd.f32 %v4792_v31, %v12622_v6 }
 0xae4   :  { %v5688_v20 = vmul.f32 -1.442695, %v4750_v26  ;;  %v4754_v52 = vpop.f32.mrb[127].mxu0  ;;  %v4795_v25 = vpop.f32.mrb[127].mxu1  ;;  %v5690_v56 = vmul.f32 -1.442695, %v4791_v23 }
 0xae5   :  { %v5689_v10 = vmul.f32 -1.442695, %v4752_v46 }
 0xae6   :  { %6533 = vpow2.f32 %v5688_v20 }
 0xae7   :  { %6535 = vpow2.f32 %v5689_v10 }
 0xae8   :  { %6537 = vtanh.f32 %v4793_v21 }
 0xae9   :  { %6539 = vpow2.f32 %v5690_v56 }
 0xaf0   :  { %v6534_v11 = vpop.eup %6533 }
 0xaf1   :  { %v4806_v43 = vadd.f32 1.0, %v6534_v11  ;;  %v6536_v15 = vpop.eup %6535 }
 0xaf2   :  { %v4807_v51 = vadd.f32 1.0, %v6536_v15  ;;  %v6538_v9 = vpop.eup %6537 }
 0xaf3   :  { %6541 = vrcp.f32 %v4806_v43  ;;  %v6540_v26 = vpop.eup %6539 }
 0xaf4   :  { %6543 = vrcp.f32 %v4807_v51  ;;  %v4808_v20 = vadd.f32 1.0, %v6540_v26  ;;  %v13432_v26 = vld [vmem:[#allocation88_spill] sm:$0xff] }
 0xaf6   :  { %6545 = vrcp.f32 %v4808_v20  ;;  %v13436_v20 = vld [vmem:[#allocation92_spill] sm:$0xff] }
 0xafd   :  { %v6542_v49 = vpop.eup %6541 }
 0xafe   :  { %v4817_v52 = vmul.f32 %v6542_v49, %v6538_v9  ;;  %v6544_v46 = vpop.eup %6543  ;;  %v13431_v9 = vld [vmem:[#allocation87_spill] sm:$0xff]  ;;  %v13433_v49 = vld [vmem:[#allocation89_spill] sm:$0xff] }
 0xaff   :  { %v4816_v25 = vmul.f32 %v6544_v46, %v10896_v30  ;;  %v13424_v30 = vld [vmem:[#allocation82_spill] sm:$0xff]  ;;  %v13435_v46 = vld [vmem:[#allocation91_spill] sm:$0xff] }
 0xb00   :  { %v6546_v31 = vpop.eup %6545 }
 0xb01   :  { %v11369_v54 = vadd.f32 %v4817_v52, %v4816_v25  ;;  %v13434_v52 = vld [vmem:[#allocation90_spill] sm:$0xff]  ;;  %v13437_v25 = vld [vmem:[#allocation152_spill] sm:$0xff] }
 0xb03   :  { %6547 = vtanh.f32 %v11369_v54 }
 0xb0d   :  { %v6548_v10 = vpop.eup %6547 }
 0xb0e   :  { %v4820_v23 = vmul.f32 %v6548_v10, %v6546_v31  ;;  %v13438_v10 = vld [vmem:[#allocation93_spill] sm:$0xff] }
 0xb10   :  { %v4928_v21 = vpack.c.bf16 %v4820_v23, %v4820_v23  ;;  %v13439_v23 = vld [vmem:[#allocation94_spill] sm:$0xff] }
 0xb12   :  { %4963 = vmatmul.mubr.bf16.vlgmr.msra.gmra.mrb[132].mxu0 %v4928_v21  ;;  %5004 = vmatmul.mubr.bf16.vlgmr.msra.gmra.mrb[132].mxu1 %v4928_v21 }
 0xb13   :  { %5038 = vmatpush1.bf16.msra.mxu0 %v10899_v27  ;;  %5079 = vmatpush1.bf16.msra.mxu1 %v10902_v45 }
 0xb14   :  { %5069 = vmatprep.mubr.bf16.mxu0 %v4928_v21  ;;  %5110 = vmatprep.mubr.bf16.mxu1 %v4928_v21  ;;  %v13440_v21 = vld [vmem:[#allocation153_spill] sm:$0xff] }
 0xb15   :  { %5039 = vmatprep.subr.bf16.mxu0 %v10905_v13  ;;  %5080 = vmatprep.subr.bf16.mxu1 %v10908_v33  ;;  %v13425_v13 = vld [vmem:[#allocation83_spill] sm:$0xff]  ;;  %v13426_v33 = vld [vmem:[#allocation84_spill] sm:$0xff] }
 0xb17   :  { %5040 = vmatpush1.bf16.msra.mxu0 %v10911_v48  ;;  %5081 = vmatpush1.bf16.msra.mxu1 %v10914_v34  ;;  %v13427_v48 = vld [vmem:[#allocation150_spill] sm:$0xff] }
 0xb18   :  { %5041 = vmatprep.subr.bf16.mxu0 %v10917_v16  ;;  %5082 = vmatprep.subr.bf16.mxu1 %v10920_v35 }
 0xb1b   :  { %5042 = vmatpush1.bf16.msra.mxu0 %v10923_v32  ;;  %5083 = vmatpush1.bf16.msra.mxu1 %v10926_v1  ;;  %v13428_v32 = vld [vmem:[#allocation151_spill] sm:$0xff] }
 0xb1c   :  { %5043 = vmatprep.subr.bf16.mxu0 %v10929_v4  ;;  %5084 = vmatprep.subr.bf16.mxu1 %v10932_v50  ;;  %v13429_v50 = vld [vmem:[#allocation85_spill] sm:$0xff] }
 0xb1f   :  { %5044 = vmatpush1.bf16.msra.mxu0 %v10935_v53  ;;  %5085 = vmatpush1.bf16.msra.mxu1 %v13424_v30  ;;  %v13430_v53 = vld [vmem:[#allocation86_spill] sm:$0xff] }
 0xb20   :  { %5045 = vmatprep.subr.bf16.mxu0 %v13425_v13  ;;  %5086 = vmatprep.subr.bf16.mxu1 %v13426_v33  ;;  %v13442_v13 = vld [vmem:[#allocation96_spill] sm:$0xff] }
 0xb21   :  { %v4856_v27 = vpop.f32.mrb[128].mxu0  ;;  %v4897_v45 = vpop.f32.mrb[128].mxu1 }
 0xb22   :  { %v4857_v34 = vadd.f32 %v4856_v27, %v13427_v48  ;;  %v4858_v16 = vpop.f32.mrb[129].mxu0  ;;  %v4899_v35 = vpop.f32.mrb[129].mxu1  ;;  %v4898_v31 = vadd.f32 %v4897_v45, %v13437_v25  ;;  %v13441_v27 = vld [vmem:[#allocation95_spill] sm:$0xff]  ;;  %v13446_v45 = vld [vmem:[#allocation100_spill] sm:$0xff] }
 0xb23   :  { %v4859_v1 = vadd.f32 %v4858_v16, %v13428_v32  ;;  %v4860_v56 = vpop.f32.mrb[130].mxu0  ;;  %v4901_v4 = vpop.f32.mrb[130].mxu1  ;;  %5046 = vmatpush1.bf16.msra.mxu0 %v13429_v50  ;;  %5087 = vmatpush1.bf16.msra.mxu1 %v13430_v53  ;;  %v4900_v30 = vadd.f32 %v4899_v35, %v13440_v21  ;;  %v13444_v16 = vld [vmem:[#allocation98_spill] sm:$0xff]  ;;  %v13449_v50 = vld [vmem:[#allocation103_spill] sm:$0xff]  ;;  %v13450_v53 = vld [vmem:[#allocation104_spill] sm:$0xff] }
 0xb24   :  { %v5691_v11 = vmul.f32 -1.442695, %v4857_v34  ;;  %v4861_v43 = vpop.f32.mrb[131].mxu0  ;;  %v4902_v15 = vpop.f32.mrb[131].mxu1  ;;  %5047 = vmatprep.subr.bf16.mxu0 %v13431_v9  ;;  %5088 = vmatprep.subr.bf16.mxu1 %v13432_v26  ;;  %v5693_v33 = vmul.f32 -1.442695, %v4898_v31 }
 0xb25   :  { %v5692_v51 = vmul.f32 -1.442695, %v4859_v1  ;;  %v13443_v34 = vld [vmem:[#allocation97_spill] sm:$0xff]  ;;  %v13445_v1 = vld [vmem:[#allocation99_spill] sm:$0xff]  ;;  %v13452_v15 = vld [vmem:[#allocation106_spill] sm:$0xff] }
 0xb26   :  { %6549 = vpow2.f32 %v5691_v11  ;;  %v13447_v4 = vld [vmem:[#allocation101_spill] sm:$0xff]  ;;  %v13448_v11 = vld [vmem:[#allocation102_spill] sm:$0xff]  ;;  %v13457_v25 = vld [vmem:[#allocation76_spill] sm:$0xff] }
 0xb27   :  { %6551 = vpow2.f32 %v5692_v51  ;;  %5048 = vmatpush1.bf16.msra.mxu0 %v13433_v49  ;;  %5089 = vmatpush1.bf16.msra.mxu1 %v13434_v52  ;;  %v13451_v43 = vld [vmem:[#allocation105_spill] sm:$0xff]  ;;  %v13453_v51 = vld [vmem:[#allocation107_spill] sm:$0xff]  ;;  %v13455_v52 = vld [vmem:[#allocation74_spill] sm:$0xff] }
 0xb28   :  { %5049 = vmatprep.subr.bf16.mxu0 %v13435_v46  ;;  %5090 = vmatprep.subr.bf16.mxu1 %v13436_v20  ;;  %6553 = vtanh.f32 %v4900_v30  ;;  %v13454_v9 = vld [vmem:[#allocation73_spill] sm:$0xff]  ;;  %v13456_v46 = vld [vmem:[#allocation75_spill] sm:$0xff]  ;;  %v13458_v31 = vld [vmem:[#allocation108_spill] sm:$0xff] }
 0xb29   :  { %6555 = vpow2.f32 %v5693_v33  ;;  %v13461_v33 = vld [vmem:[#allocation111_spill] sm:$0xff] }
 0xb2b   :  { %5050 = vmatpush1.bf16.msra.mxu0 %v13438_v10  ;;  %5091 = vmatpush1.bf16.msra.mxu1 %v13439_v23 }
 0xb2c   :  { %5051 = vmatprep.subr.bf16.mxu0 %v13441_v27  ;;  %5092 = vmatprep.subr.bf16.mxu1 %v13442_v13  ;;  %v13459_v27 = vld [vmem:[#allocation109_spill] sm:$0xff]  ;;  %v13460_v13 = vld [vmem:[#allocation110_spill] sm:$0xff] }
 0xb2f   :  { %5052 = vmatpush1.bf16.msra.mxu0 %v13443_v34  ;;  %5093 = vmatpush1.bf16.msra.mxu1 %v13444_v16  ;;  %v13463_v34 = vld [vmem:[#allocation113_spill] sm:$0xff]  ;;  %v13465_v16 = vld [vmem:[#allocation115_spill] sm:$0xff] }
 0xb30   :  { %v6550_v48 = vpop.eup %6549  ;;  %5053 = vmatprep.subr.bf16.mxu0 %v13445_v1  ;;  %5094 = vmatprep.subr.bf16.mxu1 %v13446_v45  ;;  %v13485_v1 = vld [vmem:[#allocation131_spill] sm:$0xff]  ;;  %v13486_v45 = vld [vmem:[#allocation132_spill] sm:$0xff] }
 0xb31   :  { %v4913_v32 = vadd.f32 1.0, %v6550_v48  ;;  %v6552_v56 = vpop.eup %6551 }
 0xb32   :  { %v4914_v35 = vadd.f32 1.0, %v6552_v56  ;;  %v6554_v26 = vpop.eup %6553  ;;  %v13487_v56 = vld [vmem:[#allocation133_spill] sm:$0xff] }
 0xb33   :  { %6557 = vrcp.f32 %v4913_v32  ;;  %5054 = vmatpush1.bf16.msra.mxu0 %v13447_v4  ;;  %5095 = vmatpush1.bf16.msra.mxu1 %v13448_v11  ;;  %v6556_v49 = vpop.eup %6555  ;;  %v13489_v4 = vld [vmem:[#allocation135_spill] sm:$0xff]  ;;  %v13490_v11 = vld [vmem:[#allocation57_spill] sm:$0xff] }
 0xb34   :  { %6559 = vrcp.f32 %v4914_v35  ;;  %5055 = vmatprep.subr.bf16.mxu0 %v13449_v50  ;;  %5096 = vmatprep.subr.bf16.mxu1 %v13450_v53  ;;  %v4915_v21 = vadd.f32 1.0, %v6556_v49  ;;  %v13488_v35 = vld [vmem:[#allocation134_spill] sm:$0xff]  ;;  %v13492_v53 = vld [vmem:[#allocation59_spill] sm:$0xff]  ;;  %v13498_v49 = vld [vmem:[#allocation144_spill] sm:$0xff] }
 0xb35   :  { %v13491_v50 = vld [vmem:[#allocation58_spill] sm:$0xff] }
 0xb36   :  { %6561 = vrcp.f32 %v4915_v21  ;;  %v13506_v21 = vld [vmem:[#allocation13_spill] sm:$0xff] }
 0xb37   :  { %5056 = vmatpush1.bf16.msra.mxu0 %v13451_v43  ;;  %5097 = vmatpush1.bf16.msra.mxu1 %v13452_v15  ;;  %v13493_v43 = vld [vmem:[#allocation60_spill] sm:$0xff] }
 0xb38   :  { %5057 = vmatprep.subr.bf16.mxu0 %v13453_v51  ;;  %5098 = vmatprep.subr.bf16.mxu1 %v13454_v9  ;;  %v13494_v15 = vld [vmem:[#allocation136_spill] sm:$0xff]  ;;  %v13495_v51 = vld [vmem:[#allocation137_spill] sm:$0xff]  ;;  %v13496_v9 = vld [vmem:[#allocation138_spill] sm:$0xff] }
 0xb3b   :  { %5058 = vmatpush1.bf16.msra.mxu0 %v13455_v52  ;;  %5099 = vmatpush1.bf16.msra.mxu1 %v13456_v46  ;;  %v13499_v52 = vld [vmem:[#allocation145_spill] sm:$0xff]  ;;  %v13500_v46 = vld [vmem:[#allocation146_spill] sm:$0xff] }
 0xb3c   :  { %5059 = vmatprep.subr.bf16.mxu0 %v13457_v25  ;;  %5100 = vmatprep.subr.bf16.mxu1 %v13458_v31  ;;  %v13502_v25 = vld [vmem:[#allocation141_spill] sm:$0xff]  ;;  %v13503_v31 = vld [vmem:[#allocation147_spill] sm:$0xff] }
 0xb3d   :  { %v6558_v20 = vpop.eup %6557 }
 0xb3e   :  { %v4924_v10 = vmul.f32 %v6558_v20, %v6554_v26  ;;  %v6560_v23 = vpop.eup %6559  ;;  %v13497_v26 = vld [vmem:[#allocation139_spill] sm:$0xff]  ;;  %v13501_v20 = vld [vmem:[#allocation140_spill] sm:$0xff] }
 0xb3f   :  { %v4923_v30 = vmul.f32 %v6560_v23, %v11048_v40  ;;  %5060 = vmatpush1.bf16.msra.mxu0 %v13459_v27  ;;  %5101 = vmatpush1.bf16.msra.mxu1 %v13460_v13  ;;  %v13462_v40 = vld [vmem:[#allocation112_spill] sm:$0xff]  ;;  %v13505_v23 = vld [vmem:[#allocation149_spill] sm:$0xff]  ;;  %v13508_v27 = vld [vmem:[#allocation15_spill] sm:$0xff] }
 0xb40   :  { %5061 = vmatprep.subr.bf16.mxu0 %v13461_v33  ;;  %5102 = vmatprep.subr.bf16.mxu1 %v11045_v18  ;;  %v13464_v18 = vld [vmem:[#allocation114_spill] sm:$0xff]  ;;  %v6562_v32 = vpop.eup %6561  ;;  %v13509_v13 = vld [vmem:[#allocation16_spill] sm:$0xff]  ;;  %v13510_v33 = vld [vmem:[#allocation17_spill] sm:$0xff] }
 0xb41   :  { %v4925_v48 = vadd.f32 %v4924_v10, %v4923_v30  ;;  %v13504_v10 = vld [vmem:[#allocation148_spill] sm:$0xff]  ;;  %v13507_v30 = vld [vmem:[#allocation14_spill] sm:$0xff] }
 0xb43   :  { %6563 = vtanh.f32 %v4925_v48  ;;  %5062 = vmatpush1.bf16.msra.mxu0 %v11055_v41  ;;  %5103 = vmatpush1.bf16.msra.mxu1 %v11058_v24  ;;  %v13466_v41 = vld [vmem:[#allocation116_spill] sm:$0xff]  ;;  %v13511_v48 = vld [vmem:[#allocation142_spill] sm:$0xff] }
 0xb44   :  { %5063 = vmatprep.subr.bf16.mxu0 %v11061_v0  ;;  %5104 = vmatprep.subr.bf16.mxu1 %v11064_v61 }
 0xb47   :  { %5064 = vmatpush1.bf16.msra.mxu0 %v11067_v44  ;;  %5105 = vmatpush1.bf16.msra.mxu1 %v11070_v7  ;;  %v13467_v44 = vld [vmem:[#allocation117_spill] sm:$0xff]  ;;  %v13468_v7 = vld [vmem:[#allocation118_spill] sm:$0xff] }
 0xb48   :  { %5065 = vmatprep.subr.bf16.mxu0 %v13462_v40  ;;  %5106 = vmatprep.subr.bf16.mxu1 %v13463_v34  ;;  %v13512_v40 = vld [vmem:[#allocation18_spill] sm:$0xff]  ;;  %v13513_v34 = vld [vmem:[#allocation19_spill] sm:$0xff] }
 0xb4b   :  { %5066 = vmatpush1.bf16.msra.mxu0 %v13464_v18  ;;  %5107 = vmatpush1.bf16.msra.mxu1 %v13465_v16  ;;  %v13514_v18 = vld [vmem:[#allocation20_spill] sm:$0xff]  ;;  %v13515_v16 = vld [vmem:[#allocation77_spill] sm:$0xff] }
 0xb4c   :  { %5067 = vmatprep.subr.bf16.mxu0 %v13466_v41  ;;  %5108 = vmatprep.subr.bf16.mxu1 %v11088_v36  ;;  %v13471_v36 = vld [vmem:[#allocation121_spill] sm:$0xff]  ;;  %v13517_v41 = vld [vmem:[#allocation79_spill] sm:$0xff] }
 0xb4d   :  { %v6564_v24 = vpop.eup %6563 }
 0xb4e   :  { %v4927_v0 = vmul.f32 %v6564_v24, %v6562_v32  ;;  %v13516_v32 = vld [vmem:[#allocation78_spill] sm:$0xff] }
 0xb4f   :  { %5068 = vmatpush1.bf16.msra.mxu0 %v11091_v58  ;;  %5109 = vmatpush1.bf16.msra.mxu1 %v11094_v62  ;;  %v13469_v58 = vld [vmem:[#allocation119_spill] sm:$0xff]  ;;  %v13470_v62 = vld [vmem:[#allocation120_spill] sm:$0xff] }
 0xb50   :  { %v5036_v61 = vpack.c.bf16 %v4927_v0, %v4927_v0  ;;  %5145 = vmatprep.subr.bf16.mxu0 %v11162_v55  ;;  %5186 = vmatprep.subr.bf16.mxu1 %v11165_v59  ;;  %v13472_v55 = vld [vmem:[#allocation122_spill] sm:$0xff]  ;;  %v13473_v59 = vld [vmem:[#allocation123_spill] sm:$0xff] }
 0xb52   :  { %5070 = vmatmul.mubr.bf16.vlgmr.msra.gmra.mrb[136].mxu0 %v5036_v61  ;;  %5111 = vmatmul.mubr.bf16.vlgmr.msra.gmra.mrb[136].mxu1 %v5036_v61 }
 0xb53   :  { %5146 = vmatpush1.bf16.msra.mxu0 %v11168_v19  ;;  %5187 = vmatpush1.bf16.msra.mxu1 %v11171_v63  ;;  %v13474_v19 = vld [vmem:[#allocation124_spill] sm:$0xff]  ;;  %v13475_v63 = vld [vmem:[#allocation125_spill] sm:$0xff] }
 0xb54   :  { %5147 = vmatprep.subr.bf16.mxu0 %v11174_v22  ;;  %5188 = vmatprep.subr.bf16.mxu1 %v11177_v2  ;;  %v13476_v22 = vld [vmem:[#allocation126_spill] sm:$0xff]  ;;  %v13477_v2 = vld [vmem:[#allocation127_spill] sm:$0xff] }
 0xb57   :  { %5148 = vmatpush1.bf16.msra.mxu0 %v11180_v47  ;;  %5189 = vmatpush1.bf16.msra.mxu1 %v11183_v8  ;;  %v13478_v47 = vld [vmem:[#allocation69_spill] sm:$0xff]  ;;  %v13479_v8 = vld [vmem:[#allocation70_spill] sm:$0xff] }
 0xb58   :  { %5149 = vmatprep.subr.bf16.mxu0 %v11186_v42  ;;  %5190 = vmatprep.subr.bf16.mxu1 %v11189_v5  ;;  %v13480_v42 = vld [vmem:[#allocation71_spill] sm:$0xff]  ;;  %v13481_v5 = vld [vmem:[#allocation72_spill] sm:$0xff] }
 0xb5b   :  { %5150 = vmatpush1.bf16.msra.mxu0 %v11192_v60  ;;  %5191 = vmatpush1.bf16.msra.mxu1 %v11195_v17  ;;  %v13482_v60 = vld [vmem:[#allocation128_spill] sm:$0xff]  ;;  %v13483_v17 = vld [vmem:[#allocation129_spill] sm:$0xff] }
 0xb5c   :  { %5151 = vmatprep.subr.bf16.mxu0 %v11198_v57  ;;  %5192 = vmatprep.subr.bf16.mxu1 %v13467_v44  ;;  %v13484_v57 = vld [vmem:[#allocation130_spill] sm:$0xff] }
 0xb5f   :  { %5152 = vmatpush1.bf16.msra.mxu0 %v13468_v7  ;;  %5193 = vmatpush1.bf16.msra.mxu1 %v13469_v58 }
 0xb60   :  { %5153 = vmatprep.subr.bf16.mxu0 %v13470_v62  ;;  %5194 = vmatprep.subr.bf16.mxu1 %v13471_v36 }
 0xb63   :  { %5154 = vmatpush1.bf16.msra.mxu0 %v13472_v55  ;;  %5195 = vmatpush1.bf16.msra.mxu1 %v13473_v59 }
 0xb64   :  { %5155 = vmatprep.subr.bf16.mxu0 %v13474_v19  ;;  %5196 = vmatprep.subr.bf16.mxu1 %v13475_v63 }
 0xb67   :  { %5156 = vmatpush1.bf16.msra.mxu0 %v13476_v22  ;;  %5197 = vmatpush1.bf16.msra.mxu1 %v13477_v2 }
 0xb68   :  { %5157 = vmatprep.subr.bf16.mxu0 %v13478_v47  ;;  %5198 = vmatprep.subr.bf16.mxu1 %v13479_v8 }
 0xb6b   :  { %5158 = vmatpush1.bf16.msra.mxu0 %v13480_v42  ;;  %5199 = vmatpush1.bf16.msra.mxu1 %v13481_v5 }
 0xb6c   :  { %5159 = vmatprep.subr.bf16.mxu0 %v13482_v60  ;;  %5200 = vmatprep.subr.bf16.mxu1 %v13483_v17 }
 0xb6f   :  { %5160 = vmatpush1.bf16.msra.mxu0 %v13484_v57  ;;  %5201 = vmatpush1.bf16.msra.mxu1 %v13485_v1 }
 0xb70   :  { %5161 = vmatprep.subr.bf16.mxu0 %v13486_v45  ;;  %5202 = vmatprep.subr.bf16.mxu1 %v13487_v56 }
 0xb73   :  { %5162 = vmatpush1.bf16.msra.mxu0 %v13488_v35  ;;  %5203 = vmatpush1.bf16.msra.mxu1 %v13489_v4 }
 0xb74   :  { %5163 = vmatprep.subr.bf16.mxu0 %v13490_v11  ;;  %5204 = vmatprep.subr.bf16.mxu1 %v13491_v50 }
 0xb77   :  { %5164 = vmatpush1.bf16.msra.mxu0 %v13492_v53  ;;  %5205 = vmatpush1.bf16.msra.mxu1 %v13493_v43 }
 0xb78   :  { %5165 = vmatprep.subr.bf16.mxu0 %v13494_v15  ;;  %5206 = vmatprep.subr.bf16.mxu1 %v13495_v51 }
 0xb7b   :  { %5166 = vmatpush1.bf16.msra.mxu0 %v13496_v9  ;;  %5207 = vmatpush1.bf16.msra.mxu1 %v13497_v26 }
 0xb7c   :  { %5167 = vmatprep.subr.bf16.mxu0 %v13498_v49  ;;  %5208 = vmatprep.subr.bf16.mxu1 %v13499_v52 }
 0xb7f   :  { %5168 = vmatpush1.bf16.msra.mxu0 %v13500_v46  ;;  %5209 = vmatpush1.bf16.msra.mxu1 %v13501_v20 }
 0xb80   :  { %5169 = vmatprep.subr.bf16.mxu0 %v13502_v25  ;;  %5210 = vmatprep.subr.bf16.mxu1 %v13503_v31 }
 0xb83   :  { %5170 = vmatpush1.bf16.msra.mxu0 %v13504_v10  ;;  %5211 = vmatpush1.bf16.msra.mxu1 %v13505_v23 }
 0xb84   :  { %5171 = vmatprep.subr.bf16.mxu0 %v13506_v21  ;;  %5212 = vmatprep.subr.bf16.mxu1 %v13507_v30 }
 0xb87   :  { %5172 = vmatpush1.bf16.msra.mxu0 %v13508_v27  ;;  %5213 = vmatpush1.bf16.msra.mxu1 %v13509_v13 }
 0xb88   :  { %5173 = vmatprep.subr.bf16.mxu0 %v13510_v33  ;;  %5214 = vmatprep.subr.bf16.mxu1 %v13511_v48 }
 0xb8b   :  { %5174 = vmatpush1.bf16.msra.mxu0 %v13512_v40  ;;  %5215 = vmatpush1.bf16.msra.mxu1 %v13513_v34 }
 0xb8c   :  { %5175 = vmatprep.subr.bf16.mxu0 %v13514_v18  ;;  %5216 = vmatprep.subr.bf16.mxu1 %v13515_v16 }
 0xb8f   :  { %5176 = vmatpush1.bf16.msra.mxu0 %v13516_v32  ;;  %5217 = vmatpush1.bf16.msra.mxu1 %v13517_v41 }
 0xbe5   :  { %v4964_v24 = vpop.f32.mrb[132].mxu0  ;;  %v5005_v0 = vpop.f32.mrb[132].mxu1 }
 0xbe6   :  { %v4965_v61 = vadd.f32 %v4964_v24, %v13267_v12  ;;  %v4966_v44 = vpop.f32.mrb[133].mxu0  ;;  %v5007_v7 = vpop.f32.mrb[133].mxu1  ;;  %v5006_v22 = vadd.f32 %v5005_v0, %v13277_v14 }
 0xbe7   :  { %v4967_v58 = vadd.f32 %v4966_v44, %v13268_v28  ;;  %v4968_v62 = vpop.f32.mrb[134].mxu0  ;;  %v5009_v36 = vpop.f32.mrb[134].mxu1  ;;  %v5008_v2 = vadd.f32 %v5007_v7, %v13122_v38  ;;  %v6093_v44 = vld [vmem:[%s11561_s10] sm:$0xff]   ;;  %v7409_v7 = vmov 0.0  }
 0xbe8   :  { %v5694_v55 = vmul.f32 -1.442695, %v4965_v61  ;;  %v4969_v59 = vpop.f32.mrb[135].mxu0  ;;  %v5010_v19 = vpop.f32.mrb[135].mxu1  ;;  %v5696_v47 = vmul.f32 -1.442695, %v5006_v22  ;;  %5721 = vmatprep.subr.bf16.mxu0 %v7409_v7 }
 0xbe9   :  { %v5695_v63 = vmul.f32 -1.442695, %v4967_v58  ;;  %v6095_v58 = vld [vmem:[%s11561_s10 + $0x10] sm:$0xff]   ;;  %v6096_v62 = vld [vmem:[%s11561_s10 + $0x18] sm:$0xff]   ;;  %v6097_v36 = vld [vmem:[%s11561_s10 + $0x20] sm:$0xff]  }
 0xbea   :  { %6565 = vpow2.f32 %v5694_v55  ;;  %v6098_v55 = vld [vmem:[%s11561_s10 + $0x28] sm:$0xff]   ;;  %v6099_v59 = vld [vmem:[%s11561_s10 + $0x30] sm:$0xff]   ;;  %v6100_v19 = vld [vmem:[%s11561_s10 + $0x38] sm:$0xff]  }
 0xbeb   :  { %6567 = vpow2.f32 %v5695_v63 }
 0xbec   :  { %6569 = vtanh.f32 %v5008_v2 }
 0xbed   :  { %6571 = vpow2.f32 %v5696_v47 }
 0xbf4   :  { %v6566_v8 = vpop.eup %6565 }
 0xbf5   :  { %v5021_v42 = vadd.f32 1.0, %v6566_v8  ;;  %v6568_v5 = vpop.eup %6567 }
 0xbf6   :  { %v5022_v60 = vadd.f32 1.0, %v6568_v5  ;;  %v6570_v17 = vpop.eup %6569 }
 0xbf7   :  { %6573 = vrcp.f32 %v5021_v42  ;;  %v6572_v57 = vpop.eup %6571 }
 0xbf8   :  { %6575 = vrcp.f32 %v5022_v60  ;;  %v5023_v35 = vadd.f32 1.0, %v6572_v57 }
 0xbfa   :  { %6577 = vrcp.f32 %v5023_v35 }
 0xc01   :  { %v6574_v1 = vpop.eup %6573 }
 0xc02   :  { %v5032_v45 = vmul.f32 %v6574_v1, %v6570_v17  ;;  %v6576_v56 = vpop.eup %6575 }
 0xc03   :  { %v5031_v4 = vmul.f32 %v6576_v56, %v11361_v39 }
 0xc04   :  { %v6578_v50 = vpop.eup %6577 }
 0xc05   :  { %v11508_v11 = vadd.f32 %v5032_v45, %v5031_v4 }
 0xc07   :  { %6579 = vtanh.f32 %v11508_v11 }
 0xc11   :  { %v6580_v53 = vpop.eup %6579 }
 0xc12   :  { %v5035_v43 = vmul.f32 %v6580_v53, %v6578_v50 }
 0xc14   :  { %v5144_v15 = vpack.c.bf16 %v5035_v43, %v5035_v43 }
 0xc16   :  { %5177 = vmatprep.mubr.bf16.mxu0 %v5144_v15  ;;  %5218 = vmatprep.mubr.bf16.mxu1 %v5144_v15 }
 0xc25   :  { %v5071_v51 = vpop.f32.mrb[136].mxu0  ;;  %v5112_v9 = vpop.f32.mrb[136].mxu1 }
 0xc26   :  { %v5072_v26 = vadd.f32 %v5071_v51, %v12619_v29  ;;  %v5073_v49 = vpop.f32.mrb[137].mxu0  ;;  %v5114_v52 = vpop.f32.mrb[137].mxu1  ;;  %v5113_v21 = vadd.f32 %v5112_v9, %v12621_v3 }
 0xc27   :  { %v5074_v46 = vadd.f32 %v5073_v49, %v12620_v37  ;;  %v5075_v39 = vpop.f32.mrb[138].mxu0  ;;  %v5116_v20 = vpop.f32.mrb[138].mxu1  ;;  %v5115_v30 = vadd.f32 %v5114_v52, %v12622_v6 }
 0xc28   :  { %v5697_v25 = vmul.f32 -1.442695, %v5072_v26  ;;  %v5076_v31 = vpop.f32.mrb[139].mxu0  ;;  %v5117_v10 = vpop.f32.mrb[139].mxu1  ;;  %v5699_v27 = vmul.f32 -1.442695, %v5113_v21 }
 0xc29   :  { %v5698_v23 = vmul.f32 -1.442695, %v5074_v46 }
 0xc2a   :  { %6581 = vpow2.f32 %v5697_v25  ;;  %v5703_v25 = vld [vmem:[%s11562_s11] ss:$0 sm:$0xff] }
 0xc2b   :  { %6583 = vpow2.f32 %v5698_v23 }
 0xc2c   :  { %6585 = vtanh.f32 %v5115_v30 }
 0xc2d   :  { %6587 = vpow2.f32 %v5699_v27 }
 0xc34   :  { %v6582_v13 = vpop.eup %6581 }
 0xc35   :  { %v5128_v33 = vadd.f32 1.0, %v6582_v13  ;;  %v6584_v29 = vpop.eup %6583 }
 0xc36   :  { %v5129_v37 = vadd.f32 1.0, %v6584_v29  ;;  %v6586_v48 = vpop.eup %6585 }
 0xc37   :  { %6589 = vrcp.f32 %v5128_v33  ;;  %v6588_v40 = vpop.eup %6587 }
 0xc38   :  { %6591 = vrcp.f32 %v5129_v37  ;;  %v5130_v32 = vadd.f32 1.0, %v6588_v40 }
 0xc3a   :  { %6593 = vrcp.f32 %v5130_v32 }
 0xc41   :  { %v6590_v34 = vpop.eup %6589 }
 0xc42   :  { %v5139_v18 = vmul.f32 %v6590_v34, %v6586_v48  ;;  %v6592_v16 = vpop.eup %6591 }
 0xc43   :  { %v5138_v41 = vmul.f32 %v6592_v16, %v11369_v54  ;;  %v6094_v54 = vld [vmem:[%s11561_s10 + $0x8] sm:$0xff]  }
 0xc44   :  { %v6594_v6 = vpop.eup %6593 }
 0xc45   :  { %v5140_v3 = vadd.f32 %v5139_v18, %v5138_v41 }
 0xc47   :  { %6595 = vtanh.f32 %v5140_v3 }
 0xc51   :  { %v6596_v24 = vpop.eup %6595 }
 0xc52   :  { %v5142_v0 = vmul.f32 %v6596_v24, %v6594_v6 }
 0xc54   :  { %v5143_v61 = vpack.c.bf16 %v5142_v0, %v5142_v0 }
 0xc56   :  { %5178 = vmatmul.mubr.bf16.vlgmr.msra.gmra.mrb[140].mxu0 %v5143_v61  ;;  %5219 = vmatmul.mubr.bf16.vlgmr.msra.gmra.mrb[140].mxu1 %v5143_v61 }
 0xc57   :  { %5722 = vmatpush3.bf16.msra.mxu0 %v6093_v44  ;;  %5737 = vmatprep.mubr.msk.bf16.mxu0 %vm7410_vm1, %v7409_v7 }
 0xc58   :  { %5723 = vmatprep.subr.bf16.mxu0 %v7409_v7 }
 0xc5b   :  { %5724 = vmatpush3.bf16.msra.mxu0 %v6094_v54 }
 0xc5c   :  { %5725 = vmatprep.subr.bf16.mxu0 %v7409_v7 }
 0xc5f   :  { %5726 = vmatpush3.bf16.msra.mxu0 %v6095_v58 }
 0xc60   :  { %5727 = vmatprep.subr.bf16.mxu0 %v7409_v7 }
 0xc63   :  { %5728 = vmatpush3.bf16.msra.mxu0 %v6096_v62 }
 0xc64   :  { %5729 = vmatprep.subr.bf16.mxu0 %v7409_v7 }
 0xc67   :  { %5730 = vmatpush3.bf16.msra.mxu0 %v6097_v36 }
 0xc68   :  { %5731 = vmatprep.subr.bf16.mxu0 %v7409_v7 }
 0xc6b   :  { %5732 = vmatpush3.bf16.msra.mxu0 %v6098_v55 }
 0xc6c   :  { %5733 = vmatprep.subr.bf16.mxu0 %v7409_v7 }
 0xc6f   :  { %5734 = vmatpush3.bf16.msra.mxu0 %v6099_v59 }
 0xc70   :  { %5735 = vmatprep.subr.bf16.mxu0 %v7409_v7 }
 0xc73   :  { %5736 = vmatpush3.bf16.msra.mxu0 %v6100_v19 }
 0xd29   :  { %v5179_v63 = vpop.f32.mrb[140].mxu0  ;;  %v5220_v22 = vpop.f32.mrb[140].mxu1 }
 0xd2a   :  { %v5180_v2 = vadd.f32 %v5179_v63, %v13267_v12  ;;  %v5181_v47 = vpop.f32.mrb[141].mxu0  ;;  %v5222_v8 = vpop.f32.mrb[141].mxu1  ;;  %v5221_v56 = vadd.f32 %v5220_v22, %v13277_v14 }
 0xd2b   :  { %v5182_v42 = vadd.f32 %v5181_v47, %v13268_v28  ;;  %v5183_v5 = vpop.f32.mrb[142].mxu0  ;;  %v5224_v60 = vpop.f32.mrb[142].mxu1  ;;  %v5223_v35 = vadd.f32 %v5222_v8, %v13122_v38 }
 0xd2c   :  { %v5700_v17 = vmul.f32 -1.442695, %v5180_v2  ;;  %v5184_v57 = vpop.f32.mrb[143].mxu0  ;;  %v5225_v1 = vpop.f32.mrb[143].mxu1  ;;  %v5702_v4 = vmul.f32 -1.442695, %v5221_v56 }
 0xd2d   :  { %v5701_v45 = vmul.f32 -1.442695, %v5182_v42 }
 0xd2e   :  { %6597 = vpow2.f32 %v5700_v17 }
 0xd2f   :  { %6599 = vpow2.f32 %v5701_v45 }
 0xd30   :  { %6601 = vtanh.f32 %v5223_v35 }
 0xd31   :  { %6603 = vpow2.f32 %v5702_v4 }
 0xd38   :  { %v6598_v50 = vpop.eup %6597 }
 0xd39   :  { %v5236_v53 = vadd.f32 1.0, %v6598_v50  ;;  %v6600_v12 = vpop.eup %6599 }
 0xd3a   :  { %v5237_v28 = vadd.f32 1.0, %v6600_v12  ;;  %v6602_v43 = vpop.eup %6601 }
 0xd3b   :  { %6605 = vrcp.f32 %v5236_v53  ;;  %v6604_v15 = vpop.eup %6603 }
 0xd3c   :  { %6607 = vrcp.f32 %v5237_v28  ;;  %v5238_v49 = vadd.f32 1.0, %v6604_v15 }
 0xd3e   :  { %6609 = vrcp.f32 %v5238_v49 }
 0xd45   :  { %v6606_v51 = vpop.eup %6605 }
 0xd46   :  { %v5247_v9 = vmul.f32 %v6606_v51, %v6602_v43  ;;  %v6608_v26 = vpop.eup %6607 }
 0xd47   :  { %v5246_v52 = vmul.f32 %v6608_v26, %v11508_v11 }
 0xd48   :  { %v6610_v38 = vpop.eup %6609 }
 0xd49   :  { %v5248_v14 = vadd.f32 %v5247_v9, %v5246_v52 }
 0xd4b   :  { %6611 = vtanh.f32 %v5248_v14 }
 0xd55   :  { %v6612_v46 = vpop.eup %6611 }
 0xd56   :  { %v5250_v39 = vmul.f32 %v6612_v46, %v6610_v38 }
 0xd58   :  { %v5251_v20 = vpack.c.bf16 %v5250_v39, %v5250_v39 }
 0xd5a   :  { %5738 = vmatmul.mubr.bf16.vlgmr.msra.gmra.mrb[144].mxu0 %v5251_v20 }
 0xe2d   :  { %v5357_v31 = vpop.f32.mrb[144].mxu0 }
 0xe2e   :  { %v5358_v10 = vadd.f32 %v5703_v25, %v5357_v31  ;;  %v5739_v23 = vpop.f32.mrb[145].mxu0 }
 0xe2f   :  { %v5360_v21 = vpop.f32.mrb[146].mxu0 }
 0xe30   :  { %5363 = vst [vmem:[%s11563_s12] sm:$0xff] %v5358_v10  ;;  %v5740_v11 = vpop.f32.mrb[147].mxu0 }
 0xe31   :  { %5368 = vsyncpa [#allocation4], 1 }
 0xe32   :  { %5369 = vsyncpa [#allocation6], 1 }
 0xe33   :  { %5370 = vsyncpa [#allocation9], 1 }

</bundles_post_ra>
